<compile_context>
chip_gen: v5e
topology: v5e:2x2
jax: 0.10.0
libtpu: 0.0.40
codegen_flags: <defaults>
</compile_context>

<pallas_src>
import functools

import numpy as np
import jax
import jax.numpy as jnp
from jax.experimental import pallas as pl
from jax.experimental.pallas import tpu as pltpu

LANE = 128


def _round_up(x, m):
    return ((x + m - 1) // m) * m


def _pad_last(x, to):
    pad = to - x.shape[-1]
    if pad <= 0:
        return x
    cfg = [(0, 0)] * (x.ndim - 1) + [(0, pad)]
    return jnp.pad(x, cfg)


def _pad2d(x, rows, cols):
    return jnp.pad(x, ((0, rows - x.shape[0]), (0, cols - x.shape[1])))


# ----------------------------- fused Pallas kernel --------------------------

def _cnn_fused_kernel(a1_ref, mask_ref, w1_ref, b1_ref, w2_ref, b2_ref,
                      w3_ref, b3_ref, wf_ref, bf_ref,
                      out_ref, f1_ref, y2_ref, pool_ref, a3_ref, *, batch):
    """Whole CNNModule forward.  Activation layout: row = b*256 + h*16 + w,
    lanes = 128 channels (real channels first, zero-padded)."""
    m2 = batch * 256

    # ---- conv1 (as im2col matmul) + bias + ReLU; zero the padded border ----
    y1 = jnp.dot(a1_ref[...], w1_ref[...], preferred_element_type=jnp.float32)
    y1 = jnp.maximum(y1 + b1_ref[...], 0.0)
    f1_ref[...] = y1 * mask_ref[...]          # borders / tail rows exactly 0

    # ---- conv2: padding=1 is already embedded in the 16x16 grid; the tap
    #      (di, dj) is a row shift of di*16 + dj.  9 accumulated K=128 dots. --
    y2_ref[...] = jnp.zeros_like(y2_ref)
    for di in range(3):
        for dj in range(3):
            off = di * 16 + dj
            tap = f1_ref[pl.ds(off, m2), :].astype(jnp.bfloat16)
            y2_ref[pl.ds(0, m2), :] += jnp.dot(
                tap, w2_ref[di * 3 + dj], preferred_element_type=jnp.float32)
    y2_ref[pl.ds(0, m2), :] = jnp.maximum(
        y2_ref[pl.ds(0, m2), :] + b2_ref[...], 0.0)

    # ---- maxpool 2x2 stride 2: max of the 4 shifted slabs (w+1 -> +1 row,
    #      h+1 -> +16 rows).  Row r of pool holds the window with top-left r. -
    m = jnp.maximum(y2_ref[pl.ds(0, m2), :], y2_ref[pl.ds(1, m2), :])
    m = jnp.maximum(m, y2_ref[pl.ds(16, m2), :])
    m = jnp.maximum(m, y2_ref[pl.ds(17, m2), :])
    pool_ref[...] = m

    # ---- gather the 7x7 pooled grid into conv3's im2col row layout:
    #      a3[b, (hp*7+wp)*128 + c] = pool[b*256 + (2*hp)*16 + 2*wp, c] -------
    a3_ref[...] = jnp.zeros_like(a3_ref)
    for b in range(batch):
        for p in range(49):
            hp, wp = divmod(p, 7)
            src = b * 256 + 32 * hp + 2 * wp
            a3_ref[pl.ds(b, 1), pl.ds(p * LANE, LANE)] = pool_ref[pl.ds(src, 1), :]

    # ---- conv3 (7x7 over the 7x7 map -> 1x1) + ReLU, fused with the Linear --
    h3 = jnp.dot(a3_ref[...].astype(jnp.bfloat16), w3_ref[...],
                 preferred_element_type=jnp.float32)
    h3 = jnp.maximum(h3 + b3_ref[...], 0.0)                  # (Mb, 128) f32
    y = jnp.dot(h3.astype(jnp.bfloat16), wf_ref[...],
                preferred_element_type=jnp.float32)
    out_ref[...] = y + bf_ref[...]


# ----------------------------- parameter init -------------------------------

def _init_conv(key, cout, cin, kh, kw):
    k1, k2 = jax.random.split(key)
    fan_in = cin * kh * kw
    bound = 1.0 / jnp.sqrt(fan_in)
    w = jax.random.uniform(k1, (cout, cin, kh, kw), jnp.float32, -bound, bound)
    b = jax.random.uniform(k2, (cout,), jnp.float32, -bound, bound)
    return w, b


def _init_linear(key, cin, cout):
    k1, k2 = jax.random.split(key)
    bound = 1.0 / jnp.sqrt(cin)
    w = jax.random.uniform(k1, (cout, cin), jnp.float32, -bound, bound)
    b = jax.random.uniform(k2, (cout,), jnp.float32, -bound, bound)
    return w, b


def init_params(key):
    ks = jax.random.split(key, 4)
    p = {}
    p["cnn1_w"], p["cnn1_b"] = _init_conv(ks[0], 16, 3, 5, 5)
    p["cnn2_w"], p["cnn2_b"] = _init_conv(ks[1], 32, 16, 3, 3)
    p["cnn3_w"], p["cnn3_b"] = _init_conv(ks[2], 128, 32, 7, 7)
    p["fc_w"], p["fc_b"] = _init_linear(ks[3], 128, 10)
    return p


# -------------------- one-time lane-dense weight packing --------------------

def prepare_params(params):
    """Hoisted out of the forward: transpose / zero-pad to 128 / bf16 cast."""
    # conv1: (16,3,5,5) -> (kh,kw,cin,cout) -> (75,16) -> pad to (128,128)
    w1 = params["cnn1_w"].transpose(2, 3, 1, 0).reshape(75, 16)
    w1 = _pad2d(w1, LANE, LANE).astype(jnp.bfloat16)
    b1 = _pad_last(params["cnn1_b"].reshape(1, 16), LANE).astype(jnp.float32)
    # conv2: (32,16,3,3) -> (3,3,16,32) -> pad cin/cout to 128 -> (9,128,128)
    w2 = params["cnn2_w"].transpose(2, 3, 1, 0)
    w2 = jnp.pad(w2, ((0, 0), (0, 0), (0, LANE - 16), (0, LANE - 32)))
    w2 = w2.reshape(9, LANE, LANE).astype(jnp.bfloat16)
    b2 = _pad_last(params["cnn2_b"].reshape(1, 32), LANE).astype(jnp.float32)
    # conv3: (128,32,7,7) -> (7,7,32,128) -> pad cin to 128 -> (6272,128)
    w3 = params["cnn3_w"].transpose(2, 3, 1, 0)
    w3 = jnp.pad(w3, ((0, 0), (0, 0), (0, LANE - 32), (0, 0)))
    w3 = w3.reshape(49 * LANE, LANE).astype(jnp.bfloat16)
    b3 = params["cnn3_b"].reshape(1, LANE).astype(jnp.float32)
    # fc: (10,128) -> (128,10) -> pad N to (128,128)
    wf = _pad_last(params["fc_w"].T, LANE).astype(jnp.bfloat16)
    bf = _pad_last(params["fc_b"].reshape(1, 10), LANE).astype(jnp.float32)
    return dict(w1=w1, b1=b1, w2=w2, b2=b2, w3=w3, b3=b3, wf=wf, bf=bf)


def _row_mask(batch, rows):
    """1.0 on rows holding a real conv1 output (padded coords h,w in 1..14)."""
    r = np.arange(rows)
    h = (r // 16) % 16
    w = r % 16
    valid = (r < batch * 256) & (h >= 1) & (h <= 14) & (w >= 1) & (w <= 14)
    return jnp.asarray(valid.astype(np.float32).reshape(rows, 1))


# --------------------------------- forward ----------------------------------

@jax.jit
def cnn_module_forward(packed, x):
    # x: (B, 3, 31, 31) NCHW (PyTorch convention) -> NHWC once.
    b = x.shape[0]
    xh = jnp.transpose(x, (0, 2, 3, 1))                       # (B,31,31,3)

    # conv1 im2col (5x5, stride 2, pad 0 -> 14x14) laid out on a zero-padded
    # 16x16 output grid; patch ordering (kh, kw, cin), zero-padded to 128.
    cols = []
    for i in range(5):
        for j in range(5):
            cols.append(xh[:, i:i + 28:2, j:j + 28:2, :])     # (B,14,14,3)
    patches = jnp.stack(cols, axis=3).reshape(b, 14, 14, 75)
    patches = jnp.pad(patches, ((0, 0), (1, 1), (1, 1), (0, LANE - 75)))
    m2 = b * 256
    m1 = _round_up(m2 + 34, 16)        # +34: max conv2 tap shift (2*16 + 2)
    mb = _round_up(b, 8)
    a1 = patches.reshape(m2, LANE)
    a1 = jnp.pad(a1, ((0, m1 - m2), (0, 0))).astype(jnp.bfloat16)
    mask = _row_mask(b, m1)            # compile-time constant (depends on B)

    out = pl.pallas_call(
        functools.partial(_cnn_fused_kernel, batch=b),
        out_shape=jax.ShapeDtypeStruct((mb, LANE), jnp.float32),
        grid=(1,),
        in_specs=[
            pl.BlockSpec((m1, LANE), lambda i: (0, 0)),           # a1
            pl.BlockSpec((m1, 1), lambda i: (0, 0)),              # row mask
            pl.BlockSpec((LANE, LANE), lambda i: (0, 0)),         # w1
            pl.BlockSpec((1, LANE), lambda i: (0, 0)),            # b1
            pl.BlockSpec((9, LANE, LANE), lambda i: (0, 0, 0)),   # w2 taps
            pl.BlockSpec((1, LANE), lambda i: (0, 0)),            # b2
            pl.BlockSpec((49 * LANE, LANE), lambda i: (0, 0)),    # w3
            pl.BlockSpec((1, LANE), lambda i: (0, 0)),            # b3
            pl.BlockSpec((LANE, LANE), lambda i: (0, 0)),         # wf
            pl.BlockSpec((1, LANE), lambda i: (0, 0)),            # bf
        ],
        out_specs=pl.BlockSpec((mb, LANE), lambda i: (0, 0)),
        scratch_shapes=[
            pltpu.VMEM((m1, LANE), jnp.float32),        # f1: conv1 out (padded grid)
            pltpu.VMEM((m2 + 24, LANE), jnp.float32),   # y2: conv2 out
            pltpu.VMEM((m2, LANE), jnp.float32),        # pool
            pltpu.VMEM((mb, 49 * LANE), jnp.float32),   # a3: conv3 im2col rows
        ],
        compiler_params=pltpu.CompilerParams(dimension_semantics=("arbitrary",)),
    )(a1, mask, packed["w1"], packed["b1"], packed["w2"], packed["b2"],
      packed["w3"], packed["b3"], packed["wf"], packed["bf"])
    return out[:b, :10]


if __name__ == "__main__":
    key = jax.random.PRNGKey(0)
    pkey, xkey = jax.random.split(key)
    params = init_params(pkey)
    packed = prepare_params(params)        # one-time weight packing (hoisted)
    # Input spatial size 31 so the flatten sees exactly 128 features:
    # 31 -(conv1 k5 s2)-> 14 -(conv2 k3 p1)-> 14 -(pool 2)-> 7 -(conv3 k7)-> 1.
    x = jax.random.normal(xkey, (2, 3, 31, 31), jnp.float32)
    out = cnn_module_forward(packed, x)
    out = jax.block_until_ready(out)
    assert out.shape == (2, 10), out.shape
    assert bool(jnp.all(jnp.isfinite(out)))
    print("KERNEL_OK")
</pallas_src>

<mosaic_0001>
module attributes {stable_mosaic.version = 11 : i64} {
  func.func @_cnn_fused_kernel(%arg0: i32, %arg1: memref<560x128xbf16, #tpu.memory_space<vmem>>, %arg2: memref<560x1xf32, #tpu.memory_space<vmem>>, %arg3: memref<128x128xbf16, #tpu.memory_space<vmem>>, %arg4: memref<1x128xf32, #tpu.memory_space<vmem>>, %arg5: memref<9x128x128xbf16, #tpu.memory_space<vmem>>, %arg6: memref<1x128xf32, #tpu.memory_space<vmem>>, %arg7: memref<6272x128xbf16, #tpu.memory_space<vmem>>, %arg8: memref<1x128xf32, #tpu.memory_space<vmem>>, %arg9: memref<128x128xbf16, #tpu.memory_space<vmem>>, %arg10: memref<1x128xf32, #tpu.memory_space<vmem>>, %arg11: memref<8x128xf32, #tpu.memory_space<vmem>>, %arg12: memref<560x128xf32, #tpu.memory_space<vmem>>, %arg13: memref<536x128xf32, #tpu.memory_space<vmem>>, %arg14: memref<512x128xf32, #tpu.memory_space<vmem>>, %arg15: memref<8x6272xf32, #tpu.memory_space<vmem>>) attributes {dimension_semantics = [#tpu.dimension_semantics<arbitrary>], iteration_bounds = array<i64: 1>, scalar_prefetch = 0 : i64, scratch_operands = 4 : i64, tpu.core_type = #tpu.core_type<tc>, window_params = [{pipeline_mode = #tpu.pipeline_mode<synchronous>, transform_indices = @transform_0, window_bounds = array<i64: 560, 128>}, {pipeline_mode = #tpu.pipeline_mode<synchronous>, transform_indices = @transform_1, window_bounds = array<i64: 560, 1>}, {pipeline_mode = #tpu.pipeline_mode<synchronous>, transform_indices = @transform_2, window_bounds = array<i64: 128, 128>}, {pipeline_mode = #tpu.pipeline_mode<synchronous>, transform_indices = @transform_3, window_bounds = array<i64: 1, 128>}, {pipeline_mode = #tpu.pipeline_mode<synchronous>, transform_indices = @transform_4, window_bounds = array<i64: 9, 128, 128>}, {pipeline_mode = #tpu.pipeline_mode<synchronous>, transform_indices = @transform_5, window_bounds = array<i64: 1, 128>}, {pipeline_mode = #tpu.pipeline_mode<synchronous>, transform_indices = @transform_6, window_bounds = array<i64: 6272, 128>}, {pipeline_mode = #tpu.pipeline_mode<synchronous>, transform_indices = @transform_7, window_bounds = array<i64: 1, 128>}, {pipeline_mode = #tpu.pipeline_mode<synchronous>, transform_indices = @transform_8, window_bounds = array<i64: 128, 128>}, {pipeline_mode = #tpu.pipeline_mode<synchronous>, transform_indices = @transform_9, window_bounds = array<i64: 1, 128>}, {pipeline_mode = #tpu.pipeline_mode<synchronous>, transform_indices = @transform_10, window_bounds = array<i64: 8, 128>}]} {
    %c0 = arith.constant 0 : index
    %c0_0 = arith.constant 0 : index
    %0 = vector.load %arg1[%c0, %c0_0] : memref<560x128xbf16, #tpu.memory_space<vmem>>, vector<560x128xbf16>
    %c0_1 = arith.constant 0 : index
    %c0_2 = arith.constant 0 : index
    %1 = vector.load %arg3[%c0_1, %c0_2] : memref<128x128xbf16, #tpu.memory_space<vmem>>, vector<128x128xbf16>
    %cst = arith.constant dense<0.000000e+00> : vector<560x128xf32>
    %2 = tpu.matmul %0, %1, %cst {dimension_numbers = #tpu.dot_dimension_numbers<[1], [0], [0], [1], [0, 0, 1, 1], [], []>} : vector<560x128xbf16>, vector<128x128xbf16>, vector<560x128xf32> -> vector<560x128xf32>
    %c0_3 = arith.constant 0 : index
    %c0_4 = arith.constant 0 : index
    %3 = vector.load %arg4[%c0_3, %c0_4] : memref<1x128xf32, #tpu.memory_space<vmem>>, vector<1x128xf32>
    %4 = vector.broadcast %3 : vector<1x128xf32> to vector<560x128xf32>
    %5 = arith.addf %2, %4 : vector<560x128xf32>
    %cst_5 = arith.constant 0.000000e+00 : f32
    %6 = vector.broadcast %cst_5 : f32 to vector<560x128xf32>
    %7 = arith.maximumf %5, %6 : vector<560x128xf32>
    %c0_6 = arith.constant 0 : index
    %c0_7 = arith.constant 0 : index
    %8 = vector.load %arg2[%c0_6, %c0_7] : memref<560x1xf32, #tpu.memory_space<vmem>>, vector<560x1xf32>
    %9 = vector.broadcast %8 : vector<560x1xf32> to vector<560x128xf32>
    %10 = arith.mulf %7, %9 : vector<560x128xf32>
    %c0_8 = arith.constant 0 : index
    %c0_9 = arith.constant 0 : index
    %11 = vector.load %arg12[%c0_8, %c0_9] : memref<560x128xf32, #tpu.memory_space<vmem>>, vector<560x128xf32>
    tpu.vector_store %arg12[%c0_8, %c0_9], %10 {strides = array<i32>} : memref<560x128xf32, #tpu.memory_space<vmem>>, vector<560x128xf32>,
    %cst_10 = arith.constant 0.000000e+00 : f32
    %12 = vector.broadcast %cst_10 : f32 to vector<536x128xf32>
    %c0_11 = arith.constant 0 : index
    %c0_12 = arith.constant 0 : index
    %13 = vector.load %arg13[%c0_11, %c0_12] : memref<536x128xf32, #tpu.memory_space<vmem>>, vector<536x128xf32>
    tpu.vector_store %arg13[%c0_11, %c0_12], %12 {strides = array<i32>} : memref<536x128xf32, #tpu.memory_space<vmem>>, vector<536x128xf32>,
    %c0_13 = arith.constant 0 : index
    %c0_14 = arith.constant 0 : index
    %14 = vector.load %arg12[%c0_13, %c0_14] : memref<560x128xf32, #tpu.memory_space<vmem>>, vector<512x128xf32>
    %15 = arith.truncf %14 : vector<512x128xf32> to vector<512x128xbf16>
    %c0_15 = arith.constant 0 : index
    %c0_16 = arith.constant 0 : index
    %16 = vector.load %arg13[%c0_15, %c0_16] : memref<536x128xf32, #tpu.memory_space<vmem>>, vector<512x128xf32>
    %c0_17 = arith.constant 0 : index
    %c0_18 = arith.constant 0 : index
    %c0_19 = arith.constant 0 : index
    %17 = vector.load %arg5[%c0_17, %c0_18, %c0_19] : memref<9x128x128xbf16, #tpu.memory_space<vmem>>, vector<1x128x128xbf16>
    %18 = vector.shape_cast %17 : vector<1x128x128xbf16> to vector<128x128xbf16>
    %cst_20 = arith.constant dense<0.000000e+00> : vector<512x128xf32>
    %19 = tpu.matmul %15, %18, %cst_20 {dimension_numbers = #tpu.dot_dimension_numbers<[1], [0], [0], [1], [0, 0, 1, 1], [], []>} : vector<512x128xbf16>, vector<128x128xbf16>, vector<512x128xf32> -> vector<512x128xf32>
    %20 = arith.addf %16, %19 : vector<512x128xf32>
    %c0_21 = arith.constant 0 : index
    %c0_22 = arith.constant 0 : index
    %21 = vector.load %arg13[%c0_21, %c0_22] : memref<536x128xf32, #tpu.memory_space<vmem>>, vector<512x128xf32>
    tpu.vector_store %arg13[%c0_21, %c0_22], %20 {strides = array<i32>} : memref<536x128xf32, #tpu.memory_space<vmem>>, vector<512x128xf32>,
    %c1 = arith.constant 1 : index
    %c0_23 = arith.constant 0 : index
    %22 = vector.load %arg12[%c1, %c0_23] : memref<560x128xf32, #tpu.memory_space<vmem>>, vector<512x128xf32>
    %23 = arith.truncf %22 : vector<512x128xf32> to vector<512x128xbf16>
    %c0_24 = arith.constant 0 : index
    %c0_25 = arith.constant 0 : index
    %24 = vector.load %arg13[%c0_24, %c0_25] : memref<536x128xf32, #tpu.memory_space<vmem>>, vector<512x128xf32>
    %c1_26 = arith.constant 1 : index
    %c0_27 = arith.constant 0 : index
    %c0_28 = arith.constant 0 : index
    %25 = vector.load %arg5[%c1_26, %c0_27, %c0_28] : memref<9x128x128xbf16, #tpu.memory_space<vmem>>, vector<1x128x128xbf16>
    %26 = vector.shape_cast %25 : vector<1x128x128xbf16> to vector<128x128xbf16>
    %cst_29 = arith.constant dense<0.000000e+00> : vector<512x128xf32>
    %27 = tpu.matmul %23, %26, %cst_29 {dimension_numbers = #tpu.dot_dimension_numbers<[1], [0], [0], [1], [0, 0, 1, 1], [], []>} : vector<512x128xbf16>, vector<128x128xbf16>, vector<512x128xf32> -> vector<512x128xf32>
    %28 = arith.addf %24, %27 : vector<512x128xf32>
    %c0_30 = arith.constant 0 : index
    %c0_31 = arith.constant 0 : index
    %29 = vector.load %arg13[%c0_30, %c0_31] : memref<536x128xf32, #tpu.memory_space<vmem>>, vector<512x128xf32>
    tpu.vector_store %arg13[%c0_30, %c0_31], %28 {strides = array<i32>} : memref<536x128xf32, #tpu.memory_space<vmem>>, vector<512x128xf32>,
    %c2 = arith.constant 2 : index
    %c0_32 = arith.constant 0 : index
    %30 = vector.load %arg12[%c2, %c0_32] : memref<560x128xf32, #tpu.memory_space<vmem>>, vector<512x128xf32>
    %31 = arith.truncf %30 : vector<512x128xf32> to vector<512x128xbf16>
    %c0_33 = arith.constant 0 : index
    %c0_34 = arith.constant 0 : index
    %32 = vector.load %arg13[%c0_33, %c0_34] : memref<536x128xf32, #tpu.memory_space<vmem>>, vector<512x128xf32>
    %c2_35 = arith.constant 2 : index
    %c0_36 = arith.constant 0 : index
    %c0_37 = arith.constant 0 : index
    %33 = vector.load %arg5[%c2_35, %c0_36, %c0_37] : memref<9x128x128xbf16, #tpu.memory_space<vmem>>, vector<1x128x128xbf16>
    %34 = vector.shape_cast %33 : vector<1x128x128xbf16> to vector<128x128xbf16>
    %cst_38 = arith.constant dense<0.000000e+00> : vector<512x128xf32>
    %35 = tpu.matmul %31, %34, %cst_38 {dimension_numbers = #tpu.dot_dimension_numbers<[1], [0], [0], [1], [0, 0, 1, 1], [], []>} : vector<512x128xbf16>, vector<128x128xbf16>, vector<512x128xf32> -> vector<512x128xf32>
    %36 = arith.addf %32, %35 : vector<512x128xf32>
    %c0_39 = arith.constant 0 : index
    %c0_40 = arith.constant 0 : index
    %37 = vector.load %arg13[%c0_39, %c0_40] : memref<536x128xf32, #tpu.memory_space<vmem>>, vector<512x128xf32>
    tpu.vector_store %arg13[%c0_39, %c0_40], %36 {strides = array<i32>} : memref<536x128xf32, #tpu.memory_space<vmem>>, vector<512x128xf32>,
    %c16 = arith.constant 16 : index
    %c0_41 = arith.constant 0 : index
    %38 = vector.load %arg12[%c16, %c0_41] : memref<560x128xf32, #tpu.memory_space<vmem>>, vector<512x128xf32>
    %39 = arith.truncf %38 : vector<512x128xf32> to vector<512x128xbf16>
    %c0_42 = arith.constant 0 : index
    %c0_43 = arith.constant 0 : index
    %40 = vector.load %arg13[%c0_42, %c0_43] : memref<536x128xf32, #tpu.memory_space<vmem>>, vector<512x128xf32>
    %c3 = arith.constant 3 : index
    %c0_44 = arith.constant 0 : index
    %c0_45 = arith.constant 0 : index
    %41 = vector.load %arg5[%c3, %c0_44, %c0_45] : memref<9x128x128xbf16, #tpu.memory_space<vmem>>, vector<1x128x128xbf16>
    %42 = vector.shape_cast %41 : vector<1x128x128xbf16> to vector<128x128xbf16>
    %cst_46 = arith.constant dense<0.000000e+00> : vector<512x128xf32>
    %43 = tpu.matmul %39, %42, %cst_46 {dimension_numbers = #tpu.dot_dimension_numbers<[1], [0], [0], [1], [0, 0, 1, 1], [], []>} : vector<512x128xbf16>, vector<128x128xbf16>, vector<512x128xf32> -> vector<512x128xf32>
    %44 = arith.addf %40, %43 : vector<512x128xf32>
    %c0_47 = arith.constant 0 : index
    %c0_48 = arith.constant 0 : index
    %45 = vector.load %arg13[%c0_47, %c0_48] : memref<536x128xf32, #tpu.memory_space<vmem>>, vector<512x128xf32>
    tpu.vector_store %arg13[%c0_47, %c0_48], %44 {strides = array<i32>} : memref<536x128xf32, #tpu.memory_space<vmem>>, vector<512x128xf32>,
    %c17 = arith.constant 17 : index
    %c0_49 = arith.constant 0 : index
    %46 = vector.load %arg12[%c17, %c0_49] : memref<560x128xf32, #tpu.memory_space<vmem>>, vector<512x128xf32>
    %47 = arith.truncf %46 : vector<512x128xf32> to vector<512x128xbf16>
    %c0_50 = arith.constant 0 : index
    %c0_51 = arith.constant 0 : index
    %48 = vector.load %arg13[%c0_50, %c0_51] : memref<536x128xf32, #tpu.memory_space<vmem>>, vector<512x128xf32>
    %c4 = arith.constant 4 : index
    %c0_52 = arith.constant 0 : index
    %c0_53 = arith.constant 0 : index
    %49 = vector.load %arg5[%c4, %c0_52, %c0_53] : memref<9x128x128xbf16, #tpu.memory_space<vmem>>, vector<1x128x128xbf16>
    %50 = vector.shape_cast %49 : vector<1x128x128xbf16> to vector<128x128xbf16>
    %cst_54 = arith.constant dense<0.000000e+00> : vector<512x128xf32>
    %51 = tpu.matmul %47, %50, %cst_54 {dimension_numbers = #tpu.dot_dimension_numbers<[1], [0], [0], [1], [0, 0, 1, 1], [], []>} : vector<512x128xbf16>, vector<128x128xbf16>, vector<512x128xf32> -> vector<512x128xf32>
    %52 = arith.addf %48, %51 : vector<512x128xf32>
    %c0_55 = arith.constant 0 : index
    %c0_56 = arith.constant 0 : index
    %53 = vector.load %arg13[%c0_55, %c0_56] : memref<536x128xf32, #tpu.memory_space<vmem>>, vector<512x128xf32>
    tpu.vector_store %arg13[%c0_55, %c0_56], %52 {strides = array<i32>} : memref<536x128xf32, #tpu.memory_space<vmem>>, vector<512x128xf32>,
    %c18 = arith.constant 18 : index
    %c0_57 = arith.constant 0 : index
    %54 = vector.load %arg12[%c18, %c0_57] : memref<560x128xf32, #tpu.memory_space<vmem>>, vector<512x128xf32>
    %55 = arith.truncf %54 : vector<512x128xf32> to vector<512x128xbf16>
    %c0_58 = arith.constant 0 : index
    %c0_59 = arith.constant 0 : index
    %56 = vector.load %arg13[%c0_58, %c0_59] : memref<536x128xf32, #tpu.memory_space<vmem>>, vector<512x128xf32>
    %c5 = arith.constant 5 : index
    %c0_60 = arith.constant 0 : index
    %c0_61 = arith.constant 0 : index
    %57 = vector.load %arg5[%c5, %c0_60, %c0_61] : memref<9x128x128xbf16, #tpu.memory_space<vmem>>, vector<1x128x128xbf16>
    %58 = vector.shape_cast %57 : vector<1x128x128xbf16> to vector<128x128xbf16>
    %cst_62 = arith.constant dense<0.000000e+00> : vector<512x128xf32>
    %59 = tpu.matmul %55, %58, %cst_62 {dimension_numbers = #tpu.dot_dimension_numbers<[1], [0], [0], [1], [0, 0, 1, 1], [], []>} : vector<512x128xbf16>, vector<128x128xbf16>, vector<512x128xf32> -> vector<512x128xf32>
    %60 = arith.addf %56, %59 : vector<512x128xf32>
    %c0_63 = arith.constant 0 : index
    %c0_64 = arith.constant 0 : index
    %61 = vector.load %arg13[%c0_63, %c0_64] : memref<536x128xf32, #tpu.memory_space<vmem>>, vector<512x128xf32>
    tpu.vector_store %arg13[%c0_63, %c0_64], %60 {strides = array<i32>} : memref<536x128xf32, #tpu.memory_space<vmem>>, vector<512x128xf32>,
    %c32 = arith.constant 32 : index
    %c0_65 = arith.constant 0 : index
    %62 = vector.load %arg12[%c32, %c0_65] : memref<560x128xf32, #tpu.memory_space<vmem>>, vector<512x128xf32>
    %63 = arith.truncf %62 : vector<512x128xf32> to vector<512x128xbf16>
    %c0_66 = arith.constant 0 : index
    %c0_67 = arith.constant 0 : index
    %64 = vector.load %arg13[%c0_66, %c0_67] : memref<536x128xf32, #tpu.memory_space<vmem>>, vector<512x128xf32>
    %c6 = arith.constant 6 : index
    %c0_68 = arith.constant 0 : index
    %c0_69 = arith.constant 0 : index
    %65 = vector.load %arg5[%c6, %c0_68, %c0_69] : memref<9x128x128xbf16, #tpu.memory_space<vmem>>, vector<1x128x128xbf16>
    %66 = vector.shape_cast %65 : vector<1x128x128xbf16> to vector<128x128xbf16>
    %cst_70 = arith.constant dense<0.000000e+00> : vector<512x128xf32>
    %67 = tpu.matmul %63, %66, %cst_70 {dimension_numbers = #tpu.dot_dimension_numbers<[1], [0], [0], [1], [0, 0, 1, 1], [], []>} : vector<512x128xbf16>, vector<128x128xbf16>, vector<512x128xf32> -> vector<512x128xf32>
    %68 = arith.addf %64, %67 : vector<512x128xf32>
    %c0_71 = arith.constant 0 : index
    %c0_72 = arith.constant 0 : index
    %69 = vector.load %arg13[%c0_71, %c0_72] : memref<536x128xf32, #tpu.memory_space<vmem>>, vector<512x128xf32>
    tpu.vector_store %arg13[%c0_71, %c0_72], %68 {strides = array<i32>} : memref<536x128xf32, #tpu.memory_space<vmem>>, vector<512x128xf32>,
    %c33 = arith.constant 33 : index
    %c0_73 = arith.constant 0 : index
    %70 = vector.load %arg12[%c33, %c0_73] : memref<560x128xf32, #tpu.memory_space<vmem>>, vector<512x128xf32>
    %71 = arith.truncf %70 : vector<512x128xf32> to vector<512x128xbf16>
    %c0_74 = arith.constant 0 : index
    %c0_75 = arith.constant 0 : index
    %72 = vector.load %arg13[%c0_74, %c0_75] : memref<536x128xf32, #tpu.memory_space<vmem>>, vector<512x128xf32>
    %c7 = arith.constant 7 : index
    %c0_76 = arith.constant 0 : index
    %c0_77 = arith.constant 0 : index
    %73 = vector.load %arg5[%c7, %c0_76, %c0_77] : memref<9x128x128xbf16, #tpu.memory_space<vmem>>, vector<1x128x128xbf16>
    %74 = vector.shape_cast %73 : vector<1x128x128xbf16> to vector<128x128xbf16>
    %cst_78 = arith.constant dense<0.000000e+00> : vector<512x128xf32>
    %75 = tpu.matmul %71, %74, %cst_78 {dimension_numbers = #tpu.dot_dimension_numbers<[1], [0], [0], [1], [0, 0, 1, 1], [], []>} : vector<512x128xbf16>, vector<128x128xbf16>, vector<512x128xf32> -> vector<512x128xf32>
    %76 = arith.addf %72, %75 : vector<512x128xf32>
    %c0_79 = arith.constant 0 : index
    %c0_80 = arith.constant 0 : index
    %77 = vector.load %arg13[%c0_79, %c0_80] : memref<536x128xf32, #tpu.memory_space<vmem>>, vector<512x128xf32>
    tpu.vector_store %arg13[%c0_79, %c0_80], %76 {strides = array<i32>} : memref<536x128xf32, #tpu.memory_space<vmem>>, vector<512x128xf32>,
    %c34 = arith.constant 34 : index
    %c0_81 = arith.constant 0 : index
    %78 = vector.load %arg12[%c34, %c0_81] : memref<560x128xf32, #tpu.memory_space<vmem>>, vector<512x128xf32>
    %79 = arith.truncf %78 : vector<512x128xf32> to vector<512x128xbf16>
    %c0_82 = arith.constant 0 : index
    %c0_83 = arith.constant 0 : index
    %80 = vector.load %arg13[%c0_82, %c0_83] : memref<536x128xf32, #tpu.memory_space<vmem>>, vector<512x128xf32>
    %c8 = arith.constant 8 : index
    %c0_84 = arith.constant 0 : index
    %c0_85 = arith.constant 0 : index
    %81 = vector.load %arg5[%c8, %c0_84, %c0_85] : memref<9x128x128xbf16, #tpu.memory_space<vmem>>, vector<1x128x128xbf16>
    %82 = vector.shape_cast %81 : vector<1x128x128xbf16> to vector<128x128xbf16>
    %cst_86 = arith.constant dense<0.000000e+00> : vector<512x128xf32>
    %83 = tpu.matmul %79, %82, %cst_86 {dimension_numbers = #tpu.dot_dimension_numbers<[1], [0], [0], [1], [0, 0, 1, 1], [], []>} : vector<512x128xbf16>, vector<128x128xbf16>, vector<512x128xf32> -> vector<512x128xf32>
    %84 = arith.addf %80, %83 : vector<512x128xf32>
    %c0_87 = arith.constant 0 : index
    %c0_88 = arith.constant 0 : index
    %85 = vector.load %arg13[%c0_87, %c0_88] : memref<536x128xf32, #tpu.memory_space<vmem>>, vector<512x128xf32>
    tpu.vector_store %arg13[%c0_87, %c0_88], %84 {strides = array<i32>} : memref<536x128xf32, #tpu.memory_space<vmem>>, vector<512x128xf32>,
    %c0_89 = arith.constant 0 : index
    %c0_90 = arith.constant 0 : index
    %86 = vector.load %arg13[%c0_89, %c0_90] : memref<536x128xf32, #tpu.memory_space<vmem>>, vector<512x128xf32>
    %c0_91 = arith.constant 0 : index
    %c0_92 = arith.constant 0 : index
    %87 = vector.load %arg6[%c0_91, %c0_92] : memref<1x128xf32, #tpu.memory_space<vmem>>, vector<1x128xf32>
    %88 = vector.broadcast %87 : vector<1x128xf32> to vector<512x128xf32>
    %89 = arith.addf %86, %88 : vector<512x128xf32>
    %cst_93 = arith.constant 0.000000e+00 : f32
    %90 = vector.broadcast %cst_93 : f32 to vector<512x128xf32>
    %91 = arith.maximumf %89, %90 : vector<512x128xf32>
    %c0_94 = arith.constant 0 : index
    %c0_95 = arith.constant 0 : index
    %92 = vector.load %arg13[%c0_94, %c0_95] : memref<536x128xf32, #tpu.memory_space<vmem>>, vector<512x128xf32>
    tpu.vector_store %arg13[%c0_94, %c0_95], %91 {strides = array<i32>} : memref<536x128xf32, #tpu.memory_space<vmem>>, vector<512x128xf32>,
    %c0_96 = arith.constant 0 : index
    %c0_97 = arith.constant 0 : index
    %93 = vector.load %arg13[%c0_96, %c0_97] : memref<536x128xf32, #tpu.memory_space<vmem>>, vector<512x128xf32>
    %c1_98 = arith.constant 1 : index
    %c0_99 = arith.constant 0 : index
    %94 = vector.load %arg13[%c1_98, %c0_99] : memref<536x128xf32, #tpu.memory_space<vmem>>, vector<512x128xf32>
    %95 = arith.maximumf %93, %94 : vector<512x128xf32>
    %c16_100 = arith.constant 16 : index
    %c0_101 = arith.constant 0 : index
    %96 = vector.load %arg13[%c16_100, %c0_101] : memref<536x128xf32, #tpu.memory_space<vmem>>, vector<512x128xf32>
    %97 = arith.maximumf %95, %96 : vector<512x128xf32>
    %c17_102 = arith.constant 17 : index
    %c0_103 = arith.constant 0 : index
    %98 = vector.load %arg13[%c17_102, %c0_103] : memref<536x128xf32, #tpu.memory_space<vmem>>, vector<512x128xf32>
    %99 = arith.maximumf %97, %98 : vector<512x128xf32>
    %c0_104 = arith.constant 0 : index
    %c0_105 = arith.constant 0 : index
    %100 = vector.load %arg14[%c0_104, %c0_105] : memref<512x128xf32, #tpu.memory_space<vmem>>, vector<512x128xf32>
    tpu.vector_store %arg14[%c0_104, %c0_105], %99 {strides = array<i32>} : memref<512x128xf32, #tpu.memory_space<vmem>>, vector<512x128xf32>,
    %cst_106 = arith.constant 0.000000e+00 : f32
    %101 = vector.broadcast %cst_106 : f32 to vector<8x6272xf32>
    %c0_107 = arith.constant 0 : index
    %c0_108 = arith.constant 0 : index
    %102 = vector.load %arg15[%c0_107, %c0_108] : memref<8x6272xf32, #tpu.memory_space<vmem>>, vector<8x6272xf32>
    tpu.vector_store %arg15[%c0_107, %c0_108], %101 {strides = array<i32>} : memref<8x6272xf32, #tpu.memory_space<vmem>>, vector<8x6272xf32>,
    %c0_109 = arith.constant 0 : index
    %c0_110 = arith.constant 0 : index
    %103 = vector.load %arg14[%c0_109, %c0_110] : memref<512x128xf32, #tpu.memory_space<vmem>>, vector<1x128xf32>
    %c0_111 = arith.constant 0 : index
    %c0_112 = arith.constant 0 : index
    %104 = vector.load %arg15[%c0_111, %c0_112] : memref<8x6272xf32, #tpu.memory_space<vmem>>, vector<1x128xf32>
    tpu.vector_store %arg15[%c0_111, %c0_112], %103 {strides = array<i32>} : memref<8x6272xf32, #tpu.memory_space<vmem>>, vector<1x128xf32>,
    %c2_113 = arith.constant 2 : index
    %c0_114 = arith.constant 0 : index
    %105 = vector.load %arg14[%c2_113, %c0_114] : memref<512x128xf32, #tpu.memory_space<vmem>>, vector<1x128xf32>
    %c0_115 = arith.constant 0 : index
    %c128 = arith.constant 128 : index
    %106 = vector.load %arg15[%c0_115, %c128] : memref<8x6272xf32, #tpu.memory_space<vmem>>, vector<1x128xf32>
    tpu.vector_store %arg15[%c0_115, %c128], %105 {strides = array<i32>} : memref<8x6272xf32, #tpu.memory_space<vmem>>, vector<1x128xf32>,
    %c4_116 = arith.constant 4 : index
    %c0_117 = arith.constant 0 : index
    %107 = vector.load %arg14[%c4_116, %c0_117] : memref<512x128xf32, #tpu.memory_space<vmem>>, vector<1x128xf32>
    %c0_118 = arith.constant 0 : index
    %c256 = arith.constant 256 : index
    %108 = vector.load %arg15[%c0_118, %c256] : memref<8x6272xf32, #tpu.memory_space<vmem>>, vector<1x128xf32>
    tpu.vector_store %arg15[%c0_118, %c256], %107 {strides = array<i32>} : memref<8x6272xf32, #tpu.memory_space<vmem>>, vector<1x128xf32>,
    %c6_119 = arith.constant 6 : index
    %c0_120 = arith.constant 0 : index
    %109 = vector.load %arg14[%c6_119, %c0_120] : memref<512x128xf32, #tpu.memory_space<vmem>>, vector<1x128xf32>
    %c0_121 = arith.constant 0 : index
    %c384 = arith.constant 384 : index
    %110 = vector.load %arg15[%c0_121, %c384] : memref<8x6272xf32, #tpu.memory_space<vmem>>, vector<1x128xf32>
    tpu.vector_store %arg15[%c0_121, %c384], %109 {strides = array<i32>} : memref<8x6272xf32, #tpu.memory_space<vmem>>, vector<1x128xf32>,
    %c8_122 = arith.constant 8 : index
    %c0_123 = arith.constant 0 : index
    %111 = vector.load %arg14[%c8_122, %c0_123] : memref<512x128xf32, #tpu.memory_space<vmem>>, vector<1x128xf32>
    %c0_124 = arith.constant 0 : index
    %c512 = arith.constant 512 : index
    %112 = vector.load %arg15[%c0_124, %c512] : memref<8x6272xf32, #tpu.memory_space<vmem>>, vector<1x128xf32>
    tpu.vector_store %arg15[%c0_124, %c512], %111 {strides = array<i32>} : memref<8x6272xf32, #tpu.memory_space<vmem>>, vector<1x128xf32>,
    %c10 = arith.constant 10 : index
    %c0_125 = arith.constant 0 : index
    %113 = vector.load %arg14[%c10, %c0_125] : memref<512x128xf32, #tpu.memory_space<vmem>>, vector<1x128xf32>
    %c0_126 = arith.constant 0 : index
    %c640 = arith.constant 640 : index
    %114 = vector.load %arg15[%c0_126, %c640] : memref<8x6272xf32, #tpu.memory_space<vmem>>, vector<1x128xf32>
    tpu.vector_store %arg15[%c0_126, %c640], %113 {strides = array<i32>} : memref<8x6272xf32, #tpu.memory_space<vmem>>, vector<1x128xf32>,
    %c12 = arith.constant 12 : index
    %c0_127 = arith.constant 0 : index
    %115 = vector.load %arg14[%c12, %c0_127] : memref<512x128xf32, #tpu.memory_space<vmem>>, vector<1x128xf32>
    %c0_128 = arith.constant 0 : index
    %c768 = arith.constant 768 : index
    %116 = vector.load %arg15[%c0_128, %c768] : memref<8x6272xf32, #tpu.memory_space<vmem>>, vector<1x128xf32>
    tpu.vector_store %arg15[%c0_128, %c768], %115 {strides = array<i32>} : memref<8x6272xf32, #tpu.memory_space<vmem>>, vector<1x128xf32>,
    %c32_129 = arith.constant 32 : index
    %c0_130 = arith.constant 0 : index
    %117 = vector.load %arg14[%c32_129, %c0_130] : memref<512x128xf32, #tpu.memory_space<vmem>>, vector<1x128xf32>
    %c0_131 = arith.constant 0 : index
    %c896 = arith.constant 896 : index
    %118 = vector.load %arg15[%c0_131, %c896] : memref<8x6272xf32, #tpu.memory_space<vmem>>, vector<1x128xf32>
    tpu.vector_store %arg15[%c0_131, %c896], %117 {strides = array<i32>} : memref<8x6272xf32, #tpu.memory_space<vmem>>, vector<1x128xf32>,
    %c34_132 = arith.constant 34 : index
    %c0_133 = arith.constant 0 : index
    %119 = vector.load %arg14[%c34_132, %c0_133] : memref<512x128xf32, #tpu.memory_space<vmem>>, vector<1x128xf32>
    %c0_134 = arith.constant 0 : index
    %c1024 = arith.constant 1024 : index
    %120 = vector.load %arg15[%c0_134, %c1024] : memref<8x6272xf32, #tpu.memory_space<vmem>>, vector<1x128xf32>
    tpu.vector_store %arg15[%c0_134, %c1024], %119 {strides = array<i32>} : memref<8x6272xf32, #tpu.memory_space<vmem>>, vector<1x128xf32>,
    %c36 = arith.constant 36 : index
    %c0_135 = arith.constant 0 : index
    %121 = vector.load %arg14[%c36, %c0_135] : memref<512x128xf32, #tpu.memory_space<vmem>>, vector<1x128xf32>
    %c0_136 = arith.constant 0 : index
    %c1152 = arith.constant 1152 : index
    %122 = vector.load %arg15[%c0_136, %c1152] : memref<8x6272xf32, #tpu.memory_space<vmem>>, vector<1x128xf32>
    tpu.vector_store %arg15[%c0_136, %c1152], %121 {strides = array<i32>} : memref<8x6272xf32, #tpu.memory_space<vmem>>, vector<1x128xf32>,
    %c38 = arith.constant 38 : index
    %c0_137 = arith.constant 0 : index
    %123 = vector.load %arg14[%c38, %c0_137] : memref<512x128xf32, #tpu.memory_space<vmem>>, vector<1x128xf32>
    %c0_138 = arith.constant 0 : index
    %c1280 = arith.constant 1280 : index
    %124 = vector.load %arg15[%c0_138, %c1280] : memref<8x6272xf32, #tpu.memory_space<vmem>>, vector<1x128xf32>
    tpu.vector_store %arg15[%c0_138, %c1280], %123 {strides = array<i32>} : memref<8x6272xf32, #tpu.memory_space<vmem>>, vector<1x128xf32>,
    %c40 = arith.constant 40 : index
    %c0_139 = arith.constant 0 : index
    %125 = vector.load %arg14[%c40, %c0_139] : memref<512x128xf32, #tpu.memory_space<vmem>>, vector<1x128xf32>
    %c0_140 = arith.constant 0 : index
    %c1408 = arith.constant 1408 : index
    %126 = vector.load %arg15[%c0_140, %c1408] : memref<8x6272xf32, #tpu.memory_space<vmem>>, vector<1x128xf32>
    tpu.vector_store %arg15[%c0_140, %c1408], %125 {strides = array<i32>} : memref<8x6272xf32, #tpu.memory_space<vmem>>, vector<1x128xf32>,
    %c42 = arith.constant 42 : index
    %c0_141 = arith.constant 0 : index
    %127 = vector.load %arg14[%c42, %c0_141] : memref<512x128xf32, #tpu.memory_space<vmem>>, vector<1x128xf32>
    %c0_142 = arith.constant 0 : index
    %c1536 = arith.constant 1536 : index
    %128 = vector.load %arg15[%c0_142, %c1536] : memref<8x6272xf32, #tpu.memory_space<vmem>>, vector<1x128xf32>
    tpu.vector_store %arg15[%c0_142, %c1536], %127 {strides = array<i32>} : memref<8x6272xf32, #tpu.memory_space<vmem>>, vector<1x128xf32>,
    %c44 = arith.constant 44 : index
    %c0_143 = arith.constant 0 : index
    %129 = vector.load %arg14[%c44, %c0_143] : memref<512x128xf32, #tpu.memory_space<vmem>>, vector<1x128xf32>
    %c0_144 = arith.constant 0 : index
    %c1664 = arith.constant 1664 : index
    %130 = vector.load %arg15[%c0_144, %c1664] : memref<8x6272xf32, #tpu.memory_space<vmem>>, vector<1x128xf32>
    tpu.vector_store %arg15[%c0_144, %c1664], %129 {strides = array<i32>} : memref<8x6272xf32, #tpu.memory_space<vmem>>, vector<1x128xf32>,
    %c64 = arith.constant 64 : index
    %c0_145 = arith.constant 0 : index
    %131 = vector.load %arg14[%c64, %c0_145] : memref<512x128xf32, #tpu.memory_space<vmem>>, vector<1x128xf32>
    %c0_146 = arith.constant 0 : index
    %c1792 = arith.constant 1792 : index
    %132 = vector.load %arg15[%c0_146, %c1792] : memref<8x6272xf32, #tpu.memory_space<vmem>>, vector<1x128xf32>
    tpu.vector_store %arg15[%c0_146, %c1792], %131 {strides = array<i32>} : memref<8x6272xf32, #tpu.memory_space<vmem>>, vector<1x128xf32>,
    %c66 = arith.constant 66 : index
    %c0_147 = arith.constant 0 : index
    %133 = vector.load %arg14[%c66, %c0_147] : memref<512x128xf32, #tpu.memory_space<vmem>>, vector<1x128xf32>
    %c0_148 = arith.constant 0 : index
    %c1920 = arith.constant 1920 : index
    %134 = vector.load %arg15[%c0_148, %c1920] : memref<8x6272xf32, #tpu.memory_space<vmem>>, vector<1x128xf32>
    tpu.vector_store %arg15[%c0_148, %c1920], %133 {strides = array<i32>} : memref<8x6272xf32, #tpu.memory_space<vmem>>, vector<1x128xf32>,
    %c68 = arith.constant 68 : index
    %c0_149 = arith.constant 0 : index
    %135 = vector.load %arg14[%c68, %c0_149] : memref<512x128xf32, #tpu.memory_space<vmem>>, vector<1x128xf32>
    %c0_150 = arith.constant 0 : index
    %c2048 = arith.constant 2048 : index
    %136 = vector.load %arg15[%c0_150, %c2048] : memref<8x6272xf32, #tpu.memory_space<vmem>>, vector<1x128xf32>
    tpu.vector_store %arg15[%c0_150, %c2048], %135 {strides = array<i32>} : memref<8x6272xf32, #tpu.memory_space<vmem>>, vector<1x128xf32>,
    %c70 = arith.constant 70 : index
    %c0_151 = arith.constant 0 : index
    %137 = vector.load %arg14[%c70, %c0_151] : memref<512x128xf32, #tpu.memory_space<vmem>>, vector<1x128xf32>
    %c0_152 = arith.constant 0 : index
    %c2176 = arith.constant 2176 : index
    %138 = vector.load %arg15[%c0_152, %c2176] : memref<8x6272xf32, #tpu.memory_space<vmem>>, vector<1x128xf32>
    tpu.vector_store %arg15[%c0_152, %c2176], %137 {strides = array<i32>} : memref<8x6272xf32, #tpu.memory_space<vmem>>, vector<1x128xf32>,
    %c72 = arith.constant 72 : index
    %c0_153 = arith.constant 0 : index
    %139 = vector.load %arg14[%c72, %c0_153] : memref<512x128xf32, #tpu.memory_space<vmem>>, vector<1x128xf32>
    %c0_154 = arith.constant 0 : index
    %c2304 = arith.constant 2304 : index
    %140 = vector.load %arg15[%c0_154, %c2304] : memref<8x6272xf32, #tpu.memory_space<vmem>>, vector<1x128xf32>
    tpu.vector_store %arg15[%c0_154, %c2304], %139 {strides = array<i32>} : memref<8x6272xf32, #tpu.memory_space<vmem>>, vector<1x128xf32>,
    %c74 = arith.constant 74 : index
    %c0_155 = arith.constant 0 : index
    %141 = vector.load %arg14[%c74, %c0_155] : memref<512x128xf32, #tpu.memory_space<vmem>>, vector<1x128xf32>
    %c0_156 = arith.constant 0 : index
    %c2432 = arith.constant 2432 : index
    %142 = vector.load %arg15[%c0_156, %c2432] : memref<8x6272xf32, #tpu.memory_space<vmem>>, vector<1x128xf32>
    tpu.vector_store %arg15[%c0_156, %c2432], %141 {strides = array<i32>} : memref<8x6272xf32, #tpu.memory_space<vmem>>, vector<1x128xf32>,
    %c76 = arith.constant 76 : index
    %c0_157 = arith.constant 0 : index
    %143 = vector.load %arg14[%c76, %c0_157] : memref<512x128xf32, #tpu.memory_space<vmem>>, vector<1x128xf32>
    %c0_158 = arith.constant 0 : index
    %c2560 = arith.constant 2560 : index
    %144 = vector.load %arg15[%c0_158, %c2560] : memref<8x6272xf32, #tpu.memory_space<vmem>>, vector<1x128xf32>
    tpu.vector_store %arg15[%c0_158, %c2560], %143 {strides = array<i32>} : memref<8x6272xf32, #tpu.memory_space<vmem>>, vector<1x128xf32>,
    %c96 = arith.constant 96 : index
    %c0_159 = arith.constant 0 : index
    %145 = vector.load %arg14[%c96, %c0_159] : memref<512x128xf32, #tpu.memory_space<vmem>>, vector<1x128xf32>
    %c0_160 = arith.constant 0 : index
    %c2688 = arith.constant 2688 : index
    %146 = vector.load %arg15[%c0_160, %c2688] : memref<8x6272xf32, #tpu.memory_space<vmem>>, vector<1x128xf32>
    tpu.vector_store %arg15[%c0_160, %c2688], %145 {strides = array<i32>} : memref<8x6272xf32, #tpu.memory_space<vmem>>, vector<1x128xf32>,
    %c98 = arith.constant 98 : index
    %c0_161 = arith.constant 0 : index
    %147 = vector.load %arg14[%c98, %c0_161] : memref<512x128xf32, #tpu.memory_space<vmem>>, vector<1x128xf32>
    %c0_162 = arith.constant 0 : index
    %c2816 = arith.constant 2816 : index
    %148 = vector.load %arg15[%c0_162, %c2816] : memref<8x6272xf32, #tpu.memory_space<vmem>>, vector<1x128xf32>
    tpu.vector_store %arg15[%c0_162, %c2816], %147 {strides = array<i32>} : memref<8x6272xf32, #tpu.memory_space<vmem>>, vector<1x128xf32>,
    %c100 = arith.constant 100 : index
    %c0_163 = arith.constant 0 : index
    %149 = vector.load %arg14[%c100, %c0_163] : memref<512x128xf32, #tpu.memory_space<vmem>>, vector<1x128xf32>
    %c0_164 = arith.constant 0 : index
    %c2944 = arith.constant 2944 : index
    %150 = vector.load %arg15[%c0_164, %c2944] : memref<8x6272xf32, #tpu.memory_space<vmem>>, vector<1x128xf32>
    tpu.vector_store %arg15[%c0_164, %c2944], %149 {strides = array<i32>} : memref<8x6272xf32, #tpu.memory_space<vmem>>, vector<1x128xf32>,
    %c102 = arith.constant 102 : index
    %c0_165 = arith.constant 0 : index
    %151 = vector.load %arg14[%c102, %c0_165] : memref<512x128xf32, #tpu.memory_space<vmem>>, vector<1x128xf32>
    %c0_166 = arith.constant 0 : index
    %c3072 = arith.constant 3072 : index
    %152 = vector.load %arg15[%c0_166, %c3072] : memref<8x6272xf32, #tpu.memory_space<vmem>>, vector<1x128xf32>
    tpu.vector_store %arg15[%c0_166, %c3072], %151 {strides = array<i32>} : memref<8x6272xf32, #tpu.memory_space<vmem>>, vector<1x128xf32>,
    %c104 = arith.constant 104 : index
    %c0_167 = arith.constant 0 : index
    %153 = vector.load %arg14[%c104, %c0_167] : memref<512x128xf32, #tpu.memory_space<vmem>>, vector<1x128xf32>
    %c0_168 = arith.constant 0 : index
    %c3200 = arith.constant 3200 : index
    %154 = vector.load %arg15[%c0_168, %c3200] : memref<8x6272xf32, #tpu.memory_space<vmem>>, vector<1x128xf32>
    tpu.vector_store %arg15[%c0_168, %c3200], %153 {strides = array<i32>} : memref<8x6272xf32, #tpu.memory_space<vmem>>, vector<1x128xf32>,
    %c106 = arith.constant 106 : index
    %c0_169 = arith.constant 0 : index
    %155 = vector.load %arg14[%c106, %c0_169] : memref<512x128xf32, #tpu.memory_space<vmem>>, vector<1x128xf32>
    %c0_170 = arith.constant 0 : index
    %c3328 = arith.constant 3328 : index
    %156 = vector.load %arg15[%c0_170, %c3328] : memref<8x6272xf32, #tpu.memory_space<vmem>>, vector<1x128xf32>
    tpu.vector_store %arg15[%c0_170, %c3328], %155 {strides = array<i32>} : memref<8x6272xf32, #tpu.memory_space<vmem>>, vector<1x128xf32>,
    %c108 = arith.constant 108 : index
    %c0_171 = arith.constant 0 : index
    %157 = vector.load %arg14[%c108, %c0_171] : memref<512x128xf32, #tpu.memory_space<vmem>>, vector<1x128xf32>
    %c0_172 = arith.constant 0 : index
    %c3456 = arith.constant 3456 : index
    %158 = vector.load %arg15[%c0_172, %c3456] : memref<8x6272xf32, #tpu.memory_space<vmem>>, vector<1x128xf32>
    tpu.vector_store %arg15[%c0_172, %c3456], %157 {strides = array<i32>} : memref<8x6272xf32, #tpu.memory_space<vmem>>, vector<1x128xf32>,
    %c128_173 = arith.constant 128 : index
    %c0_174 = arith.constant 0 : index
    %159 = vector.load %arg14[%c128_173, %c0_174] : memref<512x128xf32, #tpu.memory_space<vmem>>, vector<1x128xf32>
    %c0_175 = arith.constant 0 : index
    %c3584 = arith.constant 3584 : index
    %160 = vector.load %arg15[%c0_175, %c3584] : memref<8x6272xf32, #tpu.memory_space<vmem>>, vector<1x128xf32>
    tpu.vector_store %arg15[%c0_175, %c3584], %159 {strides = array<i32>} : memref<8x6272xf32, #tpu.memory_space<vmem>>, vector<1x128xf32>,
    %c130 = arith.constant 130 : index
    %c0_176 = arith.constant 0 : index
    %161 = vector.load %arg14[%c130, %c0_176] : memref<512x128xf32, #tpu.memory_space<vmem>>, vector<1x128xf32>
    %c0_177 = arith.constant 0 : index
    %c3712 = arith.constant 3712 : index
    %162 = vector.load %arg15[%c0_177, %c3712] : memref<8x6272xf32, #tpu.memory_space<vmem>>, vector<1x128xf32>
    tpu.vector_store %arg15[%c0_177, %c3712], %161 {strides = array<i32>} : memref<8x6272xf32, #tpu.memory_space<vmem>>, vector<1x128xf32>,
    %c132 = arith.constant 132 : index
    %c0_178 = arith.constant 0 : index
    %163 = vector.load %arg14[%c132, %c0_178] : memref<512x128xf32, #tpu.memory_space<vmem>>, vector<1x128xf32>
    %c0_179 = arith.constant 0 : index
    %c3840 = arith.constant 3840 : index
    %164 = vector.load %arg15[%c0_179, %c3840] : memref<8x6272xf32, #tpu.memory_space<vmem>>, vector<1x128xf32>
    tpu.vector_store %arg15[%c0_179, %c3840], %163 {strides = array<i32>} : memref<8x6272xf32, #tpu.memory_space<vmem>>, vector<1x128xf32>,
    %c134 = arith.constant 134 : index
    %c0_180 = arith.constant 0 : index
    %165 = vector.load %arg14[%c134, %c0_180] : memref<512x128xf32, #tpu.memory_space<vmem>>, vector<1x128xf32>
    %c0_181 = arith.constant 0 : index
    %c3968 = arith.constant 3968 : index
    %166 = vector.load %arg15[%c0_181, %c3968] : memref<8x6272xf32, #tpu.memory_space<vmem>>, vector<1x128xf32>
    tpu.vector_store %arg15[%c0_181, %c3968], %165 {strides = array<i32>} : memref<8x6272xf32, #tpu.memory_space<vmem>>, vector<1x128xf32>,
    %c136 = arith.constant 136 : index
    %c0_182 = arith.constant 0 : index
    %167 = vector.load %arg14[%c136, %c0_182] : memref<512x128xf32, #tpu.memory_space<vmem>>, vector<1x128xf32>
    %c0_183 = arith.constant 0 : index
    %c4096 = arith.constant 4096 : index
    %168 = vector.load %arg15[%c0_183, %c4096] : memref<8x6272xf32, #tpu.memory_space<vmem>>, vector<1x128xf32>
    tpu.vector_store %arg15[%c0_183, %c4096], %167 {strides = array<i32>} : memref<8x6272xf32, #tpu.memory_space<vmem>>, vector<1x128xf32>,
    %c138 = arith.constant 138 : index
    %c0_184 = arith.constant 0 : index
    %169 = vector.load %arg14[%c138, %c0_184] : memref<512x128xf32, #tpu.memory_space<vmem>>, vector<1x128xf32>
    %c0_185 = arith.constant 0 : index
    %c4224 = arith.constant 4224 : index
    %170 = vector.load %arg15[%c0_185, %c4224] : memref<8x6272xf32, #tpu.memory_space<vmem>>, vector<1x128xf32>
    tpu.vector_store %arg15[%c0_185, %c4224], %169 {strides = array<i32>} : memref<8x6272xf32, #tpu.memory_space<vmem>>, vector<1x128xf32>,
    %c140 = arith.constant 140 : index
    %c0_186 = arith.constant 0 : index
    %171 = vector.load %arg14[%c140, %c0_186] : memref<512x128xf32, #tpu.memory_space<vmem>>, vector<1x128xf32>
    %c0_187 = arith.constant 0 : index
    %c4352 = arith.constant 4352 : index
    %172 = vector.load %arg15[%c0_187, %c4352] : memref<8x6272xf32, #tpu.memory_space<vmem>>, vector<1x128xf32>
    tpu.vector_store %arg15[%c0_187, %c4352], %171 {strides = array<i32>} : memref<8x6272xf32, #tpu.memory_space<vmem>>, vector<1x128xf32>,
    %c160 = arith.constant 160 : index
    %c0_188 = arith.constant 0 : index
    %173 = vector.load %arg14[%c160, %c0_188] : memref<512x128xf32, #tpu.memory_space<vmem>>, vector<1x128xf32>
    %c0_189 = arith.constant 0 : index
    %c4480 = arith.constant 4480 : index
    %174 = vector.load %arg15[%c0_189, %c4480] : memref<8x6272xf32, #tpu.memory_space<vmem>>, vector<1x128xf32>
    tpu.vector_store %arg15[%c0_189, %c4480], %173 {strides = array<i32>} : memref<8x6272xf32, #tpu.memory_space<vmem>>, vector<1x128xf32>,
    %c162 = arith.constant 162 : index
    %c0_190 = arith.constant 0 : index
    %175 = vector.load %arg14[%c162, %c0_190] : memref<512x128xf32, #tpu.memory_space<vmem>>, vector<1x128xf32>
    %c0_191 = arith.constant 0 : index
    %c4608 = arith.constant 4608 : index
    %176 = vector.load %arg15[%c0_191, %c4608] : memref<8x6272xf32, #tpu.memory_space<vmem>>, vector<1x128xf32>
    tpu.vector_store %arg15[%c0_191, %c4608], %175 {strides = array<i32>} : memref<8x6272xf32, #tpu.memory_space<vmem>>, vector<1x128xf32>,
    %c164 = arith.constant 164 : index
    %c0_192 = arith.constant 0 : index
    %177 = vector.load %arg14[%c164, %c0_192] : memref<512x128xf32, #tpu.memory_space<vmem>>, vector<1x128xf32>
    %c0_193 = arith.constant 0 : index
    %c4736 = arith.constant 4736 : index
    %178 = vector.load %arg15[%c0_193, %c4736] : memref<8x6272xf32, #tpu.memory_space<vmem>>, vector<1x128xf32>
    tpu.vector_store %arg15[%c0_193, %c4736], %177 {strides = array<i32>} : memref<8x6272xf32, #tpu.memory_space<vmem>>, vector<1x128xf32>,
    %c166 = arith.constant 166 : index
    %c0_194 = arith.constant 0 : index
    %179 = vector.load %arg14[%c166, %c0_194] : memref<512x128xf32, #tpu.memory_space<vmem>>, vector<1x128xf32>
    %c0_195 = arith.constant 0 : index
    %c4864 = arith.constant 4864 : index
    %180 = vector.load %arg15[%c0_195, %c4864] : memref<8x6272xf32, #tpu.memory_space<vmem>>, vector<1x128xf32>
    tpu.vector_store %arg15[%c0_195, %c4864], %179 {strides = array<i32>} : memref<8x6272xf32, #tpu.memory_space<vmem>>, vector<1x128xf32>,
    %c168 = arith.constant 168 : index
    %c0_196 = arith.constant 0 : index
    %181 = vector.load %arg14[%c168, %c0_196] : memref<512x128xf32, #tpu.memory_space<vmem>>, vector<1x128xf32>
    %c0_197 = arith.constant 0 : index
    %c4992 = arith.constant 4992 : index
    %182 = vector.load %arg15[%c0_197, %c4992] : memref<8x6272xf32, #tpu.memory_space<vmem>>, vector<1x128xf32>
    tpu.vector_store %arg15[%c0_197, %c4992], %181 {strides = array<i32>} : memref<8x6272xf32, #tpu.memory_space<vmem>>, vector<1x128xf32>,
    %c170 = arith.constant 170 : index
    %c0_198 = arith.constant 0 : index
    %183 = vector.load %arg14[%c170, %c0_198] : memref<512x128xf32, #tpu.memory_space<vmem>>, vector<1x128xf32>
    %c0_199 = arith.constant 0 : index
    %c5120 = arith.constant 5120 : index
    %184 = vector.load %arg15[%c0_199, %c5120] : memref<8x6272xf32, #tpu.memory_space<vmem>>, vector<1x128xf32>
    tpu.vector_store %arg15[%c0_199, %c5120], %183 {strides = array<i32>} : memref<8x6272xf32, #tpu.memory_space<vmem>>, vector<1x128xf32>,
    %c172 = arith.constant 172 : index
    %c0_200 = arith.constant 0 : index
    %185 = vector.load %arg14[%c172, %c0_200] : memref<512x128xf32, #tpu.memory_space<vmem>>, vector<1x128xf32>
    %c0_201 = arith.constant 0 : index
    %c5248 = arith.constant 5248 : index
    %186 = vector.load %arg15[%c0_201, %c5248] : memref<8x6272xf32, #tpu.memory_space<vmem>>, vector<1x128xf32>
    tpu.vector_store %arg15[%c0_201, %c5248], %185 {strides = array<i32>} : memref<8x6272xf32, #tpu.memory_space<vmem>>, vector<1x128xf32>,
    %c192 = arith.constant 192 : index
    %c0_202 = arith.constant 0 : index
    %187 = vector.load %arg14[%c192, %c0_202] : memref<512x128xf32, #tpu.memory_space<vmem>>, vector<1x128xf32>
    %c0_203 = arith.constant 0 : index
    %c5376 = arith.constant 5376 : index
    %188 = vector.load %arg15[%c0_203, %c5376] : memref<8x6272xf32, #tpu.memory_space<vmem>>, vector<1x128xf32>
    tpu.vector_store %arg15[%c0_203, %c5376], %187 {strides = array<i32>} : memref<8x6272xf32, #tpu.memory_space<vmem>>, vector<1x128xf32>,
    %c194 = arith.constant 194 : index
    %c0_204 = arith.constant 0 : index
    %189 = vector.load %arg14[%c194, %c0_204] : memref<512x128xf32, #tpu.memory_space<vmem>>, vector<1x128xf32>
    %c0_205 = arith.constant 0 : index
    %c5504 = arith.constant 5504 : index
    %190 = vector.load %arg15[%c0_205, %c5504] : memref<8x6272xf32, #tpu.memory_space<vmem>>, vector<1x128xf32>
    tpu.vector_store %arg15[%c0_205, %c5504], %189 {strides = array<i32>} : memref<8x6272xf32, #tpu.memory_space<vmem>>, vector<1x128xf32>,
    %c196 = arith.constant 196 : index
    %c0_206 = arith.constant 0 : index
    %191 = vector.load %arg14[%c196, %c0_206] : memref<512x128xf32, #tpu.memory_space<vmem>>, vector<1x128xf32>
    %c0_207 = arith.constant 0 : index
    %c5632 = arith.constant 5632 : index
    %192 = vector.load %arg15[%c0_207, %c5632] : memref<8x6272xf32, #tpu.memory_space<vmem>>, vector<1x128xf32>
    tpu.vector_store %arg15[%c0_207, %c5632], %191 {strides = array<i32>} : memref<8x6272xf32, #tpu.memory_space<vmem>>, vector<1x128xf32>,
    %c198 = arith.constant 198 : index
    %c0_208 = arith.constant 0 : index
    %193 = vector.load %arg14[%c198, %c0_208] : memref<512x128xf32, #tpu.memory_space<vmem>>, vector<1x128xf32>
    %c0_209 = arith.constant 0 : index
    %c5760 = arith.constant 5760 : index
    %194 = vector.load %arg15[%c0_209, %c5760] : memref<8x6272xf32, #tpu.memory_space<vmem>>, vector<1x128xf32>
    tpu.vector_store %arg15[%c0_209, %c5760], %193 {strides = array<i32>} : memref<8x6272xf32, #tpu.memory_space<vmem>>, vector<1x128xf32>,
    %c200 = arith.constant 200 : index
    %c0_210 = arith.constant 0 : index
    %195 = vector.load %arg14[%c200, %c0_210] : memref<512x128xf32, #tpu.memory_space<vmem>>, vector<1x128xf32>
    %c0_211 = arith.constant 0 : index
    %c5888 = arith.constant 5888 : index
    %196 = vector.load %arg15[%c0_211, %c5888] : memref<8x6272xf32, #tpu.memory_space<vmem>>, vector<1x128xf32>
    tpu.vector_store %arg15[%c0_211, %c5888], %195 {strides = array<i32>} : memref<8x6272xf32, #tpu.memory_space<vmem>>, vector<1x128xf32>,
    %c202 = arith.constant 202 : index
    %c0_212 = arith.constant 0 : index
    %197 = vector.load %arg14[%c202, %c0_212] : memref<512x128xf32, #tpu.memory_space<vmem>>, vector<1x128xf32>
    %c0_213 = arith.constant 0 : index
    %c6016 = arith.constant 6016 : index
    %198 = vector.load %arg15[%c0_213, %c6016] : memref<8x6272xf32, #tpu.memory_space<vmem>>, vector<1x128xf32>
    tpu.vector_store %arg15[%c0_213, %c6016], %197 {strides = array<i32>} : memref<8x6272xf32, #tpu.memory_space<vmem>>, vector<1x128xf32>,
    %c204 = arith.constant 204 : index
    %c0_214 = arith.constant 0 : index
    %199 = vector.load %arg14[%c204, %c0_214] : memref<512x128xf32, #tpu.memory_space<vmem>>, vector<1x128xf32>
    %c0_215 = arith.constant 0 : index
    %c6144 = arith.constant 6144 : index
    %200 = vector.load %arg15[%c0_215, %c6144] : memref<8x6272xf32, #tpu.memory_space<vmem>>, vector<1x128xf32>
    tpu.vector_store %arg15[%c0_215, %c6144], %199 {strides = array<i32>} : memref<8x6272xf32, #tpu.memory_space<vmem>>, vector<1x128xf32>,
    %c256_216 = arith.constant 256 : index
    %c0_217 = arith.constant 0 : index
    %201 = vector.load %arg14[%c256_216, %c0_217] : memref<512x128xf32, #tpu.memory_space<vmem>>, vector<1x128xf32>
    %c1_218 = arith.constant 1 : index
    %c0_219 = arith.constant 0 : index
    %202 = vector.load %arg15[%c1_218, %c0_219] : memref<8x6272xf32, #tpu.memory_space<vmem>>, vector<1x128xf32>
    tpu.vector_store %arg15[%c1_218, %c0_219], %201 {strides = array<i32>} : memref<8x6272xf32, #tpu.memory_space<vmem>>, vector<1x128xf32>,
    %c258 = arith.constant 258 : index
    %c0_220 = arith.constant 0 : index
    %203 = vector.load %arg14[%c258, %c0_220] : memref<512x128xf32, #tpu.memory_space<vmem>>, vector<1x128xf32>
    %c1_221 = arith.constant 1 : index
    %c128_222 = arith.constant 128 : index
    %204 = vector.load %arg15[%c1_221, %c128_222] : memref<8x6272xf32, #tpu.memory_space<vmem>>, vector<1x128xf32>
    tpu.vector_store %arg15[%c1_221, %c128_222], %203 {strides = array<i32>} : memref<8x6272xf32, #tpu.memory_space<vmem>>, vector<1x128xf32>,
    %c260 = arith.constant 260 : index
    %c0_223 = arith.constant 0 : index
    %205 = vector.load %arg14[%c260, %c0_223] : memref<512x128xf32, #tpu.memory_space<vmem>>, vector<1x128xf32>
    %c1_224 = arith.constant 1 : index
    %c256_225 = arith.constant 256 : index
    %206 = vector.load %arg15[%c1_224, %c256_225] : memref<8x6272xf32, #tpu.memory_space<vmem>>, vector<1x128xf32>
    tpu.vector_store %arg15[%c1_224, %c256_225], %205 {strides = array<i32>} : memref<8x6272xf32, #tpu.memory_space<vmem>>, vector<1x128xf32>,
    %c262 = arith.constant 262 : index
    %c0_226 = arith.constant 0 : index
    %207 = vector.load %arg14[%c262, %c0_226] : memref<512x128xf32, #tpu.memory_space<vmem>>, vector<1x128xf32>
    %c1_227 = arith.constant 1 : index
    %c384_228 = arith.constant 384 : index
    %208 = vector.load %arg15[%c1_227, %c384_228] : memref<8x6272xf32, #tpu.memory_space<vmem>>, vector<1x128xf32>
    tpu.vector_store %arg15[%c1_227, %c384_228], %207 {strides = array<i32>} : memref<8x6272xf32, #tpu.memory_space<vmem>>, vector<1x128xf32>,
    %c264 = arith.constant 264 : index
    %c0_229 = arith.constant 0 : index
    %209 = vector.load %arg14[%c264, %c0_229] : memref<512x128xf32, #tpu.memory_space<vmem>>, vector<1x128xf32>
    %c1_230 = arith.constant 1 : index
    %c512_231 = arith.constant 512 : index
    %210 = vector.load %arg15[%c1_230, %c512_231] : memref<8x6272xf32, #tpu.memory_space<vmem>>, vector<1x128xf32>
    tpu.vector_store %arg15[%c1_230, %c512_231], %209 {strides = array<i32>} : memref<8x6272xf32, #tpu.memory_space<vmem>>, vector<1x128xf32>,
    %c266 = arith.constant 266 : index
    %c0_232 = arith.constant 0 : index
    %211 = vector.load %arg14[%c266, %c0_232] : memref<512x128xf32, #tpu.memory_space<vmem>>, vector<1x128xf32>
    %c1_233 = arith.constant 1 : index
    %c640_234 = arith.constant 640 : index
    %212 = vector.load %arg15[%c1_233, %c640_234] : memref<8x6272xf32, #tpu.memory_space<vmem>>, vector<1x128xf32>
    tpu.vector_store %arg15[%c1_233, %c640_234], %211 {strides = array<i32>} : memref<8x6272xf32, #tpu.memory_space<vmem>>, vector<1x128xf32>,
    %c268 = arith.constant 268 : index
    %c0_235 = arith.constant 0 : index
    %213 = vector.load %arg14[%c268, %c0_235] : memref<512x128xf32, #tpu.memory_space<vmem>>, vector<1x128xf32>
    %c1_236 = arith.constant 1 : index
    %c768_237 = arith.constant 768 : index
    %214 = vector.load %arg15[%c1_236, %c768_237] : memref<8x6272xf32, #tpu.memory_space<vmem>>, vector<1x128xf32>
    tpu.vector_store %arg15[%c1_236, %c768_237], %213 {strides = array<i32>} : memref<8x6272xf32, #tpu.memory_space<vmem>>, vector<1x128xf32>,
    %c288 = arith.constant 288 : index
    %c0_238 = arith.constant 0 : index
    %215 = vector.load %arg14[%c288, %c0_238] : memref<512x128xf32, #tpu.memory_space<vmem>>, vector<1x128xf32>
    %c1_239 = arith.constant 1 : index
    %c896_240 = arith.constant 896 : index
    %216 = vector.load %arg15[%c1_239, %c896_240] : memref<8x6272xf32, #tpu.memory_space<vmem>>, vector<1x128xf32>
    tpu.vector_store %arg15[%c1_239, %c896_240], %215 {strides = array<i32>} : memref<8x6272xf32, #tpu.memory_space<vmem>>, vector<1x128xf32>,
    %c290 = arith.constant 290 : index
    %c0_241 = arith.constant 0 : index
    %217 = vector.load %arg14[%c290, %c0_241] : memref<512x128xf32, #tpu.memory_space<vmem>>, vector<1x128xf32>
    %c1_242 = arith.constant 1 : index
    %c1024_243 = arith.constant 1024 : index
    %218 = vector.load %arg15[%c1_242, %c1024_243] : memref<8x6272xf32, #tpu.memory_space<vmem>>, vector<1x128xf32>
    tpu.vector_store %arg15[%c1_242, %c1024_243], %217 {strides = array<i32>} : memref<8x6272xf32, #tpu.memory_space<vmem>>, vector<1x128xf32>,
    %c292 = arith.constant 292 : index
    %c0_244 = arith.constant 0 : index
    %219 = vector.load %arg14[%c292, %c0_244] : memref<512x128xf32, #tpu.memory_space<vmem>>, vector<1x128xf32>
    %c1_245 = arith.constant 1 : index
    %c1152_246 = arith.constant 1152 : index
    %220 = vector.load %arg15[%c1_245, %c1152_246] : memref<8x6272xf32, #tpu.memory_space<vmem>>, vector<1x128xf32>
    tpu.vector_store %arg15[%c1_245, %c1152_246], %219 {strides = array<i32>} : memref<8x6272xf32, #tpu.memory_space<vmem>>, vector<1x128xf32>,
    %c294 = arith.constant 294 : index
    %c0_247 = arith.constant 0 : index
    %221 = vector.load %arg14[%c294, %c0_247] : memref<512x128xf32, #tpu.memory_space<vmem>>, vector<1x128xf32>
    %c1_248 = arith.constant 1 : index
    %c1280_249 = arith.constant 1280 : index
    %222 = vector.load %arg15[%c1_248, %c1280_249] : memref<8x6272xf32, #tpu.memory_space<vmem>>, vector<1x128xf32>
    tpu.vector_store %arg15[%c1_248, %c1280_249], %221 {strides = array<i32>} : memref<8x6272xf32, #tpu.memory_space<vmem>>, vector<1x128xf32>,
    %c296 = arith.constant 296 : index
    %c0_250 = arith.constant 0 : index
    %223 = vector.load %arg14[%c296, %c0_250] : memref<512x128xf32, #tpu.memory_space<vmem>>, vector<1x128xf32>
    %c1_251 = arith.constant 1 : index
    %c1408_252 = arith.constant 1408 : index
    %224 = vector.load %arg15[%c1_251, %c1408_252] : memref<8x6272xf32, #tpu.memory_space<vmem>>, vector<1x128xf32>
    tpu.vector_store %arg15[%c1_251, %c1408_252], %223 {strides = array<i32>} : memref<8x6272xf32, #tpu.memory_space<vmem>>, vector<1x128xf32>,
    %c298 = arith.constant 298 : index
    %c0_253 = arith.constant 0 : index
    %225 = vector.load %arg14[%c298, %c0_253] : memref<512x128xf32, #tpu.memory_space<vmem>>, vector<1x128xf32>
    %c1_254 = arith.constant 1 : index
    %c1536_255 = arith.constant 1536 : index
    %226 = vector.load %arg15[%c1_254, %c1536_255] : memref<8x6272xf32, #tpu.memory_space<vmem>>, vector<1x128xf32>
    tpu.vector_store %arg15[%c1_254, %c1536_255], %225 {strides = array<i32>} : memref<8x6272xf32, #tpu.memory_space<vmem>>, vector<1x128xf32>,
    %c300 = arith.constant 300 : index
    %c0_256 = arith.constant 0 : index
    %227 = vector.load %arg14[%c300, %c0_256] : memref<512x128xf32, #tpu.memory_space<vmem>>, vector<1x128xf32>
    %c1_257 = arith.constant 1 : index
    %c1664_258 = arith.constant 1664 : index
    %228 = vector.load %arg15[%c1_257, %c1664_258] : memref<8x6272xf32, #tpu.memory_space<vmem>>, vector<1x128xf32>
    tpu.vector_store %arg15[%c1_257, %c1664_258], %227 {strides = array<i32>} : memref<8x6272xf32, #tpu.memory_space<vmem>>, vector<1x128xf32>,
    %c320 = arith.constant 320 : index
    %c0_259 = arith.constant 0 : index
    %229 = vector.load %arg14[%c320, %c0_259] : memref<512x128xf32, #tpu.memory_space<vmem>>, vector<1x128xf32>
    %c1_260 = arith.constant 1 : index
    %c1792_261 = arith.constant 1792 : index
    %230 = vector.load %arg15[%c1_260, %c1792_261] : memref<8x6272xf32, #tpu.memory_space<vmem>>, vector<1x128xf32>
    tpu.vector_store %arg15[%c1_260, %c1792_261], %229 {strides = array<i32>} : memref<8x6272xf32, #tpu.memory_space<vmem>>, vector<1x128xf32>,
    %c322 = arith.constant 322 : index
    %c0_262 = arith.constant 0 : index
    %231 = vector.load %arg14[%c322, %c0_262] : memref<512x128xf32, #tpu.memory_space<vmem>>, vector<1x128xf32>
    %c1_263 = arith.constant 1 : index
    %c1920_264 = arith.constant 1920 : index
    %232 = vector.load %arg15[%c1_263, %c1920_264] : memref<8x6272xf32, #tpu.memory_space<vmem>>, vector<1x128xf32>
    tpu.vector_store %arg15[%c1_263, %c1920_264], %231 {strides = array<i32>} : memref<8x6272xf32, #tpu.memory_space<vmem>>, vector<1x128xf32>,
    %c324 = arith.constant 324 : index
    %c0_265 = arith.constant 0 : index
    %233 = vector.load %arg14[%c324, %c0_265] : memref<512x128xf32, #tpu.memory_space<vmem>>, vector<1x128xf32>
    %c1_266 = arith.constant 1 : index
    %c2048_267 = arith.constant 2048 : index
    %234 = vector.load %arg15[%c1_266, %c2048_267] : memref<8x6272xf32, #tpu.memory_space<vmem>>, vector<1x128xf32>
    tpu.vector_store %arg15[%c1_266, %c2048_267], %233 {strides = array<i32>} : memref<8x6272xf32, #tpu.memory_space<vmem>>, vector<1x128xf32>,
    %c326 = arith.constant 326 : index
    %c0_268 = arith.constant 0 : index
    %235 = vector.load %arg14[%c326, %c0_268] : memref<512x128xf32, #tpu.memory_space<vmem>>, vector<1x128xf32>
    %c1_269 = arith.constant 1 : index
    %c2176_270 = arith.constant 2176 : index
    %236 = vector.load %arg15[%c1_269, %c2176_270] : memref<8x6272xf32, #tpu.memory_space<vmem>>, vector<1x128xf32>
    tpu.vector_store %arg15[%c1_269, %c2176_270], %235 {strides = array<i32>} : memref<8x6272xf32, #tpu.memory_space<vmem>>, vector<1x128xf32>,
    %c328 = arith.constant 328 : index
    %c0_271 = arith.constant 0 : index
    %237 = vector.load %arg14[%c328, %c0_271] : memref<512x128xf32, #tpu.memory_space<vmem>>, vector<1x128xf32>
    %c1_272 = arith.constant 1 : index
    %c2304_273 = arith.constant 2304 : index
    %238 = vector.load %arg15[%c1_272, %c2304_273] : memref<8x6272xf32, #tpu.memory_space<vmem>>, vector<1x128xf32>
    tpu.vector_store %arg15[%c1_272, %c2304_273], %237 {strides = array<i32>} : memref<8x6272xf32, #tpu.memory_space<vmem>>, vector<1x128xf32>,
    %c330 = arith.constant 330 : index
    %c0_274 = arith.constant 0 : index
    %239 = vector.load %arg14[%c330, %c0_274] : memref<512x128xf32, #tpu.memory_space<vmem>>, vector<1x128xf32>
    %c1_275 = arith.constant 1 : index
    %c2432_276 = arith.constant 2432 : index
    %240 = vector.load %arg15[%c1_275, %c2432_276] : memref<8x6272xf32, #tpu.memory_space<vmem>>, vector<1x128xf32>
    tpu.vector_store %arg15[%c1_275, %c2432_276], %239 {strides = array<i32>} : memref<8x6272xf32, #tpu.memory_space<vmem>>, vector<1x128xf32>,
    %c332 = arith.constant 332 : index
    %c0_277 = arith.constant 0 : index
    %241 = vector.load %arg14[%c332, %c0_277] : memref<512x128xf32, #tpu.memory_space<vmem>>, vector<1x128xf32>
    %c1_278 = arith.constant 1 : index
    %c2560_279 = arith.constant 2560 : index
    %242 = vector.load %arg15[%c1_278, %c2560_279] : memref<8x6272xf32, #tpu.memory_space<vmem>>, vector<1x128xf32>
    tpu.vector_store %arg15[%c1_278, %c2560_279], %241 {strides = array<i32>} : memref<8x6272xf32, #tpu.memory_space<vmem>>, vector<1x128xf32>,
    %c352 = arith.constant 352 : index
    %c0_280 = arith.constant 0 : index
    %243 = vector.load %arg14[%c352, %c0_280] : memref<512x128xf32, #tpu.memory_space<vmem>>, vector<1x128xf32>
    %c1_281 = arith.constant 1 : index
    %c2688_282 = arith.constant 2688 : index
    %244 = vector.load %arg15[%c1_281, %c2688_282] : memref<8x6272xf32, #tpu.memory_space<vmem>>, vector<1x128xf32>
    tpu.vector_store %arg15[%c1_281, %c2688_282], %243 {strides = array<i32>} : memref<8x6272xf32, #tpu.memory_space<vmem>>, vector<1x128xf32>,
    %c354 = arith.constant 354 : index
    %c0_283 = arith.constant 0 : index
    %245 = vector.load %arg14[%c354, %c0_283] : memref<512x128xf32, #tpu.memory_space<vmem>>, vector<1x128xf32>
    %c1_284 = arith.constant 1 : index
    %c2816_285 = arith.constant 2816 : index
    %246 = vector.load %arg15[%c1_284, %c2816_285] : memref<8x6272xf32, #tpu.memory_space<vmem>>, vector<1x128xf32>
    tpu.vector_store %arg15[%c1_284, %c2816_285], %245 {strides = array<i32>} : memref<8x6272xf32, #tpu.memory_space<vmem>>, vector<1x128xf32>,
    %c356 = arith.constant 356 : index
    %c0_286 = arith.constant 0 : index
    %247 = vector.load %arg14[%c356, %c0_286] : memref<512x128xf32, #tpu.memory_space<vmem>>, vector<1x128xf32>
    %c1_287 = arith.constant 1 : index
    %c2944_288 = arith.constant 2944 : index
    %248 = vector.load %arg15[%c1_287, %c2944_288] : memref<8x6272xf32, #tpu.memory_space<vmem>>, vector<1x128xf32>
    tpu.vector_store %arg15[%c1_287, %c2944_288], %247 {strides = array<i32>} : memref<8x6272xf32, #tpu.memory_space<vmem>>, vector<1x128xf32>,
    %c358 = arith.constant 358 : index
    %c0_289 = arith.constant 0 : index
    %249 = vector.load %arg14[%c358, %c0_289] : memref<512x128xf32, #tpu.memory_space<vmem>>, vector<1x128xf32>
    %c1_290 = arith.constant 1 : index
    %c3072_291 = arith.constant 3072 : index
    %250 = vector.load %arg15[%c1_290, %c3072_291] : memref<8x6272xf32, #tpu.memory_space<vmem>>, vector<1x128xf32>
    tpu.vector_store %arg15[%c1_290, %c3072_291], %249 {strides = array<i32>} : memref<8x6272xf32, #tpu.memory_space<vmem>>, vector<1x128xf32>,
    %c360 = arith.constant 360 : index
    %c0_292 = arith.constant 0 : index
    %251 = vector.load %arg14[%c360, %c0_292] : memref<512x128xf32, #tpu.memory_space<vmem>>, vector<1x128xf32>
    %c1_293 = arith.constant 1 : index
    %c3200_294 = arith.constant 3200 : index
    %252 = vector.load %arg15[%c1_293, %c3200_294] : memref<8x6272xf32, #tpu.memory_space<vmem>>, vector<1x128xf32>
    tpu.vector_store %arg15[%c1_293, %c3200_294], %251 {strides = array<i32>} : memref<8x6272xf32, #tpu.memory_space<vmem>>, vector<1x128xf32>,
    %c362 = arith.constant 362 : index
    %c0_295 = arith.constant 0 : index
    %253 = vector.load %arg14[%c362, %c0_295] : memref<512x128xf32, #tpu.memory_space<vmem>>, vector<1x128xf32>
    %c1_296 = arith.constant 1 : index
    %c3328_297 = arith.constant 3328 : index
    %254 = vector.load %arg15[%c1_296, %c3328_297] : memref<8x6272xf32, #tpu.memory_space<vmem>>, vector<1x128xf32>
    tpu.vector_store %arg15[%c1_296, %c3328_297], %253 {strides = array<i32>} : memref<8x6272xf32, #tpu.memory_space<vmem>>, vector<1x128xf32>,
    %c364 = arith.constant 364 : index
    %c0_298 = arith.constant 0 : index
    %255 = vector.load %arg14[%c364, %c0_298] : memref<512x128xf32, #tpu.memory_space<vmem>>, vector<1x128xf32>
    %c1_299 = arith.constant 1 : index
    %c3456_300 = arith.constant 3456 : index
    %256 = vector.load %arg15[%c1_299, %c3456_300] : memref<8x6272xf32, #tpu.memory_space<vmem>>, vector<1x128xf32>
    tpu.vector_store %arg15[%c1_299, %c3456_300], %255 {strides = array<i32>} : memref<8x6272xf32, #tpu.memory_space<vmem>>, vector<1x128xf32>,
    %c384_301 = arith.constant 384 : index
    %c0_302 = arith.constant 0 : index
    %257 = vector.load %arg14[%c384_301, %c0_302] : memref<512x128xf32, #tpu.memory_space<vmem>>, vector<1x128xf32>
    %c1_303 = arith.constant 1 : index
    %c3584_304 = arith.constant 3584 : index
    %258 = vector.load %arg15[%c1_303, %c3584_304] : memref<8x6272xf32, #tpu.memory_space<vmem>>, vector<1x128xf32>
    tpu.vector_store %arg15[%c1_303, %c3584_304], %257 {strides = array<i32>} : memref<8x6272xf32, #tpu.memory_space<vmem>>, vector<1x128xf32>,
    %c386 = arith.constant 386 : index
    %c0_305 = arith.constant 0 : index
    %259 = vector.load %arg14[%c386, %c0_305] : memref<512x128xf32, #tpu.memory_space<vmem>>, vector<1x128xf32>
    %c1_306 = arith.constant 1 : index
    %c3712_307 = arith.constant 3712 : index
    %260 = vector.load %arg15[%c1_306, %c3712_307] : memref<8x6272xf32, #tpu.memory_space<vmem>>, vector<1x128xf32>
    tpu.vector_store %arg15[%c1_306, %c3712_307], %259 {strides = array<i32>} : memref<8x6272xf32, #tpu.memory_space<vmem>>, vector<1x128xf32>,
    %c388 = arith.constant 388 : index
    %c0_308 = arith.constant 0 : index
    %261 = vector.load %arg14[%c388, %c0_308] : memref<512x128xf32, #tpu.memory_space<vmem>>, vector<1x128xf32>
    %c1_309 = arith.constant 1 : index
    %c3840_310 = arith.constant 3840 : index
    %262 = vector.load %arg15[%c1_309, %c3840_310] : memref<8x6272xf32, #tpu.memory_space<vmem>>, vector<1x128xf32>
    tpu.vector_store %arg15[%c1_309, %c3840_310], %261 {strides = array<i32>} : memref<8x6272xf32, #tpu.memory_space<vmem>>, vector<1x128xf32>,
    %c390 = arith.constant 390 : index
    %c0_311 = arith.constant 0 : index
    %263 = vector.load %arg14[%c390, %c0_311] : memref<512x128xf32, #tpu.memory_space<vmem>>, vector<1x128xf32>
    %c1_312 = arith.constant 1 : index
    %c3968_313 = arith.constant 3968 : index
    %264 = vector.load %arg15[%c1_312, %c3968_313] : memref<8x6272xf32, #tpu.memory_space<vmem>>, vector<1x128xf32>
    tpu.vector_store %arg15[%c1_312, %c3968_313], %263 {strides = array<i32>} : memref<8x6272xf32, #tpu.memory_space<vmem>>, vector<1x128xf32>,
    %c392 = arith.constant 392 : index
    %c0_314 = arith.constant 0 : index
    %265 = vector.load %arg14[%c392, %c0_314] : memref<512x128xf32, #tpu.memory_space<vmem>>, vector<1x128xf32>
    %c1_315 = arith.constant 1 : index
    %c4096_316 = arith.constant 4096 : index
    %266 = vector.load %arg15[%c1_315, %c4096_316] : memref<8x6272xf32, #tpu.memory_space<vmem>>, vector<1x128xf32>
    tpu.vector_store %arg15[%c1_315, %c4096_316], %265 {strides = array<i32>} : memref<8x6272xf32, #tpu.memory_space<vmem>>, vector<1x128xf32>,
    %c394 = arith.constant 394 : index
    %c0_317 = arith.constant 0 : index
    %267 = vector.load %arg14[%c394, %c0_317] : memref<512x128xf32, #tpu.memory_space<vmem>>, vector<1x128xf32>
    %c1_318 = arith.constant 1 : index
    %c4224_319 = arith.constant 4224 : index
    %268 = vector.load %arg15[%c1_318, %c4224_319] : memref<8x6272xf32, #tpu.memory_space<vmem>>, vector<1x128xf32>
    tpu.vector_store %arg15[%c1_318, %c4224_319], %267 {strides = array<i32>} : memref<8x6272xf32, #tpu.memory_space<vmem>>, vector<1x128xf32>,
    %c396 = arith.constant 396 : index
    %c0_320 = arith.constant 0 : index
    %269 = vector.load %arg14[%c396, %c0_320] : memref<512x128xf32, #tpu.memory_space<vmem>>, vector<1x128xf32>
    %c1_321 = arith.constant 1 : index
    %c4352_322 = arith.constant 4352 : index
    %270 = vector.load %arg15[%c1_321, %c4352_322] : memref<8x6272xf32, #tpu.memory_space<vmem>>, vector<1x128xf32>
    tpu.vector_store %arg15[%c1_321, %c4352_322], %269 {strides = array<i32>} : memref<8x6272xf32, #tpu.memory_space<vmem>>, vector<1x128xf32>,
    %c416 = arith.constant 416 : index
    %c0_323 = arith.constant 0 : index
    %271 = vector.load %arg14[%c416, %c0_323] : memref<512x128xf32, #tpu.memory_space<vmem>>, vector<1x128xf32>
    %c1_324 = arith.constant 1 : index
    %c4480_325 = arith.constant 4480 : index
    %272 = vector.load %arg15[%c1_324, %c4480_325] : memref<8x6272xf32, #tpu.memory_space<vmem>>, vector<1x128xf32>
    tpu.vector_store %arg15[%c1_324, %c4480_325], %271 {strides = array<i32>} : memref<8x6272xf32, #tpu.memory_space<vmem>>, vector<1x128xf32>,
    %c418 = arith.constant 418 : index
    %c0_326 = arith.constant 0 : index
    %273 = vector.load %arg14[%c418, %c0_326] : memref<512x128xf32, #tpu.memory_space<vmem>>, vector<1x128xf32>
    %c1_327 = arith.constant 1 : index
    %c4608_328 = arith.constant 4608 : index
    %274 = vector.load %arg15[%c1_327, %c4608_328] : memref<8x6272xf32, #tpu.memory_space<vmem>>, vector<1x128xf32>
    tpu.vector_store %arg15[%c1_327, %c4608_328], %273 {strides = array<i32>} : memref<8x6272xf32, #tpu.memory_space<vmem>>, vector<1x128xf32>,
    %c420 = arith.constant 420 : index
    %c0_329 = arith.constant 0 : index
    %275 = vector.load %arg14[%c420, %c0_329] : memref<512x128xf32, #tpu.memory_space<vmem>>, vector<1x128xf32>
    %c1_330 = arith.constant 1 : index
    %c4736_331 = arith.constant 4736 : index
    %276 = vector.load %arg15[%c1_330, %c4736_331] : memref<8x6272xf32, #tpu.memory_space<vmem>>, vector<1x128xf32>
    tpu.vector_store %arg15[%c1_330, %c4736_331], %275 {strides = array<i32>} : memref<8x6272xf32, #tpu.memory_space<vmem>>, vector<1x128xf32>,
    %c422 = arith.constant 422 : index
    %c0_332 = arith.constant 0 : index
    %277 = vector.load %arg14[%c422, %c0_332] : memref<512x128xf32, #tpu.memory_space<vmem>>, vector<1x128xf32>
    %c1_333 = arith.constant 1 : index
    %c4864_334 = arith.constant 4864 : index
    %278 = vector.load %arg15[%c1_333, %c4864_334] : memref<8x6272xf32, #tpu.memory_space<vmem>>, vector<1x128xf32>
    tpu.vector_store %arg15[%c1_333, %c4864_334], %277 {strides = array<i32>} : memref<8x6272xf32, #tpu.memory_space<vmem>>, vector<1x128xf32>,
    %c424 = arith.constant 424 : index
    %c0_335 = arith.constant 0 : index
    %279 = vector.load %arg14[%c424, %c0_335] : memref<512x128xf32, #tpu.memory_space<vmem>>, vector<1x128xf32>
    %c1_336 = arith.constant 1 : index
    %c4992_337 = arith.constant 4992 : index
    %280 = vector.load %arg15[%c1_336, %c4992_337] : memref<8x6272xf32, #tpu.memory_space<vmem>>, vector<1x128xf32>
    tpu.vector_store %arg15[%c1_336, %c4992_337], %279 {strides = array<i32>} : memref<8x6272xf32, #tpu.memory_space<vmem>>, vector<1x128xf32>,
    %c426 = arith.constant 426 : index
    %c0_338 = arith.constant 0 : index
    %281 = vector.load %arg14[%c426, %c0_338] : memref<512x128xf32, #tpu.memory_space<vmem>>, vector<1x128xf32>
    %c1_339 = arith.constant 1 : index
    %c5120_340 = arith.constant 5120 : index
    %282 = vector.load %arg15[%c1_339, %c5120_340] : memref<8x6272xf32, #tpu.memory_space<vmem>>, vector<1x128xf32>
    tpu.vector_store %arg15[%c1_339, %c5120_340], %281 {strides = array<i32>} : memref<8x6272xf32, #tpu.memory_space<vmem>>, vector<1x128xf32>,
    %c428 = arith.constant 428 : index
    %c0_341 = arith.constant 0 : index
    %283 = vector.load %arg14[%c428, %c0_341] : memref<512x128xf32, #tpu.memory_space<vmem>>, vector<1x128xf32>
    %c1_342 = arith.constant 1 : index
    %c5248_343 = arith.constant 5248 : index
    %284 = vector.load %arg15[%c1_342, %c5248_343] : memref<8x6272xf32, #tpu.memory_space<vmem>>, vector<1x128xf32>
    tpu.vector_store %arg15[%c1_342, %c5248_343], %283 {strides = array<i32>} : memref<8x6272xf32, #tpu.memory_space<vmem>>, vector<1x128xf32>,
    %c448 = arith.constant 448 : index
    %c0_344 = arith.constant 0 : index
    %285 = vector.load %arg14[%c448, %c0_344] : memref<512x128xf32, #tpu.memory_space<vmem>>, vector<1x128xf32>
    %c1_345 = arith.constant 1 : index
    %c5376_346 = arith.constant 5376 : index
    %286 = vector.load %arg15[%c1_345, %c5376_346] : memref<8x6272xf32, #tpu.memory_space<vmem>>, vector<1x128xf32>
    tpu.vector_store %arg15[%c1_345, %c5376_346], %285 {strides = array<i32>} : memref<8x6272xf32, #tpu.memory_space<vmem>>, vector<1x128xf32>,
    %c450 = arith.constant 450 : index
    %c0_347 = arith.constant 0 : index
    %287 = vector.load %arg14[%c450, %c0_347] : memref<512x128xf32, #tpu.memory_space<vmem>>, vector<1x128xf32>
    %c1_348 = arith.constant 1 : index
    %c5504_349 = arith.constant 5504 : index
    %288 = vector.load %arg15[%c1_348, %c5504_349] : memref<8x6272xf32, #tpu.memory_space<vmem>>, vector<1x128xf32>
    tpu.vector_store %arg15[%c1_348, %c5504_349], %287 {strides = array<i32>} : memref<8x6272xf32, #tpu.memory_space<vmem>>, vector<1x128xf32>,
    %c452 = arith.constant 452 : index
    %c0_350 = arith.constant 0 : index
    %289 = vector.load %arg14[%c452, %c0_350] : memref<512x128xf32, #tpu.memory_space<vmem>>, vector<1x128xf32>
    %c1_351 = arith.constant 1 : index
    %c5632_352 = arith.constant 5632 : index
    %290 = vector.load %arg15[%c1_351, %c5632_352] : memref<8x6272xf32, #tpu.memory_space<vmem>>, vector<1x128xf32>
    tpu.vector_store %arg15[%c1_351, %c5632_352], %289 {strides = array<i32>} : memref<8x6272xf32, #tpu.memory_space<vmem>>, vector<1x128xf32>,
    %c454 = arith.constant 454 : index
    %c0_353 = arith.constant 0 : index
    %291 = vector.load %arg14[%c454, %c0_353] : memref<512x128xf32, #tpu.memory_space<vmem>>, vector<1x128xf32>
    %c1_354 = arith.constant 1 : index
    %c5760_355 = arith.constant 5760 : index
    %292 = vector.load %arg15[%c1_354, %c5760_355] : memref<8x6272xf32, #tpu.memory_space<vmem>>, vector<1x128xf32>
    tpu.vector_store %arg15[%c1_354, %c5760_355], %291 {strides = array<i32>} : memref<8x6272xf32, #tpu.memory_space<vmem>>, vector<1x128xf32>,
    %c456 = arith.constant 456 : index
    %c0_356 = arith.constant 0 : index
    %293 = vector.load %arg14[%c456, %c0_356] : memref<512x128xf32, #tpu.memory_space<vmem>>, vector<1x128xf32>
    %c1_357 = arith.constant 1 : index
    %c5888_358 = arith.constant 5888 : index
    %294 = vector.load %arg15[%c1_357, %c5888_358] : memref<8x6272xf32, #tpu.memory_space<vmem>>, vector<1x128xf32>
    tpu.vector_store %arg15[%c1_357, %c5888_358], %293 {strides = array<i32>} : memref<8x6272xf32, #tpu.memory_space<vmem>>, vector<1x128xf32>,
    %c458 = arith.constant 458 : index
    %c0_359 = arith.constant 0 : index
    %295 = vector.load %arg14[%c458, %c0_359] : memref<512x128xf32, #tpu.memory_space<vmem>>, vector<1x128xf32>
    %c1_360 = arith.constant 1 : index
    %c6016_361 = arith.constant 6016 : index
    %296 = vector.load %arg15[%c1_360, %c6016_361] : memref<8x6272xf32, #tpu.memory_space<vmem>>, vector<1x128xf32>
    tpu.vector_store %arg15[%c1_360, %c6016_361], %295 {strides = array<i32>} : memref<8x6272xf32, #tpu.memory_space<vmem>>, vector<1x128xf32>,
    %c460 = arith.constant 460 : index
    %c0_362 = arith.constant 0 : index
    %297 = vector.load %arg14[%c460, %c0_362] : memref<512x128xf32, #tpu.memory_space<vmem>>, vector<1x128xf32>
    %c1_363 = arith.constant 1 : index
    %c6144_364 = arith.constant 6144 : index
    %298 = vector.load %arg15[%c1_363, %c6144_364] : memref<8x6272xf32, #tpu.memory_space<vmem>>, vector<1x128xf32>
    tpu.vector_store %arg15[%c1_363, %c6144_364], %297 {strides = array<i32>} : memref<8x6272xf32, #tpu.memory_space<vmem>>, vector<1x128xf32>,
    %c0_365 = arith.constant 0 : index
    %c0_366 = arith.constant 0 : index
    %299 = vector.load %arg15[%c0_365, %c0_366] : memref<8x6272xf32, #tpu.memory_space<vmem>>, vector<8x6272xf32>
    %300 = arith.truncf %299 : vector<8x6272xf32> to vector<8x6272xbf16>
    %c0_367 = arith.constant 0 : index
    %c0_368 = arith.constant 0 : index
    %301 = vector.load %arg7[%c0_367, %c0_368] : memref<6272x128xbf16, #tpu.memory_space<vmem>>, vector<6272x128xbf16>
    %cst_369 = arith.constant dense<0.000000e+00> : vector<8x128xf32>
    %302 = tpu.matmul %300, %301, %cst_369 {dimension_numbers = #tpu.dot_dimension_numbers<[1], [0], [0], [1], [0, 0, 1, 1], [], []>} : vector<8x6272xbf16>, vector<6272x128xbf16>, vector<8x128xf32> -> vector<8x128xf32>
    %c0_370 = arith.constant 0 : index
    %c0_371 = arith.constant 0 : index
    %303 = vector.load %arg8[%c0_370, %c0_371] : memref<1x128xf32, #tpu.memory_space<vmem>>, vector<1x128xf32>
    %304 = vector.broadcast %303 : vector<1x128xf32> to vector<8x128xf32>
    %305 = arith.addf %302, %304 : vector<8x128xf32>
    %cst_372 = arith.constant 0.000000e+00 : f32
    %306 = vector.broadcast %cst_372 : f32 to vector<8x128xf32>
    %307 = arith.maximumf %305, %306 : vector<8x128xf32>
    %308 = arith.truncf %307 : vector<8x128xf32> to vector<8x128xbf16>
    %c0_373 = arith.constant 0 : index
    %c0_374 = arith.constant 0 : index
    %309 = vector.load %arg9[%c0_373, %c0_374] : memref<128x128xbf16, #tpu.memory_space<vmem>>, vector<128x128xbf16>
    %cst_375 = arith.constant dense<0.000000e+00> : vector<8x128xf32>
    %310 = tpu.matmul %308, %309, %cst_375 {dimension_numbers = #tpu.dot_dimension_numbers<[1], [0], [0], [1], [0, 0, 1, 1], [], []>} : vector<8x128xbf16>, vector<128x128xbf16>, vector<8x128xf32> -> vector<8x128xf32>
    %c0_376 = arith.constant 0 : index
    %c0_377 = arith.constant 0 : index
    %311 = vector.load %arg10[%c0_376, %c0_377] : memref<1x128xf32, #tpu.memory_space<vmem>>, vector<1x128xf32>
    %312 = vector.broadcast %311 : vector<1x128xf32> to vector<8x128xf32>
    %313 = arith.addf %310, %312 : vector<8x128xf32>
    %c0_378 = arith.constant 0 : index
    %c0_379 = arith.constant 0 : index
    %314 = vector.load %arg11[%c0_378, %c0_379] : memref<8x128xf32, #tpu.memory_space<vmem>>, vector<8x128xf32>
    tpu.vector_store %arg11[%c0_378, %c0_379], %313 {strides = array<i32>} : memref<8x128xf32, #tpu.memory_space<vmem>>, vector<8x128xf32>,
    return
  }
  func.func @transform_0(%arg0: i32) -> (i32, i32) {
    %c0_i32 = arith.constant 0 : i32
    %c0_i32_0 = arith.constant 0 : i32
    %c0_i32_1 = arith.constant 0 : i32
    return %c0_i32, %c0_i32_0 : i32, i32
  }
  func.func @transform_1(%arg0: i32) -> (i32, i32) {
    %c0_i32 = arith.constant 0 : i32
    %c0_i32_0 = arith.constant 0 : i32
    %c0_i32_1 = arith.constant 0 : i32
    return %c0_i32, %c0_i32_0 : i32, i32
  }
  func.func @transform_2(%arg0: i32) -> (i32, i32) {
    %c0_i32 = arith.constant 0 : i32
    %c0_i32_0 = arith.constant 0 : i32
    %c0_i32_1 = arith.constant 0 : i32
    return %c0_i32, %c0_i32_0 : i32, i32
  }
  func.func @transform_3(%arg0: i32) -> (i32, i32) {
    %c0_i32 = arith.constant 0 : i32
    %c0_i32_0 = arith.constant 0 : i32
    %c0_i32_1 = arith.constant 0 : i32
    return %c0_i32, %c0_i32_0 : i32, i32
  }
  func.func @transform_4(%arg0: i32) -> (i32, i32, i32) {
    %c0_i32 = arith.constant 0 : i32
    %c0_i32_0 = arith.constant 0 : i32
    %c0_i32_1 = arith.constant 0 : i32
    %c0_i32_2 = arith.constant 0 : i32
    return %c0_i32, %c0_i32_0, %c0_i32_1 : i32, i32, i32
  }
  func.func @transform_5(%arg0: i32) -> (i32, i32) {
    %c0_i32 = arith.constant 0 : i32
    %c0_i32_0 = arith.constant 0 : i32
    %c0_i32_1 = arith.constant 0 : i32
    return %c0_i32, %c0_i32_0 : i32, i32
  }
  func.func @transform_6(%arg0: i32) -> (i32, i32) {
    %c0_i32 = arith.constant 0 : i32
    %c0_i32_0 = arith.constant 0 : i32
    %c0_i32_1 = arith.constant 0 : i32
    return %c0_i32, %c0_i32_0 : i32, i32
  }
  func.func @transform_7(%arg0: i32) -> (i32, i32) {
    %c0_i32 = arith.constant 0 : i32
    %c0_i32_0 = arith.constant 0 : i32
    %c0_i32_1 = arith.constant 0 : i32
    return %c0_i32, %c0_i32_0 : i32, i32
  }
  func.func @transform_8(%arg0: i32) -> (i32, i32) {
    %c0_i32 = arith.constant 0 : i32
    %c0_i32_0 = arith.constant 0 : i32
    %c0_i32_1 = arith.constant 0 : i32
    return %c0_i32, %c0_i32_0 : i32, i32
  }
  func.func @transform_9(%arg0: i32) -> (i32, i32) {
    %c0_i32 = arith.constant 0 : i32
    %c0_i32_0 = arith.constant 0 : i32
    %c0_i32_1 = arith.constant 0 : i32
    return %c0_i32, %c0_i32_0 : i32, i32
  }
  func.func @transform_10(%arg0: i32) -> (i32, i32) {
    %c0_i32 = arith.constant 0 : i32
    %c0_i32_0 = arith.constant 0 : i32
    %c0_i32_1 = arith.constant 0 : i32
    return %c0_i32, %c0_i32_0 : i32, i32
  }
}

</mosaic_0001>

<bundles_post_ra>
// kernel: cnn_module_forward.1
= control target key start
LH: loop header
LB: loop body
LE: loop exit
PB: predicated region body
PF: predicated region fallthrough
CT: control target
= control target key end

     0   :  { %v13537_v0 = vmov 0   ;;  %s16290_s1 = inlined_call_operand.vmem [shape: f32[560,1], index: 1, kind: input, shape index: {}]   ;;  %s16291_s2 = inlined_call_operand.vmem [shape: bf16[128,128], index: 2, kind: input, shape index: {}]   ;;  %s16292_s0 = inlined_call_operand.vmem [shape: bf16[560,128], index: 0, kind: input, shape index: {}]   ;;  %s16293_s3 = inlined_call_operand.vmem [shape: f32[1,128], index: 3, kind: input, shape index: {}]   ;;  %s16294_s4 = inlined_call_operand.vmem [shape: bf16[9,128,128], index: 4, kind: input, shape index: {}]   ;;  %s16295_s5 = inlined_call_operand.vmem [shape: f32[1,128], index: 5, kind: input, shape index: {}]   ;;  %s16296_s6 = inlined_call_operand.vmem [shape: bf16[6272,128], index: 6, kind: input, shape index: {}]   ;;  %s16297_s7 = inlined_call_operand.vmem [shape: f32[1,128], index: 7, kind: input, shape index: {}]   ;;  %s16298_s9 = inlined_call_operand.vmem [shape: f32[1,128], index: 9, kind: input, shape index: {}]   ;;  %s16299_s8 = inlined_call_operand.vmem [shape: bf16[128,128], index: 8, kind: input, shape index: {}]   ;;  %s16300_s10 = inlined_call_operand.vmem [shape: f32[8,128], index: 10, kind: output, shape index: {}]  }
   0x1   :  { %13524 = vset.pattern.permute.xlu2 %v13537_v0  ;;  %13523 = vset.pattern.permute.xlu1 %v13537_v0  ;;  %v641_v1 = vld [vmem:[%s16290_s1 + $0x20] sm:$0xff]  ;;  %v639_v2 = vld [vmem:[%s16290_s1 + $0x10] sm:$0xff]  ;;  %v13047_v4 = vld [vmem:[%s16291_s2 + $0x38] sm:$0xff] }
   0x2   :  { %v637_v3 = vld [vmem:[%s16290_s1] sm:$0xff]  ;;  %13522 = vset.pattern.permute.xlu0 %v13537_v0  ;;  %729 = vperm.xlu2 %13524, %v641_v1   ;;  %v13046_v5 = vld [vmem:[%s16291_s2 + $0x30] sm:$0xff]  ;;  %v642_v6 = vld [vmem:[%s16290_s1 + $0x28] sm:$0xff] }
   0x3   :  { %719 = vperm.xlu1 %13523, %v639_v2   ;;  %709 = vperm.xlu0 %13522, %v637_v3   ;;  %v640_v7 = vld [vmem:[%s16290_s1 + $0x18] sm:$0xff]  ;;  %v638_v8 = vld [vmem:[%s16290_s1 + $0x8] sm:$0xff]  ;;  %v13044_v10 = vld [vmem:[%s16291_s2 + $0x20] sm:$0xff] }
   0x4   :  { %383 = vmatpush.bf16.msra.mxu0 %v13047_v4  ;;  %v13045_v9 = vld [vmem:[%s16291_s2 + $0x28] sm:$0xff]  ;;  %v645_v11 = vld [vmem:[%s16290_s1 + $0x40] sm:$0xff]  ;;  %v644_v12 = vld [vmem:[%s16290_s1 + $0x38] sm:$0xff] }
   0x5   :  { %v643_v13 = vld [vmem:[%s16290_s1 + $0x30] sm:$0xff]  ;;  %v13043_v14 = vld [vmem:[%s16291_s2 + $0x18] sm:$0xff]  ;;  %v646_v18 = vld [vmem:[%s16290_s1 + $0x48] sm:$0xff] }
   0x6   :  { %v13042_v15 = vld [vmem:[%s16291_s2 + $0x10] sm:$0xff]  ;;  %v648_v16 = vld [vmem:[%s16290_s1 + $0x58] sm:$0xff]  ;;  %v13041_v19 = vld [vmem:[%s16291_s2 + $0x8] sm:$0xff] }
   0x7   :  { %v647_v17 = vld [vmem:[%s16290_s1 + $0x50] sm:$0xff]  ;;  %v13040_v20 = vld [vmem:[%s16291_s2] sm:$0xff]  ;;  %v650_v22 = vld [vmem:[%s16290_s1 + $0x68] sm:$0xff] }
   0x8   :  { %384 = vmatpush.bf16.msra.mxu0 %v13046_v5  ;;  %v651_v21 = vld [vmem:[%s16290_s1 + $0x70] sm:$0xff]  ;;  %v649_v23 = vld [vmem:[%s16290_s1 + $0x60] sm:$0xff]  ;;  %v654_v25 = vld [vmem:[%s16290_s1 + $0x88] sm:$0xff] }
   0x9   :  { %v13005_v24 = vld [vmem:[%s16292_s0] sm:$0xff]  ;;  %v652_v27 = vld [vmem:[%s16290_s1 + $0x78] sm:$0xff]  ;;  %v655_v30 = vld [vmem:[%s16290_s1 + $0x90] sm:$0xff] }
   0xa   :  { %734 = vperm.xlu2 %13524, %v642_v6   ;;  %v653_v26 = vld [vmem:[%s16290_s1 + $0x80] sm:$0xff]  ;;  %v656_v29 = vld [vmem:[%s16290_s1 + $0x98] sm:$0xff]  ;;  %v13006_v31 = vld [vmem:[%s16292_s0 + $0x8] sm:$0xff] }
   0xb   :  { %724 = vperm.xlu1 %13523, %v640_v7   ;;  %714 = vperm.xlu0 %13522, %v638_v8   ;;  %v657_v28 = vld [vmem:[%s16290_s1 + $0xa0] sm:$0xff]  ;;  %v660_v32 = vld [vmem:[%s16290_s1 + $0xb8] sm:$0xff]  ;;  %v659_v33 = vld [vmem:[%s16290_s1 + $0xb0] sm:$0xff] }
   0xc   :  { %385 = vmatpush.bf16.msra.mxu0 %v13045_v9  ;;  %v658_v34 = vld [vmem:[%s16290_s1 + $0xa8] sm:$0xff]  ;;  %v663_v35 = vld [vmem:[%s16290_s1 + $0xd0] sm:$0xff]  ;;  %v661_v37 = vld [vmem:[%s16290_s1 + $0xc0] sm:$0xff] }
   0xd   :  { %v662_v36 = vld [vmem:[%s16290_s1 + $0xc8] sm:$0xff]  ;;  %v13007_v38 = vld [vmem:[%s16292_s0 + $0x10] sm:$0xff]  ;;  %v665_v40 = vld [vmem:[%s16290_s1 + $0xe0] sm:$0xff] }
   0xe   :  { %v666_v39 = vld [vmem:[%s16290_s1 + $0xe8] sm:$0xff]  ;;  %v664_v41 = vld [vmem:[%s16290_s1 + $0xd8] sm:$0xff]  ;;  %v669_v42 = vld [vmem:[%s16290_s1 + $0x100] sm:$0xff] }
   0xf   :  { %v668_v43 = vld [vmem:[%s16290_s1 + $0xf8] sm:$0xff]  ;;  %v667_v44 = vld [vmem:[%s16290_s1 + $0xf0] sm:$0xff]  ;;  %v670_v48 = vld [vmem:[%s16290_s1 + $0x108] sm:$0xff] }
  0x10   :  { %386 = vmatpush.bf16.msra.mxu0 %v13044_v10  ;;  %v13008_v45 = vld [vmem:[%s16292_s0 + $0x18] sm:$0xff]  ;;  %v671_v47 = vld [vmem:[%s16290_s1 + $0x110] sm:$0xff]  ;;  %v674_v50 = vld [vmem:[%s16290_s1 + $0x128] sm:$0xff] }
  0x11   :  { %v672_v46 = vld [vmem:[%s16290_s1 + $0x118] sm:$0xff]  ;;  %v675_v49 = vld [vmem:[%s16290_s1 + $0x130] sm:$0xff]  ;;  %v673_v51 = vld [vmem:[%s16290_s1 + $0x120] sm:$0xff] }
  0x12   :  { %749 = vperm.xlu2 %13524, %v645_v11   ;;  %v13009_v52 = vld [vmem:[%s16292_s0 + $0x20] sm:$0xff]  ;;  %v678_v53 = vld [vmem:[%s16290_s1 + $0x148] sm:$0xff]  ;;  %v676_v55 = vld [vmem:[%s16290_s1 + $0x138] sm:$0xff] }
  0x13   :  { %744 = vperm.xlu1 %13523, %v644_v12   ;;  %739 = vperm.xlu0 %13522, %v643_v13   ;;  %v677_v54 = vld [vmem:[%s16290_s1 + $0x140] sm:$0xff]  ;;  %v680_v57 = vld [vmem:[%s16290_s1 + $0x158] sm:$0xff]  ;;  %v679_v58 = vld [vmem:[%s16290_s1 + $0x150] sm:$0xff] }
  0x14   :  { %387 = vmatpush.bf16.msra.mxu0 %v13043_v14  ;;  %v681_v56 = vld [vmem:[%s16290_s1 + $0x160] sm:$0xff]  ;;  %v13010_v59 = vld [vmem:[%s16292_s0 + $0x28] sm:$0xff]  ;;  %v13055_v60 = vld [vmem:[%s16294_s4 + $0x38] sm:$0xff] }
  0x15   :  { %1488 = vmatpush.bf16.msra.mxu1 %v13055_v60  ;;  %v13054_v61 = vld [vmem:[%s16294_s4 + $0x30] sm:$0xff]  ;;  %v684_v62 = vld [vmem:[%s16290_s1 + $0x178] sm:$0xff]  ;;  %v682_v0 = vld [vmem:[%s16290_s1 + $0x168] sm:$0xff] }
  0x16   :  { %v683_v63 = vld [vmem:[%s16290_s1 + $0x170] sm:$0xff]  ;;  %v13053_v1 = vld [vmem:[%s16294_s4 + $0x28] sm:$0xff]  ;;  %v13052_v2 = vld [vmem:[%s16294_s4 + $0x20] sm:$0xff] }
  0x17   :  { %v687_v3 = vld [vmem:[%s16290_s1 + $0x190] sm:$0xff]  ;;  %v686_v4 = vld [vmem:[%s16290_s1 + $0x188] sm:$0xff]  ;;  %v685_v5 = vld [vmem:[%s16290_s1 + $0x180] sm:$0xff] }
  0x18   :  { %388 = vmatpush.bf16.msra.mxu0 %v13042_v15  ;;  %v13011_v6 = vld [vmem:[%s16292_s0 + $0x30] sm:$0xff]  ;;  %v13063_v7 = vld [vmem:[%s16294_s4 + $0x78] sm:$0xff]  ;;  %v690_v13 = vld [vmem:[%s16290_s1 + $0x1a8] sm:$0xff] }
  0x19   :  { %1489 = vmatpush.bf16.msra.mxu1 %v13054_v61  ;;  %v13071_v8 = vld [vmem:[%s16294_s4 + $0xb8] sm:$0xff]  ;;  %2010 = vmatpush.bf16.msra.mxu2 %v13063_v7  ;;  %v13062_v10 = vld [vmem:[%s16294_s4 + $0x70] sm:$0xff]  ;;  %v689_v14 = vld [vmem:[%s16290_s1 + $0x1a0] sm:$0xff] }
  0x1a   :  { %764 = vperm.xlu2 %13524, %v648_v16   ;;  %v13051_v9 = vld [vmem:[%s16294_s4 + $0x18] sm:$0xff]  ;;  %2532 = vmatpush.bf16.msra.mxu3 %v13071_v8  ;;  %v13070_v11 = vld [vmem:[%s16294_s4 + $0xb0] sm:$0xff]  ;;  %v13061_v16 = vld [vmem:[%s16294_s4 + $0x68] sm:$0xff] }
  0x1b   :  { %759 = vperm.xlu1 %13523, %v647_v17   ;;  %754 = vperm.xlu0 %13522, %v646_v18   ;;  %v13050_v12 = vld [vmem:[%s16294_s4 + $0x10] sm:$0xff]  ;;  %v688_v15 = vld [vmem:[%s16290_s1 + $0x198] sm:$0xff]  ;;  %v13069_v17 = vld [vmem:[%s16294_s4 + $0xa8] sm:$0xff] }
  0x1c   :  { %389 = vmatpush.bf16.msra.mxu0 %v13041_v19  ;;  %v13049_v18 = vld [vmem:[%s16294_s4 + $0x8] sm:$0xff]  ;;  %v13060_v19 = vld [vmem:[%s16294_s4 + $0x60] sm:$0xff] }
  0x1d   :  { %1490 = vmatpush.bf16.msra.mxu1 %v13053_v1  ;;  %2011 = vmatpush.bf16.msra.mxu2 %v13062_v10  ;;  %v706_v1 = vld [vmem:[%s16290_s1 + $0x228] sm:$0xff] }
  0x1e   :  { %2533 = vmatpush.bf16.msra.mxu3 %v13070_v11 }
  0x20   :  { %390 = vmatpush.bf16.msra.mxu0 %v13040_v20  ;;  %v13068_v20 = vld [vmem:[%s16294_s4 + $0xa0] sm:$0xff] }
  0x21   :  { %1491 = vmatpush.bf16.msra.mxu1 %v13052_v2  ;;  %2012 = vmatpush.bf16.msra.mxu2 %v13061_v16 }
  0x22   :  { %779 = vperm.xlu2 %13524, %v651_v21   ;;  %2534 = vmatpush.bf16.msra.mxu3 %v13069_v17  ;;  %v13048_v21 = vld [vmem:[%s16294_s4] sm:$0xff] }
  0x23   :  { %774 = vperm.xlu1 %13523, %v650_v22   ;;  %769 = vperm.xlu0 %13522, %v649_v23   ;;  %v693_v22 = vld [vmem:[%s16290_s1 + $0x1c0] sm:$0xff]  ;;  %v692_v23 = vld [vmem:[%s16290_s1 + $0x1b8] sm:$0xff] }
  0x24   :  { %391 = vmatmul.bf16.vlgmr.msra.gmra.mxu0 %v13005_v24  ;;  %v691_v24 = vld [vmem:[%s16290_s1 + $0x1b0] sm:$0xff] }
  0x25   :  { %1492 = vmatpush.bf16.msra.mxu1 %v13051_v9  ;;  %2013 = vmatpush.bf16.msra.mxu2 %v13060_v19 }
  0x26   :  { %2535 = vmatpush.bf16.msra.mxu3 %v13068_v20 }
  0x29   :  { %1493 = vmatpush.bf16.msra.mxu1 %v13050_v12 }
  0x2a   :  { %794 = vperm.xlu2 %13524, %v654_v25   ;;  %v13012_v25 = vld [vmem:[%s16292_s0 + $0x38] sm:$0xff] }
  0x2b   :  { %789 = vperm.xlu1 %13523, %v653_v26   ;;  %784 = vperm.xlu0 %13522, %v652_v27   ;;  %v13059_v26 = vld [vmem:[%s16294_s4 + $0x58] sm:$0xff] }
  0x2c   :  { %v13067_v27 = vld [vmem:[%s16294_s4 + $0x98] sm:$0xff]  ;;  %2014 = vmatpush.bf16.msra.mxu2 %v13059_v26 }
  0x2d   :  { %1494 = vmatpush.bf16.msra.mxu1 %v13049_v18  ;;  %2536 = vmatpush.bf16.msra.mxu3 %v13067_v27 }
  0x31   :  { %1495 = vmatpush.bf16.msra.mxu1 %v13048_v21 }
  0x32   :  { %809 = vperm.xlu2 %13524, %v657_v28   ;;  %v13058_v28 = vld [vmem:[%s16294_s4 + $0x50] sm:$0xff] }
  0x33   :  { %804 = vperm.xlu1 %13523, %v656_v29   ;;  %799 = vperm.xlu0 %13522, %v655_v30   ;;  %v13066_v29 = vld [vmem:[%s16294_s4 + $0x90] sm:$0xff]  ;;  %v696_v30 = vld [vmem:[%s16290_s1 + $0x1d8] sm:$0xff] }
  0x34   :  { %396 = vmatmul.bf16.gmra.mxu0 %v13006_v31  ;;  %v695_v31 = vld [vmem:[%s16290_s1 + $0x1d0] sm:$0xff]  ;;  %2015 = vmatpush.bf16.msra.mxu2 %v13058_v28 }
  0x35   :  { %2537 = vmatpush.bf16.msra.mxu3 %v13066_v29 }
  0x3a   :  { %824 = vperm.xlu2 %13524, %v660_v32   ;;  %v694_v32 = vld [vmem:[%s16290_s1 + $0x1c8] sm:$0xff] }
  0x3b   :  { %819 = vperm.xlu1 %13523, %v659_v33   ;;  %814 = vperm.xlu0 %13522, %v658_v34   ;;  %v13057_v33 = vld [vmem:[%s16294_s4 + $0x48] sm:$0xff] }
  0x3c   :  { %v13065_v34 = vld [vmem:[%s16294_s4 + $0x88] sm:$0xff]  ;;  %2016 = vmatpush.bf16.msra.mxu2 %v13057_v33 }
  0x3d   :  { %2538 = vmatpush.bf16.msra.mxu3 %v13065_v34 }
  0x42   :  { %839 = vperm.xlu2 %13524, %v663_v35   ;;  %v13056_v35 = vld [vmem:[%s16294_s4 + $0x40] sm:$0xff] }
  0x43   :  { %834 = vperm.xlu1 %13523, %v662_v36   ;;  %829 = vperm.xlu0 %13522, %v661_v37   ;;  %v13064_v36 = vld [vmem:[%s16294_s4 + $0x80] sm:$0xff] }
  0x44   :  { %401 = vmatmul.bf16.gmra.mxu0 %v13007_v38  ;;  %v13897_v37 = vld [vmem:[%s16293_s3] ss:$0 sm:$0xff]  ;;  %v699_v38 = vld [vmem:[%s16290_s1 + $0x1f0] sm:$0xff]  ;;  %2017 = vmatpush.bf16.msra.mxu2 %v13056_v35 }
  0x45   :  { %2539 = vmatpush.bf16.msra.mxu3 %v13064_v36 }
  0x4a   :  { %854 = vperm.xlu2 %13524, %v666_v39   ;;  %v698_v39 = vld [vmem:[%s16290_s1 + $0x1e8] sm:$0xff] }
  0x4b   :  { %849 = vperm.xlu1 %13523, %v665_v40   ;;  %844 = vperm.xlu0 %13522, %v664_v41   ;;  %v697_v40 = vld [vmem:[%s16290_s1 + $0x1e0] sm:$0xff] }
  0x4c   :  { %v13013_v41 = vld [vmem:[%s16292_s0 + $0x40] sm:$0xff] }
  0x52   :  { %869 = vperm.xlu2 %13524, %v669_v42  }
  0x53   :  { %864 = vperm.xlu1 %13523, %v668_v43   ;;  %859 = vperm.xlu0 %13522, %v667_v44  }
  0x54   :  { %406 = vmatmul.bf16.gmra.mxu0 %v13008_v45 }
  0x5a   :  { %884 = vperm.xlu2 %13524, %v672_v46  }
  0x5b   :  { %879 = vperm.xlu1 %13523, %v671_v47   ;;  %874 = vperm.xlu0 %13522, %v670_v48   ;;  %v702_v47 = vld [vmem:[%s16290_s1 + $0x208] sm:$0xff]  ;;  %v701_v48 = vld [vmem:[%s16290_s1 + $0x200] sm:$0xff] }
  0x5c   :  { %v730_v17 = vpop.permute.xlu2 %729 }
  0x62   :  { %899 = vperm.xlu2 %13524, %v675_v49   ;;  %v700_v49 = vld [vmem:[%s16290_s1 + $0x1f8] sm:$0xff] }
  0x63   :  { %894 = vperm.xlu1 %13523, %v674_v50   ;;  %889 = vperm.xlu0 %13522, %v673_v51  }
  0x64   :  { %411 = vmatmul.bf16.gmra.mxu0 %v13009_v52 }
  0x6a   :  { %914 = vperm.xlu2 %13524, %v678_v53  }
  0x6b   :  { %909 = vperm.xlu1 %13523, %v677_v54   ;;  %904 = vperm.xlu0 %13522, %v676_v55   ;;  %v705_v55 = vld [vmem:[%s16290_s1 + $0x220] sm:$0xff] }
  0x72   :  { %929 = vperm.xlu2 %13524, %v681_v56   ;;  %v704_v56 = vld [vmem:[%s16290_s1 + $0x218] sm:$0xff] }
  0x73   :  { %924 = vperm.xlu1 %13523, %v680_v57   ;;  %919 = vperm.xlu0 %13522, %v679_v58   ;;  %v703_v57 = vld [vmem:[%s16290_s1 + $0x210] sm:$0xff]  ;;  %v13014_v58 = vld [vmem:[%s16292_s0 + $0x48] sm:$0xff] }
  0x74   :  { %416 = vmatmul.bf16.gmra.mxu0 %v13010_v59 }
  0x75   :  { %v710_v44 = vpop.permute.xlu0 %709 }
  0x7a   :  { %944 = vperm.xlu2 %13524, %v684_v62   ;;  %v720_v62 = vpop.permute.xlu1 %719 }
  0x7b   :  { %939 = vperm.xlu1 %13523, %v683_v63   ;;  %934 = vperm.xlu0 %13522, %v682_v0  }
  0x7d   :  { %v715_v53 = vpop.permute.xlu0 %714 }
  0x82   :  { %959 = vperm.xlu2 %13524, %v687_v3  }
  0x83   :  { %954 = vperm.xlu1 %13523, %v686_v4   ;;  %949 = vperm.xlu0 %13522, %v685_v5   ;;  %v725_v5 = vpop.permute.xlu1 %724 }
  0x84   :  { %421 = vmatmul.bf16.gmra.mxu0 %v13011_v6 }
  0x85   :  { %v740_v36 = vpop.permute.xlu0 %739 }
  0x8a   :  { %974 = vperm.xlu2 %13524, %v690_v13   ;;  %v13015_v13 = vld [vmem:[%s16292_s0 + $0x50] sm:$0xff] }
  0x8b   :  { %969 = vperm.xlu1 %13523, %v689_v14   ;;  %964 = vperm.xlu0 %13522, %v688_v15  }
  0x92   :  { %989 = vperm.xlu2 %13524, %v693_v22  }
  0x93   :  { %984 = vperm.xlu1 %13523, %v692_v23   ;;  %979 = vperm.xlu0 %13522, %v691_v24   ;;  %v735_v23 = vpop.permute.xlu2 %734 }
  0x94   :  { %426 = vmatmul.bf16.gmra.mxu0 %v13012_v25 }
  0x9a   :  { %1004 = vperm.xlu2 %13524, %v696_v30  }
  0x9b   :  { %999 = vperm.xlu1 %13523, %v695_v31   ;;  %994 = vperm.xlu0 %13522, %v694_v32   ;;  %v13016_v31 = vld [vmem:[%s16292_s0 + $0x58] sm:$0xff] }
  0xa1   :  { %v392_v42 = vpop.f32.mrf.mxu0 }
  0xa2   :  { %v393_v43 = vadd.f32 %v13897_v37, %v392_v42  ;;  %1019 = vperm.xlu2 %13524, %v699_v38   ;;  %v745_v42 = vpop.permute.xlu1 %744 }
  0xa3   :  { %1014 = vperm.xlu1 %13523, %v698_v39   ;;  %1009 = vperm.xlu0 %13522, %v697_v40  }
  0xa4   :  { %v567_v45 = vmax.f32 %v393_v43, 0.0  ;;  %431 = vmatmul.bf16.gmra.mxu0 %v13013_v41 }
  0xa6   :  { %v1057_v46 = vmul.f32 %v710_v44, %v567_v45 }
  0xa8   :  { %1127 = vst [vmem:[#allocation2] sm:$0xff] %v1057_v46 }
  0xa9   :  { %v394_v50 = vpop.f32.mrf.mxu0 }
  0xaa   :  { %v395_v51 = vadd.f32 %v13897_v37, %v394_v50  ;;  %1034 = vperm.xlu2 %13524, %v702_v47   ;;  %v13017_v50 = vld [vmem:[%s16292_s0 + $0x60] sm:$0xff] }
  0xab   :  { %1029 = vperm.xlu1 %13523, %v701_v48   ;;  %1024 = vperm.xlu0 %13522, %v700_v49  }
  0xac   :  { %v568_v52 = vmax.f32 %v395_v51, 0.0 }
  0xae   :  { %v1058_v54 = vmul.f32 %v715_v53, %v568_v52 }
  0xb0   :  { %1128 = vst [vmem:[#allocation2 + $0x8] sm:$0xff] %v1058_v54  ;;  %v1328_v59 = vpack.c.bf16 %v1058_v54, %v1057_v46 }
  0xb1   :  { %v397_v60 = vpop.f32.mrf.mxu0 }
  0xb2   :  { %v398_v61 = vadd.f32 %v13897_v37, %v397_v60  ;;  %1049 = vperm.xlu2 %13524, %v705_v55   ;;  %1496 = vmatmul.bf16.vlgmr.msra.gmra.mxu1 %v1328_v59  ;;  %v750_v55 = vpop.permute.xlu2 %749  ;;  %v755_v60 = vpop.permute.xlu0 %754 }
  0xb3   :  { %1044 = vperm.xlu1 %13523, %v704_v56   ;;  %1039 = vperm.xlu0 %13522, %v703_v57  }
  0xb4   :  { %v569_v63 = vmax.f32 %v398_v61, 0.0  ;;  %436 = vmatmul.bf16.gmra.mxu0 %v13014_v58 }
  0xb6   :  { %v1059_v0 = vmul.f32 %v720_v62, %v569_v63 }
  0xb7   :  { %v1785_v7 = vld [vmem:[#allocation2 + $0x1] sm:$0xff] }
  0xb8   :  { %1129 = vst [vmem:[#allocation2 + $0x10] sm:$0xff] %v1059_v0  ;;  %v2307_v9 = vld [vmem:[#allocation2 + $0x2] sm:$0xff] }
  0xb9   :  { %v399_v2 = vpop.f32.mrf.mxu0 }
  0xba   :  { %v400_v3 = vadd.f32 %v13897_v37, %v399_v2 }
  0xbb   :  { %1054 = vperm.xlu0 %13522, %v706_v1  }
  0xbc   :  { %v570_v4 = vmax.f32 %v400_v3, 0.0 }
  0xbe   :  { %v1060_v6 = vmul.f32 %v725_v5, %v570_v4  ;;  %v13018_v4 = vld [vmem:[%s16292_s0 + $0x68] sm:$0xff] }
  0xbf   :  { %v1786_v8 = vld [vmem:[#allocation2 + $0x9] sm:$0xff] }
  0xc0   :  { %v2308_v10 = vld [vmem:[#allocation2 + $0xa] sm:$0xff]  ;;  %1130 = vst [vmem:[#allocation2 + $0x18] sm:$0xff] %v1060_v6  ;;  %v1849_v11 = vpack.c.bf16 %v1786_v8, %v1785_v7  ;;  %v1329_v14 = vpack.c.bf16 %v1060_v6, %v1059_v0 }
  0xc1   :  { %v2371_v12 = vpack.c.bf16 %v2308_v10, %v2307_v9  ;;  %v402_v15 = vpop.f32.mrf.mxu0  ;;  %v760_v9 = vpop.permute.xlu1 %759 }
  0xc2   :  { %v403_v16 = vadd.f32 %v13897_v37, %v402_v15  ;;  %2018 = vmatmul.bf16.vlgmr.msra.gmra.mxu2 %v1849_v11  ;;  %1501 = vmatmul.bf16.gmra.mxu1 %v1329_v14  ;;  %v765_v14 = vpop.permute.xlu2 %764 }
  0xc3   :  { %2540 = vmatmul.bf16.vlgmr.msra.gmra.mxu3 %v2371_v12 }
  0xc4   :  { %v571_v18 = vmax.f32 %v403_v16, 0.0  ;;  %441 = vmatmul.bf16.gmra.mxu0 %v13015_v13 }
  0xc6   :  { %v1061_v19 = vmul.f32 %v730_v17, %v571_v18 }
  0xc7   :  { %v1787_v25 = vld [vmem:[#allocation2 + $0x11] sm:$0xff] }
  0xc8   :  { %1131 = vst [vmem:[#allocation2 + $0x20] sm:$0xff] %v1061_v19  ;;  %v2309_v27 = vld [vmem:[#allocation2 + $0x12] sm:$0xff] }
  0xc9   :  { %v404_v20 = vpop.f32.mrf.mxu0 }
  0xca   :  { %v405_v21 = vadd.f32 %v13897_v37, %v404_v20 }
  0xcc   :  { %v572_v22 = vmax.f32 %v405_v21, 0.0 }
  0xce   :  { %v1062_v24 = vmul.f32 %v735_v23, %v572_v22  ;;  %v13019_v22 = vld [vmem:[%s16292_s0 + $0x70] sm:$0xff] }
  0xcf   :  { %v1788_v26 = vld [vmem:[#allocation2 + $0x19] sm:$0xff] }
  0xd0   :  { %v2310_v28 = vld [vmem:[#allocation2 + $0x1a] sm:$0xff]  ;;  %1132 = vst [vmem:[#allocation2 + $0x28] sm:$0xff] %v1062_v24  ;;  %v1850_v29 = vpack.c.bf16 %v1788_v26, %v1787_v25  ;;  %v1330_v32 = vpack.c.bf16 %v1062_v24, %v1061_v19 }
  0xd1   :  { %v2372_v30 = vpack.c.bf16 %v2310_v28, %v2309_v27  ;;  %v407_v33 = vpop.f32.mrf.mxu0  ;;  %v770_v27 = vpop.permute.xlu0 %769 }
  0xd2   :  { %v408_v34 = vadd.f32 %v13897_v37, %v407_v33  ;;  %2023 = vmatmul.bf16.gmra.mxu2 %v1850_v29  ;;  %1506 = vmatmul.bf16.gmra.mxu1 %v1330_v32  ;;  %v775_v32 = vpop.permute.xlu1 %774 }
  0xd3   :  { %2545 = vmatmul.bf16.gmra.mxu3 %v2372_v30 }
  0xd4   :  { %v573_v35 = vmax.f32 %v408_v34, 0.0  ;;  %446 = vmatmul.bf16.gmra.mxu0 %v13016_v31 }
  0xd6   :  { %v1063_v38 = vmul.f32 %v740_v36, %v573_v35 }
  0xd7   :  { %v1789_v44 = vld [vmem:[#allocation2 + $0x21] sm:$0xff] }
  0xd8   :  { %1133 = vst [vmem:[#allocation2 + $0x30] sm:$0xff] %v1063_v38  ;;  %v2311_v46 = vld [vmem:[#allocation2 + $0x22] sm:$0xff] }
  0xd9   :  { %v409_v39 = vpop.f32.mrf.mxu0 }
  0xda   :  { %v410_v40 = vadd.f32 %v13897_v37, %v409_v39 }
  0xdc   :  { %v574_v41 = vmax.f32 %v410_v40, 0.0 }
  0xde   :  { %v1064_v43 = vmul.f32 %v745_v42, %v574_v41  ;;  %v13020_v41 = vld [vmem:[%s16292_s0 + $0x78] sm:$0xff] }
  0xdf   :  { %v1790_v45 = vld [vmem:[#allocation2 + $0x29] sm:$0xff] }
  0xe0   :  { %v2312_v47 = vld [vmem:[#allocation2 + $0x2a] sm:$0xff]  ;;  %1134 = vst [vmem:[#allocation2 + $0x38] sm:$0xff] %v1064_v43  ;;  %v1851_v48 = vpack.c.bf16 %v1790_v45, %v1789_v44  ;;  %v1331_v51 = vpack.c.bf16 %v1064_v43, %v1063_v38  ;;  %v13538_v44 = vmov 0.0  }
  0xe1   :  { %v2373_v49 = vpack.c.bf16 %v2312_v47, %v2311_v46  ;;  %v412_v52 = vpop.f32.mrf.mxu0  ;;  %1261 = vst [vmem:[#allocation3 + $0x200] sm:$0xff] %v13538_v44  ;;  %v780_v47 = vpop.permute.xlu2 %779 }
  0xe2   :  { %v413_v53 = vadd.f32 %v13897_v37, %v412_v52  ;;  %2028 = vmatmul.bf16.gmra.mxu2 %v1851_v48  ;;  %1511 = vmatmul.bf16.gmra.mxu1 %v1331_v51  ;;  %1262 = vst [vmem:[#allocation3 + $0x208] sm:$0xff] %v13538_v44  ;;  %v785_v52 = vpop.permute.xlu0 %784 }
  0xe3   :  { %2550 = vmatmul.bf16.gmra.mxu3 %v2373_v49  ;;  %1263 = vst [vmem:[#allocation3 + $0x210] sm:$0xff] %v13538_v44 }
  0xe4   :  { %v575_v54 = vmax.f32 %v413_v53, 0.0  ;;  %451 = vmatmul.bf16.gmra.mxu0 %v13017_v50  ;;  %6609 = vst [vmem:[#allocation5] sm:$0xff] %v13538_v44 }
  0xe5   :  { %6610 = vst [vmem:[#allocation5 + $0x8] sm:$0xff] %v13538_v44 }
  0xe6   :  { %v1065_v56 = vmul.f32 %v750_v55, %v575_v54  ;;  %6611 = vst [vmem:[#allocation5 + $0x10] sm:$0xff] %v13538_v44 }
  0xe7   :  { %v1791_v62 = vld [vmem:[#allocation2 + $0x31] sm:$0xff]  ;;  %6612 = vst [vmem:[#allocation5 + $0x18] sm:$0xff] %v13538_v44 }
  0xe8   :  { %1135 = vst [vmem:[#allocation2 + $0x40] sm:$0xff] %v1065_v56  ;;  %v2313_v0 = vld [vmem:[#allocation2 + $0x32] sm:$0xff] }
  0xe9   :  { %v414_v57 = vpop.f32.mrf.mxu0  ;;  %6613 = vst [vmem:[#allocation5 + $0x20] sm:$0xff] %v13538_v44 }
  0xea   :  { %v415_v58 = vadd.f32 %v13897_v37, %v414_v57  ;;  %6614 = vst [vmem:[#allocation5 + $0x28] sm:$0xff] %v13538_v44 }
  0xeb   :  { %6615 = vst [vmem:[#allocation5 + $0x30] sm:$0xff] %v13538_v44 }
  0xec   :  { %v576_v59 = vmax.f32 %v415_v58, 0.0  ;;  %6616 = vst [vmem:[#allocation5 + $0x38] sm:$0xff] %v13538_v44 }
  0xed   :  { %6617 = vst [vmem:[#allocation5 + $0x40] sm:$0xff] %v13538_v44 }
  0xee   :  { %v1066_v61 = vmul.f32 %v755_v60, %v576_v59  ;;  %6618 = vst [vmem:[#allocation5 + $0x48] sm:$0xff] %v13538_v44  ;;  %v13021_v60 = vld [vmem:[%s16292_s0 + $0x80] sm:$0xff] }
  0xef   :  { %v1792_v63 = vld [vmem:[#allocation2 + $0x39] sm:$0xff]  ;;  %6619 = vst [vmem:[#allocation5 + $0x50] sm:$0xff] %v13538_v44 }
  0xf0   :  { %v2314_v1 = vld [vmem:[#allocation2 + $0x3a] sm:$0xff]  ;;  %1136 = vst [vmem:[#allocation2 + $0x48] sm:$0xff] %v1066_v61  ;;  %v1852_v2 = vpack.c.bf16 %v1792_v63, %v1791_v62  ;;  %v1332_v5 = vpack.c.bf16 %v1066_v61, %v1065_v56 }
  0xf1   :  { %v2374_v3 = vpack.c.bf16 %v2314_v1, %v2313_v0  ;;  %v417_v6 = vpop.f32.mrf.mxu0  ;;  %6620 = vst [vmem:[#allocation5 + $0x58] sm:$0xff] %v13538_v44  ;;  %v790_v1 = vpop.permute.xlu1 %789 }
  0xf2   :  { %v418_v7 = vadd.f32 %v13897_v37, %v417_v6  ;;  %2033 = vmatmul.bf16.gmra.mxu2 %v1852_v2  ;;  %1516 = vmatmul.bf16.gmra.mxu1 %v1332_v5  ;;  %6621 = vst [vmem:[#allocation5 + $0x60] sm:$0xff] %v13538_v44  ;;  %v795_v6 = vpop.permute.xlu2 %794 }
  0xf3   :  { %2555 = vmatmul.bf16.gmra.mxu3 %v2374_v3  ;;  %6622 = vst [vmem:[#allocation5 + $0x68] sm:$0xff] %v13538_v44 }
  0xf4   :  { %v577_v8 = vmax.f32 %v418_v7, 0.0  ;;  %456 = vmatmul.bf16.gmra.mxu0 %v13018_v4  ;;  %6623 = vst [vmem:[#allocation5 + $0x70] sm:$0xff] %v13538_v44 }
  0xf5   :  { %6624 = vst [vmem:[#allocation5 + $0x78] sm:$0xff] %v13538_v44 }
  0xf6   :  { %v1067_v10 = vmul.f32 %v760_v9, %v577_v8  ;;  %6625 = vst [vmem:[#allocation5 + $0x80] sm:$0xff] %v13538_v44 }
  0xf7   :  { %v1793_v16 = vld [vmem:[#allocation2 + $0x41] sm:$0xff]  ;;  %6626 = vst [vmem:[#allocation5 + $0x88] sm:$0xff] %v13538_v44 }
  0xf8   :  { %1137 = vst [vmem:[#allocation2 + $0x50] sm:$0xff] %v1067_v10  ;;  %v2315_v18 = vld [vmem:[#allocation2 + $0x42] sm:$0xff] }
  0xf9   :  { %v419_v11 = vpop.f32.mrf.mxu0  ;;  %6627 = vst [vmem:[#allocation5 + $0x90] sm:$0xff] %v13538_v44 }
  0xfa   :  { %v420_v12 = vadd.f32 %v13897_v37, %v419_v11  ;;  %6628 = vst [vmem:[#allocation5 + $0x98] sm:$0xff] %v13538_v44 }
  0xfb   :  { %6629 = vst [vmem:[#allocation5 + $0xa0] sm:$0xff] %v13538_v44 }
  0xfc   :  { %v578_v13 = vmax.f32 %v420_v12, 0.0  ;;  %6630 = vst [vmem:[#allocation5 + $0xa8] sm:$0xff] %v13538_v44 }
  0xfd   :  { %6631 = vst [vmem:[#allocation5 + $0xb0] sm:$0xff] %v13538_v44 }
  0xfe   :  { %v1068_v15 = vmul.f32 %v765_v14, %v578_v13  ;;  %6632 = vst [vmem:[#allocation5 + $0xb8] sm:$0xff] %v13538_v44 }
  0xff   :  { %v1794_v17 = vld [vmem:[#allocation2 + $0x49] sm:$0xff]  ;;  %6633 = vst [vmem:[#allocation5 + $0xc0] sm:$0xff] %v13538_v44 }
 0x100   :  { %v2316_v19 = vld [vmem:[#allocation2 + $0x4a] sm:$0xff]  ;;  %1138 = vst [vmem:[#allocation2 + $0x58] sm:$0xff] %v1068_v15  ;;  %v1853_v20 = vpack.c.bf16 %v1794_v17, %v1793_v16  ;;  %v1333_v23 = vpack.c.bf16 %v1068_v15, %v1067_v10 }
 0x101   :  { %v2375_v21 = vpack.c.bf16 %v2316_v19, %v2315_v18  ;;  %v422_v24 = vpop.f32.mrf.mxu0  ;;  %v13022_v15 = vld [vmem:[%s16292_s0 + $0x88] sm:$0xff]  ;;  %6634 = vst [vmem:[#allocation5 + $0xc8] sm:$0xff] %v13538_v44 }
 0x102   :  { %v423_v25 = vadd.f32 %v13897_v37, %v422_v24  ;;  %2038 = vmatmul.bf16.gmra.mxu2 %v1853_v20  ;;  %1521 = vmatmul.bf16.gmra.mxu1 %v1333_v23  ;;  %6635 = vst [vmem:[#allocation5 + $0xd0] sm:$0xff] %v13538_v44  ;;  %v800_v20 = vpop.permute.xlu0 %799 }
 0x103   :  { %2560 = vmatmul.bf16.gmra.mxu3 %v2375_v21  ;;  %6636 = vst [vmem:[#allocation5 + $0xd8] sm:$0xff] %v13538_v44 }
 0x104   :  { %v579_v26 = vmax.f32 %v423_v25, 0.0  ;;  %461 = vmatmul.bf16.gmra.mxu0 %v13019_v22  ;;  %6637 = vst [vmem:[#allocation5 + $0xe0] sm:$0xff] %v13538_v44 }
 0x105   :  { %6638 = vst [vmem:[#allocation5 + $0xe8] sm:$0xff] %v13538_v44 }
 0x106   :  { %v1069_v28 = vmul.f32 %v770_v27, %v579_v26  ;;  %6639 = vst [vmem:[#allocation5 + $0xf0] sm:$0xff] %v13538_v44  ;;  %v805_v26 = vpop.permute.xlu1 %804 }
 0x107   :  { %v1795_v34 = vld [vmem:[#allocation2 + $0x51] sm:$0xff]  ;;  %6640 = vst [vmem:[#allocation5 + $0xf8] sm:$0xff] %v13538_v44 }
 0x108   :  { %1139 = vst [vmem:[#allocation2 + $0x60] sm:$0xff] %v1069_v28  ;;  %v2317_v36 = vld [vmem:[#allocation2 + $0x52] sm:$0xff] }
 0x109   :  { %v424_v29 = vpop.f32.mrf.mxu0  ;;  %6641 = vst [vmem:[#allocation5 + $0x100] sm:$0xff] %v13538_v44 }
 0x10a   :  { %v425_v30 = vadd.f32 %v13897_v37, %v424_v29  ;;  %6642 = vst [vmem:[#allocation5 + $0x108] sm:$0xff] %v13538_v44 }
 0x10b   :  { %6643 = vst [vmem:[#allocation5 + $0x110] sm:$0xff] %v13538_v44 }
 0x10c   :  { %v580_v31 = vmax.f32 %v425_v30, 0.0  ;;  %6644 = vst [vmem:[#allocation5 + $0x118] sm:$0xff] %v13538_v44 }
 0x10d   :  { %6645 = vst [vmem:[#allocation5 + $0x120] sm:$0xff] %v13538_v44 }
 0x10e   :  { %v1070_v33 = vmul.f32 %v775_v32, %v580_v31  ;;  %6646 = vst [vmem:[#allocation5 + $0x128] sm:$0xff] %v13538_v44 }
 0x10f   :  { %v1796_v35 = vld [vmem:[#allocation2 + $0x59] sm:$0xff]  ;;  %6647 = vst [vmem:[#allocation5 + $0x130] sm:$0xff] %v13538_v44 }
 0x110   :  { %v2318_v38 = vld [vmem:[#allocation2 + $0x5a] sm:$0xff]  ;;  %1140 = vst [vmem:[#allocation2 + $0x68] sm:$0xff] %v1070_v33  ;;  %v1854_v39 = vpack.c.bf16 %v1796_v35, %v1795_v34  ;;  %v1334_v42 = vpack.c.bf16 %v1070_v33, %v1069_v28  ;;  %v13023_v34 = vld [vmem:[%s16292_s0 + $0x90] sm:$0xff] }
 0x111   :  { %v2376_v40 = vpack.c.bf16 %v2318_v38, %v2317_v36  ;;  %v427_v43 = vpop.f32.mrf.mxu0  ;;  %6648 = vst [vmem:[#allocation5 + $0x138] sm:$0xff] %v13538_v44 }
 0x112   :  { %v428_v45 = vadd.f32 %v13897_v37, %v427_v43  ;;  %2043 = vmatmul.bf16.gmra.mxu2 %v1854_v39  ;;  %1526 = vmatmul.bf16.gmra.mxu1 %v1334_v42  ;;  %6649 = vst [vmem:[#allocation5 + $0x140] sm:$0xff] %v13538_v44  ;;  %v810_v43 = vpop.permute.xlu2 %809 }
 0x113   :  { %2565 = vmatmul.bf16.gmra.mxu3 %v2376_v40  ;;  %6650 = vst [vmem:[#allocation5 + $0x148] sm:$0xff] %v13538_v44 }
 0x114   :  { %v581_v46 = vmax.f32 %v428_v45, 0.0  ;;  %466 = vmatmul.bf16.gmra.mxu0 %v13020_v41  ;;  %6651 = vst [vmem:[#allocation5 + $0x150] sm:$0xff] %v13538_v44 }
 0x115   :  { %6652 = vst [vmem:[#allocation5 + $0x158] sm:$0xff] %v13538_v44 }
 0x116   :  { %v1071_v48 = vmul.f32 %v780_v47, %v581_v46  ;;  %6653 = vst [vmem:[#allocation5 + $0x160] sm:$0xff] %v13538_v44 }
 0x117   :  { %v1797_v54 = vld [vmem:[#allocation2 + $0x61] sm:$0xff]  ;;  %6654 = vst [vmem:[#allocation5 + $0x168] sm:$0xff] %v13538_v44 }
 0x118   :  { %1141 = vst [vmem:[#allocation2 + $0x70] sm:$0xff] %v1071_v48  ;;  %v2319_v56 = vld [vmem:[#allocation2 + $0x62] sm:$0xff] }
 0x119   :  { %v429_v49 = vpop.f32.mrf.mxu0  ;;  %6655 = vst [vmem:[#allocation5 + $0x170] sm:$0xff] %v13538_v44 }
 0x11a   :  { %v430_v50 = vadd.f32 %v13897_v37, %v429_v49  ;;  %6656 = vst [vmem:[#allocation5 + $0x178] sm:$0xff] %v13538_v44 }
 0x11b   :  { %6657 = vst [vmem:[#allocation5 + $0x180] sm:$0xff] %v13538_v44 }
 0x11c   :  { %v582_v51 = vmax.f32 %v430_v50, 0.0 }
 0x11e   :  { %v1072_v53 = vmul.f32 %v785_v52, %v582_v51  ;;  %v815_v51 = vpop.permute.xlu0 %814 }
 0x11f   :  { %v1798_v55 = vld [vmem:[#allocation2 + $0x69] sm:$0xff] }
 0x120   :  { %v2320_v57 = vld [vmem:[#allocation2 + $0x6a] sm:$0xff]  ;;  %1142 = vst [vmem:[#allocation2 + $0x78] sm:$0xff] %v1072_v53  ;;  %v1855_v58 = vpack.c.bf16 %v1798_v55, %v1797_v54  ;;  %v1335_v61 = vpack.c.bf16 %v1072_v53, %v1071_v48 }
 0x121   :  { %v2377_v59 = vpack.c.bf16 %v2320_v57, %v2319_v56  ;;  %v432_v62 = vpop.f32.mrf.mxu0 }
 0x122   :  { %v433_v63 = vadd.f32 %v13897_v37, %v432_v62  ;;  %2048 = vmatmul.bf16.gmra.mxu2 %v1855_v58  ;;  %1531 = vmatmul.bf16.gmra.mxu1 %v1335_v61  ;;  %v13024_v58 = vld [vmem:[%s16292_s0 + $0x98] sm:$0xff] }
 0x123   :  { %2570 = vmatmul.bf16.gmra.mxu3 %v2377_v59 }
 0x124   :  { %v583_v0 = vmax.f32 %v433_v63, 0.0  ;;  %471 = vmatmul.bf16.gmra.mxu0 %v13021_v60 }
 0x126   :  { %v1073_v2 = vmul.f32 %v790_v1, %v583_v0 }
 0x127   :  { %v1799_v8 = vld [vmem:[#allocation2 + $0x71] sm:$0xff] }
 0x128   :  { %1143 = vst [vmem:[#allocation2 + $0x80] sm:$0xff] %v1073_v2  ;;  %v2321_v10 = vld [vmem:[#allocation2 + $0x72] sm:$0xff] }
 0x129   :  { %v434_v3 = vpop.f32.mrf.mxu0 }
 0x12a   :  { %v435_v4 = vadd.f32 %v13897_v37, %v434_v3 }
 0x12c   :  { %v584_v5 = vmax.f32 %v435_v4, 0.0  ;;  %v820_v4 = vpop.permute.xlu1 %819 }
 0x12e   :  { %v1074_v7 = vmul.f32 %v795_v6, %v584_v5 }
 0x12f   :  { %v1800_v9 = vld [vmem:[#allocation2 + $0x79] sm:$0xff]  ;;  %v14001_v12 = vpop.f32.mrf.mxu1 }
 0x130   :  { %v2322_v11 = vld [vmem:[#allocation2 + $0x7a] sm:$0xff]  ;;  %1144 = vst [vmem:[#allocation2 + $0x88] sm:$0xff] %v1074_v7  ;;  %v1856_v13 = vpack.c.bf16 %v1800_v9, %v1799_v8  ;;  %v1336_v16 = vpack.c.bf16 %v1074_v7, %v1073_v2 }
 0x131   :  { %v2378_v14 = vpack.c.bf16 %v2322_v11, %v2321_v10  ;;  %v437_v17 = vpop.f32.mrf.mxu0 }
 0x132   :  { %v438_v18 = vadd.f32 %v13897_v37, %v437_v17  ;;  %2053 = vmatmul.bf16.gmra.mxu2 %v1856_v13  ;;  %1536 = vmatmul.bf16.gmra.mxu1 %v1336_v16 }
 0x133   :  { %2575 = vmatmul.bf16.gmra.mxu3 %v2378_v14  ;;  %v825_v14 = vpop.permute.xlu2 %824 }
 0x134   :  { %v585_v19 = vmax.f32 %v438_v18, 0.0  ;;  %476 = vmatmul.bf16.gmra.mxu0 %v13022_v15 }
 0x136   :  { %v1075_v21 = vmul.f32 %v800_v20, %v585_v19 }
 0x137   :  { %v1499_v22 = vpop.f32.mrf.mxu1  ;;  %v1801_v28 = vld [vmem:[#allocation2 + $0x81] sm:$0xff] }
 0x138   :  { %1145 = vst [vmem:[#allocation2 + $0x90] sm:$0xff] %v1075_v21  ;;  %v2323_v30 = vld [vmem:[#allocation2 + $0x82] sm:$0xff] }
 0x139   :  { %v439_v23 = vpop.f32.mrf.mxu0 }
 0x13a   :  { %v440_v24 = vadd.f32 %v13897_v37, %v439_v23 }
 0x13c   :  { %v586_v25 = vmax.f32 %v440_v24, 0.0 }
 0x13e   :  { %v1076_v27 = vmul.f32 %v805_v26, %v586_v25  ;;  %v13025_v25 = vld [vmem:[%s16292_s0 + $0xa0] sm:$0xff] }
 0x13f   :  { %v1802_v29 = vld [vmem:[#allocation2 + $0x89] sm:$0xff]  ;;  %v1502_v35 = vpop.f32.mrf.mxu1 }
 0x140   :  { %v2324_v31 = vld [vmem:[#allocation2 + $0x8a] sm:$0xff]  ;;  %v1857_v32 = vpack.c.bf16 %v1802_v29, %v1801_v28  ;;  %v1337_v36 = vpack.c.bf16 %v1076_v27, %v1075_v21  ;;  %1146 = vst [vmem:[#allocation2 + $0x98] sm:$0xff] %v1076_v27 }
 0x141   :  { %v2379_v33 = vpack.c.bf16 %v2324_v31, %v2323_v30  ;;  %v442_v38 = vpop.f32.mrf.mxu0 }
 0x142   :  { %v443_v39 = vadd.f32 %v13897_v37, %v442_v38  ;;  %2058 = vmatmul.bf16.gmra.mxu2 %v1857_v32  ;;  %1541 = vmatmul.bf16.gmra.mxu1 %v1337_v36  ;;  %v830_v32 = vpop.permute.xlu0 %829 }
 0x143   :  { %2580 = vmatmul.bf16.gmra.mxu3 %v2379_v33 }
 0x144   :  { %v587_v40 = vmax.f32 %v443_v39, 0.0  ;;  %481 = vmatmul.bf16.gmra.mxu0 %v13023_v34 }
 0x145   :  { %v2019_v41 = vpop.f32.mrf.mxu2 }
 0x146   :  { %v2541_v42 = vpop.f32.mrf.mxu3  ;;  %v2179_v45 = vadd.f32 %v2019_v41, %v14001_v12  ;;  %v1077_v46 = vmul.f32 %v810_v43, %v587_v40  ;;  %v835_v43 = vpop.permute.xlu1 %834 }
 0x147   :  { %v1504_v48 = vpop.f32.mrf.mxu1  ;;  %v1803_v61 = vld [vmem:[#allocation2 + $0x91] sm:$0xff] }
 0x148   :  { %v2701_v47 = vadd.f32 %v2541_v42, %v2179_v45  ;;  %1147 = vst [vmem:[#allocation2 + $0xa0] sm:$0xff] %v1077_v46  ;;  %v2325_v0 = vld [vmem:[#allocation2 + $0x92] sm:$0xff] }
 0x149   :  { %v444_v49 = vpop.f32.mrf.mxu0 }
 0x14a   :  { %v445_v50 = vadd.f32 %v13897_v37, %v444_v49  ;;  %2765 = vst [vmem:[#allocation3] sm:$0xff] %v2701_v47 }
 0x14c   :  { %v588_v52 = vmax.f32 %v445_v50, 0.0 }
 0x14d   :  { %v2021_v53 = vpop.f32.mrf.mxu2 }
 0x14e   :  { %v2543_v54 = vpop.f32.mrf.mxu3  ;;  %v1078_v55 = vmul.f32 %v815_v51, %v588_v52  ;;  %v2180_v56 = vadd.f32 %v2021_v53, %v1499_v22 }
 0x14f   :  { %v1507_v59 = vpop.f32.mrf.mxu1  ;;  %v1804_v63 = vld [vmem:[#allocation2 + $0x99] sm:$0xff] }
 0x150   :  { %1148 = vst [vmem:[#allocation2 + $0xa8] sm:$0xff] %v1078_v55  ;;  %v2702_v57 = vadd.f32 %v2543_v54, %v2180_v56  ;;  %v1338_v44 = vpack.c.bf16 %v1078_v55, %v1077_v46  ;;  %v2326_v1 = vld [vmem:[#allocation2 + $0x9a] sm:$0xff]  ;;  %v1858_v2 = vpack.c.bf16 %v1804_v63, %v1803_v61  ;;  %v13026_v55 = vld [vmem:[%s16292_s0 + $0xa8] sm:$0xff]  ;;  %v840_v61 = vpop.permute.xlu2 %839 }
 0x151   :  { %v447_v60 = vpop.f32.mrf.mxu0  ;;  %v2380_v3 = vpack.c.bf16 %v2326_v1, %v2325_v0 }
 0x152   :  { %2766 = vst [vmem:[#allocation3 + $0x8] sm:$0xff] %v2702_v57  ;;  %v448_v62 = vadd.f32 %v13897_v37, %v447_v60  ;;  %1546 = vmatmul.bf16.gmra.mxu1 %v1338_v44  ;;  %2063 = vmatmul.bf16.gmra.mxu2 %v1858_v2 }
 0x153   :  { %2585 = vmatmul.bf16.gmra.mxu3 %v2380_v3 }
 0x154   :  { %v589_v5 = vmax.f32 %v448_v62, 0.0  ;;  %486 = vmatmul.bf16.gmra.mxu0 %v13024_v58 }
 0x155   :  { %v2024_v6 = vpop.f32.mrf.mxu2 }
 0x156   :  { %v2546_v7 = vpop.f32.mrf.mxu3  ;;  %v1079_v8 = vmul.f32 %v820_v4, %v589_v5  ;;  %v2181_v9 = vadd.f32 %v2024_v6, %v1502_v35 }
 0x157   :  { %v1509_v11 = vpop.f32.mrf.mxu1  ;;  %v1805_v23 = vld [vmem:[#allocation2 + $0xa1] sm:$0xff] }
 0x158   :  { %1149 = vst [vmem:[#allocation2 + $0xb0] sm:$0xff] %v1079_v8  ;;  %v2703_v10 = vadd.f32 %v2546_v7, %v2181_v9  ;;  %v2327_v24 = vld [vmem:[#allocation2 + $0xa2] sm:$0xff]  ;;  %v845_v7 = vpop.permute.xlu0 %844 }
 0x159   :  { %v449_v12 = vpop.f32.mrf.mxu0 }
 0x15a   :  { %2767 = vst [vmem:[#allocation3 + $0x10] sm:$0xff] %v2703_v10  ;;  %v450_v13 = vadd.f32 %v13897_v37, %v449_v12 }
 0x15c   :  { %v590_v15 = vmax.f32 %v450_v13, 0.0 }
 0x15d   :  { %v2026_v16 = vpop.f32.mrf.mxu2 }
 0x15e   :  { %v2548_v17 = vpop.f32.mrf.mxu3  ;;  %v1080_v18 = vmul.f32 %v825_v14, %v590_v15  ;;  %v2182_v19 = vadd.f32 %v2026_v16, %v1504_v48  ;;  %v13027_v15 = vld [vmem:[%s16292_s0 + $0xb0] sm:$0xff] }
 0x15f   :  { %v1806_v20 = vld [vmem:[#allocation2 + $0xa9] sm:$0xff]  ;;  %v1512_v26 = vpop.f32.mrf.mxu1 }
 0x160   :  { %v2328_v21 = vld [vmem:[#allocation2 + $0xaa] sm:$0xff]  ;;  %1150 = vst [vmem:[#allocation2 + $0xb8] sm:$0xff] %v1080_v18  ;;  %v2704_v22 = vadd.f32 %v2548_v17, %v2182_v19  ;;  %v1339_v27 = vpack.c.bf16 %v1080_v18, %v1079_v8  ;;  %v1859_v29 = vpack.c.bf16 %v1806_v20, %v1805_v23 }
 0x161   :  { %v452_v28 = vpop.f32.mrf.mxu0  ;;  %v2381_v30 = vpack.c.bf16 %v2328_v21, %v2327_v24  ;;  %v13079_v21 = vld [vmem:[%s16294_s4 + $0xf8] sm:$0xff] }
 0x162   :  { %2768 = vst [vmem:[#allocation3 + $0x18] sm:$0xff] %v2704_v22  ;;  %v453_v31 = vadd.f32 %v13897_v37, %v452_v28  ;;  %1551 = vmatmul.bf16.gmra.mxu1 %v1339_v27  ;;  %2068 = vmatmul.bf16.gmra.mxu2 %v1859_v29  ;;  %v850_v27 = vpop.permute.xlu1 %849 }
 0x163   :  { %2590 = vmatmul.bf16.gmra.mxu3 %v2381_v30  ;;  %3054 = vmatpush.bf16.msrb.mxu1 %v13079_v21 }
 0x164   :  { %v591_v33 = vmax.f32 %v453_v31, 0.0  ;;  %491 = vmatmul.bf16.gmra.mxu0 %v13025_v25 }
 0x165   :  { %v2029_v34 = vpop.f32.mrf.mxu2 }
 0x166   :  { %v2551_v35 = vpop.f32.mrf.mxu3  ;;  %v1081_v36 = vmul.f32 %v830_v32, %v591_v33  ;;  %v2183_v38 = vadd.f32 %v2029_v34, %v1507_v59 }
 0x167   :  { %v1514_v40 = vpop.f32.mrf.mxu1  ;;  %v1807_v53 = vld [vmem:[#allocation2 + $0xb1] sm:$0xff] }
 0x168   :  { %1151 = vst [vmem:[#allocation2 + $0xc0] sm:$0xff] %v1081_v36  ;;  %v2705_v39 = vadd.f32 %v2551_v35, %v2183_v38  ;;  %v2329_v54 = vld [vmem:[#allocation2 + $0xb2] sm:$0xff]  ;;  %v855_v38 = vpop.permute.xlu2 %854 }
 0x169   :  { %v454_v41 = vpop.f32.mrf.mxu0 }
 0x16a   :  { %2769 = vst [vmem:[#allocation3 + $0x20] sm:$0xff] %v2705_v39  ;;  %v455_v42 = vadd.f32 %v13897_v37, %v454_v41 }
 0x16c   :  { %v592_v45 = vmax.f32 %v455_v42, 0.0 }
 0x16d   :  { %v2031_v46 = vpop.f32.mrf.mxu2 }
 0x16e   :  { %v2553_v47 = vpop.f32.mrf.mxu3  ;;  %v1082_v48 = vmul.f32 %v835_v43, %v592_v45  ;;  %v2184_v49 = vadd.f32 %v2031_v46, %v1509_v11 }
 0x16f   :  { %v1808_v50 = vld [vmem:[#allocation2 + $0xb9] sm:$0xff]  ;;  %v1517_v56 = vpop.f32.mrf.mxu1 }
 0x170   :  { %v2330_v51 = vld [vmem:[#allocation2 + $0xba] sm:$0xff]  ;;  %1152 = vst [vmem:[#allocation2 + $0xc8] sm:$0xff] %v1082_v48  ;;  %v2706_v52 = vadd.f32 %v2553_v47, %v2184_v49  ;;  %v1340_v57 = vpack.c.bf16 %v1082_v48, %v1081_v36  ;;  %v1860_v59 = vpack.c.bf16 %v1808_v50, %v1807_v53 }
 0x171   :  { %v457_v58 = vpop.f32.mrf.mxu0  ;;  %v2382_v44 = vpack.c.bf16 %v2330_v51, %v2329_v54  ;;  %v13028_v50 = vld [vmem:[%s16292_s0 + $0xb8] sm:$0xff] }
 0x172   :  { %2770 = vst [vmem:[#allocation3 + $0x28] sm:$0xff] %v2706_v52  ;;  %v458_v60 = vadd.f32 %v13897_v37, %v457_v58  ;;  %1556 = vmatmul.bf16.gmra.mxu1 %v1340_v57  ;;  %2073 = vmatmul.bf16.gmra.mxu2 %v1860_v59  ;;  %v860_v57 = vpop.permute.xlu0 %859 }
 0x173   :  { %2595 = vmatmul.bf16.gmra.mxu3 %v2382_v44 }
 0x174   :  { %v593_v62 = vmax.f32 %v458_v60, 0.0  ;;  %496 = vmatmul.bf16.gmra.mxu0 %v13026_v55 }
 0x175   :  { %v2034_v63 = vpop.f32.mrf.mxu2 }
 0x176   :  { %v2556_v0 = vpop.f32.mrf.mxu3  ;;  %v1083_v1 = vmul.f32 %v840_v61, %v593_v62  ;;  %v2185_v2 = vadd.f32 %v2034_v63, %v1512_v26  ;;  %v13087_v26 = vld [vmem:[%s16294_s4 + $0x138] sm:$0xff] }
 0x177   :  { %v1519_v4 = vpop.f32.mrf.mxu1  ;;  %v1809_v17 = vld [vmem:[#allocation2 + $0xc1] sm:$0xff]  ;;  %3576 = vmatpush.bf16.msrb.mxu2 %v13087_v26 }
 0x178   :  { %1153 = vst [vmem:[#allocation2 + $0xd0] sm:$0xff] %v1083_v1  ;;  %v2707_v3 = vadd.f32 %v2556_v0, %v2185_v2  ;;  %v2331_v18 = vld [vmem:[#allocation2 + $0xc2] sm:$0xff]  ;;  %v865_v2 = vpop.permute.xlu1 %864 }
 0x179   :  { %v459_v5 = vpop.f32.mrf.mxu0 }
 0x17a   :  { %2771 = vst [vmem:[#allocation3 + $0x30] sm:$0xff] %v2707_v3  ;;  %v460_v6 = vadd.f32 %v13897_v37, %v459_v5 }
 0x17c   :  { %v594_v8 = vmax.f32 %v460_v6, 0.0 }
 0x17d   :  { %v2036_v9 = vpop.f32.mrf.mxu2 }
 0x17e   :  { %v2558_v10 = vpop.f32.mrf.mxu3  ;;  %v1084_v11 = vmul.f32 %v845_v7, %v594_v8  ;;  %v2186_v12 = vadd.f32 %v2036_v9, %v1514_v40 }
 0x17f   :  { %v1810_v13 = vld [vmem:[#allocation2 + $0xc9] sm:$0xff]  ;;  %v1522_v19 = vpop.f32.mrf.mxu1 }
 0x180   :  { %v2332_v14 = vld [vmem:[#allocation2 + $0xca] sm:$0xff]  ;;  %1154 = vst [vmem:[#allocation2 + $0xd8] sm:$0xff] %v1084_v11  ;;  %v2708_v16 = vadd.f32 %v2558_v10, %v2186_v12  ;;  %v1341_v20 = vpack.c.bf16 %v1084_v11, %v1083_v1  ;;  %v1861_v23 = vpack.c.bf16 %v1810_v13, %v1809_v17  ;;  %v14072_v1 = vld [vmem:[%s16293_s3] ss:$0 sm:$0xff] }
 0x181   :  { %v462_v22 = vpop.f32.mrf.mxu0  ;;  %v2383_v24 = vpack.c.bf16 %v2332_v14, %v2331_v18  ;;  %v13029_v13 = vld [vmem:[%s16292_s0 + $0xc0] sm:$0xff] }
 0x182   :  { %2772 = vst [vmem:[#allocation3 + $0x38] sm:$0xff] %v2708_v16  ;;  %v463_v25 = vadd.f32 %v13897_v37, %v462_v22  ;;  %1561 = vmatmul.bf16.gmra.mxu1 %v1341_v20  ;;  %2078 = vmatmul.bf16.gmra.mxu2 %v1861_v23  ;;  %v870_v20 = vpop.permute.xlu2 %869 }
 0x183   :  { %2600 = vmatmul.bf16.gmra.mxu3 %v2383_v24 }
 0x184   :  { %v595_v28 = vmax.f32 %v463_v25, 0.0  ;;  %501 = vmatmul.bf16.gmra.mxu0 %v13027_v15 }
 0x185   :  { %v2039_v29 = vpop.f32.mrf.mxu2 }
 0x186   :  { %v2561_v30 = vpop.f32.mrf.mxu3  ;;  %v1085_v31 = vmul.f32 %v850_v27, %v595_v28  ;;  %v2187_v32 = vadd.f32 %v2039_v29, %v1517_v56 }
 0x187   :  { %v1524_v34 = vpop.f32.mrf.mxu1  ;;  %v1811_v48 = vld [vmem:[#allocation2 + $0xd1] sm:$0xff] }
 0x188   :  { %1155 = vst [vmem:[#allocation2 + $0xe0] sm:$0xff] %v1085_v31  ;;  %v2709_v33 = vadd.f32 %v2561_v30, %v2187_v32  ;;  %v2333_v49 = vld [vmem:[#allocation2 + $0xd2] sm:$0xff]  ;;  %v875_v30 = vpop.permute.xlu0 %874 }
 0x189   :  { %v464_v35 = vpop.f32.mrf.mxu0 }
 0x18a   :  { %2773 = vst [vmem:[#allocation3 + $0x40] sm:$0xff] %v2709_v33  ;;  %v465_v36 = vadd.f32 %v13897_v37, %v464_v35 }
 0x18c   :  { %v596_v39 = vmax.f32 %v465_v36, 0.0 }
 0x18d   :  { %v2041_v40 = vpop.f32.mrf.mxu2 }
 0x18e   :  { %v2563_v41 = vpop.f32.mrf.mxu3  ;;  %v1086_v42 = vmul.f32 %v855_v38, %v596_v39  ;;  %v2188_v43 = vadd.f32 %v2041_v40, %v1519_v4 }
 0x18f   :  { %v1812_v45 = vld [vmem:[#allocation2 + $0xd9] sm:$0xff]  ;;  %v1527_v51 = vpop.f32.mrf.mxu1 }
 0x190   :  { %v2334_v46 = vld [vmem:[#allocation2 + $0xda] sm:$0xff]  ;;  %1156 = vst [vmem:[#allocation2 + $0xe8] sm:$0xff] %v1086_v42  ;;  %v2710_v47 = vadd.f32 %v2563_v41, %v2188_v43  ;;  %v1342_v52 = vpack.c.bf16 %v1086_v42, %v1085_v31  ;;  %v1862_v54 = vpack.c.bf16 %v1812_v45, %v1811_v48  ;;  %v13030_v42 = vld [vmem:[%s16292_s0 + $0xc8] sm:$0xff] }
 0x191   :  { %v467_v53 = vpop.f32.mrf.mxu0  ;;  %v2384_v55 = vpack.c.bf16 %v2334_v46, %v2333_v49 }
 0x192   :  { %2774 = vst [vmem:[#allocation3 + $0x48] sm:$0xff] %v2710_v47  ;;  %v468_v56 = vadd.f32 %v13897_v37, %v467_v53  ;;  %1566 = vmatmul.bf16.gmra.mxu1 %v1342_v52  ;;  %2083 = vmatmul.bf16.gmra.mxu2 %v1862_v54 }
 0x193   :  { %2605 = vmatmul.bf16.gmra.mxu3 %v2384_v55 }
 0x194   :  { %v597_v58 = vmax.f32 %v468_v56, 0.0  ;;  %506 = vmatmul.bf16.gmra.mxu0 %v13028_v50  ;;  %v880_v50 = vpop.permute.xlu1 %879 }
 0x195   :  { %v2044_v59 = vpop.f32.mrf.mxu2 }
 0x196   :  { %v2566_v44 = vpop.f32.mrf.mxu3  ;;  %v1087_v60 = vmul.f32 %v860_v57, %v597_v58  ;;  %v2189_v61 = vadd.f32 %v2044_v59, %v1522_v19 }
 0x197   :  { %v1529_v63 = vpop.f32.mrf.mxu1  ;;  %v1813_v11 = vld [vmem:[#allocation2 + $0xe1] sm:$0xff] }
 0x198   :  { %1157 = vst [vmem:[#allocation2 + $0xf0] sm:$0xff] %v1087_v60  ;;  %v2711_v62 = vadd.f32 %v2566_v44, %v2189_v61  ;;  %v2335_v12 = vld [vmem:[#allocation2 + $0xe2] sm:$0xff]  ;;  %v885_v44 = vpop.permute.xlu2 %884 }
 0x199   :  { %v469_v0 = vpop.f32.mrf.mxu0 }
 0x19a   :  { %2775 = vst [vmem:[#allocation3 + $0x50] sm:$0xff] %v2711_v62  ;;  %v470_v37 = vadd.f32 %v14072_v1, %v469_v0 }
 0x19c   :  { %v598_v3 = vmax.f32 %v470_v37, 0.0 }
 0x19d   :  { %v2046_v4 = vpop.f32.mrf.mxu2 }
 0x19e   :  { %v2568_v5 = vpop.f32.mrf.mxu3  ;;  %v1088_v6 = vmul.f32 %v865_v2, %v598_v3  ;;  %v2190_v7 = vadd.f32 %v2046_v4, %v1524_v34  ;;  %v13031_v3 = vld [vmem:[%s16292_s0 + $0xd0] sm:$0xff] }
 0x19f   :  { %v1814_v8 = vld [vmem:[#allocation2 + $0xe9] sm:$0xff]  ;;  %v1532_v14 = vpop.f32.mrf.mxu1 }
 0x1a0   :  { %v2336_v9 = vld [vmem:[#allocation2 + $0xea] sm:$0xff]  ;;  %1158 = vst [vmem:[#allocation2 + $0xf8] sm:$0xff] %v1088_v6  ;;  %v2712_v10 = vadd.f32 %v2568_v5, %v2190_v7  ;;  %v1343_v15 = vpack.c.bf16 %v1088_v6, %v1087_v60  ;;  %v1863_v17 = vpack.c.bf16 %v1814_v8, %v1813_v11 }
 0x1a1   :  { %v472_v16 = vpop.f32.mrf.mxu0  ;;  %v2385_v18 = vpack.c.bf16 %v2336_v9, %v2335_v12  ;;  %v13078_v9 = vld [vmem:[%s16294_s4 + $0xf0] sm:$0xff] }
 0x1a2   :  { %2776 = vst [vmem:[#allocation3 + $0x58] sm:$0xff] %v2712_v10  ;;  %v473_v19 = vadd.f32 %v14072_v1, %v472_v16  ;;  %1571 = vmatmul.bf16.gmra.mxu1 %v1343_v15  ;;  %2088 = vmatmul.bf16.gmra.mxu2 %v1863_v17 }
 0x1a3   :  { %2610 = vmatmul.bf16.gmra.mxu3 %v2385_v18  ;;  %3055 = vmatpush.bf16.msrb.mxu1 %v13078_v9  ;;  %v13086_v18 = vld [vmem:[%s16294_s4 + $0x130] sm:$0xff] }
 0x1a4   :  { %v599_v21 = vmax.f32 %v473_v19, 0.0  ;;  %511 = vmatmul.bf16.gmra.mxu0 %v13029_v13  ;;  %3577 = vmatpush.bf16.msrb.mxu2 %v13086_v18 }
 0x1a5   :  { %v2049_v22 = vpop.f32.mrf.mxu2 }
 0x1a6   :  { %v2571_v23 = vpop.f32.mrf.mxu3  ;;  %v1089_v24 = vmul.f32 %v870_v20, %v599_v21  ;;  %v2191_v25 = vadd.f32 %v2049_v22, %v1527_v51 }
 0x1a7   :  { %v1534_v27 = vpop.f32.mrf.mxu1  ;;  %v1815_v40 = vld [vmem:[#allocation2 + $0xf1] sm:$0xff] }
 0x1a8   :  { %1159 = vst [vmem:[#allocation2 + $0x100] sm:$0xff] %v1089_v24  ;;  %v2713_v26 = vadd.f32 %v2571_v23, %v2191_v25  ;;  %v2337_v41 = vld [vmem:[#allocation2 + $0xf2] sm:$0xff] }
 0x1a9   :  { %v474_v28 = vpop.f32.mrf.mxu0 }
 0x1aa   :  { %2777 = vst [vmem:[#allocation3 + $0x60] sm:$0xff] %v2713_v26  ;;  %v475_v29 = vadd.f32 %v14072_v1, %v474_v28  ;;  %v895_v26 = vpop.permute.xlu1 %894 }
 0x1ac   :  { %v600_v31 = vmax.f32 %v475_v29, 0.0 }
 0x1ad   :  { %v2051_v32 = vpop.f32.mrf.mxu2 }
 0x1ae   :  { %v2573_v33 = vpop.f32.mrf.mxu3  ;;  %v1090_v34 = vmul.f32 %v875_v30, %v600_v31  ;;  %v2192_v35 = vadd.f32 %v2051_v32, %v1529_v63 }
 0x1af   :  { %v1816_v36 = vld [vmem:[#allocation2 + $0xf9] sm:$0xff]  ;;  %v1537_v43 = vpop.f32.mrf.mxu1 }
 0x1b0   :  { %v2338_v38 = vld [vmem:[#allocation2 + $0xfa] sm:$0xff]  ;;  %1160 = vst [vmem:[#allocation2 + $0x108] sm:$0xff] %v1090_v34  ;;  %v2714_v39 = vadd.f32 %v2573_v33, %v2192_v35  ;;  %v1344_v45 = vpack.c.bf16 %v1090_v34, %v1089_v24  ;;  %v1864_v47 = vpack.c.bf16 %v1816_v36, %v1815_v40 }
 0x1b1   :  { %v477_v46 = vpop.f32.mrf.mxu0  ;;  %v2386_v48 = vpack.c.bf16 %v2338_v38, %v2337_v41  ;;  %v13032_v36 = vld [vmem:[%s16292_s0 + $0xd8] sm:$0xff] }
 0x1b2   :  { %2778 = vst [vmem:[#allocation3 + $0x68] sm:$0xff] %v2714_v39  ;;  %v478_v49 = vadd.f32 %v14072_v1, %v477_v46  ;;  %1576 = vmatmul.bf16.gmra.mxu1 %v1344_v45  ;;  %2093 = vmatmul.bf16.gmra.mxu2 %v1864_v47  ;;  %v900_v46 = vpop.permute.xlu2 %899  ;;  %v910_v9 = vpop.permute.xlu1 %909 }
 0x1b3   :  { %2615 = vmatmul.bf16.gmra.mxu3 %v2386_v48 }
 0x1b4   :  { %v601_v51 = vmax.f32 %v478_v49, 0.0  ;;  %516 = vmatmul.bf16.gmra.mxu0 %v13030_v42 }
 0x1b5   :  { %v2054_v52 = vpop.f32.mrf.mxu2 }
 0x1b6   :  { %v2576_v53 = vpop.f32.mrf.mxu3  ;;  %v1091_v54 = vmul.f32 %v880_v50, %v601_v51  ;;  %v2193_v55 = vadd.f32 %v2054_v52, %v1532_v14  ;;  %v890_v14 = vpop.permute.xlu0 %889 }
 0x1b7   :  { %v1539_v57 = vpop.f32.mrf.mxu1  ;;  %v1817_v5 = vld [vmem:[#allocation2 + $0x101] sm:$0xff] }
 0x1b8   :  { %1161 = vst [vmem:[#allocation2 + $0x110] sm:$0xff] %v1091_v54  ;;  %v2715_v56 = vadd.f32 %v2576_v53, %v2193_v55  ;;  %v2339_v6 = vld [vmem:[#allocation2 + $0x102] sm:$0xff] }
 0x1b9   :  { %v479_v58 = vpop.f32.mrf.mxu0 }
 0x1ba   :  { %2779 = vst [vmem:[#allocation3 + $0x70] sm:$0xff] %v2715_v56  ;;  %v480_v59 = vadd.f32 %v14072_v1, %v479_v58 }
 0x1bc   :  { %v602_v60 = vmax.f32 %v480_v59, 0.0 }
 0x1bd   :  { %v2056_v61 = vpop.f32.mrf.mxu2 }
 0x1be   :  { %v2578_v62 = vpop.f32.mrf.mxu3  ;;  %v1092_v63 = vmul.f32 %v885_v44, %v602_v60  ;;  %v2194_v0 = vadd.f32 %v2056_v61, %v1534_v27  ;;  %v905_v56 = vpop.permute.xlu0 %904 }
 0x1bf   :  { %v1818_v37 = vld [vmem:[#allocation2 + $0x109] sm:$0xff]  ;;  %v1542_v7 = vpop.f32.mrf.mxu1 }
 0x1c0   :  { %v2340_v2 = vld [vmem:[#allocation2 + $0x10a] sm:$0xff]  ;;  %1162 = vst [vmem:[#allocation2 + $0x118] sm:$0xff] %v1092_v63  ;;  %v2716_v4 = vadd.f32 %v2578_v62, %v2194_v0  ;;  %v1345_v8 = vpack.c.bf16 %v1092_v63, %v1091_v54  ;;  %v1865_v11 = vpack.c.bf16 %v1818_v37, %v1817_v5  ;;  %v13033_v63 = vld [vmem:[%s16292_s0 + $0xe0] sm:$0xff] }
 0x1c1   :  { %v482_v10 = vpop.f32.mrf.mxu0  ;;  %v2387_v12 = vpack.c.bf16 %v2340_v2, %v2339_v6 }
 0x1c2   :  { %2780 = vst [vmem:[#allocation3 + $0x78] sm:$0xff] %v2716_v4  ;;  %v483_v13 = vadd.f32 %v14072_v1, %v482_v10  ;;  %1581 = vmatmul.bf16.gmra.mxu1 %v1345_v8  ;;  %2098 = vmatmul.bf16.gmra.mxu2 %v1865_v11  ;;  %v14105_v11 = vld [vmem:[#allocation3 + $0x200] sm:$0xff] }
 0x1c3   :  { %2620 = vmatmul.bf16.gmra.mxu3 %v2387_v12 }
 0x1c4   :  { %v603_v15 = vmax.f32 %v483_v13, 0.0  ;;  %521 = vmatmul.bf16.gmra.mxu0 %v13031_v3 }
 0x1c5   :  { %v2059_v16 = vpop.f32.mrf.mxu2 }
 0x1c6   :  { %v2581_v17 = vpop.f32.mrf.mxu3  ;;  %v1093_v19 = vmul.f32 %v890_v14, %v603_v15  ;;  %v2195_v20 = vadd.f32 %v2059_v16, %v1537_v43 }
 0x1c7   :  { %v1544_v22 = vpop.f32.mrf.mxu1  ;;  %v1819_v34 = vld [vmem:[#allocation2 + $0x111] sm:$0xff] }
 0x1c8   :  { %1163 = vst [vmem:[#allocation2 + $0x120] sm:$0xff] %v1093_v19  ;;  %v2717_v21 = vadd.f32 %v2581_v17, %v2195_v20  ;;  %v2341_v35 = vld [vmem:[#allocation2 + $0x112] sm:$0xff] }
 0x1c9   :  { %v484_v23 = vpop.f32.mrf.mxu0 }
 0x1ca   :  { %2781 = vst [vmem:[#allocation3 + $0x80] sm:$0xff] %v2717_v21  ;;  %v485_v24 = vadd.f32 %v14072_v1, %v484_v23  ;;  %v915_v21 = vpop.permute.xlu2 %914 }
 0x1cc   :  { %v604_v25 = vmax.f32 %v485_v24, 0.0 }
 0x1cd   :  { %v2061_v27 = vpop.f32.mrf.mxu2 }
 0x1ce   :  { %v1094_v28 = vmul.f32 %v895_v26, %v604_v25  ;;  %v2196_v29 = vadd.f32 %v2061_v27, %v1539_v57  ;;  %v2583_v30 = vpop.f32.mrf.mxu3 }
 0x1cf   :  { %v1820_v31 = vld [vmem:[#allocation2 + $0x119] sm:$0xff]  ;;  %v1547_v38 = vpop.f32.mrf.mxu1 }
 0x1d0   :  { %v2342_v32 = vld [vmem:[#allocation2 + $0x11a] sm:$0xff]  ;;  %1164 = vst [vmem:[#allocation2 + $0x128] sm:$0xff] %v1094_v28  ;;  %v2718_v33 = vadd.f32 %v2583_v30, %v2196_v29  ;;  %v1346_v39 = vpack.c.bf16 %v1094_v28, %v1093_v19  ;;  %v1866_v41 = vpack.c.bf16 %v1820_v31, %v1819_v34  ;;  %v1677_v12 = vadd.f32 %v14105_v11, %v1547_v38  ;;  %v13034_v30 = vld [vmem:[%s16292_s0 + $0xe8] sm:$0xff] }
 0x1d1   :  { %v487_v40 = vpop.f32.mrf.mxu0  ;;  %v2388_v42 = vpack.c.bf16 %v2342_v32, %v2341_v35 }
 0x1d2   :  { %2782 = vst [vmem:[#allocation3 + $0x88] sm:$0xff] %v2718_v33  ;;  %v488_v43 = vadd.f32 %v14072_v1, %v487_v40  ;;  %1586 = vmatmul.bf16.gmra.mxu1 %v1346_v39  ;;  %2103 = vmatmul.bf16.gmra.mxu2 %v1866_v41  ;;  %v920_v41 = vpop.permute.xlu0 %919 }
 0x1d3   :  { %2625 = vmatmul.bf16.gmra.mxu3 %v2388_v42 }
 0x1d4   :  { %v605_v45 = vmax.f32 %v488_v43, 0.0  ;;  %526 = vmatmul.bf16.gmra.mxu0 %v13032_v36 }
 0x1d5   :  { %v2064_v48 = vpop.f32.mrf.mxu2 }
 0x1d6   :  { %v1095_v47 = vmul.f32 %v900_v46, %v605_v45  ;;  %v2586_v49 = vpop.f32.mrf.mxu3  ;;  %v2197_v50 = vadd.f32 %v2064_v48, %v1542_v7 }
 0x1d7   :  { %v1549_v52 = vpop.f32.mrf.mxu1  ;;  %v1821_v61 = vld [vmem:[#allocation2 + $0x121] sm:$0xff] }
 0x1d8   :  { %1165 = vst [vmem:[#allocation2 + $0x130] sm:$0xff] %v1095_v47  ;;  %v2719_v54 = vadd.f32 %v2586_v49, %v2197_v50  ;;  %v2343_v62 = vld [vmem:[#allocation2 + $0x122] sm:$0xff]  ;;  %v1678_v23 = vadd.f32 %v14105_v11, %v1549_v52 }
 0x1d9   :  { %v489_v51 = vpop.f32.mrf.mxu0 }
 0x1da   :  { %v490_v53 = vadd.f32 %v14072_v1, %v489_v51  ;;  %2783 = vst [vmem:[#allocation3 + $0x90] sm:$0xff] %v2719_v54 }
 0x1dc   :  { %v606_v55 = vmax.f32 %v490_v53, 0.0  ;;  %v925_v53 = vpop.permute.xlu1 %924 }
 0x1dd   :  { %v2066_v44 = vpop.f32.mrf.mxu2 }
 0x1de   :  { %v1096_v57 = vmul.f32 %v905_v56, %v606_v55  ;;  %v2588_v60 = vpop.f32.mrf.mxu3  ;;  %v2198_v37 = vadd.f32 %v2066_v44, %v1544_v22 }
 0x1df   :  { %v1822_v58 = vld [vmem:[#allocation2 + $0x129] sm:$0xff]  ;;  %v1552_v5 = vpop.f32.mrf.mxu1 }
 0x1e0   :  { %v2344_v59 = vld [vmem:[#allocation2 + $0x12a] sm:$0xff]  ;;  %1166 = vst [vmem:[#allocation2 + $0x138] sm:$0xff] %v1096_v57  ;;  %v1347_v0 = vpack.c.bf16 %v1096_v57, %v1095_v47  ;;  %v1867_v3 = vpack.c.bf16 %v1822_v58, %v1821_v61  ;;  %v2720_v7 = vadd.f32 %v2588_v60, %v2198_v37  ;;  %v1679_v43 = vadd.f32 %v14105_v11, %v1552_v5 }
 0x1e1   :  { %v492_v2 = vpop.f32.mrf.mxu0  ;;  %v2389_v4 = vpack.c.bf16 %v2344_v59, %v2343_v62  ;;  %v13035_v58 = vld [vmem:[%s16292_s0 + $0xf0] sm:$0xff] }
 0x1e2   :  { %v493_v6 = vadd.f32 %v14072_v1, %v492_v2  ;;  %1591 = vmatmul.bf16.gmra.mxu1 %v1347_v0  ;;  %2784 = vst [vmem:[#allocation3 + $0x98] sm:$0xff] %v2720_v7  ;;  %2108 = vmatmul.bf16.gmra.mxu2 %v1867_v3 }
 0x1e3   :  { %2630 = vmatmul.bf16.gmra.mxu3 %v2389_v4 }
 0x1e4   :  { %v607_v8 = vmax.f32 %v493_v6, 0.0  ;;  %531 = vmatmul.bf16.gmra.mxu0 %v13033_v63  ;;  %v13077_v63 = vld [vmem:[%s16294_s4 + $0xe8] sm:$0xff] }
 0x1e5   :  { %v2069_v13 = vpop.f32.mrf.mxu2  ;;  %3056 = vmatpush.bf16.msrb.mxu1 %v13077_v63 }
 0x1e6   :  { %v1097_v10 = vmul.f32 %v910_v9, %v607_v8  ;;  %v2591_v14 = vpop.f32.mrf.mxu3  ;;  %v2199_v15 = vadd.f32 %v2069_v13, %v1677_v12  ;;  %v930_v8 = vpop.permute.xlu2 %929  ;;  %v13085_v9 = vld [vmem:[%s16294_s4 + $0x128] sm:$0xff] }
 0x1e7   :  { %v1554_v17 = vpop.f32.mrf.mxu1  ;;  %v1823_v28 = vld [vmem:[#allocation2 + $0x131] sm:$0xff]  ;;  %3578 = vmatpush.bf16.msrb.mxu2 %v13085_v9 }
 0x1e8   :  { %1167 = vst [vmem:[#allocation2 + $0x140] sm:$0xff] %v1097_v10  ;;  %v2721_v19 = vadd.f32 %v2591_v14, %v2199_v15  ;;  %v2345_v29 = vld [vmem:[#allocation2 + $0x132] sm:$0xff]  ;;  %v1680_v55 = vadd.f32 %v14105_v11, %v1554_v17 }
 0x1e9   :  { %v494_v16 = vpop.f32.mrf.mxu0 }
 0x1ea   :  { %v495_v18 = vadd.f32 %v14072_v1, %v494_v16  ;;  %2785 = vst [vmem:[#allocation3 + $0xa0] sm:$0xff] %v2721_v19 }
 0x1ec   :  { %v608_v20 = vmax.f32 %v495_v18, 0.0 }
 0x1ed   :  { %v2071_v26 = vpop.f32.mrf.mxu2 }
 0x1ee   :  { %v1098_v22 = vmul.f32 %v915_v21, %v608_v20  ;;  %v2593_v27 = vpop.f32.mrf.mxu3  ;;  %v2200_v32 = vadd.f32 %v2071_v26, %v1678_v23  ;;  %v935_v21 = vpop.permute.xlu0 %934 }
 0x1ef   :  { %v1824_v24 = vld [vmem:[#allocation2 + $0x139] sm:$0xff]  ;;  %v1557_v36 = vpop.f32.mrf.mxu1 }
 0x1f0   :  { %v2346_v25 = vld [vmem:[#allocation2 + $0x13a] sm:$0xff]  ;;  %1168 = vst [vmem:[#allocation2 + $0x148] sm:$0xff] %v1098_v22  ;;  %v1348_v31 = vpack.c.bf16 %v1098_v22, %v1097_v10  ;;  %v1868_v34 = vpack.c.bf16 %v1824_v24, %v1823_v28  ;;  %v2722_v39 = vadd.f32 %v2593_v27, %v2200_v32  ;;  %v1681_v12 = vadd.f32 %v14105_v11, %v1557_v36 }
 0x1f1   :  { %v497_v33 = vpop.f32.mrf.mxu0  ;;  %v2390_v35 = vpack.c.bf16 %v2346_v25, %v2345_v29 }
 0x1f2   :  { %v498_v38 = vadd.f32 %v14072_v1, %v497_v33  ;;  %1596 = vmatmul.bf16.gmra.mxu1 %v1348_v31  ;;  %2786 = vst [vmem:[#allocation3 + $0xa8] sm:$0xff] %v2722_v39  ;;  %2113 = vmatmul.bf16.gmra.mxu2 %v1868_v34 }
 0x1f3   :  { %2635 = vmatmul.bf16.gmra.mxu3 %v2390_v35 }
 0x1f4   :  { %v609_v40 = vmax.f32 %v498_v38, 0.0  ;;  %536 = vmatmul.bf16.gmra.mxu0 %v13034_v30  ;;  %v13036_v30 = vld [vmem:[%s16292_s0 + $0xf8] sm:$0xff] }
 0x1f5   :  { %v2074_v45 = vpop.f32.mrf.mxu2 }
 0x1f6   :  { %v1099_v42 = vmul.f32 %v920_v41, %v609_v40  ;;  %v2596_v46 = vpop.f32.mrf.mxu3  ;;  %v2201_v47 = vadd.f32 %v2074_v45, %v1679_v43  ;;  %v940_v41 = vpop.permute.xlu1 %939 }
 0x1f7   :  { %v1559_v49 = vpop.f32.mrf.mxu1  ;;  %v1825_v60 = vld [vmem:[#allocation2 + $0x141] sm:$0xff]  ;;  %v950_v9 = vpop.permute.xlu0 %949 }
 0x1f8   :  { %1169 = vst [vmem:[#allocation2 + $0x150] sm:$0xff] %v1099_v42  ;;  %v2723_v51 = vadd.f32 %v2596_v46, %v2201_v47  ;;  %v2347_v61 = vld [vmem:[#allocation2 + $0x142] sm:$0xff]  ;;  %v1682_v23 = vadd.f32 %v14105_v11, %v1559_v49 }
 0x1f9   :  { %v499_v48 = vpop.f32.mrf.mxu0 }
 0x1fa   :  { %v500_v50 = vadd.f32 %v14072_v1, %v499_v48  ;;  %2787 = vst [vmem:[#allocation3 + $0xb0] sm:$0xff] %v2723_v51 }
 0x1fc   :  { %v610_v52 = vmax.f32 %v500_v50, 0.0 }
 0x1fd   :  { %v2076_v59 = vpop.f32.mrf.mxu2 }
 0x1fe   :  { %v1100_v54 = vmul.f32 %v925_v53, %v610_v52  ;;  %v2598_v44 = vpop.f32.mrf.mxu3  ;;  %v2202_v0 = vadd.f32 %v2076_v59, %v1680_v55  ;;  %v945_v53 = vpop.permute.xlu2 %944  ;;  %v13037_v59 = vld [vmem:[%s16292_s0 + $0x100] sm:$0xff] }
 0x1ff   :  { %v1826_v56 = vld [vmem:[#allocation2 + $0x149] sm:$0xff]  ;;  %v1562_v4 = vpop.f32.mrf.mxu1 }
 0x200   :  { %v2348_v57 = vld [vmem:[#allocation2 + $0x14a] sm:$0xff]  ;;  %1170 = vst [vmem:[#allocation2 + $0x158] sm:$0xff] %v1100_v54  ;;  %v1349_v62 = vpack.c.bf16 %v1100_v54, %v1099_v42  ;;  %v1869_v2 = vpack.c.bf16 %v1826_v56, %v1825_v60  ;;  %v2724_v6 = vadd.f32 %v2598_v44, %v2202_v0  ;;  %v1683_v43 = vadd.f32 %v14105_v11, %v1562_v4  ;;  %v13103_v54 = vld [vmem:[%s16294_s4 + $0x1b8] sm:$0xff] }
 0x201   :  { %v502_v37 = vpop.f32.mrf.mxu0  ;;  %v2391_v3 = vpack.c.bf16 %v2348_v57, %v2347_v61  ;;  %4620 = vmatpush.bf16.msrb.mxu0 %v13103_v54  ;;  %v13102_v0 = vld [vmem:[%s16294_s4 + $0x1b0] sm:$0xff] }
 0x202   :  { %v503_v5 = vadd.f32 %v14072_v1, %v502_v37  ;;  %1601 = vmatmul.bf16.gmra.mxu1 %v1349_v62  ;;  %2788 = vst [vmem:[#allocation3 + $0xb8] sm:$0xff] %v2724_v6  ;;  %2118 = vmatmul.bf16.gmra.mxu2 %v1869_v2 }
 0x203   :  { %2640 = vmatmul.bf16.gmra.mxu3 %v2391_v3 }
 0x204   :  { %v611_v7 = vmax.f32 %v503_v5, 0.0  ;;  %541 = vmatmul.bf16.gmra.mxu0 %v13035_v58 }
 0x205   :  { %v2079_v13 = vpop.f32.mrf.mxu2  ;;  %4621 = vmatpush.bf16.msrb.mxu0 %v13102_v0 }
 0x206   :  { %v1101_v10 = vmul.f32 %v930_v8, %v611_v7  ;;  %v2601_v14 = vpop.f32.mrf.mxu3  ;;  %v2203_v15 = vadd.f32 %v2079_v13, %v1681_v12 }
 0x207   :  { %v1564_v17 = vpop.f32.mrf.mxu1  ;;  %v1827_v28 = vld [vmem:[#allocation2 + $0x151] sm:$0xff] }
 0x208   :  { %1171 = vst [vmem:[#allocation2 + $0x160] sm:$0xff] %v1101_v10  ;;  %v2725_v19 = vadd.f32 %v2601_v14, %v2203_v15  ;;  %v2349_v29 = vld [vmem:[#allocation2 + $0x152] sm:$0xff]  ;;  %v1684_v56 = vadd.f32 %v14105_v11, %v1564_v17 }
 0x209   :  { %v504_v16 = vpop.f32.mrf.mxu0 }
 0x20a   :  { %v505_v18 = vadd.f32 %v14072_v1, %v504_v16  ;;  %2789 = vst [vmem:[#allocation3 + $0xc0] sm:$0xff] %v2725_v19  ;;  %v13100_v16 = vld [vmem:[%s16294_s4 + $0x1a0] sm:$0xff] }
 0x20c   :  { %v612_v20 = vmax.f32 %v505_v18, 0.0 }
 0x20d   :  { %v2081_v26 = vpop.f32.mrf.mxu2 }
 0x20e   :  { %v1102_v22 = vmul.f32 %v935_v21, %v612_v20  ;;  %v2603_v27 = vpop.f32.mrf.mxu3  ;;  %v2204_v32 = vadd.f32 %v2081_v26, %v1682_v23  ;;  %v955_v23 = vpop.permute.xlu1 %954 }
 0x20f   :  { %v1828_v24 = vld [vmem:[#allocation2 + $0x159] sm:$0xff]  ;;  %v1567_v36 = vpop.f32.mrf.mxu1 }
 0x210   :  { %v2350_v25 = vld [vmem:[#allocation2 + $0x15a] sm:$0xff]  ;;  %1172 = vst [vmem:[#allocation2 + $0x168] sm:$0xff] %v1102_v22  ;;  %v1350_v31 = vpack.c.bf16 %v1102_v22, %v1101_v10  ;;  %v1870_v34 = vpack.c.bf16 %v1828_v24, %v1827_v28  ;;  %v2726_v39 = vadd.f32 %v2603_v27, %v2204_v32  ;;  %v13101_v10 = vld [vmem:[%s16294_s4 + $0x1a8] sm:$0xff]  ;;  %v1685_v13 = vadd.f32 %v14105_v11, %v1567_v36 }
 0x211   :  { %v507_v33 = vpop.f32.mrf.mxu0  ;;  %v2392_v35 = vpack.c.bf16 %v2350_v25, %v2349_v29  ;;  %4622 = vmatpush.bf16.msrb.mxu0 %v13101_v10  ;;  %v13099_v24 = vld [vmem:[%s16294_s4 + $0x198] sm:$0xff]  ;;  %v13038_v29 = vld [vmem:[%s16292_s0 + $0x108] sm:$0xff] }
 0x212   :  { %v508_v38 = vadd.f32 %v14072_v1, %v507_v33  ;;  %1606 = vmatmul.bf16.gmra.mxu1 %v1350_v31  ;;  %2790 = vst [vmem:[#allocation3 + $0xc8] sm:$0xff] %v2726_v39  ;;  %2123 = vmatmul.bf16.gmra.mxu2 %v1870_v34 }
 0x213   :  { %2645 = vmatmul.bf16.gmra.mxu3 %v2392_v35  ;;  %v13098_v35 = vld [vmem:[%s16294_s4 + $0x190] sm:$0xff] }
 0x214   :  { %v613_v40 = vmax.f32 %v508_v38, 0.0  ;;  %546 = vmatmul.bf16.gmra.mxu0 %v13036_v30 }
 0x215   :  { %v2084_v45 = vpop.f32.mrf.mxu2  ;;  %4623 = vmatpush.bf16.msrb.mxu0 %v13100_v16  ;;  %v13084_v16 = vld [vmem:[%s16294_s4 + $0x120] sm:$0xff] }
 0x216   :  { %v1103_v42 = vmul.f32 %v940_v41, %v613_v40  ;;  %v2606_v46 = vpop.f32.mrf.mxu3  ;;  %v2205_v47 = vadd.f32 %v2084_v45, %v1683_v43  ;;  %3579 = vmatpush.bf16.msrb.mxu2 %v13084_v16 }
 0x217   :  { %v1569_v49 = vpop.f32.mrf.mxu1  ;;  %v1829_v61 = vld [vmem:[#allocation2 + $0x161] sm:$0xff] }
 0x218   :  { %1173 = vst [vmem:[#allocation2 + $0x170] sm:$0xff] %v1103_v42  ;;  %v2727_v51 = vadd.f32 %v2606_v46, %v2205_v47  ;;  %v2351_v62 = vld [vmem:[#allocation2 + $0x162] sm:$0xff]  ;;  %v1686_v26 = vadd.f32 %v14105_v11, %v1569_v49  ;;  %v960_v46 = vpop.permute.xlu2 %959 }
 0x219   :  { %v509_v48 = vpop.f32.mrf.mxu0  ;;  %4624 = vmatpush.bf16.msrb.mxu0 %v13099_v24  ;;  %v13097_v47 = vld [vmem:[%s16294_s4 + $0x188] sm:$0xff] }
 0x21a   :  { %v510_v50 = vadd.f32 %v14072_v1, %v509_v48  ;;  %2791 = vst [vmem:[#allocation3 + $0xd0] sm:$0xff] %v2727_v51 }
 0x21c   :  { %v614_v52 = vmax.f32 %v510_v50, 0.0 }
 0x21d   :  { %v2086_v44 = vpop.f32.mrf.mxu2  ;;  %4625 = vmatpush.bf16.msrb.mxu0 %v13098_v35 }
 0x21e   :  { %v1104_v55 = vmul.f32 %v945_v53, %v614_v52  ;;  %v2608_v60 = vpop.f32.mrf.mxu3  ;;  %v2206_v37 = vadd.f32 %v2086_v44, %v1684_v56  ;;  %v13096_v52 = vld [vmem:[%s16294_s4 + $0x180] sm:$0xff] }
 0x21f   :  { %v1830_v57 = vld [vmem:[#allocation2 + $0x169] sm:$0xff]  ;;  %v1572_v5 = vpop.f32.mrf.mxu1 }
 0x220   :  { %v2352_v58 = vld [vmem:[#allocation2 + $0x16a] sm:$0xff]  ;;  %1174 = vst [vmem:[#allocation2 + $0x178] sm:$0xff] %v1104_v55  ;;  %v1351_v63 = vpack.c.bf16 %v1104_v55, %v1103_v42  ;;  %v1871_v3 = vpack.c.bf16 %v1830_v57, %v1829_v61  ;;  %v2728_v7 = vadd.f32 %v2608_v60, %v2206_v37  ;;  %v1687_v49 = vadd.f32 %v14105_v11, %v1572_v5  ;;  %v13076_v5 = vld [vmem:[%s16294_s4 + $0xe0] sm:$0xff] }
 0x221   :  { %v512_v2 = vpop.f32.mrf.mxu0  ;;  %v2393_v4 = vpack.c.bf16 %v2352_v58, %v2351_v62  ;;  %4626 = vmatpush.bf16.msrb.mxu0 %v13097_v47  ;;  %3057 = vmatpush.bf16.msrb.mxu1 %v13076_v5 }
 0x222   :  { %v513_v6 = vadd.f32 %v14072_v1, %v512_v2  ;;  %1611 = vmatmul.bf16.gmra.mxu1 %v1351_v63  ;;  %2792 = vst [vmem:[#allocation3 + $0xd8] sm:$0xff] %v2728_v7  ;;  %2128 = vmatmul.bf16.gmra.mxu2 %v1871_v3  ;;  %v13039_v63 = vld [vmem:[%s16292_s0 + $0x110] sm:$0xff] }
 0x223   :  { %2650 = vmatmul.bf16.gmra.mxu3 %v2393_v4 }
 0x224   :  { %v615_v8 = vmax.f32 %v513_v6, 0.0  ;;  %551 = vmatmul.bf16.gmra.mxu0 %v13037_v59  ;;  %v965_v59 = vpop.permute.xlu0 %964 }
 0x225   :  { %v2089_v14 = vpop.f32.mrf.mxu2  ;;  %4627 = vmatpush.bf16.msrb.mxu0 %v13096_v52 }
 0x226   :  { %v1105_v12 = vmul.f32 %v950_v9, %v615_v8  ;;  %v2611_v15 = vpop.f32.mrf.mxu3  ;;  %v2207_v17 = vadd.f32 %v2089_v14, %v1685_v13 }
 0x227   :  { %v1574_v19 = vpop.f32.mrf.mxu1  ;;  %v1831_v32 = vld [vmem:[#allocation2 + $0x171] sm:$0xff] }
 0x228   :  { %1175 = vst [vmem:[#allocation2 + $0x180] sm:$0xff] %v1105_v12  ;;  %v2729_v21 = vadd.f32 %v2611_v15, %v2207_v17  ;;  %v2353_v33 = vld [vmem:[#allocation2 + $0x172] sm:$0xff]  ;;  %v1688_v60 = vadd.f32 %v14105_v11, %v1574_v19  ;;  %v970_v15 = vpop.permute.xlu1 %969 }
 0x229   :  { %v514_v18 = vpop.f32.mrf.mxu0 }
 0x22a   :  { %v515_v20 = vadd.f32 %v14072_v1, %v514_v18  ;;  %2793 = vst [vmem:[#allocation3 + $0xe0] sm:$0xff] %v2729_v21 }
 0x22c   :  { %v616_v22 = vmax.f32 %v515_v20, 0.0 }
 0x22d   :  { %v2091_v30 = vpop.f32.mrf.mxu2 }
 0x22e   :  { %v1106_v25 = vmul.f32 %v955_v23, %v616_v22  ;;  %v2613_v31 = vpop.f32.mrf.mxu3  ;;  %v2208_v36 = vadd.f32 %v2091_v30, %v1686_v26 }
 0x22f   :  { %v1832_v27 = vld [vmem:[#allocation2 + $0x179] sm:$0xff]  ;;  %v1577_v41 = vpop.f32.mrf.mxu1 }
 0x230   :  { %v2354_v28 = vld [vmem:[#allocation2 + $0x17a] sm:$0xff]  ;;  %1176 = vst [vmem:[#allocation2 + $0x188] sm:$0xff] %v1106_v25  ;;  %v1352_v34 = vpack.c.bf16 %v1106_v25, %v1105_v12  ;;  %v1872_v39 = vpack.c.bf16 %v1832_v27, %v1831_v32  ;;  %v2730_v43 = vadd.f32 %v2613_v31, %v2208_v36  ;;  %v1689_v18 = vadd.f32 %v14105_v11, %v1577_v41  ;;  %v975_v27 = vpop.permute.xlu2 %974  ;;  %v4396_v32 = vld [vmem:[#allocation2 + $0x28] sm:$0xff] }
 0x231   :  { %v517_v38 = vpop.f32.mrf.mxu0  ;;  %v2394_v40 = vpack.c.bf16 %v2354_v28, %v2353_v33 }
 0x232   :  { %v518_v42 = vadd.f32 %v14072_v1, %v517_v38  ;;  %1616 = vmatmul.bf16.gmra.mxu1 %v1352_v34  ;;  %2794 = vst [vmem:[#allocation3 + $0xe8] sm:$0xff] %v2730_v43  ;;  %2133 = vmatmul.bf16.gmra.mxu2 %v1872_v39  ;;  %v4395_v43 = vld [vmem:[#allocation2 + $0x20] sm:$0xff] }
 0x233   :  { %2655 = vmatmul.bf16.gmra.mxu3 %v2394_v40  ;;  %v14189_v47 = vpack.c.bf16 %v4396_v32, %v4395_v43 }
 0x234   :  { %v617_v45 = vmax.f32 %v518_v42, 0.0  ;;  %556 = vmatmul.bf16.gmra.mxu0 %v13038_v29 }
 0x235   :  { %v2094_v50 = vpop.f32.mrf.mxu2 }
 0x236   :  { %v1107_v48 = vmul.f32 %v960_v46, %v617_v45  ;;  %v2616_v51 = vpop.f32.mrf.mxu3  ;;  %v2209_v53 = vadd.f32 %v2094_v50, %v1687_v49  ;;  %v980_v50 = vpop.permute.xlu0 %979 }
 0x237   :  { %v1579_v55 = vpop.f32.mrf.mxu1  ;;  %v1833_v2 = vld [vmem:[#allocation2 + $0x181] sm:$0xff] }
 0x238   :  { %1177 = vst [vmem:[#allocation2 + $0x190] sm:$0xff] %v1107_v48  ;;  %v2731_v57 = vadd.f32 %v2616_v51, %v2209_v53  ;;  %v2355_v3 = vld [vmem:[#allocation2 + $0x182] sm:$0xff]  ;;  %v1690_v29 = vadd.f32 %v14105_v11, %v1579_v55 }
 0x239   :  { %v519_v54 = vpop.f32.mrf.mxu0 }
 0x23a   :  { %v520_v56 = vadd.f32 %v14072_v1, %v519_v54  ;;  %2795 = vst [vmem:[#allocation3 + $0xf0] sm:$0xff] %v2731_v57 }
 0x23c   :  { %v618_v58 = vmax.f32 %v520_v56, 0.0 }
 0x23d   :  { %v2096_v0 = vpop.f32.mrf.mxu2 }
 0x23e   :  { %v1108_v44 = vmul.f32 %v965_v59, %v618_v58  ;;  %v2618_v37 = vpop.f32.mrf.mxu3  ;;  %v2210_v6 = vadd.f32 %v2096_v0, %v1688_v60  ;;  %v985_v60 = vpop.permute.xlu1 %984 }
 0x23f   :  { %v1834_v61 = vld [vmem:[#allocation2 + $0x189] sm:$0xff]  ;;  %v1582_v10 = vpop.f32.mrf.mxu1 }
 0x240   :  { %v2356_v62 = vld [vmem:[#allocation2 + $0x18a] sm:$0xff]  ;;  %1178 = vst [vmem:[#allocation2 + $0x198] sm:$0xff] %v1108_v44  ;;  %v1353_v4 = vpack.c.bf16 %v1108_v44, %v1107_v48  ;;  %v1873_v8 = vpack.c.bf16 %v1834_v61, %v1833_v2  ;;  %v2732_v13 = vadd.f32 %v2618_v37, %v2210_v6  ;;  %v1691_v52 = vadd.f32 %v14105_v11, %v1582_v10  ;;  %v4398_v37 = vld [vmem:[#allocation2 + $0x38] sm:$0xff] }
 0x241   :  { %v522_v7 = vpop.f32.mrf.mxu0  ;;  %v2395_v9 = vpack.c.bf16 %v2356_v62, %v2355_v3 }
 0x242   :  { %v523_v12 = vadd.f32 %v14072_v1, %v522_v7  ;;  %1621 = vmatmul.bf16.gmra.mxu1 %v1353_v4  ;;  %2796 = vst [vmem:[#allocation3 + $0xf8] sm:$0xff] %v2732_v13  ;;  %2138 = vmatmul.bf16.gmra.mxu2 %v1873_v8 }
 0x243   :  { %2660 = vmatmul.bf16.gmra.mxu3 %v2395_v9 }
 0x244   :  { %v619_v14 = vmax.f32 %v523_v12, 0.0  ;;  %561 = vmatmul.bf16.gmra.mxu0 %v13039_v63  ;;  %v4397_v12 = vld [vmem:[#allocation2 + $0x30] sm:$0xff] }
 0x245   :  { %v2099_v19 = vpop.f32.mrf.mxu2 }
 0x246   :  { %v1109_v17 = vmul.f32 %v970_v15, %v619_v14  ;;  %v2621_v20 = vpop.f32.mrf.mxu3  ;;  %v2211_v21 = vadd.f32 %v2099_v19, %v1689_v18  ;;  %v14196_v15 = vpack.c.bf16 %v4398_v37, %v4397_v12  ;;  %v990_v18 = vpop.permute.xlu2 %989 }
 0x247   :  { %v1584_v23 = vpop.f32.mrf.mxu1  ;;  %v1835_v35 = vld [vmem:[#allocation2 + $0x191] sm:$0xff] }
 0x248   :  { %1179 = vst [vmem:[#allocation2 + $0x1a0] sm:$0xff] %v1109_v17  ;;  %v2733_v25 = vadd.f32 %v2621_v20, %v2211_v21  ;;  %v2357_v36 = vld [vmem:[#allocation2 + $0x192] sm:$0xff]  ;;  %v1692_v62 = vadd.f32 %v14105_v11, %v1584_v23 }
 0x249   :  { %v524_v22 = vpop.f32.mrf.mxu0 }
 0x24a   :  { %v525_v24 = vadd.f32 %v14072_v1, %v524_v22  ;;  %2797 = vst [vmem:[#allocation3 + $0x100] sm:$0xff] %v2733_v25  ;;  %v14203_v25 = vld [vmem:[%s16293_s3] ss:$0 sm:$0xff] }
 0x24c   :  { %v620_v26 = vmax.f32 %v525_v24, 0.0 }
 0x24d   :  { %v2101_v33 = vpop.f32.mrf.mxu2 }
 0x24e   :  { %v1110_v28 = vmul.f32 %v975_v27, %v620_v26  ;;  %v2623_v34 = vpop.f32.mrf.mxu3  ;;  %v2212_v39 = vadd.f32 %v2101_v33, %v1690_v29  ;;  %v995_v29 = vpop.permute.xlu0 %994 }
 0x24f   :  { %v1836_v30 = vld [vmem:[#allocation2 + $0x199] sm:$0xff]  ;;  %v1587_v45 = vpop.f32.mrf.mxu1 }
 0x250   :  { %v2358_v31 = vld [vmem:[#allocation2 + $0x19a] sm:$0xff]  ;;  %1180 = vst [vmem:[#allocation2 + $0x1a8] sm:$0xff] %v1110_v28  ;;  %v1354_v38 = vpack.c.bf16 %v1110_v28, %v1109_v17  ;;  %v1874_v41 = vpack.c.bf16 %v1836_v30, %v1835_v35  ;;  %v2734_v48 = vadd.f32 %v2623_v34, %v2212_v39  ;;  %v1693_v20 = vadd.f32 %v14105_v11, %v1587_v45  ;;  %v4400_v34 = vld [vmem:[#allocation2 + $0x48] sm:$0xff] }
 0x251   :  { %v527_v40 = vpop.f32.mrf.mxu0  ;;  %v2396_v42 = vpack.c.bf16 %v2358_v31, %v2357_v36 }
 0x252   :  { %v528_v46 = vadd.f32 %v14072_v1, %v527_v40  ;;  %1626 = vmatmul.bf16.gmra.mxu1 %v1354_v38  ;;  %2798 = vst [vmem:[#allocation3 + $0x108] sm:$0xff] %v2734_v48  ;;  %2143 = vmatmul.bf16.gmra.mxu2 %v1874_v41 }
 0x253   :  { %2665 = vmatmul.bf16.gmra.mxu3 %v2396_v42 }
 0x254   :  { %v621_v49 = vmax.f32 %v528_v46, 0.0  ;;  %4628 = vmatmul.bf16.vlgmr.msrb.gmra.mxu0 %v14189_v47  ;;  %v4399_v46 = vld [vmem:[#allocation2 + $0x40] sm:$0xff] }
 0x255   :  { %v2104_v53 = vpop.f32.mrf.mxu2 }
 0x256   :  { %v1111_v51 = vmul.f32 %v980_v50, %v621_v49  ;;  %v2626_v54 = vpop.f32.mrf.mxu3  ;;  %v2213_v55 = vadd.f32 %v2104_v53, %v1691_v52  ;;  %v14208_v50 = vpack.c.bf16 %v4400_v34, %v4399_v46  ;;  %v1000_v53 = vpop.permute.xlu1 %999 }
 0x257   :  { %v1589_v57 = vpop.f32.mrf.mxu1  ;;  %v1837_v4 = vld [vmem:[#allocation2 + $0x1a1] sm:$0xff] }
 0x258   :  { %1181 = vst [vmem:[#allocation2 + $0x1b0] sm:$0xff] %v1111_v51  ;;  %v2735_v59 = vadd.f32 %v2626_v54, %v2213_v55  ;;  %v2359_v5 = vld [vmem:[#allocation2 + $0x1a2] sm:$0xff]  ;;  %v1694_v31 = vadd.f32 %v14105_v11, %v1589_v57 }
 0x259   :  { %v529_v56 = vpop.f32.mrf.mxu0 }
 0x25a   :  { %v530_v58 = vadd.f32 %v14072_v1, %v529_v56  ;;  %2799 = vst [vmem:[#allocation3 + $0x110] sm:$0xff] %v2735_v59 }
 0x25c   :  { %v622_v44 = vmax.f32 %v530_v58, 0.0 }
 0x25d   :  { %v2106_v2 = vpop.f32.mrf.mxu2 }
 0x25e   :  { %v1112_v61 = vmul.f32 %v985_v60, %v622_v44  ;;  %v2628_v3 = vpop.f32.mrf.mxu3  ;;  %v2214_v7 = vadd.f32 %v2106_v2, %v1692_v62 }
 0x25f   :  { %v1838_v63 = vld [vmem:[#allocation2 + $0x1a9] sm:$0xff]  ;;  %v1592_v13 = vpop.f32.mrf.mxu1 }
 0x260   :  { %v2360_v0 = vld [vmem:[#allocation2 + $0x1aa] sm:$0xff]  ;;  %1182 = vst [vmem:[#allocation2 + $0x1b8] sm:$0xff] %v1112_v61  ;;  %v1355_v6 = vpack.c.bf16 %v1112_v61, %v1111_v51  ;;  %v1875_v9 = vpack.c.bf16 %v1838_v63, %v1837_v4  ;;  %v2736_v16 = vadd.f32 %v2628_v3, %v2214_v7  ;;  %v1695_v55 = vadd.f32 %v14105_v11, %v1592_v13  ;;  %v1005_v63 = vpop.permute.xlu2 %1004  ;;  %v4402_v4 = vld [vmem:[#allocation2 + $0x58] sm:$0xff] }
 0x261   :  { %v532_v8 = vpop.f32.mrf.mxu0  ;;  %v2397_v10 = vpack.c.bf16 %v2360_v0, %v2359_v5 }
 0x262   :  { %v533_v14 = vadd.f32 %v14072_v1, %v532_v8  ;;  %1631 = vmatmul.bf16.gmra.mxu1 %v1355_v6  ;;  %2800 = vst [vmem:[#allocation3 + $0x118] sm:$0xff] %v2736_v16  ;;  %2148 = vmatmul.bf16.gmra.mxu2 %v1875_v9 }
 0x263   :  { %2670 = vmatmul.bf16.gmra.mxu3 %v2397_v10  ;;  %v13075_v10 = vld [vmem:[%s16294_s4 + $0xd8] sm:$0xff] }
 0x264   :  { %v623_v17 = vmax.f32 %v533_v14, 0.0  ;;  %4633 = vmatmul.bf16.gmra.mxu0 %v14196_v15  ;;  %3058 = vmatpush.bf16.msrb.mxu1 %v13075_v10 }
 0x265   :  { %v2109_v21 = vpop.f32.mrf.mxu2 }
 0x266   :  { %v1113_v19 = vmul.f32 %v990_v18, %v623_v17  ;;  %v2631_v22 = vpop.f32.mrf.mxu3  ;;  %v2215_v23 = vadd.f32 %v2109_v21, %v1693_v20  ;;  %v4401_v17 = vld [vmem:[#allocation2 + $0x50] sm:$0xff] }
 0x267   :  { %v1594_v1 = vpop.f32.mrf.mxu1  ;;  %v1839_v38 = vld [vmem:[#allocation2 + $0x1b1] sm:$0xff]  ;;  %v14220_v20 = vpack.c.bf16 %v4402_v4, %v4401_v17  ;;  %v13072_v4 = vld [vmem:[%s16294_s4 + $0xc0] sm:$0xff] }
 0x268   :  { %1183 = vst [vmem:[#allocation2 + $0x1c0] sm:$0xff] %v1113_v19  ;;  %v2737_v27 = vadd.f32 %v2631_v22, %v2215_v23  ;;  %v2361_v39 = vld [vmem:[#allocation2 + $0x1b2] sm:$0xff]  ;;  %v1696_v37 = vadd.f32 %v14105_v11, %v1594_v1  ;;  %v1010_v23 = vpop.permute.xlu0 %1009 }
 0x269   :  { %v534_v24 = vpop.f32.mrf.mxu0  ;;  %v13082_v17 = vld [vmem:[%s16294_s4 + $0x110] sm:$0xff] }
 0x26a   :  { %v535_v26 = vadd.f32 %v14203_v25, %v534_v24  ;;  %2801 = vst [vmem:[#allocation3 + $0x120] sm:$0xff] %v2737_v27  ;;  %v13083_v24 = vld [vmem:[%s16294_s4 + $0x118] sm:$0xff] }
 0x26b   :  { %3580 = vmatpush.bf16.msrb.mxu2 %v13083_v24 }
 0x26c   :  { %v624_v28 = vmax.f32 %v535_v26, 0.0 }
 0x26d   :  { %v2111_v35 = vpop.f32.mrf.mxu2 }
 0x26e   :  { %v1114_v30 = vmul.f32 %v995_v29, %v624_v28  ;;  %v2633_v36 = vpop.f32.mrf.mxu3  ;;  %v2216_v41 = vadd.f32 %v2111_v35, %v1694_v31  ;;  %v13095_v29 = vld [vmem:[%s16294_s4 + $0x178] sm:$0xff] }
 0x26f   :  { %v1840_v32 = vld [vmem:[#allocation2 + $0x1b9] sm:$0xff]  ;;  %v1597_v48 = vpop.f32.mrf.mxu1  ;;  %4098 = vmatpush.bf16.msrb.mxu3 %v13095_v29  ;;  %3581 = vmatpush.bf16.msrb.mxu2 %v13082_v17 }
 0x270   :  { %v2362_v33 = vld [vmem:[#allocation2 + $0x1ba] sm:$0xff]  ;;  %1184 = vst [vmem:[#allocation2 + $0x1c8] sm:$0xff] %v1114_v30  ;;  %v1356_v40 = vpack.c.bf16 %v1114_v30, %v1113_v19  ;;  %v1876_v43 = vpack.c.bf16 %v1840_v32, %v1839_v38  ;;  %v2738_v51 = vadd.f32 %v2633_v36, %v2216_v41  ;;  %v1697_v26 = vadd.f32 %v14105_v11, %v1597_v48  ;;  %v1015_v36 = vpop.permute.xlu1 %1014  ;;  %v13094_v38 = vld [vmem:[%s16294_s4 + $0x170] sm:$0xff] }
 0x271   :  { %v537_v42 = vpop.f32.mrf.mxu0  ;;  %v2398_v45 = vpack.c.bf16 %v2362_v33, %v2361_v39 }
 0x272   :  { %v538_v49 = vadd.f32 %v14203_v25, %v537_v42  ;;  %1636 = vmatmul.bf16.gmra.mxu1 %v1356_v40  ;;  %2802 = vst [vmem:[#allocation3 + $0x128] sm:$0xff] %v2738_v51  ;;  %2153 = vmatmul.bf16.gmra.mxu2 %v1876_v43  ;;  %v4404_v40 = vld [vmem:[#allocation2 + $0x68] sm:$0xff] }
 0x273   :  { %2675 = vmatmul.bf16.gmra.mxu3 %v2398_v45  ;;  %v13074_v45 = vld [vmem:[%s16294_s4 + $0xd0] sm:$0xff] }
 0x274   :  { %v625_v52 = vmax.f32 %v538_v49, 0.0  ;;  %4638 = vmatmul.bf16.gmra.mxu0 %v14208_v50  ;;  %4099 = vmatpush.bf16.msrb.mxu3 %v13094_v38 }
 0x275   :  { %v2114_v56 = vpop.f32.mrf.mxu2  ;;  %3059 = vmatpush.bf16.msrb.mxu1 %v13074_v45  ;;  %v13088_v45 = vld [vmem:[%s16294_s4 + $0x140] sm:$0xff] }
 0x276   :  { %v1115_v54 = vmul.f32 %v1000_v53, %v625_v52  ;;  %v2636_v57 = vpop.f32.mrf.mxu3  ;;  %v2217_v58 = vadd.f32 %v2114_v56, %v1695_v55  ;;  %v13093_v53 = vld [vmem:[%s16294_s4 + $0x168] sm:$0xff] }
 0x277   :  { %v1599_v44 = vpop.f32.mrf.mxu1  ;;  %v1841_v7 = vld [vmem:[#allocation2 + $0x1c1] sm:$0xff] }
 0x278   :  { %1185 = vst [vmem:[#allocation2 + $0x1d0] sm:$0xff] %v1115_v54  ;;  %v2739_v61 = vadd.f32 %v2636_v57, %v2217_v58  ;;  %v2363_v8 = vld [vmem:[#allocation2 + $0x1c2] sm:$0xff]  ;;  %v1698_v41 = vadd.f32 %v14105_v11, %v1599_v44  ;;  %4100 = vmatpush.bf16.msrb.mxu3 %v13093_v53 }
 0x279   :  { %v539_v59 = vpop.f32.mrf.mxu0  ;;  %v4403_v58 = vld [vmem:[#allocation2 + $0x60] sm:$0xff] }
 0x27a   :  { %v540_v60 = vadd.f32 %v14203_v25, %v539_v59  ;;  %2803 = vst [vmem:[#allocation3 + $0x130] sm:$0xff] %v2739_v61 }
 0x27c   :  { %v626_v62 = vmax.f32 %v540_v60, 0.0  ;;  %v14246_v60 = vpack.c.bf16 %v4404_v40, %v4403_v58 }
 0x27d   :  { %v2116_v5 = vpop.f32.mrf.mxu2 }
 0x27e   :  { %v1116_v0 = vmul.f32 %v1005_v63, %v626_v62  ;;  %v2638_v6 = vpop.f32.mrf.mxu3  ;;  %v2218_v12 = vadd.f32 %v2116_v5, %v1696_v37  ;;  %v13073_v62 = vld [vmem:[%s16294_s4 + $0xc8] sm:$0xff]  ;;  %v13092_v37 = vld [vmem:[%s16294_s4 + $0x160] sm:$0xff] }
 0x27f   :  { %v1842_v2 = vld [vmem:[#allocation2 + $0x1c9] sm:$0xff]  ;;  %v14217_v18 = vpop.f32.mrf.mxu1  ;;  %3060 = vmatpush.bf16.msrb.mxu1 %v13073_v62  ;;  %4101 = vmatpush.bf16.msrb.mxu3 %v13092_v37  ;;  %v2830_v62 = vld [vmem:[#allocation2 + $0x18] sm:$0xff] }
 0x280   :  { %v2364_v3 = vld [vmem:[#allocation2 + $0x1ca] sm:$0xff]  ;;  %1186 = vst [vmem:[#allocation2 + $0x1d8] sm:$0xff] %v1116_v0  ;;  %v1357_v9 = vpack.c.bf16 %v1116_v0, %v1115_v54  ;;  %v1877_v14 = vpack.c.bf16 %v1842_v2, %v1841_v7  ;;  %v2740_v21 = vadd.f32 %v2638_v6, %v2218_v12  ;;  %v1020_v0 = vpop.permute.xlu2 %1019  ;;  %v13091_v7 = vld [vmem:[%s16294_s4 + $0x158] sm:$0xff] }
 0x281   :  { %v542_v13 = vpop.f32.mrf.mxu0  ;;  %v2399_v16 = vpack.c.bf16 %v2364_v3, %v2363_v8  ;;  %v1699_v3 = vadd.f32 %v14105_v11, %v14217_v18  ;;  %v13090_v18 = vld [vmem:[%s16294_s4 + $0x150] sm:$0xff]  ;;  %v4408_v37 = vld [vmem:[#allocation2 + $0x88] sm:$0xff] }
 0x282   :  { %v543_v19 = vadd.f32 %v14203_v25, %v542_v13  ;;  %1641 = vmatmul.bf16.gmra.mxu1 %v1357_v9  ;;  %2804 = vst [vmem:[#allocation3 + $0x138] sm:$0xff] %v2740_v21  ;;  %2158 = vmatmul.bf16.gmra.mxu2 %v1877_v14  ;;  %v4406_v21 = vld [vmem:[#allocation2 + $0x78] sm:$0xff] }
 0x283   :  { %2680 = vmatmul.bf16.gmra.mxu3 %v2399_v16  ;;  %3061 = vmatpush.bf16.msrb.mxu1 %v13072_v4  ;;  %v1025_v16 = vpop.permute.xlu0 %1024 }
 0x284   :  { %v627_v22 = vmax.f32 %v543_v19, 0.0  ;;  %4643 = vmatmul.bf16.gmra.mxu0 %v14220_v20  ;;  %4102 = vmatpush.bf16.msrb.mxu3 %v13091_v7 }
 0x285   :  { %v2119_v27 = vpop.f32.mrf.mxu2 }
 0x286   :  { %v1117_v1 = vmul.f32 %v1010_v23, %v627_v22  ;;  %v2641_v28 = vpop.f32.mrf.mxu3  ;;  %v2219_v30 = vadd.f32 %v2119_v27, %v1697_v26 }
 0x287   :  { %v14230_v32 = vpop.f32.mrf.mxu1  ;;  %v1843_v49 = vld [vmem:[#allocation2 + $0x1d1] sm:$0xff] }
 0x288   :  { %1187 = vst [vmem:[#allocation2 + $0x1e0] sm:$0xff] %v1117_v1  ;;  %v2741_v34 = vadd.f32 %v2641_v28, %v2219_v30  ;;  %v2365_v51 = vld [vmem:[#allocation2 + $0x1d2] sm:$0xff]  ;;  %v1700_v22 = vadd.f32 %v14105_v11, %v14230_v32  ;;  %4103 = vmatpush.bf16.msrb.mxu3 %v13090_v18  ;;  %v13081_v30 = vld [vmem:[%s16294_s4 + $0x108] sm:$0xff] }
 0x289   :  { %v544_v31 = vpop.f32.mrf.mxu0  ;;  %3582 = vmatpush.bf16.msrb.mxu2 %v13081_v30 }
 0x28a   :  { %v545_v33 = vadd.f32 %v14203_v25, %v544_v31  ;;  %2805 = vst [vmem:[#allocation3 + $0x140] sm:$0xff] %v2741_v34  ;;  %v13089_v31 = vld [vmem:[%s16294_s4 + $0x148] sm:$0xff] }
 0x28c   :  { %v628_v35 = vmax.f32 %v545_v33, 0.0  ;;  %4104 = vmatpush.bf16.msrb.mxu3 %v13089_v31 }
 0x28d   :  { %v2121_v46 = vpop.f32.mrf.mxu2 }
 0x28e   :  { %v1118_v39 = vmul.f32 %v1015_v36, %v628_v35  ;;  %v2643_v48 = vpop.f32.mrf.mxu3  ;;  %v2220_v54 = vadd.f32 %v2121_v46, %v1698_v41  ;;  %v4405_v35 = vld [vmem:[#allocation2 + $0x70] sm:$0xff] }
 0x28f   :  { %v1844_v42 = vld [vmem:[#allocation2 + $0x1d9] sm:$0xff]  ;;  %v14243_v59 = vpop.f32.mrf.mxu1 }
 0x290   :  { %v2366_v43 = vld [vmem:[#allocation2 + $0x1da] sm:$0xff]  ;;  %1188 = vst [vmem:[#allocation2 + $0x1e8] sm:$0xff] %v1118_v39  ;;  %v1358_v52 = vpack.c.bf16 %v1118_v39, %v1117_v1  ;;  %v1878_v56 = vpack.c.bf16 %v1844_v42, %v1843_v49  ;;  %v2742_v61 = vadd.f32 %v2643_v48, %v2220_v54  ;;  %v14281_v39 = vpack.c.bf16 %v4406_v21, %v4405_v35  ;;  %v1030_v42 = vpop.permute.xlu1 %1029  ;;  %v14290_v48 = vld [vmem:[#allocation3 + $0x200] sm:$0xff]  ;;  %v1040_v21 = vpop.permute.xlu0 %1039 }
 0x291   :  { %v547_v55 = vpop.f32.mrf.mxu0  ;;  %v2400_v57 = vpack.c.bf16 %v2366_v43, %v2365_v51  ;;  %v13080_v43 = vld [vmem:[%s16294_s4 + $0x100] sm:$0xff]  ;;  %v1701_v49 = vadd.f32 %v14290_v48, %v14243_v59  ;;  %4105 = vmatpush.bf16.msrb.mxu3 %v13088_v45 }
 0x292   :  { %v548_v44 = vadd.f32 %v14203_v25, %v547_v55  ;;  %1646 = vmatmul.bf16.gmra.mxu1 %v1358_v52  ;;  %2806 = vst [vmem:[#allocation3 + $0x148] sm:$0xff] %v2742_v61  ;;  %2163 = vmatmul.bf16.gmra.mxu2 %v1878_v56 }
 0x293   :  { %2685 = vmatmul.bf16.gmra.mxu3 %v2400_v57  ;;  %3583 = vmatpush.bf16.msrb.mxu2 %v13080_v43  ;;  %v4409_v43 = vld [vmem:[#allocation2 + $0x90] sm:$0xff] }
 0x294   :  { %v629_v63 = vmax.f32 %v548_v44, 0.0  ;;  %4648 = vmatmul.bf16.gmra.mxu0 %v14246_v60  ;;  %v1035_v44 = vpop.permute.xlu2 %1034 }
 0x295   :  { %v2124_v5 = vpop.f32.mrf.mxu2 }
 0x296   :  { %v1119_v2 = vmul.f32 %v1020_v0, %v629_v63  ;;  %v2646_v6 = vpop.f32.mrf.mxu3  ;;  %v2221_v8 = vadd.f32 %v2124_v5, %v1699_v3 }
 0x297   :  { %v14263_v10 = vpop.f32.mrf.mxu1  ;;  %v1845_v23 = vld [vmem:[#allocation2 + $0x1e1] sm:$0xff] }
 0x298   :  { %1189 = vst [vmem:[#allocation2 + $0x1f0] sm:$0xff] %v1119_v2  ;;  %v2743_v13 = vadd.f32 %v2646_v6, %v2221_v8  ;;  %v2367_v28 = vld [vmem:[#allocation2 + $0x1e2] sm:$0xff]  ;;  %v1702_v63 = vadd.f32 %v14290_v48, %v14263_v10  ;;  %v2829_v6 = vld [vmem:[#allocation2 + $0x10] sm:$0xff] }
 0x299   :  { %v549_v9 = vpop.f32.mrf.mxu0 }
 0x29a   :  { %v550_v12 = vadd.f32 %v14203_v25, %v549_v9  ;;  %2807 = vst [vmem:[#allocation3 + $0x150] sm:$0xff] %v2743_v13  ;;  %v4407_v13 = vld [vmem:[#allocation2 + $0x80] sm:$0xff] }
 0x29b   :  { %v14298_v18 = vpack.c.bf16 %v4408_v37, %v4407_v13  ;;  %v1055_v37 = vpop.permute.xlu0 %1054  ;;  %v3353_v13 = vld [vmem:[#allocation2 + $0x21] sm:$0xff] }
 0x29c   :  { %v630_v14 = vmax.f32 %v550_v12, 0.0  ;;  %v3879_v37 = vld [vmem:[#allocation2 + $0x42] sm:$0xff] }
 0x29d   :  { %v2126_v26 = vpop.f32.mrf.mxu2 }
 0x29e   :  { %v1120_v19 = vmul.f32 %v1025_v16, %v630_v14  ;;  %v2648_v27 = vpop.f32.mrf.mxu3  ;;  %v2222_v33 = vadd.f32 %v2126_v26, %v1700_v22  ;;  %v2893_v16 = vpack.c.bf16 %v2830_v62, %v2829_v6  ;;  %v3876_v6 = vld [vmem:[#allocation2 + $0x2a] sm:$0xff] }
 0x29f   :  { %v1846_v24 = vld [vmem:[#allocation2 + $0x1e9] sm:$0xff]  ;;  %v1612_v36 = vpop.f32.mrf.mxu1 }
 0x2a0   :  { %v2368_v1 = vld [vmem:[#allocation2 + $0x1ea] sm:$0xff]  ;;  %1190 = vst [vmem:[#allocation2 + $0x1f8] sm:$0xff] %v1120_v19  ;;  %v1359_v29 = vpack.c.bf16 %v1120_v19, %v1119_v2  ;;  %v1879_v32 = vpack.c.bf16 %v1846_v24, %v1845_v23  ;;  %v2744_v40 = vadd.f32 %v2648_v27, %v2222_v33  ;;  %v1703_v23 = vadd.f32 %v14290_v48, %v1612_v36  ;;  %v1045_v33 = vpop.permute.xlu1 %1044  ;;  %v3352_v36 = vld [vmem:[#allocation2 + $0x19] sm:$0xff] }
 0x2a1   :  { %v552_v11 = vpop.f32.mrf.mxu0  ;;  %v2401_v34 = vpack.c.bf16 %v2368_v1, %v2367_v28 }
 0x2a2   :  { %v553_v38 = vadd.f32 %v14203_v25, %v552_v11  ;;  %1651 = vmatmul.bf16.gmra.mxu1 %v1359_v29  ;;  %2808 = vst [vmem:[#allocation3 + $0x158] sm:$0xff] %v2744_v40  ;;  %2168 = vmatmul.bf16.gmra.mxu2 %v1879_v32  ;;  %v3874_v40 = vld [vmem:[#allocation2 + $0x1a] sm:$0xff] }
 0x2a3   :  { %2690 = vmatmul.bf16.gmra.mxu3 %v2401_v34  ;;  %v4410_v34 = vld [vmem:[#allocation2 + $0x98] sm:$0xff] }
 0x2a4   :  { %v631_v41 = vmax.f32 %v553_v38, 0.0  ;;  %4653 = vmatmul.bf16.gmra.mxu0 %v14281_v39 }
 0x2a5   :  { %v2129_v51 = vpop.f32.mrf.mxu2 }
 0x2a6   :  { %v1121_v46 = vmul.f32 %v1030_v42, %v631_v41  ;;  %v2651_v52 = vpop.f32.mrf.mxu3  ;;  %v2223_v53 = vadd.f32 %v2129_v51, %v1701_v49  ;;  %v3351_v49 = vld [vmem:[#allocation2 + $0x11] sm:$0xff] }
 0x2a7   :  { %v1614_v55 = vpop.f32.mrf.mxu1  ;;  %v1847_v4 = vld [vmem:[#allocation2 + $0x1f1] sm:$0xff] }
 0x2a8   :  { %1191 = vst [vmem:[#allocation2 + $0x200] sm:$0xff] %v1121_v46  ;;  %v2745_v57 = vadd.f32 %v2651_v52, %v2223_v53  ;;  %v2369_v5 = vld [vmem:[#allocation2 + $0x1f2] sm:$0xff]  ;;  %v1704_v32 = vadd.f32 %v14290_v48, %v1614_v55  ;;  %v14305_v52 = vpack.c.bf16 %v4410_v34, %v4409_v43 }
 0x2a9   :  { %v554_v54 = vpop.f32.mrf.mxu0  ;;  %v3873_v51 = vld [vmem:[#allocation2 + $0x12] sm:$0xff] }
 0x2aa   :  { %v555_v56 = vadd.f32 %v14203_v25, %v554_v54  ;;  %2809 = vst [vmem:[#allocation3 + $0x160] sm:$0xff] %v2745_v57  ;;  %v3415_v54 = vpack.c.bf16 %v3352_v36, %v3351_v49  ;;  %v1050_v57 = vpop.permute.xlu2 %1049  ;;  %v4413_v34 = vld [vmem:[#allocation2 + $0xb0] sm:$0xff] }
 0x2ab   :  { %v3877_v36 = vld [vmem:[#allocation2 + $0x32] sm:$0xff] }
 0x2ac   :  { %v632_v58 = vmax.f32 %v555_v56, 0.0  ;;  %v3937_v56 = vpack.c.bf16 %v3874_v40, %v3873_v51 }
 0x2ad   :  { %v2131_v2 = vpop.f32.mrf.mxu2 }
 0x2ae   :  { %v1122_v61 = vmul.f32 %v1035_v44, %v632_v58  ;;  %v2653_v3 = vpop.f32.mrf.mxu3  ;;  %v2224_v7 = vadd.f32 %v2131_v2, %v1702_v63  ;;  %v4412_v2 = vld [vmem:[#allocation2 + $0xa8] sm:$0xff] }
 0x2af   :  { %v1848_v59 = vld [vmem:[#allocation2 + $0x1f9] sm:$0xff]  ;;  %v1617_v14 = vpop.f32.mrf.mxu1 }
 0x2b0   :  { %v2370_v0 = vld [vmem:[#allocation2 + $0x1fa] sm:$0xff]  ;;  %1192 = vst [vmem:[#allocation2 + $0x208] sm:$0xff] %v1122_v61  ;;  %v1880_v9 = vpack.c.bf16 %v1848_v59, %v1847_v4  ;;  %v2746_v10 = vadd.f32 %v2653_v3, %v2224_v7  ;;  %v1705_v44 = vadd.f32 %v14290_v48, %v1617_v14  ;;  %v3875_v14 = vld [vmem:[#allocation2 + $0x22] sm:$0xff] }
 0x2b1   :  { %v557_v8 = vpop.f32.mrf.mxu0  ;;  %v2402_v12 = vpack.c.bf16 %v2370_v0, %v2369_v5  ;;  %v3354_v5 = vld [vmem:[#allocation2 + $0x29] sm:$0xff] }
 0x2b2   :  { %v558_v17 = vadd.f32 %v14203_v25, %v557_v8  ;;  %3062 = vmatmul.bf16.vlgmr.msrb.gmra.mxu1 %v2893_v16  ;;  %2810 = vst [vmem:[#allocation3 + $0x168] sm:$0xff] %v2746_v10  ;;  %2173 = vmatmul.bf16.gmra.mxu2 %v1880_v9  ;;  %v4411_v9 = vld [vmem:[#allocation2 + $0xa0] sm:$0xff]  ;;  %v3416_v10 = vpack.c.bf16 %v3354_v5, %v3353_v13 }
 0x2b3   :  { %2695 = vmatmul.bf16.gmra.mxu3 %v2402_v12  ;;  %v14313_v16 = vpack.c.bf16 %v4412_v2, %v4411_v9 }
 0x2b4   :  { %v633_v19 = vmax.f32 %v558_v17, 0.0  ;;  %4658 = vmatmul.bf16.gmra.mxu0 %v14298_v18 }
 0x2b5   :  { %v2134_v24 = vpop.f32.mrf.mxu2 }
 0x2b6   :  { %v1123_v22 = vmul.f32 %v1040_v21, %v633_v19  ;;  %v2656_v1 = vpop.f32.mrf.mxu3  ;;  %v2225_v26 = vadd.f32 %v2134_v24, %v1703_v23  ;;  %v3938_v19 = vpack.c.bf16 %v3876_v6, %v3875_v14 }
 0x2b7   :  { %v1619_v28 = vpop.f32.mrf.mxu1 }
 0x2b8   :  { %1193 = vst [vmem:[#allocation2 + $0x210] sm:$0xff] %v1123_v22  ;;  %v2747_v30 = vadd.f32 %v2656_v1, %v2225_v26 }
 0x2b9   :  { %v559_v27 = vpop.f32.mrf.mxu0 }
 0x2ba   :  { %v560_v29 = vadd.f32 %v14203_v25, %v559_v27  ;;  %2811 = vst [vmem:[#allocation3 + $0x170] sm:$0xff] %v2747_v30 }
 0x2bc   :  { %v634_v31 = vmax.f32 %v560_v29, 0.0  ;;  %v4414_v29 = vld [vmem:[#allocation2 + $0xb8] sm:$0xff] }
 0x2bd   :  { %v2136_v35 = vpop.f32.mrf.mxu2  ;;  %v14323_v40 = vpack.c.bf16 %v4414_v29, %v4413_v34  ;;  %v3881_v29 = vld [vmem:[#allocation2 + $0x52] sm:$0xff] }
 0x2be   :  { %v1124_v11 = vmul.f32 %v1045_v33, %v634_v31  ;;  %v2658_v38 = vpop.f32.mrf.mxu3  ;;  %v2226_v41 = vadd.f32 %v2136_v35, %v1704_v32  ;;  %v3356_v31 = vld [vmem:[#allocation2 + $0x39] sm:$0xff] }
 0x2bf   :  { %v1622_v45 = vpop.f32.mrf.mxu1  ;;  %v3878_v33 = vld [vmem:[#allocation2 + $0x3a] sm:$0xff] }
 0x2c0   :  { %1194 = vst [vmem:[#allocation2 + $0x218] sm:$0xff] %v1124_v11  ;;  %v2748_v53 = vadd.f32 %v2658_v38, %v2226_v41  ;;  %v1707_v21 = vadd.f32 %v14290_v48, %v1622_v45  ;;  %v3355_v38 = vld [vmem:[#allocation2 + $0x31] sm:$0xff]  ;;  %v3939_v43 = vpack.c.bf16 %v3878_v33, %v3877_v36 }
 0x2c1   :  { %v562_v42 = vpop.f32.mrf.mxu0 }
 0x2c2   :  { %v563_v46 = vadd.f32 %v14203_v25, %v562_v42  ;;  %3067 = vmatmul.bf16.gmra.mxu1 %v14189_v47  ;;  %2812 = vst [vmem:[#allocation3 + $0x178] sm:$0xff] %v2748_v53  ;;  %3584 = vmatmul.bf16.vlgmr.msrb.gmra.mxu2 %v3415_v54  ;;  %v1706_v47 = vadd.f32 %v14290_v48, %v1619_v28 }
 0x2c3   :  { %4106 = vmatmul.bf16.vlgmr.msrb.gmra.mxu3 %v3937_v56  ;;  %v3417_v42 = vpack.c.bf16 %v3356_v31, %v3355_v38 }
 0x2c4   :  { %v635_v55 = vmax.f32 %v563_v46, 0.0  ;;  %4663 = vmatmul.bf16.gmra.mxu0 %v14305_v52 }
 0x2c5   :  { %v2139_v25 = vpop.f32.mrf.mxu2 }
 0x2c6   :  { %v1125_v58 = vmul.f32 %v1050_v57, %v635_v55  ;;  %v2661_v61 = vpop.f32.mrf.mxu3  ;;  %v2227_v62 = vadd.f32 %v2139_v25, %v1705_v44  ;;  %v4416_v57 = vld [vmem:[#allocation2 + $0xc8] sm:$0xff] }
 0x2c7   :  { %v1624_v59 = vpop.f32.mrf.mxu1  ;;  %v3358_v44 = vld [vmem:[#allocation2 + $0x49] sm:$0xff] }
 0x2c8   :  { %1195 = vst [vmem:[#allocation2 + $0x220] sm:$0xff] %v1125_v58  ;;  %v2749_v0 = vadd.f32 %v2661_v61, %v2227_v62  ;;  %v1708_v28 = vadd.f32 %v14290_v48, %v1624_v59  ;;  %v3880_v25 = vld [vmem:[#allocation2 + $0x4a] sm:$0xff] }
 0x2c9   :  { %v564_v63 = vpop.f32.mrf.mxu0 }
 0x2ca   :  { %2813 = vst [vmem:[#allocation3 + $0x180] sm:$0xff] %v2749_v0  ;;  %v4415_v63 = vld [vmem:[#allocation2 + $0xc0] sm:$0xff] }
 0x2cb   :  { %v3357_v0 = vld [vmem:[#allocation2 + $0x41] sm:$0xff] }
 0x2cd   :  { %v2141_v3 = vpop.f32.mrf.mxu2 }
 0x2ce   :  { %v2663_v4 = vpop.f32.mrf.mxu3  ;;  %v2228_v7 = vadd.f32 %v2141_v3, %v1706_v47  ;;  %v14333_v47 = vpack.c.bf16 %v4416_v57, %v4415_v63  ;;  %v3418_v3 = vpack.c.bf16 %v3358_v44, %v3357_v0 }
 0x2cf   :  { %v1627_v12 = vpop.f32.mrf.mxu1 }
 0x2d0   :  { %v2750_v17 = vadd.f32 %v2663_v4, %v2228_v7  ;;  %v1709_v45 = vadd.f32 %v14290_v48, %v1627_v12  ;;  %v3940_v4 = vpack.c.bf16 %v3880_v25, %v3879_v37 }
 0x2d1   :  { %v14311_v8 = vpop.f32.mrf.mxu0 }
 0x2d2   :  { %3072 = vmatmul.bf16.gmra.mxu1 %v14196_v15  ;;  %2814 = vst [vmem:[#allocation3 + $0x188] sm:$0xff] %v2750_v17  ;;  %3589 = vmatmul.bf16.gmra.mxu2 %v3416_v10  ;;  %v4418_v10 = vld [vmem:[#allocation2 + $0xd8] sm:$0xff] }
 0x2d3   :  { %4111 = vmatmul.bf16.gmra.mxu3 %v3938_v19 }
 0x2d4   :  { %4668 = vmatmul.bf16.gmra.mxu0 %v14313_v16 }
 0x2d5   :  { %v2144_v22 = vpop.f32.mrf.mxu2 }
 0x2d6   :  { %v2666_v23 = vpop.f32.mrf.mxu3  ;;  %v2229_v24 = vadd.f32 %v2144_v22, %v1707_v21  ;;  %v3360_v21 = vld [vmem:[#allocation2 + $0x59] sm:$0xff] }
 0x2d7   :  { %v1629_v26 = vpop.f32.mrf.mxu1  ;;  %v3882_v22 = vld [vmem:[#allocation2 + $0x5a] sm:$0xff] }
 0x2d8   :  { %v2751_v27 = vadd.f32 %v2666_v23, %v2229_v24  ;;  %v1710_v55 = vadd.f32 %v14290_v48, %v1629_v26  ;;  %v4417_v26 = vld [vmem:[#allocation2 + $0xd0] sm:$0xff]  ;;  %v3941_v33 = vpack.c.bf16 %v3882_v22, %v3881_v29 }
 0x2d9   :  { %v14318_v1 = vpop.f32.mrf.mxu0  ;;  %v3885_v22 = vld [vmem:[#allocation2 + $0x72] sm:$0xff] }
 0x2da   :  { %2815 = vst [vmem:[#allocation3 + $0x190] sm:$0xff] %v2751_v27 }
 0x2dd   :  { %v2146_v30 = vpop.f32.mrf.mxu2 }
 0x2de   :  { %v2668_v15 = vpop.f32.mrf.mxu3  ;;  %v2230_v11 = vadd.f32 %v2146_v30, %v1708_v28  ;;  %v3359_v28 = vld [vmem:[#allocation2 + $0x51] sm:$0xff]  ;;  %v14343_v30 = vpack.c.bf16 %v4418_v10, %v4417_v26 }
 0x2df   :  { %v1632_v35 = vpop.f32.mrf.mxu1  ;;  %v3419_v31 = vpack.c.bf16 %v3360_v21, %v3359_v28  ;;  %v3363_v21 = vld [vmem:[#allocation2 + $0x71] sm:$0xff] }
 0x2e0   :  { %v2752_v41 = vadd.f32 %v2668_v15, %v2230_v11  ;;  %v1711_v5 = vadd.f32 %v14290_v48, %v1632_v35 }
 0x2e1   :  { %v14321_v32 = vpop.f32.mrf.mxu0 }
 0x2e2   :  { %3077 = vmatmul.bf16.gmra.mxu1 %v14208_v50  ;;  %2816 = vst [vmem:[#allocation3 + $0x198] sm:$0xff] %v2752_v41  ;;  %3594 = vmatmul.bf16.gmra.mxu2 %v3417_v42 }
 0x2e3   :  { %4116 = vmatmul.bf16.gmra.mxu3 %v3939_v43 }
 0x2e4   :  { %4673 = vmatmul.bf16.gmra.mxu0 %v14323_v40 }
 0x2e5   :  { %v2149_v46 = vpop.f32.mrf.mxu2 }
 0x2e6   :  { %v2671_v49 = vpop.f32.mrf.mxu3  ;;  %v2231_v51 = vadd.f32 %v2149_v46, %v1709_v45  ;;  %v4420_v45 = vld [vmem:[#allocation2 + $0xe8] sm:$0xff] }
 0x2e7   :  { %v1634_v54 = vpop.f32.mrf.mxu1 }
 0x2e8   :  { %v2753_v56 = vadd.f32 %v2671_v49, %v2231_v51  ;;  %v1712_v17 = vadd.f32 %v14290_v48, %v1634_v54  ;;  %v3362_v49 = vld [vmem:[#allocation2 + $0x69] sm:$0xff] }
 0x2e9   :  { %v14328_v53 = vpop.f32.mrf.mxu0  ;;  %v3884_v51 = vld [vmem:[#allocation2 + $0x6a] sm:$0xff] }
 0x2ea   :  { %2817 = vst [vmem:[#allocation3 + $0x1a0] sm:$0xff] %v2753_v56 }
 0x2ed   :  { %v2151_v58 = vpop.f32.mrf.mxu2 }
 0x2ee   :  { %v2673_v50 = vpop.f32.mrf.mxu3  ;;  %v2232_v61 = vadd.f32 %v2151_v58, %v1710_v55  ;;  %v4419_v55 = vld [vmem:[#allocation2 + $0xe0] sm:$0xff] }
 0x2ef   :  { %v1637_v59 = vpop.f32.mrf.mxu1  ;;  %v3361_v58 = vld [vmem:[#allocation2 + $0x61] sm:$0xff]  ;;  %v14353_v44 = vpack.c.bf16 %v4420_v45, %v4419_v55  ;;  %v3888_v45 = vld [vmem:[#allocation2 + $0x8a] sm:$0xff] }
 0x2f0   :  { %v2754_v2 = vadd.f32 %v2673_v50, %v2232_v61  ;;  %v1713_v11 = vadd.f32 %v14290_v48, %v1637_v59  ;;  %v3883_v50 = vld [vmem:[#allocation2 + $0x62] sm:$0xff]  ;;  %v3420_v61 = vpack.c.bf16 %v3362_v49, %v3361_v58 }
 0x2f1   :  { %v14331_v62 = vpop.f32.mrf.mxu0  ;;  %v3942_v63 = vpack.c.bf16 %v3884_v51, %v3883_v50  ;;  %v3365_v51 = vld [vmem:[#allocation2 + $0x81] sm:$0xff] }
 0x2f2   :  { %3082 = vmatmul.bf16.gmra.mxu1 %v14220_v20  ;;  %2818 = vst [vmem:[#allocation3 + $0x1a8] sm:$0xff] %v2754_v2  ;;  %3599 = vmatmul.bf16.gmra.mxu2 %v3418_v3 }
 0x2f3   :  { %4121 = vmatmul.bf16.gmra.mxu3 %v3940_v4 }
 0x2f4   :  { %4678 = vmatmul.bf16.gmra.mxu0 %v14333_v47 }
 0x2f5   :  { %v2154_v6 = vpop.f32.mrf.mxu2 }
 0x2f6   :  { %v2676_v7 = vpop.f32.mrf.mxu3  ;;  %v2233_v9 = vadd.f32 %v2154_v6, %v1711_v5 }
 0x2f7   :  { %v1639_v13 = vpop.f32.mrf.mxu1 }
 0x2f8   :  { %v2755_v14 = vadd.f32 %v2676_v7, %v2233_v9  ;;  %v1714_v43 = vadd.f32 %v14290_v48, %v1639_v13  ;;  %v4422_v7 = vld [vmem:[#allocation2 + $0xf8] sm:$0xff] }
 0x2f9   :  { %v14338_v12 = vpop.f32.mrf.mxu0  ;;  %v3364_v13 = vld [vmem:[#allocation2 + $0x79] sm:$0xff] }
 0x2fa   :  { %2819 = vst [vmem:[#allocation3 + $0x1b0] sm:$0xff] %v2755_v14  ;;  %v3886_v14 = vld [vmem:[#allocation2 + $0x7a] sm:$0xff] }
 0x2fb   :  { %v3943_v28 = vpack.c.bf16 %v3886_v14, %v3885_v22  ;;  %v4425_v14 = vld [vmem:[#allocation2 + $0x110] sm:$0xff] }
 0x2fd   :  { %v2156_v19 = vpop.f32.mrf.mxu2 }
 0x2fe   :  { %v2678_v20 = vpop.f32.mrf.mxu3  ;;  %v2234_v23 = vadd.f32 %v2156_v19, %v1712_v17  ;;  %v4421_v19 = vld [vmem:[#allocation2 + $0xf0] sm:$0xff] }
 0x2ff   :  { %v1642_v27 = vpop.f32.mrf.mxu1 }
 0x300   :  { %v2756_v15 = vadd.f32 %v2678_v20, %v2234_v23  ;;  %v1715_v59 = vadd.f32 %v14290_v48, %v1642_v27  ;;  %v14363_v23 = vpack.c.bf16 %v4422_v7, %v4421_v19  ;;  %v3421_v27 = vpack.c.bf16 %v3364_v13, %v3363_v21  ;;  %v3367_v19 = vld [vmem:[#allocation2 + $0x91] sm:$0xff] }
 0x301   :  { %v14341_v24 = vpop.f32.mrf.mxu0 }
 0x302   :  { %3087 = vmatmul.bf16.gmra.mxu1 %v14246_v60  ;;  %2820 = vst [vmem:[#allocation3 + $0x1b8] sm:$0xff] %v2756_v15  ;;  %3604 = vmatmul.bf16.gmra.mxu2 %v3419_v31 }
 0x303   :  { %4126 = vmatmul.bf16.gmra.mxu3 %v3941_v33 }
 0x304   :  { %4683 = vmatmul.bf16.gmra.mxu0 %v14343_v30 }
 0x305   :  { %v2159_v34 = vpop.f32.mrf.mxu2 }
 0x306   :  { %v2681_v35 = vpop.f32.mrf.mxu3  ;;  %v2235_v38 = vadd.f32 %v2159_v34, %v1713_v11 }
 0x307   :  { %v1644_v41 = vpop.f32.mrf.mxu1 }
 0x308   :  { %v2757_v42 = vadd.f32 %v2681_v35, %v2235_v38  ;;  %v1716_v6 = vadd.f32 %v14290_v48, %v1644_v41  ;;  %v4424_v41 = vld [vmem:[#allocation2 + $0x108] sm:$0xff] }
 0x309   :  { %v14348_v36 = vpop.f32.mrf.mxu0 }
 0x30a   :  { %2821 = vst [vmem:[#allocation3 + $0x1c0] sm:$0xff] %v2757_v42 }
 0x30d   :  { %v2161_v46 = vpop.f32.mrf.mxu2 }
 0x30e   :  { %v2683_v60 = vpop.f32.mrf.mxu3  ;;  %v2236_v54 = vadd.f32 %v2161_v46, %v1714_v43  ;;  %v3366_v43 = vld [vmem:[#allocation2 + $0x89] sm:$0xff] }
 0x30f   :  { %v1647_v57 = vpop.f32.mrf.mxu1  ;;  %v3422_v58 = vpack.c.bf16 %v3366_v43, %v3365_v51  ;;  %v3370_v43 = vld [vmem:[#allocation2 + $0xa9] sm:$0xff] }
 0x310   :  { %v2758_v25 = vadd.f32 %v2683_v60, %v2236_v54  ;;  %v1717_v29 = vadd.f32 %v14290_v48, %v1647_v57  ;;  %v4423_v60 = vld [vmem:[#allocation2 + $0x100] sm:$0xff] }
 0x311   :  { %v14351_v56 = vpop.f32.mrf.mxu0  ;;  %v3887_v54 = vld [vmem:[#allocation2 + $0x82] sm:$0xff]  ;;  %v14371_v55 = vpack.c.bf16 %v4424_v41, %v4423_v60 }
 0x312   :  { %3092 = vmatmul.bf16.gmra.mxu1 %v14281_v39  ;;  %2822 = vst [vmem:[#allocation3 + $0x1c8] sm:$0xff] %v2758_v25  ;;  %3609 = vmatmul.bf16.gmra.mxu2 %v3420_v61  ;;  %v3944_v50 = vpack.c.bf16 %v3888_v45, %v3887_v54  ;;  %v3892_v45 = vld [vmem:[#allocation2 + $0xaa] sm:$0xff]  ;;  %v4427_v60 = vld [vmem:[#allocation2 + $0x120] sm:$0xff] }
 0x313   :  { %4131 = vmatmul.bf16.gmra.mxu3 %v3942_v63  ;;  %v3369_v54 = vld [vmem:[#allocation2 + $0xa1] sm:$0xff] }
 0x314   :  { %4688 = vmatmul.bf16.gmra.mxu0 %v14353_v44 }
 0x315   :  { %v2164_v0 = vpop.f32.mrf.mxu2 }
 0x316   :  { %v2686_v37 = vpop.f32.mrf.mxu3  ;;  %v2237_v2 = vadd.f32 %v2164_v0, %v1715_v59 }
 0x317   :  { %v1649_v4 = vpop.f32.mrf.mxu1 }
 0x318   :  { %v2759_v5 = vadd.f32 %v2686_v37, %v2237_v2  ;;  %v1718_v38 = vadd.f32 %v14290_v48, %v1649_v4 }
 0x319   :  { %v14358_v3 = vpop.f32.mrf.mxu0 }
 0x31a   :  { %2823 = vst [vmem:[#allocation3 + $0x1d0] sm:$0xff] %v2759_v5 }
 0x31d   :  { %v2166_v9 = vpop.f32.mrf.mxu2 }
 0x31e   :  { %v2688_v39 = vpop.f32.mrf.mxu3  ;;  %v2238_v17 = vadd.f32 %v2166_v9, %v1716_v6  ;;  %v3368_v9 = vld [vmem:[#allocation2 + $0x99] sm:$0xff] }
 0x31f   :  { %v1652_v20 = vpop.f32.mrf.mxu1 }
 0x320   :  { %v2760_v26 = vadd.f32 %v2688_v39, %v2238_v17  ;;  %v1719_v61 = vadd.f32 %v14290_v48, %v1652_v20  ;;  %v3890_v39 = vld [vmem:[#allocation2 + $0x9a] sm:$0xff]  ;;  %v3889_v20 = vld [vmem:[#allocation2 + $0x92] sm:$0xff] }
 0x321   :  { %v14361_v10 = vpop.f32.mrf.mxu0 }
 0x322   :  { %3097 = vmatmul.bf16.gmra.mxu1 %v14298_v18  ;;  %2824 = vst [vmem:[#allocation3 + $0x1d8] sm:$0xff] %v2760_v26  ;;  %3614 = vmatmul.bf16.gmra.mxu2 %v3421_v27  ;;  %v3423_v26 = vpack.c.bf16 %v3368_v9, %v3367_v19  ;;  %v3945_v27 = vpack.c.bf16 %v3890_v39, %v3889_v20  ;;  %v2928_v9 = vld [vmem:[#allocation3 + $0x18] sm:$0xff]  ;;  %v3372_v19 = vld [vmem:[#allocation2 + $0xb9] sm:$0xff] }
 0x323   :  { %4136 = vmatmul.bf16.gmra.mxu3 %v3943_v28  ;;  %v3894_v20 = vld [vmem:[#allocation2 + $0xba] sm:$0xff] }
 0x324   :  { %4693 = vmatmul.bf16.gmra.mxu0 %v14363_v23 }
 0x325   :  { %v2169_v15 = vpop.f32.mrf.mxu2 }
 0x326   :  { %v2691_v31 = vpop.f32.mrf.mxu3  ;;  %v2239_v33 = vadd.f32 %v2169_v15, %v1717_v29 }
 0x327   :  { %v1654_v11 = vpop.f32.mrf.mxu1 }
 0x328   :  { %v2761_v34 = vadd.f32 %v2691_v31, %v2239_v33  ;;  %v1720_v4 = vadd.f32 %v14290_v48, %v1654_v11  ;;  %v2925_v48 = vld [vmem:[#allocation3] sm:$0xff] }
 0x329   :  { %v14368_v35 = vpop.f32.mrf.mxu0 }
 0x32a   :  { %2825 = vst [vmem:[#allocation3 + $0x1e0] sm:$0xff] %v2761_v34 }
 0x32d   :  { %v2171_v42 = vpop.f32.mrf.mxu2 }
 0x32e   :  { %v2693_v18 = vpop.f32.mrf.mxu3  ;;  %v2240_v46 = vadd.f32 %v2171_v42, %v1718_v38  ;;  %v2926_v38 = vld [vmem:[#allocation3 + $0x8] sm:$0xff]  ;;  %v4428_v42 = vld [vmem:[#allocation2 + $0x128] sm:$0xff] }
 0x32f   :  { %v3063_v49 = vpop.f32.mrf.mxu1 }
 0x330   :  { %v2762_v57 = vadd.f32 %v2693_v18, %v2240_v46  ;;  %v3223_v28 = vadd.f32 %v3063_v49, %v2925_v48  ;;  %v3891_v49 = vld [vmem:[#allocation2 + $0xa2] sm:$0xff]  ;;  %v3371_v48 = vld [vmem:[#allocation2 + $0xb1] sm:$0xff] }
 0x331   :  { %v14375_v25 = vpop.f32.mrf.mxu0 }
 0x332   :  { %3102 = vmatmul.bf16.gmra.mxu1 %v14305_v52  ;;  %2826 = vst [vmem:[#allocation3 + $0x1e8] sm:$0xff] %v2762_v57  ;;  %3619 = vmatmul.bf16.gmra.mxu2 %v3422_v58  ;;  %v4426_v52 = vld [vmem:[#allocation2 + $0x118] sm:$0xff]  ;;  %v14387_v57 = vpack.c.bf16 %v4428_v42, %v4427_v60  ;;  %v4432_v60 = vld [vmem:[#allocation2 + $0x148] sm:$0xff] }
 0x333   :  { %4141 = vmatmul.bf16.gmra.mxu3 %v3944_v50  ;;  %v14381_v21 = vpack.c.bf16 %v4426_v52, %v4425_v14 }
 0x334   :  { %4698 = vmatmul.bf16.gmra.mxu0 %v14371_v55 }
 0x335   :  { %v2174_v63 = vpop.f32.mrf.mxu2 }
 0x336   :  { %v2696_v59 = vpop.f32.mrf.mxu3  ;;  %v2241_v0 = vadd.f32 %v2174_v63, %v1719_v61  ;;  %v3424_v61 = vpack.c.bf16 %v3370_v43, %v3369_v54  ;;  %v3946_v63 = vpack.c.bf16 %v3892_v45, %v3891_v49  ;;  %v2930_v45 = vld [vmem:[#allocation3 + $0x28] sm:$0xff]  ;;  %v3374_v49 = vld [vmem:[#allocation2 + $0xc9] sm:$0xff] }
 0x337   :  { %v3065_v37 = vpop.f32.mrf.mxu1 }
 0x338   :  { %v2763_v2 = vadd.f32 %v2696_v59, %v2241_v0  ;;  %v3224_v41 = vadd.f32 %v3065_v37, %v2926_v38  ;;  %v2927_v59 = vld [vmem:[#allocation3 + $0x10] sm:$0xff] }
 0x339   :  { %v14379_v5 = vpop.f32.mrf.mxu0 }
 0x33a   :  { %2827 = vst [vmem:[#allocation3 + $0x1f0] sm:$0xff] %v2763_v2 }
 0x33d   :  { %v2176_v6 = vpop.f32.mrf.mxu2 }
 0x33e   :  { %v2698_v7 = vpop.f32.mrf.mxu3  ;;  %v2242_v13 = vadd.f32 %v2176_v6, %v1720_v4 }
 0x33f   :  { %v3068_v17 = vpop.f32.mrf.mxu1 }
 0x340   :  { %v2764_v22 = vadd.f32 %v2698_v7, %v2242_v13  ;;  %v3225_v0 = vadd.f32 %v3068_v17, %v2927_v59  ;;  %v4430_v13 = vld [vmem:[#allocation2 + $0x138] sm:$0xff]  ;;  %v4431_v59 = vld [vmem:[#allocation2 + $0x140] sm:$0xff] }
 0x341   :  { %v14385_v31 = vpop.f32.mrf.mxu0  ;;  %v3893_v17 = vld [vmem:[#allocation2 + $0xb2] sm:$0xff] }
 0x342   :  { %3107 = vmatmul.bf16.gmra.mxu1 %v14313_v16  ;;  %2828 = vst [vmem:[#allocation3 + $0x1f8] sm:$0xff] %v2764_v22  ;;  %3624 = vmatmul.bf16.gmra.mxu2 %v3423_v26  ;;  %v4429_v26 = vld [vmem:[#allocation2 + $0x130] sm:$0xff] }
 0x343   :  { %4146 = vmatmul.bf16.gmra.mxu3 %v3945_v27 }
 0x344   :  { %4703 = vmatmul.bf16.gmra.mxu0 %v14381_v21 }
 0x345   :  { %v3585_v29 = vpop.f32.mrf.mxu2 }
 0x346   :  { %v4107_v15 = vpop.f32.mrf.mxu3  ;;  %v3745_v33 = vadd.f32 %v3585_v29, %v3223_v28  ;;  %v14395_v28 = vpack.c.bf16 %v4430_v13, %v4429_v26  ;;  %v13111_v26 = vld [vmem:[%s16294_s4 + $0x1f8] sm:$0xff] }
 0x347   :  { %v3070_v11 = vpop.f32.mrf.mxu1  ;;  %5142 = vmatpush.bf16.msra.mxu1 %v13111_v26 }
 0x348   :  { %v4267_v34 = vadd.f32 %v4107_v15, %v3745_v33  ;;  %v3226_v39 = vadd.f32 %v3070_v11, %v2928_v9  ;;  %v3425_v15 = vpack.c.bf16 %v3372_v19, %v3371_v48  ;;  %v3947_v33 = vpack.c.bf16 %v3894_v20, %v3893_v17  ;;  %v2929_v11 = vld [vmem:[#allocation3 + $0x20] sm:$0xff]  ;;  %v4434_v17 = vld [vmem:[#allocation2 + $0x158] sm:$0xff] }
 0x349   :  { %v14389_v58 = vpop.f32.mrf.mxu0 }
 0x34a   :  { %4331 = vst [vmem:[#allocation3] sm:$0xff] %v4267_v34 }
 0x34d   :  { %v3587_v18 = vpop.f32.mrf.mxu2 }
 0x34e   :  { %v4109_v16 = vpop.f32.mrf.mxu3  ;;  %v3746_v46 = vadd.f32 %v3587_v18, %v3224_v41 }
 0x34f   :  { %v3073_v51 = vpop.f32.mrf.mxu1 }
 0x350   :  { %v4268_v50 = vadd.f32 %v4109_v16, %v3746_v46  ;;  %v3227_v34 = vadd.f32 %v3073_v51, %v2929_v11 }
 0x351   :  { %v14393_v7 = vpop.f32.mrf.mxu0 }
 0x352   :  { %3112 = vmatmul.bf16.gmra.mxu1 %v14323_v40  ;;  %4332 = vst [vmem:[#allocation3 + $0x8] sm:$0xff] %v4268_v50  ;;  %3629 = vmatmul.bf16.gmra.mxu2 %v3424_v61  ;;  %v3896_v50 = vld [vmem:[#allocation2 + $0xca] sm:$0xff] }
 0x353   :  { %4151 = vmatmul.bf16.gmra.mxu3 %v3946_v63 }
 0x354   :  { %4708 = vmatmul.bf16.gmra.mxu0 %v14387_v57 }
 0x355   :  { %v3590_v37 = vpop.f32.mrf.mxu2 }
 0x356   :  { %v4112_v2 = vpop.f32.mrf.mxu3  ;;  %v3747_v4 = vadd.f32 %v3590_v37, %v3225_v0  ;;  %v3373_v0 = vld [vmem:[#allocation2 + $0xc1] sm:$0xff] }
 0x357   :  { %v3075_v52 = vpop.f32.mrf.mxu1  ;;  %v3895_v37 = vld [vmem:[#allocation2 + $0xc2] sm:$0xff] }
 0x358   :  { %v4269_v6 = vadd.f32 %v4112_v2, %v3747_v4  ;;  %v3228_v46 = vadd.f32 %v3075_v52, %v2930_v45  ;;  %v14403_v2 = vpack.c.bf16 %v4432_v60, %v4431_v59  ;;  %v3948_v9 = vpack.c.bf16 %v3896_v50, %v3895_v37  ;;  %v2931_v52 = vld [vmem:[#allocation3 + $0x30] sm:$0xff] }
 0x359   :  { %v14399_v38 = vpop.f32.mrf.mxu0 }
 0x35a   :  { %4333 = vst [vmem:[#allocation3 + $0x10] sm:$0xff] %v4269_v6  ;;  %v3426_v6 = vpack.c.bf16 %v3374_v49, %v3373_v0 }
 0x35d   :  { %v3592_v14 = vpop.f32.mrf.mxu2 }
 0x35e   :  { %v4114_v40 = vpop.f32.mrf.mxu3  ;;  %v3748_v22 = vadd.f32 %v3592_v14, %v3226_v39 }
 0x35f   :  { %v3078_v27 = vpop.f32.mrf.mxu1 }
 0x360   :  { %v4270_v29 = vadd.f32 %v4114_v40, %v3748_v22  ;;  %v3229_v39 = vadd.f32 %v3078_v27, %v2931_v52  ;;  %v3898_v27 = vld [vmem:[#allocation2 + $0xda] sm:$0xff] }
 0x361   :  { %v14401_v61 = vpop.f32.mrf.mxu0 }
 0x362   :  { %3117 = vmatmul.bf16.gmra.mxu1 %v14333_v47  ;;  %4334 = vst [vmem:[#allocation3 + $0x18] sm:$0xff] %v4270_v29  ;;  %3634 = vmatmul.bf16.gmra.mxu2 %v3425_v15 }
 0x363   :  { %4156 = vmatmul.bf16.gmra.mxu3 %v3947_v33  ;;  %v3376_v33 = vld [vmem:[#allocation2 + $0xd9] sm:$0xff] }
 0x364   :  { %4713 = vmatmul.bf16.gmra.mxu0 %v14395_v28 }
 0x365   :  { %v3595_v41 = vpop.f32.mrf.mxu2 }
 0x366   :  { %v4117_v42 = vpop.f32.mrf.mxu3  ;;  %v3749_v18 = vadd.f32 %v3595_v41, %v3227_v34  ;;  %v4433_v34 = vld [vmem:[#allocation2 + $0x150] sm:$0xff] }
 0x367   :  { %v3080_v16 = vpop.f32.mrf.mxu1 }
 0x368   :  { %v4271_v43 = vadd.f32 %v4117_v42, %v3749_v18  ;;  %v3375_v42 = vld [vmem:[#allocation2 + $0xd1] sm:$0xff] }
 0x369   :  { %v14407_v20 = vpop.f32.mrf.mxu0  ;;  %v3897_v18 = vld [vmem:[#allocation2 + $0xd2] sm:$0xff] }
 0x36a   :  { %4335 = vst [vmem:[#allocation3 + $0x20] sm:$0xff] %v4271_v43  ;;  %v14412_v43 = vpack.c.bf16 %v4434_v17, %v4433_v34  ;;  %v3949_v60 = vpack.c.bf16 %v3898_v27, %v3897_v18 }
 0x36d   :  { %v3597_v54 = vpop.f32.mrf.mxu2 }
 0x36e   :  { %v4119_v47 = vpop.f32.mrf.mxu3  ;;  %v3750_v63 = vadd.f32 %v3597_v54, %v3228_v46  ;;  %v3427_v46 = vpack.c.bf16 %v3376_v33, %v3375_v42  ;;  %v13119_v54 = vld [vmem:[%s16294_s4 + $0x238] sm:$0xff] }
 0x36f   :  { %v3083_v51 = vpop.f32.mrf.mxu1  ;;  %5664 = vmatpush.bf16.msra.mxu2 %v13119_v54  ;;  %v4438_v54 = vld [vmem:[#allocation2 + $0x178] sm:$0xff] }
 0x370   :  { %v4272_v4 = vadd.f32 %v4119_v47, %v3750_v63  ;;  %v2933_v47 = vld [vmem:[#allocation3 + $0x40] sm:$0xff] }
 0x371   :  { %v3231_v49 = vadd.f32 %v3083_v51, %v2933_v47  ;;  %v3377_v51 = vld [vmem:[#allocation2 + $0xe1] sm:$0xff] }
 0x372   :  { %3122 = vmatmul.bf16.gmra.mxu1 %v14343_v30  ;;  %4336 = vst [vmem:[#allocation3 + $0x28] sm:$0xff] %v4272_v4  ;;  %3639 = vmatmul.bf16.gmra.mxu2 %v3426_v6  ;;  %v2932_v30 = vld [vmem:[#allocation3 + $0x38] sm:$0xff] }
 0x373   :  { %4161 = vmatmul.bf16.gmra.mxu3 %v3948_v9  ;;  %v3230_v48 = vadd.f32 %v3080_v16, %v2932_v30  ;;  %v14416_v16 = vpop.f32.mrf.mxu0  ;;  %v4436_v9 = vld [vmem:[#allocation2 + $0x168] sm:$0xff] }
 0x374   :  { %4718 = vmatmul.bf16.gmra.mxu0 %v14403_v2  ;;  %v3899_v30 = vld [vmem:[#allocation2 + $0xe2] sm:$0xff] }
 0x375   :  { %v3600_v13 = vpop.f32.mrf.mxu2 }
 0x376   :  { %v4122_v14 = vpop.f32.mrf.mxu3  ;;  %v3751_v40 = vadd.f32 %v3600_v13, %v3229_v39  ;;  %v3378_v13 = vld [vmem:[#allocation2 + $0xe9] sm:$0xff] }
 0x377   :  { %v3085_v19 = vpop.f32.mrf.mxu1 }
 0x378   :  { %v4273_v22 = vadd.f32 %v4122_v14, %v3751_v40  ;;  %v3900_v14 = vld [vmem:[#allocation2 + $0xea] sm:$0xff] }
 0x37a   :  { %4337 = vst [vmem:[#allocation3 + $0x30] sm:$0xff] %v4273_v22  ;;  %v4435_v22 = vld [vmem:[#allocation2 + $0x160] sm:$0xff] }
 0x37b   :  { %v14421_v4 = vpop.f32.mrf.mxu0 }
 0x37d   :  { %v3602_v29 = vpop.f32.mrf.mxu2 }
 0x37e   :  { %v4124_v15 = vpop.f32.mrf.mxu3  ;;  %v3752_v11 = vadd.f32 %v3602_v29, %v3230_v48  ;;  %v14423_v48 = vpack.c.bf16 %v4436_v9, %v4435_v22  ;;  %v3428_v29 = vpack.c.bf16 %v3378_v13, %v3377_v51 }
 0x37f   :  { %v3088_v41 = vpop.f32.mrf.mxu1 }
 0x380   :  { %v4274_v45 = vadd.f32 %v4124_v15, %v3752_v11  ;;  %v3950_v15 = vpack.c.bf16 %v3900_v14, %v3899_v30 }
 0x382   :  { %3127 = vmatmul.bf16.gmra.mxu1 %v14353_v44  ;;  %4338 = vst [vmem:[#allocation3 + $0x38] sm:$0xff] %v4274_v45  ;;  %3644 = vmatmul.bf16.gmra.mxu2 %v3427_v46  ;;  %v2934_v44 = vld [vmem:[#allocation3 + $0x48] sm:$0xff]  ;;  %v2936_v46 = vld [vmem:[#allocation3 + $0x58] sm:$0xff] }
 0x383   :  { %4166 = vmatmul.bf16.gmra.mxu3 %v3949_v60  ;;  %v3232_v6 = vadd.f32 %v3085_v19, %v2934_v44  ;;  %v2935_v19 = vld [vmem:[#allocation3 + $0x50] sm:$0xff]  ;;  %v14427_v34 = vpop.f32.mrf.mxu0  ;;  %v3379_v44 = vld [vmem:[#allocation2 + $0xf1] sm:$0xff] }
 0x384   :  { %4723 = vmatmul.bf16.gmra.mxu0 %v14412_v43  ;;  %v3233_v33 = vadd.f32 %v3088_v41, %v2935_v19  ;;  %v3901_v41 = vld [vmem:[#allocation2 + $0xf2] sm:$0xff] }
 0x385   :  { %v3605_v50 = vpop.f32.mrf.mxu2 }
 0x386   :  { %v4127_v63 = vpop.f32.mrf.mxu3  ;;  %v3753_v59 = vadd.f32 %v3605_v50, %v3231_v49  ;;  %v3380_v49 = vld [vmem:[#allocation2 + $0xf9] sm:$0xff] }
 0x387   :  { %v3090_v0 = vpop.f32.mrf.mxu1  ;;  %v3902_v50 = vld [vmem:[#allocation2 + $0xfa] sm:$0xff] }
 0x388   :  { %v4275_v37 = vadd.f32 %v4127_v63, %v3753_v59  ;;  %v3234_v60 = vadd.f32 %v3090_v0, %v2936_v46  ;;  %v4437_v59 = vld [vmem:[#allocation2 + $0x170] sm:$0xff]  ;;  %v3951_v13 = vpack.c.bf16 %v3902_v50, %v3901_v41  ;;  %v4439_v46 = vld [vmem:[#allocation2 + $0x180] sm:$0xff] }
 0x389   :  { %v2937_v0 = vld [vmem:[#allocation3 + $0x60] sm:$0xff] }
 0x38a   :  { %4339 = vst [vmem:[#allocation3 + $0x40] sm:$0xff] %v4275_v37 }
 0x38b   :  { %v14431_v9 = vpop.f32.mrf.mxu0 }
 0x38d   :  { %v3607_v52 = vpop.f32.mrf.mxu2 }
 0x38e   :  { %v4129_v39 = vpop.f32.mrf.mxu3  ;;  %v3754_v40 = vadd.f32 %v3607_v52, %v3232_v6  ;;  %v14429_v6 = vpack.c.bf16 %v4438_v54, %v4437_v59  ;;  %v3381_v54 = vld [vmem:[#allocation2 + $0x101] sm:$0xff] }
 0x38f   :  { %v3093_v26 = vpop.f32.mrf.mxu1 }
 0x390   :  { %v4276_v17 = vadd.f32 %v4129_v39, %v3754_v40  ;;  %v3429_v39 = vpack.c.bf16 %v3380_v49, %v3379_v44  ;;  %v3235_v14 = vadd.f32 %v3093_v26, %v2937_v0  ;;  %v3903_v26 = vld [vmem:[#allocation2 + $0x102] sm:$0xff]  ;;  %v13110_v0 = vld [vmem:[%s16294_s4 + $0x1f0] sm:$0xff] }
 0x391   :  { %5143 = vmatpush.bf16.msra.mxu1 %v13110_v0 }
 0x392   :  { %3132 = vmatmul.bf16.gmra.mxu1 %v14363_v23  ;;  %4340 = vst [vmem:[#allocation3 + $0x48] sm:$0xff] %v4276_v17  ;;  %3649 = vmatmul.bf16.gmra.mxu2 %v3428_v29 }
 0x393   :  { %4171 = vmatmul.bf16.gmra.mxu3 %v3950_v15  ;;  %v14435_v29 = vpop.f32.mrf.mxu0  ;;  %v2938_v15 = vld [vmem:[#allocation3 + $0x68] sm:$0xff] }
 0x394   :  { %4728 = vmatmul.bf16.gmra.mxu0 %v14423_v48 }
 0x395   :  { %v3610_v27 = vpop.f32.mrf.mxu2 }
 0x396   :  { %v4132_v11 = vpop.f32.mrf.mxu3  ;;  %v3755_v42 = vadd.f32 %v3610_v27, %v3233_v33  ;;  %v4440_v33 = vld [vmem:[#allocation2 + $0x188] sm:$0xff] }
 0x397   :  { %v3095_v18 = vpop.f32.mrf.mxu1 }
 0x398   :  { %v4277_v45 = vadd.f32 %v4132_v11, %v3755_v42  ;;  %v3236_v19 = vadd.f32 %v3095_v18, %v2938_v15  ;;  %v3382_v11 = vld [vmem:[#allocation2 + $0x109] sm:$0xff]  ;;  %v2939_v18 = vld [vmem:[#allocation3 + $0x70] sm:$0xff] }
 0x399   :  { %v3904_v42 = vld [vmem:[#allocation2 + $0x10a] sm:$0xff]  ;;  %v3430_v49 = vpack.c.bf16 %v3382_v11, %v3381_v54  ;;  %v3906_v15 = vld [vmem:[#allocation2 + $0x11a] sm:$0xff]  ;;  %v3905_v11 = vld [vmem:[#allocation2 + $0x112] sm:$0xff] }
 0x39a   :  { %4341 = vst [vmem:[#allocation3 + $0x50] sm:$0xff] %v4277_v45  ;;  %v3952_v50 = vpack.c.bf16 %v3904_v42, %v3903_v26  ;;  %v3953_v54 = vpack.c.bf16 %v3906_v15, %v3905_v11  ;;  %v2941_v26 = vld [vmem:[#allocation3 + $0x80] sm:$0xff]  ;;  %v3907_v15 = vld [vmem:[#allocation2 + $0x122] sm:$0xff] }
 0x39d   :  { %v3612_v47 = vpop.f32.mrf.mxu2 }
 0x39e   :  { %v4134_v23 = vpop.f32.mrf.mxu3  ;;  %v3756_v63 = vadd.f32 %v3612_v47, %v3234_v60  ;;  %v14437_v47 = vpack.c.bf16 %v4440_v33, %v4439_v46  ;;  %v4441_v33 = vld [vmem:[#allocation2 + $0x190] sm:$0xff] }
 0x39f   :  { %v3098_v37 = vpop.f32.mrf.mxu1 }
 0x3a0   :  { %v4278_v52 = vadd.f32 %v4134_v23, %v3756_v63  ;;  %v14441_v63 = vpop.f32.mrf.mxu0  ;;  %v3237_v59 = vadd.f32 %v3098_v37, %v2939_v18 }
 0x3a2   :  { %3137 = vmatmul.bf16.gmra.mxu1 %v14371_v55  ;;  %4342 = vst [vmem:[#allocation3 + $0x58] sm:$0xff] %v4278_v52  ;;  %3654 = vmatmul.bf16.gmra.mxu2 %v3429_v39 }
 0x3a3   :  { %4176 = vmatmul.bf16.gmra.mxu3 %v3951_v13 }
 0x3a4   :  { %4733 = vmatmul.bf16.gmra.mxu0 %v14429_v6 }
 0x3a5   :  { %v3615_v40 = vpop.f32.mrf.mxu2 }
 0x3a6   :  { %v4137_v22 = vpop.f32.mrf.mxu3  ;;  %v3757_v51 = vadd.f32 %v3615_v40, %v3235_v14  ;;  %v4442_v40 = vld [vmem:[#allocation2 + $0x198] sm:$0xff] }
 0x3a7   :  { %v3100_v30 = vpop.f32.mrf.mxu1  ;;  %v14448_v42 = vpack.c.bf16 %v4442_v40, %v4441_v33  ;;  %v3908_v40 = vld [vmem:[#allocation2 + $0x12a] sm:$0xff] }
 0x3a8   :  { %v4279_v17 = vadd.f32 %v4137_v22, %v3757_v51  ;;  %v3954_v11 = vpack.c.bf16 %v3908_v40, %v3907_v15 }
 0x3aa   :  { %4343 = vst [vmem:[#allocation3 + $0x60] sm:$0xff] %v4279_v17  ;;  %v3384_v17 = vld [vmem:[#allocation2 + $0x119] sm:$0xff] }
 0x3ad   :  { %v3617_v27 = vpop.f32.mrf.mxu2 }
 0x3ae   :  { %v4139_v55 = vpop.f32.mrf.mxu3  ;;  %v3758_v45 = vadd.f32 %v3617_v27, %v3236_v19  ;;  %v14446_v19 = vpop.f32.mrf.mxu0 }
 0x3af   :  { %v3103_v60 = vpop.f32.mrf.mxu1 }
 0x3b0   :  { %v4280_v23 = vadd.f32 %v4139_v55, %v3758_v45  ;;  %v3383_v55 = vld [vmem:[#allocation2 + $0x111] sm:$0xff] }
 0x3b1   :  { %v3431_v46 = vpack.c.bf16 %v3384_v17, %v3383_v55 }
 0x3b2   :  { %3142 = vmatmul.bf16.gmra.mxu1 %v14381_v21  ;;  %4344 = vst [vmem:[#allocation3 + $0x68] sm:$0xff] %v4280_v23  ;;  %3659 = vmatmul.bf16.gmra.mxu2 %v3430_v49  ;;  %v2940_v21 = vld [vmem:[#allocation3 + $0x78] sm:$0xff]  ;;  %v3239_v23 = vadd.f32 %v3103_v60, %v2941_v26 }
 0x3b3   :  { %4181 = vmatmul.bf16.gmra.mxu3 %v3952_v50  ;;  %v3238_v14 = vadd.f32 %v3100_v30, %v2940_v21  ;;  %v13118_v30 = vld [vmem:[%s16294_s4 + $0x230] sm:$0xff]  ;;  %v3385_v60 = vld [vmem:[#allocation2 + $0x121] sm:$0xff] }
 0x3b4   :  { %4738 = vmatmul.bf16.gmra.mxu0 %v14437_v47  ;;  %5665 = vmatpush.bf16.msra.mxu2 %v13118_v30 }
 0x3b5   :  { %v3620_v44 = vpop.f32.mrf.mxu2 }
 0x3b6   :  { %v4142_v41 = vpop.f32.mrf.mxu3  ;;  %v3759_v52 = vadd.f32 %v3620_v44, %v3237_v59  ;;  %v14455_v44 = vpop.f32.mrf.mxu0 }
 0x3b7   :  { %v3105_v39 = vpop.f32.mrf.mxu1 }
 0x3b8   :  { %v4281_v13 = vadd.f32 %v4142_v41, %v3759_v52 }
 0x3ba   :  { %4345 = vst [vmem:[#allocation3 + $0x70] sm:$0xff] %v4281_v13  ;;  %v4444_v13 = vld [vmem:[#allocation2 + $0x1a8] sm:$0xff] }
 0x3bd   :  { %v3622_v22 = vpop.f32.mrf.mxu2 }
 0x3be   :  { %v4144_v51 = vpop.f32.mrf.mxu3  ;;  %v3760_v37 = vadd.f32 %v3622_v22, %v3238_v14  ;;  %v3386_v14 = vld [vmem:[#allocation2 + $0x129] sm:$0xff] }
 0x3bf   :  { %v3108_v27 = vpop.f32.mrf.mxu1  ;;  %v3432_v55 = vpack.c.bf16 %v3386_v14, %v3385_v60  ;;  %v4445_v14 = vld [vmem:[#allocation2 + $0x1b0] sm:$0xff] }
 0x3c0   :  { %v4282_v45 = vadd.f32 %v4144_v51, %v3760_v37  ;;  %v4443_v51 = vld [vmem:[#allocation2 + $0x1a0] sm:$0xff] }
 0x3c1   :  { %v14457_v37 = vpack.c.bf16 %v4444_v13, %v4443_v51  ;;  %v3388_v13 = vld [vmem:[#allocation2 + $0x139] sm:$0xff] }
 0x3c2   :  { %3147 = vmatmul.bf16.gmra.mxu1 %v14387_v57  ;;  %4346 = vst [vmem:[#allocation3 + $0x78] sm:$0xff] %v4282_v45  ;;  %3664 = vmatmul.bf16.gmra.mxu2 %v3431_v46  ;;  %v2942_v57 = vld [vmem:[#allocation3 + $0x88] sm:$0xff]  ;;  %v2943_v45 = vld [vmem:[#allocation3 + $0x90] sm:$0xff] }
 0x3c3   :  { %4186 = vmatmul.bf16.gmra.mxu3 %v3953_v54  ;;  %v3240_v52 = vadd.f32 %v3105_v39, %v2942_v57  ;;  %v14461_v39 = vpop.f32.mrf.mxu0  ;;  %v3241_v46 = vadd.f32 %v3108_v27, %v2943_v45  ;;  %v3909_v27 = vld [vmem:[#allocation2 + $0x132] sm:$0xff] }
 0x3c4   :  { %4743 = vmatmul.bf16.gmra.mxu0 %v14448_v42 }
 0x3c5   :  { %v3625_v49 = vpop.f32.mrf.mxu2 }
 0x3c6   :  { %v4147_v50 = vpop.f32.mrf.mxu3  ;;  %v3761_v18 = vadd.f32 %v3625_v49, %v3239_v23 }
 0x3c7   :  { %v3110_v59 = vpop.f32.mrf.mxu1 }
 0x3c8   :  { %v4283_v41 = vadd.f32 %v4147_v50, %v3761_v18  ;;  %v2944_v50 = vld [vmem:[#allocation3 + $0x98] sm:$0xff] }
 0x3ca   :  { %4347 = vst [vmem:[#allocation3 + $0x80] sm:$0xff] %v4283_v41  ;;  %v3242_v41 = vadd.f32 %v3110_v59, %v2944_v50  ;;  %v2945_v59 = vld [vmem:[#allocation3 + $0xa0] sm:$0xff] }
 0x3cb   :  { %v14463_v18 = vpop.f32.mrf.mxu0 }
 0x3cd   :  { %v3627_v0 = vpop.f32.mrf.mxu2 }
 0x3ce   :  { %v4149_v21 = vpop.f32.mrf.mxu3  ;;  %v3762_v22 = vadd.f32 %v3627_v0, %v3240_v52  ;;  %v3910_v0 = vld [vmem:[#allocation2 + $0x13a] sm:$0xff] }
 0x3cf   :  { %v3113_v17 = vpop.f32.mrf.mxu1 }
 0x3d0   :  { %v4284_v33 = vadd.f32 %v4149_v21, %v3762_v22  ;;  %v3387_v22 = vld [vmem:[#allocation2 + $0x131] sm:$0xff] }
 0x3d1   :  { %v3433_v15 = vpack.c.bf16 %v3388_v13, %v3387_v22 }
 0x3d2   :  { %3152 = vmatmul.bf16.gmra.mxu1 %v14395_v28  ;;  %4348 = vst [vmem:[#allocation3 + $0x88] sm:$0xff] %v4284_v33  ;;  %3669 = vmatmul.bf16.gmra.mxu2 %v3432_v55  ;;  %v4446_v28 = vld [vmem:[#allocation2 + $0x1b8] sm:$0xff]  ;;  %v3955_v33 = vpack.c.bf16 %v3910_v0, %v3909_v27  ;;  %v3243_v55 = vadd.f32 %v3113_v17, %v2945_v59  ;;  %v4447_v0 = vld [vmem:[#allocation2 + $0x1c0] sm:$0xff] }
 0x3d3   :  { %4191 = vmatmul.bf16.gmra.mxu3 %v3954_v11  ;;  %v14465_v51 = vpack.c.bf16 %v4446_v28, %v4445_v14  ;;  %v3389_v14 = vld [vmem:[#allocation2 + $0x141] sm:$0xff] }
 0x3d4   :  { %4748 = vmatmul.bf16.gmra.mxu0 %v14457_v37  ;;  %v3911_v17 = vld [vmem:[#allocation2 + $0x142] sm:$0xff] }
 0x3d5   :  { %v3630_v54 = vpop.f32.mrf.mxu2 }
 0x3d6   :  { %v4152_v30 = vpop.f32.mrf.mxu3  ;;  %v3763_v26 = vadd.f32 %v3630_v54, %v3241_v46  ;;  %v14469_v46 = vpop.f32.mrf.mxu0 }
 0x3d7   :  { %v3115_v23 = vpop.f32.mrf.mxu1 }
 0x3d8   :  { %v4285_v49 = vadd.f32 %v4152_v30, %v3763_v26 }
 0x3da   :  { %4349 = vst [vmem:[#allocation3 + $0x90] sm:$0xff] %v4285_v49  ;;  %v2946_v49 = vld [vmem:[#allocation3 + $0xa8] sm:$0xff] }
 0x3db   :  { %v3244_v50 = vadd.f32 %v3115_v23, %v2946_v49  ;;  %v2947_v23 = vld [vmem:[#allocation3 + $0xb0] sm:$0xff] }
 0x3dd   :  { %v3632_v57 = vpop.f32.mrf.mxu2 }
 0x3de   :  { %v4154_v52 = vpop.f32.mrf.mxu3  ;;  %v3764_v21 = vadd.f32 %v3632_v57, %v3242_v41  ;;  %v4448_v41 = vld [vmem:[#allocation2 + $0x1c8] sm:$0xff]  ;;  %v14473_v27 = vpop.f32.mrf.mxu0 }
 0x3df   :  { %v3118_v40 = vpop.f32.mrf.mxu1  ;;  %v3390_v57 = vld [vmem:[#allocation2 + $0x149] sm:$0xff]  ;;  %v14471_v22 = vpack.c.bf16 %v4448_v41, %v4447_v0 }
 0x3e0   :  { %v4286_v60 = vadd.f32 %v4154_v52, %v3764_v21  ;;  %v3912_v52 = vld [vmem:[#allocation2 + $0x14a] sm:$0xff]  ;;  %v3245_v59 = vadd.f32 %v3118_v40, %v2947_v23  ;;  %v3914_v40 = vld [vmem:[#allocation2 + $0x15a] sm:$0xff] }
 0x3e1   :  { %v4449_v0 = vld [vmem:[#allocation2 + $0x1d0] sm:$0xff] }
 0x3e2   :  { %3157 = vmatmul.bf16.gmra.mxu1 %v14403_v2  ;;  %4350 = vst [vmem:[#allocation3 + $0x98] sm:$0xff] %v4286_v60  ;;  %3674 = vmatmul.bf16.gmra.mxu2 %v3433_v15  ;;  %v3434_v15 = vpack.c.bf16 %v3390_v57, %v3389_v14 }
 0x3e3   :  { %4196 = vmatmul.bf16.gmra.mxu3 %v3955_v33  ;;  %v3956_v33 = vpack.c.bf16 %v3912_v52, %v3911_v17  ;;  %v3392_v52 = vld [vmem:[#allocation2 + $0x159] sm:$0xff]  ;;  %v3391_v17 = vld [vmem:[#allocation2 + $0x151] sm:$0xff] }
 0x3e4   :  { %4753 = vmatmul.bf16.gmra.mxu0 %v14465_v51  ;;  %v3435_v23 = vpack.c.bf16 %v3392_v52, %v3391_v17 }
 0x3e5   :  { %v3635_v11 = vpop.f32.mrf.mxu2 }
 0x3e6   :  { %v4157_v45 = vpop.f32.mrf.mxu3  ;;  %v3765_v54 = vadd.f32 %v3635_v11, %v3243_v55  ;;  %v14477_v49 = vpop.f32.mrf.mxu0 }
 0x3e7   :  { %v3120_v30 = vpop.f32.mrf.mxu1 }
 0x3e8   :  { %v4287_v26 = vadd.f32 %v4157_v45, %v3765_v54 }
 0x3ea   :  { %4351 = vst [vmem:[#allocation3 + $0xa0] sm:$0xff] %v4287_v26 }
 0x3ed   :  { %v3637_v28 = vpop.f32.mrf.mxu2 }
 0x3ee   :  { %v4159_v2 = vpop.f32.mrf.mxu3  ;;  %v3766_v13 = vadd.f32 %v3637_v28, %v3244_v50  ;;  %v13109_v50 = vld [vmem:[%s16294_s4 + $0x1e8] sm:$0xff]  ;;  %v4450_v28 = vld [vmem:[#allocation2 + $0x1d8] sm:$0xff] }
 0x3ef   :  { %v3123_v21 = vpop.f32.mrf.mxu1  ;;  %5144 = vmatpush.bf16.msra.mxu1 %v13109_v50 }
 0x3f0   :  { %v4288_v60 = vadd.f32 %v4159_v2, %v3766_v13 }
 0x3f2   :  { %3162 = vmatmul.bf16.gmra.mxu1 %v14412_v43  ;;  %4352 = vst [vmem:[#allocation3 + $0xa8] sm:$0xff] %v4288_v60  ;;  %3679 = vmatmul.bf16.gmra.mxu2 %v3434_v15  ;;  %v2948_v43 = vld [vmem:[#allocation3 + $0xb8] sm:$0xff]  ;;  %v3913_v60 = vld [vmem:[#allocation2 + $0x152] sm:$0xff]  ;;  %v14482_v15 = vpack.c.bf16 %v4450_v28, %v4449_v0 }
 0x3f3   :  { %4201 = vmatmul.bf16.gmra.mxu3 %v3956_v33  ;;  %v3246_v41 = vadd.f32 %v3120_v30, %v2948_v43  ;;  %v13117_v30 = vld [vmem:[%s16294_s4 + $0x228] sm:$0xff] }
 0x3f4   :  { %4758 = vmatmul.bf16.gmra.mxu0 %v14471_v22  ;;  %5666 = vmatpush.bf16.msra.mxu2 %v13117_v30  ;;  %v3916_v0 = vld [vmem:[#allocation2 + $0x16a] sm:$0xff] }
 0x3f5   :  { %v3640_v55 = vpop.f32.mrf.mxu2 }
 0x3f6   :  { %v4162_v11 = vpop.f32.mrf.mxu3  ;;  %v3767_v45 = vadd.f32 %v3640_v55, %v3245_v59  ;;  %v3957_v59 = vpack.c.bf16 %v3914_v40, %v3913_v60  ;;  %v2949_v55 = vld [vmem:[#allocation3 + $0xc0] sm:$0xff] }
 0x3f7   :  { %v3125_v54 = vpop.f32.mrf.mxu1 }
 0x3f8   :  { %v4289_v26 = vadd.f32 %v4162_v11, %v3767_v45  ;;  %v14489_v11 = vpop.f32.mrf.mxu0  ;;  %v3247_v45 = vadd.f32 %v3123_v21, %v2949_v55  ;;  %v3393_v21 = vld [vmem:[#allocation2 + $0x161] sm:$0xff] }
 0x3fa   :  { %4353 = vst [vmem:[#allocation3 + $0xb0] sm:$0xff] %v4289_v26 }
 0x3fd   :  { %v3642_v2 = vpop.f32.mrf.mxu2 }
 0x3fe   :  { %v4164_v57 = vpop.f32.mrf.mxu3  ;;  %v3768_v13 = vadd.f32 %v3642_v2, %v3246_v41 }
 0x3ff   :  { %v3128_v14 = vpop.f32.mrf.mxu1 }
 0x400   :  { %v4290_v33 = vadd.f32 %v4164_v57, %v3768_v13  ;;  %v4452_v57 = vld [vmem:[#allocation2 + $0x1e8] sm:$0xff]  ;;  %v14491_v17 = vpop.f32.mrf.mxu0 }
 0x401   :  { %v3394_v13 = vld [vmem:[#allocation2 + $0x169] sm:$0xff]  ;;  %16301 = vst [vmem:[#allocation6_spill] sm:$0xff] %v14491_v17 }
 0x402   :  { %3167 = vmatmul.bf16.gmra.mxu1 %v14423_v48  ;;  %4354 = vst [vmem:[#allocation3 + $0xb8] sm:$0xff] %v4290_v33  ;;  %3684 = vmatmul.bf16.gmra.mxu2 %v3435_v23  ;;  %v2950_v48 = vld [vmem:[#allocation3 + $0xc8] sm:$0xff]  ;;  %v4451_v33 = vld [vmem:[#allocation2 + $0x1e0] sm:$0xff] }
 0x403   :  { %4206 = vmatmul.bf16.gmra.mxu3 %v3957_v59  ;;  %v3248_v2 = vadd.f32 %v3125_v54, %v2950_v48  ;;  %v3915_v59 = vld [vmem:[#allocation2 + $0x162] sm:$0xff]  ;;  %v14493_v30 = vpack.c.bf16 %v4452_v57, %v4451_v33  ;;  %v3396_v33 = vld [vmem:[#allocation2 + $0x179] sm:$0xff] }
 0x404   :  { %4763 = vmatmul.bf16.gmra.mxu0 %v14482_v15  ;;  %v2951_v54 = vld [vmem:[#allocation3 + $0xd0] sm:$0xff] }
 0x405   :  { %v3645_v26 = vpop.f32.mrf.mxu2 }
 0x406   :  { %v4167_v50 = vpop.f32.mrf.mxu3  ;;  %v3769_v43 = vadd.f32 %v3645_v26, %v3247_v45  ;;  %v3436_v45 = vpack.c.bf16 %v3394_v13, %v3393_v21  ;;  %v3958_v26 = vpack.c.bf16 %v3916_v0, %v3915_v59  ;;  %v4454_v0 = vld [vmem:[#allocation2 + $0x1f8] sm:$0xff] }
 0x407   :  { %v3130_v41 = vpop.f32.mrf.mxu1  ;;  %v3918_v21 = vld [vmem:[#allocation2 + $0x17a] sm:$0xff] }
 0x408   :  { %v4291_v28 = vadd.f32 %v4167_v50, %v3769_v43  ;;  %v3249_v50 = vadd.f32 %v3128_v14, %v2951_v54  ;;  %v3917_v14 = vld [vmem:[#allocation2 + $0x172] sm:$0xff] }
 0x409   :  { %v3959_v17 = vpack.c.bf16 %v3918_v21, %v3917_v14  ;;  %v3920_v14 = vld [vmem:[#allocation2 + $0x18a] sm:$0xff] }
 0x40a   :  { %4355 = vst [vmem:[#allocation3 + $0xc0] sm:$0xff] %v4291_v28 }
 0x40d   :  { %v3647_v52 = vpop.f32.mrf.mxu2 }
 0x40e   :  { %v4169_v40 = vpop.f32.mrf.mxu3  ;;  %v3770_v60 = vadd.f32 %v3647_v52, %v3248_v2  ;;  %v14497_v52 = vpop.f32.mrf.mxu0 }
 0x40f   :  { %v3133_v23 = vpop.f32.mrf.mxu1 }
 0x410   :  { %v4292_v55 = vadd.f32 %v4169_v40, %v3770_v60  ;;  %v2952_v40 = vld [vmem:[#allocation3 + $0xd8] sm:$0xff] }
 0x411   :  { %v3250_v13 = vadd.f32 %v3130_v41, %v2952_v40 }
 0x412   :  { %3172 = vmatmul.bf16.gmra.mxu1 %v14429_v6  ;;  %4356 = vst [vmem:[#allocation3 + $0xc8] sm:$0xff] %v4292_v55  ;;  %3689 = vmatmul.bf16.gmra.mxu2 %v3436_v45  ;;  %v4453_v55 = vld [vmem:[#allocation2 + $0x1f0] sm:$0xff] }
 0x413   :  { %4211 = vmatmul.bf16.gmra.mxu3 %v3958_v26  ;;  %v3395_v26 = vld [vmem:[#allocation2 + $0x171] sm:$0xff]  ;;  %v14499_v54 = vpack.c.bf16 %v4454_v0, %v4453_v55 }
 0x414   :  { %4768 = vmatmul.bf16.gmra.mxu0 %v14493_v30 }
 0x415   :  { %v3650_v43 = vpop.f32.mrf.mxu2 }
 0x416   :  { %v4172_v28 = vpop.f32.mrf.mxu3  ;;  %v3771_v48 = vadd.f32 %v3650_v43, %v3249_v50  ;;  %v3437_v43 = vpack.c.bf16 %v3396_v33, %v3395_v26  ;;  %v14503_v41 = vpop.f32.mrf.mxu0  ;;  %v3398_v26 = vld [vmem:[#allocation2 + $0x189] sm:$0xff] }
 0x417   :  { %v3135_v2 = vpop.f32.mrf.mxu1  ;;  %16302 = vst [vmem:[#allocation7_spill] sm:$0xff] %v14503_v41  ;;  %v3397_v41 = vld [vmem:[#allocation2 + $0x181] sm:$0xff] }
 0x418   :  { %v4293_v57 = vadd.f32 %v4172_v28, %v3771_v48  ;;  %v2953_v28 = vld [vmem:[#allocation3 + $0xe0] sm:$0xff] }
 0x419   :  { %v3251_v48 = vadd.f32 %v3133_v23, %v2953_v28  ;;  %v3919_v23 = vld [vmem:[#allocation2 + $0x182] sm:$0xff] }
 0x41a   :  { %4357 = vst [vmem:[#allocation3 + $0xd0] sm:$0xff] %v4293_v57 }
 0x41d   :  { %v3652_v60 = vpop.f32.mrf.mxu2 }
 0x41e   :  { %v4174_v6 = vpop.f32.mrf.mxu3  ;;  %v3772_v59 = vadd.f32 %v3652_v60, %v3250_v13  ;;  %v14505_v33 = vpop.f32.mrf.mxu0 }
 0x41f   :  { %v3138_v45 = vpop.f32.mrf.mxu1  ;;  %16303 = vst [vmem:[#allocation8_spill] sm:$0xff] %v14505_v33 }
 0x420   :  { %v4294_v50 = vadd.f32 %v4174_v6, %v3772_v59  ;;  %v2954_v6 = vld [vmem:[#allocation3 + $0xe8] sm:$0xff] }
 0x421   :  { %v3252_v21 = vadd.f32 %v3135_v2, %v2954_v6  ;;  %v2955_v2 = vld [vmem:[#allocation3 + $0xf0] sm:$0xff] }
 0x422   :  { %3177 = vmatmul.bf16.gmra.mxu1 %v14437_v47  ;;  %4358 = vst [vmem:[#allocation3 + $0xd8] sm:$0xff] %v4294_v50  ;;  %3694 = vmatmul.bf16.gmra.mxu2 %v3437_v43  ;;  %v4456_v47 = vld [vmem:[#allocation2 + $0x208] sm:$0xff]  ;;  %v4455_v43 = vld [vmem:[#allocation2 + $0x200] sm:$0xff] }
 0x423   :  { %4216 = vmatmul.bf16.gmra.mxu3 %v3959_v17  ;;  %v14507_v28 = vpack.c.bf16 %v4456_v47, %v4455_v43  ;;  %v3400_v43 = vld [vmem:[#allocation2 + $0x199] sm:$0xff] }
 0x424   :  { %4773 = vmatmul.bf16.gmra.mxu0 %v14499_v54 }
 0x425   :  { %v3655_v57 = vpop.f32.mrf.mxu2 }
 0x426   :  { %v4177_v40 = vpop.f32.mrf.mxu3  ;;  %v3773_v13 = vadd.f32 %v3655_v57, %v3251_v48  ;;  %v3438_v57 = vpack.c.bf16 %v3398_v26, %v3397_v41  ;;  %v14511_v33 = vpop.f32.mrf.mxu0  ;;  %v13108_v41 = vld [vmem:[%s16294_s4 + $0x1e0] sm:$0xff]  ;;  %v4458_v26 = vld [vmem:[#allocation2 + $0x218] sm:$0xff] }
 0x427   :  { %v3140_v60 = vpop.f32.mrf.mxu1  ;;  %16304 = vst [vmem:[#allocation9_spill] sm:$0xff] %v14511_v33  ;;  %5145 = vmatpush.bf16.msra.mxu1 %v13108_v41  ;;  %v2957_v41 = vld [vmem:[#allocation3 + $0x100] sm:$0xff] }
 0x428   :  { %v4295_v0 = vadd.f32 %v4177_v40, %v3773_v13  ;;  %v3960_v40 = vpack.c.bf16 %v3920_v14, %v3919_v23  ;;  %v3253_v13 = vadd.f32 %v3138_v45, %v2955_v2  ;;  %v3922_v45 = vld [vmem:[#allocation2 + $0x19a] sm:$0xff]  ;;  %v3921_v2 = vld [vmem:[#allocation2 + $0x192] sm:$0xff] }
 0x42a   :  { %4359 = vst [vmem:[#allocation3 + $0xe0] sm:$0xff] %v4295_v0 }
 0x42d   :  { %v3657_v59 = vpop.f32.mrf.mxu2 }
 0x42e   :  { %v4179_v55 = vpop.f32.mrf.mxu3  ;;  %v3774_v50 = vadd.f32 %v3657_v59, %v3252_v21 }
 0x42f   :  { %v3143_v17 = vpop.f32.mrf.mxu1 }
 0x430   :  { %v4296_v48 = vadd.f32 %v4179_v55, %v3774_v50 }
 0x432   :  { %3182 = vmatmul.bf16.gmra.mxu1 %v14448_v42  ;;  %4360 = vst [vmem:[#allocation3 + $0xe8] sm:$0xff] %v4296_v48  ;;  %3699 = vmatmul.bf16.gmra.mxu2 %v3438_v57  ;;  %v2956_v42 = vld [vmem:[#allocation3 + $0xf8] sm:$0xff]  ;;  %v4457_v48 = vld [vmem:[#allocation2 + $0x210] sm:$0xff] }
 0x433   :  { %4221 = vmatmul.bf16.gmra.mxu3 %v3960_v40  ;;  %v3254_v55 = vadd.f32 %v3140_v60, %v2956_v42  ;;  %v3399_v40 = vld [vmem:[#allocation2 + $0x191] sm:$0xff]  ;;  %v13116_v60 = vld [vmem:[%s16294_s4 + $0x220] sm:$0xff]  ;;  %v3255_v42 = vadd.f32 %v3143_v17, %v2957_v41 }
 0x434   :  { %4778 = vmatmul.bf16.gmra.mxu0 %v14507_v28  ;;  %5667 = vmatpush.bf16.msra.mxu2 %v13116_v60  ;;  %v2959_v60 = vld [vmem:[#allocation3 + $0x110] sm:$0xff] }
 0x435   :  { %v3660_v0 = vpop.f32.mrf.mxu2 }
 0x436   :  { %v4182_v6 = vpop.f32.mrf.mxu3  ;;  %v3775_v21 = vadd.f32 %v3660_v0, %v3253_v13  ;;  %v4490_v13 = vpack.c.bf16 %v4458_v26, %v4457_v48 }
 0x437   :  { %v3145_v59 = vpop.f32.mrf.mxu1 }
 0x438   :  { %v4297_v47 = vadd.f32 %v4182_v6, %v3775_v21  ;;  %v3439_v6 = vpack.c.bf16 %v3400_v43, %v3399_v40  ;;  %v3961_v21 = vpack.c.bf16 %v3922_v45, %v3921_v2  ;;  %v3402_v40 = vld [vmem:[#allocation2 + $0x1a9] sm:$0xff] }
 0x439   :  { %v3924_v2 = vld [vmem:[#allocation2 + $0x1aa] sm:$0xff] }
 0x43a   :  { %4361 = vst [vmem:[#allocation3 + $0xf0] sm:$0xff] %v4297_v47  ;;  %v14517_v47 = vpop.f32.mrf.mxu0 }
 0x43b   :  { %16305 = vst [vmem:[#allocation10_spill] sm:$0xff] %v14517_v47 }
 0x43d   :  { %v3662_v14 = vpop.f32.mrf.mxu2 }
 0x43e   :  { %v4184_v50 = vpop.f32.mrf.mxu3  ;;  %v3776_v23 = vadd.f32 %v3662_v14, %v3254_v55 }
 0x43f   :  { %v3148_v57 = vpop.f32.mrf.mxu1 }
 0x440   :  { %v4298_v0 = vadd.f32 %v4184_v50, %v3776_v23  ;;  %v3257_v41 = vadd.f32 %v3148_v57, %v2959_v60  ;;  %v2961_v57 = vld [vmem:[#allocation3 + $0x120] sm:$0xff] }
 0x442   :  { %3187 = vmatmul.bf16.gmra.mxu1 %v14457_v37  ;;  %4362 = vst [vmem:[#allocation3 + $0xf8] sm:$0xff] %v4298_v0  ;;  %3704 = vmatmul.bf16.gmra.mxu2 %v3439_v6  ;;  %v2958_v37 = vld [vmem:[#allocation3 + $0x108] sm:$0xff]  ;;  %v3401_v6 = vld [vmem:[#allocation2 + $0x1a1] sm:$0xff] }
 0x443   :  { %4226 = vmatmul.bf16.gmra.mxu3 %v3961_v21  ;;  %v3256_v45 = vadd.f32 %v3145_v59, %v2958_v37  ;;  %v3923_v21 = vld [vmem:[#allocation2 + $0x1a2] sm:$0xff]  ;;  %v3440_v33 = vpack.c.bf16 %v3402_v40, %v3401_v6  ;;  %v3926_v40 = vld [vmem:[#allocation2 + $0x1ba] sm:$0xff] }
 0x444   :  { %4783 = vmatmul.bf16.gmra.mxu0 %v4490_v13  ;;  %v3962_v17 = vpack.c.bf16 %v3924_v2, %v3923_v21 }
 0x445   :  { %v3665_v55 = vpop.f32.mrf.mxu2 }
 0x446   :  { %v4187_v26 = vpop.f32.mrf.mxu3  ;;  %v3777_v14 = vadd.f32 %v3665_v55, %v3255_v42 }
 0x447   :  { %v3150_v50 = vpop.f32.mrf.mxu1 }
 0x448   :  { %v4299_v43 = vadd.f32 %v4187_v26, %v3777_v14 }
 0x44a   :  { %4363 = vst [vmem:[#allocation3 + $0x100] sm:$0xff] %v4299_v43  ;;  %v2960_v43 = vld [vmem:[#allocation3 + $0x118] sm:$0xff] }
 0x44b   :  { %v3258_v37 = vadd.f32 %v3150_v50, %v2960_v43 }
 0x44d   :  { %v3667_v23 = vpop.f32.mrf.mxu2 }
 0x44e   :  { %v4189_v48 = vpop.f32.mrf.mxu3  ;;  %v3778_v13 = vadd.f32 %v3667_v23, %v3256_v45 }
 0x44f   :  { %v3153_v0 = vpop.f32.mrf.mxu1 }
 0x450   :  { %v4300_v47 = vadd.f32 %v4189_v48, %v3778_v13  ;;  %v3404_v48 = vld [vmem:[#allocation2 + $0x1b9] sm:$0xff] }
 0x452   :  { %3192 = vmatmul.bf16.gmra.mxu1 %v14465_v51  ;;  %4364 = vst [vmem:[#allocation3 + $0x108] sm:$0xff] %v4300_v47  ;;  %3709 = vmatmul.bf16.gmra.mxu2 %v3440_v33  ;;  %v3403_v51 = vld [vmem:[#allocation2 + $0x1b1] sm:$0xff] }
 0x453   :  { %4231 = vmatmul.bf16.gmra.mxu3 %v3962_v17  ;;  %v3925_v47 = vld [vmem:[#allocation2 + $0x1b2] sm:$0xff]  ;;  %v3441_v6 = vpack.c.bf16 %v3404_v48, %v3403_v51  ;;  %v3259_v17 = vadd.f32 %v3153_v0, %v2961_v57  ;;  %v2963_v0 = vld [vmem:[#allocation3 + $0x130] sm:$0xff] }
 0x454   :  { %v3963_v21 = vpack.c.bf16 %v3926_v40, %v3925_v47 }
 0x455   :  { %v3670_v42 = vpop.f32.mrf.mxu2 }
 0x456   :  { %v4192_v59 = vpop.f32.mrf.mxu3  ;;  %v3779_v55 = vadd.f32 %v3670_v42, %v3257_v41 }
 0x457   :  { %v3155_v26 = vpop.f32.mrf.mxu1 }
 0x458   :  { %v4301_v14 = vadd.f32 %v4192_v59, %v3779_v55  ;;  %v2962_v55 = vld [vmem:[#allocation3 + $0x128] sm:$0xff] }
 0x45a   :  { %4365 = vst [vmem:[#allocation3 + $0x110] sm:$0xff] %v4301_v14  ;;  %v3260_v14 = vadd.f32 %v3155_v26, %v2962_v55 }
 0x45d   :  { %v3672_v45 = vpop.f32.mrf.mxu2 }
 0x45e   :  { %v4194_v23 = vpop.f32.mrf.mxu3  ;;  %v3780_v2 = vadd.f32 %v3672_v45, %v3258_v37  ;;  %v3406_v45 = vld [vmem:[#allocation2 + $0x1c9] sm:$0xff] }
 0x45f   :  { %v3158_v13 = vpop.f32.mrf.mxu1 }
 0x460   :  { %v4302_v33 = vadd.f32 %v4194_v23, %v3780_v2  ;;  %v3928_v23 = vld [vmem:[#allocation2 + $0x1ca] sm:$0xff]  ;;  %v3927_v2 = vld [vmem:[#allocation2 + $0x1c2] sm:$0xff] }
 0x462   :  { %3197 = vmatmul.bf16.gmra.mxu1 %v14471_v22  ;;  %4366 = vst [vmem:[#allocation3 + $0x118] sm:$0xff] %v4302_v33  ;;  %3714 = vmatmul.bf16.gmra.mxu2 %v3441_v6  ;;  %v3405_v22 = vld [vmem:[#allocation2 + $0x1c1] sm:$0xff]  ;;  %v3964_v33 = vpack.c.bf16 %v3928_v23, %v3927_v2  ;;  %v3261_v6 = vadd.f32 %v3158_v13, %v2963_v0  ;;  %v3407_v13 = vld [vmem:[#allocation2 + $0x1d1] sm:$0xff] }
 0x463   :  { %4236 = vmatmul.bf16.gmra.mxu3 %v3963_v21  ;;  %v3442_v47 = vpack.c.bf16 %v3406_v45, %v3405_v22  ;;  %v3929_v23 = vld [vmem:[#allocation2 + $0x1d2] sm:$0xff] }
 0x465   :  { %v3675_v60 = vpop.f32.mrf.mxu2 }
 0x466   :  { %v4197_v50 = vpop.f32.mrf.mxu3  ;;  %v3781_v41 = vadd.f32 %v3675_v60, %v3259_v17 }
 0x467   :  { %v3160_v42 = vpop.f32.mrf.mxu1 }
 0x468   :  { %v4303_v59 = vadd.f32 %v4197_v50, %v3781_v41  ;;  %v13107_v50 = vld [vmem:[%s16294_s4 + $0x1d8] sm:$0xff]  ;;  %v2964_v41 = vld [vmem:[#allocation3 + $0x138] sm:$0xff] }
 0x469   :  { %5146 = vmatpush.bf16.msra.mxu1 %v13107_v50 }
 0x46a   :  { %4367 = vst [vmem:[#allocation3 + $0x120] sm:$0xff] %v4303_v59  ;;  %v3262_v59 = vadd.f32 %v3160_v42, %v2964_v41  ;;  %v13115_v42 = vld [vmem:[%s16294_s4 + $0x218] sm:$0xff]  ;;  %v3410_v41 = vld [vmem:[#allocation2 + $0x1e9] sm:$0xff] }
 0x46b   :  { %5668 = vmatpush.bf16.msra.mxu2 %v13115_v42 }
 0x46d   :  { %v3677_v43 = vpop.f32.mrf.mxu2 }
 0x46e   :  { %v4199_v37 = vpop.f32.mrf.mxu3  ;;  %v3782_v48 = vadd.f32 %v3677_v43, %v3260_v14  ;;  %v3408_v14 = vld [vmem:[#allocation2 + $0x1d9] sm:$0xff] }
 0x46f   :  { %v3163_v40 = vpop.f32.mrf.mxu1  ;;  %v3930_v43 = vld [vmem:[#allocation2 + $0x1da] sm:$0xff]  ;;  %v3443_v22 = vpack.c.bf16 %v3408_v14, %v3407_v13 }
 0x470   :  { %v4304_v51 = vadd.f32 %v4199_v37, %v3782_v48  ;;  %v3965_v2 = vpack.c.bf16 %v3930_v43, %v3929_v23  ;;  %v3409_v14 = vld [vmem:[#allocation2 + $0x1e1] sm:$0xff] }
 0x471   :  { %v3931_v43 = vld [vmem:[#allocation2 + $0x1e2] sm:$0xff]  ;;  %v3444_v13 = vpack.c.bf16 %v3410_v41, %v3409_v14  ;;  %v3933_v14 = vld [vmem:[#allocation2 + $0x1f2] sm:$0xff] }
 0x472   :  { %3202 = vmatmul.bf16.gmra.mxu1 %v14482_v15  ;;  %4368 = vst [vmem:[#allocation3 + $0x128] sm:$0xff] %v4304_v51  ;;  %3719 = vmatmul.bf16.gmra.mxu2 %v3442_v47  ;;  %v2965_v51 = vld [vmem:[#allocation3 + $0x140] sm:$0xff] }
 0x473   :  { %4241 = vmatmul.bf16.gmra.mxu3 %v3964_v33  ;;  %v3263_v47 = vadd.f32 %v3163_v40, %v2965_v51  ;;  %v13106_v40 = vld [vmem:[%s16294_s4 + $0x1d0] sm:$0xff] }
 0x474   :  { %5147 = vmatpush.bf16.msra.mxu1 %v13106_v40 }
 0x475   :  { %v3680_v21 = vpop.f32.mrf.mxu2 }
 0x476   :  { %v4202_v26 = vpop.f32.mrf.mxu3  ;;  %v3783_v57 = vadd.f32 %v3680_v21, %v3261_v6 }
 0x477   :  { %v3165_v17 = vpop.f32.mrf.mxu1 }
 0x478   :  { %v4305_v60 = vadd.f32 %v4202_v26, %v3783_v57  ;;  %v2966_v57 = vld [vmem:[#allocation3 + $0x148] sm:$0xff] }
 0x47a   :  { %4369 = vst [vmem:[#allocation3 + $0x130] sm:$0xff] %v4305_v60  ;;  %v3264_v60 = vadd.f32 %v3165_v17, %v2966_v57  ;;  %v13105_v17 = vld [vmem:[%s16294_s4 + $0x1c8] sm:$0xff] }
 0x47b   :  { %5148 = vmatpush.bf16.msra.mxu1 %v13105_v17 }
 0x47d   :  { %v3682_v55 = vpop.f32.mrf.mxu2 }
 0x47e   :  { %v4204_v15 = vpop.f32.mrf.mxu3  ;;  %v3784_v37 = vadd.f32 %v3682_v55, %v3262_v59  ;;  %v3932_v59 = vld [vmem:[#allocation2 + $0x1ea] sm:$0xff] }
 0x47f   :  { %v3168_v45 = vpop.f32.mrf.mxu1  ;;  %v3966_v23 = vpack.c.bf16 %v3932_v59, %v3931_v43 }
 0x480   :  { %v4306_v48 = vadd.f32 %v4204_v15, %v3784_v37 }
 0x482   :  { %3207 = vmatmul.bf16.gmra.mxu1 %v14493_v30  ;;  %4370 = vst [vmem:[#allocation3 + $0x138] sm:$0xff] %v4306_v48  ;;  %3724 = vmatmul.bf16.gmra.mxu2 %v3443_v22  ;;  %v2967_v48 = vld [vmem:[#allocation3 + $0x150] sm:$0xff] }
 0x483   :  { %4246 = vmatmul.bf16.gmra.mxu3 %v3965_v2  ;;  %v3265_v22 = vadd.f32 %v3168_v45, %v2967_v48  ;;  %v13113_v45 = vld [vmem:[%s16294_s4 + $0x208] sm:$0xff] }
 0x485   :  { %v3685_v33 = vpop.f32.mrf.mxu2 }
 0x486   :  { %v4207_v0 = vpop.f32.mrf.mxu3  ;;  %v3785_v6 = vadd.f32 %v3685_v33, %v3263_v47  ;;  %v13104_v33 = vld [vmem:[%s16294_s4 + $0x1c0] sm:$0xff] }
 0x487   :  { %v3170_v21 = vpop.f32.mrf.mxu1  ;;  %5149 = vmatpush.bf16.msra.mxu1 %v13104_v33  ;;  %v4918_v33 = vld [vmem:[#allocation2 + $0x29] sm:$0xff] }
 0x488   :  { %v4307_v26 = vadd.f32 %v4207_v0, %v3785_v6  ;;  %v13114_v0 = vld [vmem:[%s16294_s4 + $0x210] sm:$0xff]  ;;  %v2968_v6 = vld [vmem:[#allocation3 + $0x158] sm:$0xff] }
 0x489   :  { %5669 = vmatpush.bf16.msra.mxu2 %v13114_v0 }
 0x48a   :  { %4371 = vst [vmem:[#allocation3 + $0x140] sm:$0xff] %v4307_v26  ;;  %v3266_v26 = vadd.f32 %v3170_v21, %v2968_v6  ;;  %v13112_v21 = vld [vmem:[%s16294_s4 + $0x200] sm:$0xff]  ;;  %v3414_v6 = vld [vmem:[#allocation2 + $0x209] sm:$0xff] }
 0x48d   :  { %v3687_v50 = vpop.f32.mrf.mxu2  ;;  %5670 = vmatpush.bf16.msra.mxu2 %v13113_v45  ;;  %v4917_v45 = vld [vmem:[#allocation2 + $0x21] sm:$0xff] }
 0x48e   :  { %v4209_v30 = vpop.f32.mrf.mxu3  ;;  %v3786_v55 = vadd.f32 %v3687_v50, %v3264_v60  ;;  %v3412_v50 = vld [vmem:[#allocation2 + $0x1f9] sm:$0xff] }
 0x48f   :  { %v3173_v15 = vpop.f32.mrf.mxu1 }
 0x490   :  { %v4308_v37 = vadd.f32 %v4209_v30, %v3786_v55  ;;  %v3934_v30 = vld [vmem:[#allocation2 + $0x1fa] sm:$0xff]  ;;  %v3411_v55 = vld [vmem:[#allocation2 + $0x1f1] sm:$0xff] }
 0x491   :  { %v3445_v40 = vpack.c.bf16 %v3412_v50, %v3411_v55  ;;  %5671 = vmatpush.bf16.msra.mxu2 %v13112_v21  ;;  %v4981_v50 = vpack.c.bf16 %v4918_v33, %v4917_v45  ;;  %v5440_v33 = vld [vmem:[#allocation2 + $0x2a] sm:$0xff] }
 0x492   :  { %3212 = vmatmul.bf16.gmra.mxu1 %v14499_v54  ;;  %4372 = vst [vmem:[#allocation3 + $0x148] sm:$0xff] %v4308_v37  ;;  %3729 = vmatmul.bf16.gmra.mxu2 %v3444_v13  ;;  %v3967_v37 = vpack.c.bf16 %v3934_v30, %v3933_v14  ;;  %v2969_v13 = vld [vmem:[#allocation3 + $0x160] sm:$0xff]  ;;  %v3413_v30 = vld [vmem:[#allocation2 + $0x201] sm:$0xff] }
 0x493   :  { %4251 = vmatmul.bf16.gmra.mxu3 %v3966_v23  ;;  %v3267_v23 = vadd.f32 %v3173_v15, %v2969_v13  ;;  %v3935_v15 = vld [vmem:[#allocation2 + $0x202] sm:$0xff]  ;;  %v3446_v55 = vpack.c.bf16 %v3414_v6, %v3413_v30 }
 0x495   :  { %v3690_v2 = vpop.f32.mrf.mxu2 }
 0x496   :  { %v4212_v42 = vpop.f32.mrf.mxu3  ;;  %v3787_v51 = vadd.f32 %v3690_v2, %v3265_v22 }
 0x497   :  { %v3175_v47 = vpop.f32.mrf.mxu1 }
 0x498   :  { %v4309_v54 = vadd.f32 %v4212_v42, %v3787_v51  ;;  %v2970_v51 = vld [vmem:[#allocation3 + $0x168] sm:$0xff] }
 0x49a   :  { %4373 = vst [vmem:[#allocation3 + $0x150] sm:$0xff] %v4309_v54 }
 0x49d   :  { %v3692_v57 = vpop.f32.mrf.mxu2 }
 0x49e   :  { %v4214_v60 = vpop.f32.mrf.mxu3  ;;  %v3788_v41 = vadd.f32 %v3692_v57, %v3266_v26  ;;  %v3936_v26 = vld [vmem:[#allocation2 + $0x20a] sm:$0xff] }
 0x49f   :  { %v3178_v59 = vpop.f32.mrf.mxu1  ;;  %v3968_v14 = vpack.c.bf16 %v3936_v26, %v3935_v15  ;;  %v5439_v26 = vld [vmem:[#allocation2 + $0x22] sm:$0xff] }
 0x4a0   :  { %v4310_v43 = vadd.f32 %v4214_v60, %v3788_v41 }
 0x4a2   :  { %3217 = vmatmul.bf16.gmra.mxu1 %v14507_v28  ;;  %4374 = vst [vmem:[#allocation3 + $0x158] sm:$0xff] %v4310_v43  ;;  %3734 = vmatmul.bf16.gmra.mxu2 %v3445_v40  ;;  %v3268_v28 = vadd.f32 %v3175_v47, %v2970_v51  ;;  %v2971_v43 = vld [vmem:[#allocation3 + $0x170] sm:$0xff] }
 0x4a3   :  { %4256 = vmatmul.bf16.gmra.mxu3 %v3967_v37  ;;  %v3269_v40 = vadd.f32 %v3178_v59, %v2971_v43  ;;  %v2973_v59 = vld [vmem:[#allocation3 + $0x180] sm:$0xff] }
 0x4a4   :  { %v4922_v43 = vld [vmem:[#allocation2 + $0x49] sm:$0xff] }
 0x4a5   :  { %v3695_v17 = vpop.f32.mrf.mxu2 }
 0x4a6   :  { %v4217_v48 = vpop.f32.mrf.mxu3  ;;  %v3789_v22 = vadd.f32 %v3695_v17, %v3267_v23  ;;  %v2972_v17 = vld [vmem:[#allocation3 + $0x178] sm:$0xff] }
 0x4a7   :  { %v3180_v2 = vpop.f32.mrf.mxu1 }
 0x4a8   :  { %v4311_v42 = vadd.f32 %v4217_v48, %v3789_v22  ;;  %v4920_v48 = vld [vmem:[#allocation2 + $0x39] sm:$0xff]  ;;  %v3270_v22 = vadd.f32 %v3180_v2, %v2972_v17 }
 0x4aa   :  { %4375 = vst [vmem:[#allocation3 + $0x160] sm:$0xff] %v4311_v42 }
 0x4ad   :  { %v3697_v54 = vpop.f32.mrf.mxu2 }
 0x4ae   :  { %v4219_v0 = vpop.f32.mrf.mxu3  ;;  %v3790_v57 = vadd.f32 %v3697_v54, %v3268_v28  ;;  %v4919_v28 = vld [vmem:[#allocation2 + $0x31] sm:$0xff] }
 0x4af   :  { %v3183_v60 = vpop.f32.mrf.mxu1  ;;  %v4982_v6 = vpack.c.bf16 %v4920_v48, %v4919_v28 }
 0x4b0   :  { %v4312_v41 = vadd.f32 %v4219_v0, %v3790_v57  ;;  %v5503_v57 = vpack.c.bf16 %v5440_v33, %v5439_v26 }
 0x4b2   :  { %5150 = vmatmul.bf16.vlgmr.msra.gmra.mxu1 %v4981_v50  ;;  %4376 = vst [vmem:[#allocation3 + $0x168] sm:$0xff] %v4312_v41  ;;  %3739 = vmatmul.bf16.gmra.mxu2 %v3446_v55  ;;  %v3271_v50 = vadd.f32 %v3183_v60, %v2973_v59  ;;  %v2975_v60 = vld [vmem:[#allocation3 + $0x190] sm:$0xff] }
 0x4b3   :  { %4261 = vmatmul.bf16.gmra.mxu3 %v3968_v14  ;;  %v2974_v14 = vld [vmem:[#allocation3 + $0x188] sm:$0xff] }
 0x4b4   :  { %v4924_v59 = vld [vmem:[#allocation2 + $0x59] sm:$0xff] }
 0x4b5   :  { %v3700_v47 = vpop.f32.mrf.mxu2 }
 0x4b6   :  { %v4222_v37 = vpop.f32.mrf.mxu3  ;;  %v3791_v21 = vadd.f32 %v3700_v47, %v3269_v40 }
 0x4b7   :  { %v3185_v13 = vpop.f32.mrf.mxu1 }
 0x4b8   :  { %v4313_v23 = vadd.f32 %v4222_v37, %v3791_v21  ;;  %v3272_v40 = vadd.f32 %v3185_v13, %v2974_v14  ;;  %v5442_v21 = vld [vmem:[#allocation2 + $0x3a] sm:$0xff] }
 0x4ba   :  { %4377 = vst [vmem:[#allocation3 + $0x170] sm:$0xff] %v4313_v23  ;;  %v4921_v23 = vld [vmem:[#allocation2 + $0x41] sm:$0xff] }
 0x4bd   :  { %v3702_v42 = vpop.f32.mrf.mxu2 }
 0x4be   :  { %v4224_v51 = vpop.f32.mrf.mxu3  ;;  %v3792_v54 = vadd.f32 %v3702_v42, %v3270_v22  ;;  %v4983_v22 = vpack.c.bf16 %v4922_v43, %v4921_v23  ;;  %v5441_v42 = vld [vmem:[#allocation2 + $0x32] sm:$0xff] }
 0x4bf   :  { %v3188_v0 = vpop.f32.mrf.mxu1  ;;  %v5504_v33 = vpack.c.bf16 %v5442_v21, %v5441_v42 }
 0x4c0   :  { %v4314_v45 = vadd.f32 %v4224_v51, %v3792_v54  ;;  %v3273_v28 = vadd.f32 %v3188_v0, %v2975_v60  ;;  %v2977_v0 = vld [vmem:[#allocation3 + $0x1a0] sm:$0xff] }
 0x4c1   :  { %v4926_v60 = vld [vmem:[#allocation2 + $0x69] sm:$0xff] }
 0x4c2   :  { %5155 = vmatmul.bf16.gmra.mxu1 %v4982_v6  ;;  %4378 = vst [vmem:[#allocation3 + $0x178] sm:$0xff] %v4314_v45  ;;  %5672 = vmatmul.bf16.vlgmr.msra.gmra.mxu2 %v5503_v57  ;;  %v2976_v57 = vld [vmem:[#allocation3 + $0x198] sm:$0xff] }
 0x4c5   :  { %v3705_v30 = vpop.f32.mrf.mxu2 }
 0x4c6   :  { %v4227_v15 = vpop.f32.mrf.mxu3  ;;  %v3793_v41 = vadd.f32 %v3705_v30, %v3271_v50 }
 0x4c7   :  { %v3190_v55 = vpop.f32.mrf.mxu1 }
 0x4c8   :  { %v4315_v2 = vadd.f32 %v4227_v15, %v3793_v41  ;;  %v3274_v50 = vadd.f32 %v3190_v55, %v2976_v57  ;;  %v5444_v41 = vld [vmem:[#allocation2 + $0x4a] sm:$0xff] }
 0x4ca   :  { %4379 = vst [vmem:[#allocation3 + $0x180] sm:$0xff] %v4315_v2  ;;  %v4923_v2 = vld [vmem:[#allocation2 + $0x51] sm:$0xff] }
 0x4cd   :  { %v3707_v47 = vpop.f32.mrf.mxu2 }
 0x4ce   :  { %v4229_v37 = vpop.f32.mrf.mxu3  ;;  %v3794_v17 = vadd.f32 %v3707_v47, %v3272_v40  ;;  %v4984_v40 = vpack.c.bf16 %v4924_v59, %v4923_v2  ;;  %v5443_v47 = vld [vmem:[#allocation2 + $0x42] sm:$0xff] }
 0x4cf   :  { %v3193_v48 = vpop.f32.mrf.mxu1  ;;  %v5505_v21 = vpack.c.bf16 %v5444_v41, %v5443_v47 }
 0x4d0   :  { %v4316_v51 = vadd.f32 %v4229_v37, %v3794_v17  ;;  %v3275_v23 = vadd.f32 %v3193_v48, %v2977_v0  ;;  %v2979_v48 = vld [vmem:[#allocation3 + $0x1b0] sm:$0xff] }
 0x4d1   :  { %v4928_v0 = vld [vmem:[#allocation2 + $0x79] sm:$0xff] }
 0x4d2   :  { %5160 = vmatmul.bf16.gmra.mxu1 %v4983_v22  ;;  %4380 = vst [vmem:[#allocation3 + $0x188] sm:$0xff] %v4316_v51  ;;  %5677 = vmatmul.bf16.gmra.mxu2 %v5504_v33  ;;  %v2978_v33 = vld [vmem:[#allocation3 + $0x1a8] sm:$0xff] }
 0x4d5   :  { %v3710_v54 = vpop.f32.mrf.mxu2 }
 0x4d6   :  { %v4232_v6 = vpop.f32.mrf.mxu3  ;;  %v3795_v26 = vadd.f32 %v3710_v54, %v3273_v28 }
 0x4d7   :  { %v3195_v45 = vpop.f32.mrf.mxu1 }
 0x4d8   :  { %v4317_v13 = vadd.f32 %v4232_v6, %v3795_v26  ;;  %v3276_v28 = vadd.f32 %v3195_v45, %v2978_v33  ;;  %v5446_v26 = vld [vmem:[#allocation2 + $0x5a] sm:$0xff] }
 0x4da   :  { %4381 = vst [vmem:[#allocation3 + $0x190] sm:$0xff] %v4317_v13  ;;  %v4925_v13 = vld [vmem:[#allocation2 + $0x61] sm:$0xff] }
 0x4dd   :  { %v3712_v30 = vpop.f32.mrf.mxu2 }
 0x4de   :  { %v4234_v15 = vpop.f32.mrf.mxu3  ;;  %v3796_v14 = vadd.f32 %v3712_v30, %v3274_v50  ;;  %v4985_v50 = vpack.c.bf16 %v4926_v60, %v4925_v13  ;;  %v5445_v30 = vld [vmem:[#allocation2 + $0x52] sm:$0xff] }
 0x4df   :  { %v3198_v43 = vpop.f32.mrf.mxu1  ;;  %v5506_v41 = vpack.c.bf16 %v5446_v26, %v5445_v30 }
 0x4e0   :  { %v4318_v37 = vadd.f32 %v4234_v15, %v3796_v14  ;;  %v3277_v2 = vadd.f32 %v3198_v43, %v2979_v48  ;;  %v2981_v43 = vld [vmem:[#allocation3 + $0x1c0] sm:$0xff] }
 0x4e1   :  { %v4930_v48 = vld [vmem:[#allocation2 + $0x89] sm:$0xff] }
 0x4e2   :  { %5165 = vmatmul.bf16.gmra.mxu1 %v4984_v40  ;;  %4382 = vst [vmem:[#allocation3 + $0x198] sm:$0xff] %v4318_v37  ;;  %5682 = vmatmul.bf16.gmra.mxu2 %v5505_v21  ;;  %v2980_v21 = vld [vmem:[#allocation3 + $0x1b8] sm:$0xff] }
 0x4e5   :  { %v3715_v17 = vpop.f32.mrf.mxu2 }
 0x4e6   :  { %v4237_v22 = vpop.f32.mrf.mxu3  ;;  %v3797_v42 = vadd.f32 %v3715_v17, %v3275_v23 }
 0x4e7   :  { %v3200_v51 = vpop.f32.mrf.mxu1 }
 0x4e8   :  { %v4319_v55 = vadd.f32 %v4237_v22, %v3797_v42  ;;  %v3278_v23 = vadd.f32 %v3200_v51, %v2980_v21  ;;  %v5448_v42 = vld [vmem:[#allocation2 + $0x6a] sm:$0xff] }
 0x4ea   :  { %4383 = vst [vmem:[#allocation3 + $0x1a0] sm:$0xff] %v4319_v55  ;;  %v4927_v55 = vld [vmem:[#allocation2 + $0x71] sm:$0xff] }
 0x4ed   :  { %v3717_v54 = vpop.f32.mrf.mxu2 }
 0x4ee   :  { %v4239_v6 = vpop.f32.mrf.mxu3  ;;  %v3798_v57 = vadd.f32 %v3717_v54, %v3276_v28  ;;  %v4986_v28 = vpack.c.bf16 %v4928_v0, %v4927_v55  ;;  %v5447_v54 = vld [vmem:[#allocation2 + $0x62] sm:$0xff] }
 0x4ef   :  { %v3203_v59 = vpop.f32.mrf.mxu1  ;;  %v5507_v26 = vpack.c.bf16 %v5448_v42, %v5447_v54 }
 0x4f0   :  { %v4320_v15 = vadd.f32 %v4239_v6, %v3798_v57  ;;  %v3279_v13 = vadd.f32 %v3203_v59, %v2981_v43  ;;  %v2983_v59 = vld [vmem:[#allocation3 + $0x1d0] sm:$0xff] }
 0x4f1   :  { %v4932_v43 = vld [vmem:[#allocation2 + $0x99] sm:$0xff] }
 0x4f2   :  { %5170 = vmatmul.bf16.gmra.mxu1 %v4985_v50  ;;  %4384 = vst [vmem:[#allocation3 + $0x1a8] sm:$0xff] %v4320_v15  ;;  %5687 = vmatmul.bf16.gmra.mxu2 %v5506_v41  ;;  %v2982_v41 = vld [vmem:[#allocation3 + $0x1c8] sm:$0xff] }
 0x4f5   :  { %v3720_v14 = vpop.f32.mrf.mxu2 }
 0x4f6   :  { %v4242_v40 = vpop.f32.mrf.mxu3  ;;  %v3799_v47 = vadd.f32 %v3720_v14, %v3277_v2 }
 0x4f7   :  { %v3205_v37 = vpop.f32.mrf.mxu1 }
 0x4f8   :  { %v4321_v45 = vadd.f32 %v4242_v40, %v3799_v47  ;;  %v3280_v2 = vadd.f32 %v3205_v37, %v2982_v41  ;;  %v5450_v47 = vld [vmem:[#allocation2 + $0x7a] sm:$0xff] }
 0x4fa   :  { %4385 = vst [vmem:[#allocation3 + $0x1b0] sm:$0xff] %v4321_v45  ;;  %v4929_v45 = vld [vmem:[#allocation2 + $0x81] sm:$0xff] }
 0x4fd   :  { %v3722_v17 = vpop.f32.mrf.mxu2 }
 0x4fe   :  { %v4244_v22 = vpop.f32.mrf.mxu3  ;;  %v3800_v33 = vadd.f32 %v3722_v17, %v3278_v23  ;;  %v4987_v23 = vpack.c.bf16 %v4930_v48, %v4929_v45  ;;  %v5449_v17 = vld [vmem:[#allocation2 + $0x72] sm:$0xff] }
 0x4ff   :  { %v3208_v60 = vpop.f32.mrf.mxu1  ;;  %v5508_v42 = vpack.c.bf16 %v5450_v47, %v5449_v17 }
 0x500   :  { %v4322_v6 = vadd.f32 %v4244_v22, %v3800_v33  ;;  %v3281_v55 = vadd.f32 %v3208_v60, %v2983_v59  ;;  %v2985_v60 = vld [vmem:[#allocation3 + $0x1e0] sm:$0xff] }
 0x501   :  { %v4934_v59 = vld [vmem:[#allocation2 + $0xa9] sm:$0xff] }
 0x502   :  { %5175 = vmatmul.bf16.gmra.mxu1 %v4986_v28  ;;  %4386 = vst [vmem:[#allocation3 + $0x1b8] sm:$0xff] %v4322_v6  ;;  %5692 = vmatmul.bf16.gmra.mxu2 %v5507_v26  ;;  %v2984_v26 = vld [vmem:[#allocation3 + $0x1d8] sm:$0xff] }
 0x505   :  { %v3725_v57 = vpop.f32.mrf.mxu2 }
 0x506   :  { %v4247_v50 = vpop.f32.mrf.mxu3  ;;  %v3801_v30 = vadd.f32 %v3725_v57, %v3279_v13 }
 0x507   :  { %v3210_v15 = vpop.f32.mrf.mxu1 }
 0x508   :  { %v4323_v51 = vadd.f32 %v4247_v50, %v3801_v30  ;;  %v3282_v13 = vadd.f32 %v3210_v15, %v2984_v26  ;;  %v5452_v30 = vld [vmem:[#allocation2 + $0x8a] sm:$0xff] }
 0x50a   :  { %4387 = vst [vmem:[#allocation3 + $0x1c0] sm:$0xff] %v4323_v51  ;;  %v4931_v51 = vld [vmem:[#allocation2 + $0x91] sm:$0xff] }
 0x50d   :  { %v3727_v14 = vpop.f32.mrf.mxu2 }
 0x50e   :  { %v4249_v40 = vpop.f32.mrf.mxu3  ;;  %v3802_v21 = vadd.f32 %v3727_v14, %v3280_v2  ;;  %v4988_v2 = vpack.c.bf16 %v4932_v43, %v4931_v51  ;;  %v5451_v14 = vld [vmem:[#allocation2 + $0x82] sm:$0xff] }
 0x50f   :  { %v3213_v0 = vpop.f32.mrf.mxu1  ;;  %v5509_v47 = vpack.c.bf16 %v5452_v30, %v5451_v14 }
 0x510   :  { %v4324_v22 = vadd.f32 %v4249_v40, %v3802_v21  ;;  %v3283_v45 = vadd.f32 %v3213_v0, %v2985_v60  ;;  %v2987_v0 = vld [vmem:[#allocation3 + $0x1f0] sm:$0xff] }
 0x511   :  { %v4936_v60 = vld [vmem:[#allocation2 + $0xb9] sm:$0xff] }
 0x512   :  { %5180 = vmatmul.bf16.gmra.mxu1 %v4987_v23  ;;  %4388 = vst [vmem:[#allocation3 + $0x1c8] sm:$0xff] %v4324_v22  ;;  %5697 = vmatmul.bf16.gmra.mxu2 %v5508_v42  ;;  %v2986_v42 = vld [vmem:[#allocation3 + $0x1e8] sm:$0xff] }
 0x515   :  { %v3730_v33 = vpop.f32.mrf.mxu2 }
 0x516   :  { %v4252_v28 = vpop.f32.mrf.mxu3  ;;  %v3803_v54 = vadd.f32 %v3730_v33, %v3281_v55 }
 0x517   :  { %v3215_v6 = vpop.f32.mrf.mxu1 }
 0x518   :  { %v4325_v37 = vadd.f32 %v4252_v28, %v3803_v54  ;;  %v3284_v55 = vadd.f32 %v3215_v6, %v2986_v42  ;;  %v5454_v54 = vld [vmem:[#allocation2 + $0x9a] sm:$0xff] }
 0x51a   :  { %4389 = vst [vmem:[#allocation3 + $0x1d0] sm:$0xff] %v4325_v37  ;;  %v4933_v37 = vld [vmem:[#allocation2 + $0xa1] sm:$0xff] }
 0x51d   :  { %v3732_v57 = vpop.f32.mrf.mxu2 }
 0x51e   :  { %v4254_v50 = vpop.f32.mrf.mxu3  ;;  %v3804_v41 = vadd.f32 %v3732_v57, %v3282_v13  ;;  %v4989_v13 = vpack.c.bf16 %v4934_v59, %v4933_v37  ;;  %v5453_v57 = vld [vmem:[#allocation2 + $0x92] sm:$0xff] }
 0x51f   :  { %v3218_v48 = vpop.f32.mrf.mxu1  ;;  %v5510_v30 = vpack.c.bf16 %v5454_v54, %v5453_v57 }
 0x520   :  { %v4326_v40 = vadd.f32 %v4254_v50, %v3804_v41  ;;  %v3285_v51 = vadd.f32 %v3218_v48, %v2987_v0 }
 0x522   :  { %5185 = vmatmul.bf16.gmra.mxu1 %v4988_v2  ;;  %4390 = vst [vmem:[#allocation3 + $0x1d8] sm:$0xff] %v4326_v40  ;;  %5702 = vmatmul.bf16.gmra.mxu2 %v5509_v47  ;;  %v2988_v47 = vld [vmem:[#allocation3 + $0x1f8] sm:$0xff] }
 0x525   :  { %v3735_v21 = vpop.f32.mrf.mxu2 }
 0x526   :  { %v4257_v23 = vpop.f32.mrf.mxu3  ;;  %v3805_v17 = vadd.f32 %v3735_v21, %v3283_v45 }
 0x527   :  { %v3220_v22 = vpop.f32.mrf.mxu1 }
 0x528   :  { %v4327_v15 = vadd.f32 %v4257_v23, %v3805_v17  ;;  %v3286_v45 = vadd.f32 %v3220_v22, %v2988_v47  ;;  %v5456_v23 = vld [vmem:[#allocation2 + $0xaa] sm:$0xff]  ;;  %v14556_v22 = vld [vmem:[%s16295_s5] ss:$0 sm:$0xff] }
 0x529   :  { %v4935_v17 = vld [vmem:[#allocation2 + $0xb1] sm:$0xff] }
 0x52a   :  { %4391 = vst [vmem:[#allocation3 + $0x1e0] sm:$0xff] %v4327_v15  ;;  %v4990_v59 = vpack.c.bf16 %v4936_v60, %v4935_v17  ;;  %v5457_v17 = vld [vmem:[#allocation2 + $0xb2] sm:$0xff] }
 0x52d   :  { %v3737_v33 = vpop.f32.mrf.mxu2 }
 0x52e   :  { %v4259_v28 = vpop.f32.mrf.mxu3  ;;  %v3806_v26 = vadd.f32 %v3737_v33, %v3284_v55  ;;  %v4491_v55 = vld [vmem:[#allocation3] sm:$0xff] }
 0x52f   :  { %v5151_v43 = vpop.f32.mrf.mxu1  ;;  %v4789_v37 = vadd.f32 %v14311_v8, %v4491_v55 }
 0x530   :  { %v4328_v50 = vadd.f32 %v4259_v28, %v3806_v26  ;;  %v5455_v28 = vld [vmem:[#allocation2 + $0xa2] sm:$0xff] }
 0x531   :  { %v5511_v48 = vpack.c.bf16 %v5456_v23, %v5455_v28  ;;  %v5311_v26 = vadd.f32 %v5151_v43, %v4789_v37  ;;  %v4937_v43 = vld [vmem:[#allocation2 + $0xc1] sm:$0xff] }
 0x532   :  { %5190 = vmatmul.bf16.gmra.mxu1 %v4989_v13  ;;  %4392 = vst [vmem:[#allocation3 + $0x1e8] sm:$0xff] %v4328_v50  ;;  %5707 = vmatmul.bf16.gmra.mxu2 %v5510_v30  ;;  %v4492_v30 = vld [vmem:[#allocation3 + $0x8] sm:$0xff]  ;;  %v4493_v23 = vld [vmem:[#allocation3 + $0x10] sm:$0xff] }
 0x535   :  { %v3740_v41 = vpop.f32.mrf.mxu2 }
 0x536   :  { %v4262_v2 = vpop.f32.mrf.mxu3  ;;  %v3807_v14 = vadd.f32 %v3740_v41, %v3285_v51  ;;  %v4790_v51 = vadd.f32 %v14318_v1, %v4492_v30  ;;  %v4791_v1 = vadd.f32 %v14321_v32, %v4493_v23 }
 0x537   :  { %v5153_v40 = vpop.f32.mrf.mxu1 }
 0x538   :  { %v4329_v6 = vadd.f32 %v4262_v2, %v3807_v14  ;;  %v4938_v2 = vld [vmem:[#allocation2 + $0xc9] sm:$0xff]  ;;  %v5312_v14 = vadd.f32 %v5153_v40, %v4790_v51 }
 0x539   :  { %v5460_v51 = vld [vmem:[#allocation2 + $0xca] sm:$0xff] }
 0x53a   :  { %4393 = vst [vmem:[#allocation3 + $0x1f0] sm:$0xff] %v4329_v6  ;;  %v5458_v6 = vld [vmem:[#allocation2 + $0xba] sm:$0xff] }
 0x53d   :  { %v3742_v21 = vpop.f32.mrf.mxu2 }
 0x53e   :  { %v3808_v15 = vadd.f32 %v3742_v21, %v3286_v45  ;;  %v4264_v33 = vpop.f32.mrf.mxu3  ;;  %v4991_v45 = vpack.c.bf16 %v4938_v2, %v4937_v43  ;;  %v13127_v21 = vld [vmem:[%s16296_s6 + $0x38] sm:$0xff] }
 0x53f   :  { %v5156_v42 = vpop.f32.mrf.mxu1  ;;  %10092 = vmatpush.bf16.msra.mxu3 %v13127_v21  ;;  %v4939_v2 = vld [vmem:[#allocation2 + $0xd1] sm:$0xff] }
 0x540   :  { %v4330_v54 = vadd.f32 %v4264_v33, %v3808_v15  ;;  %v5313_v55 = vadd.f32 %v5156_v42, %v4791_v1  ;;  %v4495_v42 = vld [vmem:[#allocation3 + $0x20] sm:$0xff]  ;;  %v13143_v1 = vld [vmem:[%s16296_s6 + $0xb8] sm:$0xff] }
 0x541   :  { %10118 = vmatpush.bf16.msra.mxu0 %v13143_v1 }
 0x542   :  { %5195 = vmatmul.bf16.gmra.mxu1 %v4990_v59  ;;  %4394 = vst [vmem:[#allocation3 + $0x1f8] sm:$0xff] %v4330_v54  ;;  %5712 = vmatmul.bf16.gmra.mxu2 %v5511_v48  ;;  %v5512_v59 = vpack.c.bf16 %v5458_v6, %v5457_v17  ;;  %v4494_v48 = vld [vmem:[#allocation3 + $0x18] sm:$0xff] }
 0x543   :  { %v5459_v6 = vld [vmem:[#allocation2 + $0xc2] sm:$0xff] }
 0x545   :  { %v5673_v13 = vpop.f32.mrf.mxu2 }
 0x546   :  { %v5833_v57 = vadd.f32 %v5673_v13, %v5311_v26  ;;  %v4792_v26 = vadd.f32 %v14328_v53, %v4494_v48 }
 0x547   :  { %v5158_v50 = vpop.f32.mrf.mxu1 }
 0x548   :  { %v6029_v0 = vadd.f32 %v14556_v22, %v5833_v57  ;;  %v4940_v57 = vld [vmem:[#allocation2 + $0xd9] sm:$0xff]  ;;  %v5314_v30 = vadd.f32 %v5158_v50, %v4792_v26  ;;  %v4942_v26 = vld [vmem:[#allocation2 + $0xe9] sm:$0xff] }
 0x54a   :  { %v6093_v41 = vmax.f32 %v6029_v0, 0.0 }
 0x54c   :  { %6157 = vst [vmem:[#allocation3] sm:$0xff] %v6093_v41 }
 0x54d   :  { %v5675_v8 = vpop.f32.mrf.mxu2 }
 0x54e   :  { %v5834_v47 = vadd.f32 %v5675_v8, %v5312_v14  ;;  %v4992_v8 = vpack.c.bf16 %v4940_v57, %v4939_v2 }
 0x54f   :  { %v5161_v60 = vpop.f32.mrf.mxu1 }
 0x550   :  { %v6030_v15 = vadd.f32 %v14556_v22, %v5834_v47  ;;  %v5513_v47 = vpack.c.bf16 %v5460_v51, %v5459_v6  ;;  %v4941_v51 = vld [vmem:[#allocation2 + $0xe1] sm:$0xff] }
 0x552   :  { %5200 = vmatmul.bf16.gmra.mxu1 %v4991_v45  ;;  %v6094_v40 = vmax.f32 %v6030_v15, 0.0  ;;  %5717 = vmatmul.bf16.gmra.mxu2 %v5512_v59  ;;  %v4793_v45 = vadd.f32 %v14331_v62, %v4495_v42  ;;  %v4497_v42 = vld [vmem:[#allocation3 + $0x30] sm:$0xff] }
 0x554   :  { %6158 = vst [vmem:[#allocation3 + $0x8] sm:$0xff] %v6094_v40  ;;  %v5315_v23 = vadd.f32 %v5161_v60, %v4793_v45 }
 0x555   :  { %v5678_v33 = vpop.f32.mrf.mxu2 }
 0x556   :  { %v5835_v28 = vadd.f32 %v5678_v33, %v5313_v55  ;;  %v4496_v55 = vld [vmem:[#allocation3 + $0x28] sm:$0xff] }
 0x557   :  { %v5163_v54 = vpop.f32.mrf.mxu1  ;;  %v4794_v62 = vadd.f32 %v14338_v12, %v4496_v55  ;;  %v5461_v12 = vld [vmem:[#allocation2 + $0xd2] sm:$0xff] }
 0x558   :  { %v6031_v37 = vadd.f32 %v14556_v22, %v5835_v28 }
 0x559   :  { %v5316_v57 = vadd.f32 %v5163_v54, %v4794_v62  ;;  %v4795_v54 = vadd.f32 %v14341_v24, %v4497_v42  ;;  %v4498_v62 = vld [vmem:[#allocation3 + $0x38] sm:$0xff] }
 0x55a   :  { %v6095_v13 = vmax.f32 %v6031_v37, 0.0 }
 0x55b   :  { %v6285_v53 = vld [vmem:[#allocation3 + $0x1] sm:$0xff] }
 0x55c   :  { %6159 = vst [vmem:[#allocation3 + $0x10] sm:$0xff] %v6095_v13  ;;  %v6349_v17 = vmax.f32 %v6093_v41, %v6285_v53 }
 0x55d   :  { %v5680_v0 = vpop.f32.mrf.mxu2 }
 0x55e   :  { %v5836_v32 = vadd.f32 %v5680_v0, %v5314_v30  ;;  %v6415_v28 = vmax.f32 %v6349_v17, %v6095_v13  ;;  %v5462_v0 = vld [vmem:[#allocation2 + $0xda] sm:$0xff]  ;;  %v4993_v13 = vpack.c.bf16 %v4942_v26, %v4941_v51 }
 0x55f   :  { %v5166_v14 = vpop.f32.mrf.mxu1  ;;  %v4944_v26 = vld [vmem:[#allocation2 + $0xf9] sm:$0xff] }
 0x560   :  { %v6032_v43 = vadd.f32 %v14556_v22, %v5836_v32 }
 0x562   :  { %5205 = vmatmul.bf16.gmra.mxu1 %v4992_v8  ;;  %v6096_v21 = vmax.f32 %v6032_v43, 0.0  ;;  %5722 = vmatmul.bf16.gmra.mxu2 %v5513_v47  ;;  %v5514_v43 = vpack.c.bf16 %v5462_v0, %v5461_v12  ;;  %v4943_v0 = vld [vmem:[#allocation2 + $0xf1] sm:$0xff] }
 0x563   :  { %v6286_v60 = vld [vmem:[#allocation3 + $0x9] sm:$0xff]  ;;  %v4994_v42 = vpack.c.bf16 %v4944_v26, %v4943_v0  ;;  %v4946_v26 = vld [vmem:[#allocation2 + $0x109] sm:$0xff] }
 0x564   :  { %6160 = vst [vmem:[#allocation3 + $0x18] sm:$0xff] %v6096_v21  ;;  %v6350_v2 = vmax.f32 %v6094_v40, %v6286_v60  ;;  %v5317_v40 = vadd.f32 %v5166_v14, %v4795_v54  ;;  %v4796_v60 = vadd.f32 %v14348_v36, %v4498_v62 }
 0x565   :  { %v5683_v50 = vpop.f32.mrf.mxu2 }
 0x566   :  { %v5837_v15 = vadd.f32 %v5683_v50, %v5315_v23  ;;  %v6416_v47 = vmax.f32 %v6350_v2, %v6096_v21 }
 0x567   :  { %v5168_v59 = vpop.f32.mrf.mxu1 }
 0x568   :  { %v14573_v33 = vadd.f32 %v14556_v22, %v5837_v15 }
 0x56a   :  { %v6097_v48 = vmax.f32 %v14573_v33, 0.0 }
 0x56b   :  { %v6287_v37 = vld [vmem:[#allocation3 + $0x11] sm:$0xff] }
 0x56c   :  { %v6481_v41 = vmax.f32 %v6415_v28, %v6287_v37  ;;  %6161 = vst [vmem:[#allocation3 + $0x20] sm:$0xff] %v6097_v48 }
 0x56d   :  { %v5685_v30 = vpop.f32.mrf.mxu2 }
 0x56e   :  { %6545 = vst [vmem:[#allocation4] sm:$0xff] %v6481_v41  ;;  %v5838_v32 = vadd.f32 %v5685_v30, %v5316_v57  ;;  %v5318_v41 = vadd.f32 %v5168_v59, %v4796_v60  ;;  %v5464_v57 = vld [vmem:[#allocation2 + $0xea] sm:$0xff] }
 0x56f   :  { %v5171_v8 = vpop.f32.mrf.mxu1 }
 0x570   :  { %v14580_v6 = vadd.f32 %v14556_v22, %v5838_v32 }
 0x572   :  { %5210 = vmatmul.bf16.gmra.mxu1 %v4993_v13  ;;  %v6098_v45 = vmax.f32 %v14580_v6, 0.0  ;;  %5727 = vmatmul.bf16.gmra.mxu2 %v5514_v43  ;;  %v4499_v43 = vld [vmem:[#allocation3 + $0x40] sm:$0xff] }
 0x573   :  { %v6288_v53 = vld [vmem:[#allocation3 + $0x19] sm:$0xff]  ;;  %v4797_v59 = vadd.f32 %v14351_v56, %v4499_v43 }
 0x574   :  { %v6482_v23 = vmax.f32 %v6416_v47, %v6288_v53  ;;  %6162 = vst [vmem:[#allocation3 + $0x28] sm:$0xff] %v6098_v45  ;;  %v5463_v47 = vld [vmem:[#allocation2 + $0xe2] sm:$0xff] }
 0x575   :  { %v5688_v50 = vpop.f32.mrf.mxu2  ;;  %v6658_v17 = vld [vmem:[#allocation4] sm:$0x1]  ;;  %v6662_v15 = vld [vmem:[#allocation4 + $0x4] sm:$0x1]  ;;  %v6660_v28 = vld [vmem:[#allocation4 + $0x2] sm:$0x1]  ;;  %v5515_v54 = vpack.c.bf16 %v5464_v57, %v5463_v47 }
 0x576   :  { %6546 = vst [vmem:[#allocation4 + $0x8] sm:$0xff] %v6482_v23  ;;  %v5839_v1 = vadd.f32 %v5688_v50, %v5317_v40  ;;  %v6664_v21 = vld [vmem:[#allocation4 + $0x6] sm:$0x1]  ;;  %v5319_v40 = vadd.f32 %v5171_v8, %v4797_v59 }
 0x577   :  { %v5173_v55 = vpop.f32.mrf.mxu1  ;;  %6659 = vst [vmem:[#allocation5] sm:$0x1] %v6658_v17 }
 0x578   :  { %v6035_v24 = vadd.f32 %v14556_v22, %v5839_v1  ;;  %6663 = vst [vmem:[#allocation5 + $0x10] sm:$0x1] %v6662_v15 }
 0x579   :  { %6661 = vst [vmem:[#allocation5 + $0x8] sm:$0x1] %v6660_v28  ;;  %v4500_v28 = vld [vmem:[#allocation3 + $0x48] sm:$0xff] }
 0x57a   :  { %v6099_v14 = vmax.f32 %v6035_v24, 0.0  ;;  %6665 = vst [vmem:[#allocation5 + $0x18] sm:$0x1] %v6664_v21  ;;  %v4798_v24 = vadd.f32 %v14358_v3, %v4500_v28  ;;  %v13126_v3 = vld [vmem:[%s16296_s6 + $0x30] sm:$0xff] }
 0x57b   :  { %v6289_v37 = vld [vmem:[#allocation3 + $0x21] sm:$0xff]  ;;  %10093 = vmatpush.bf16.msra.mxu3 %v13126_v3  ;;  %v5467_v3 = vld [vmem:[#allocation2 + $0x102] sm:$0xff] }
 0x57c   :  { %6163 = vst [vmem:[#allocation3 + $0x30] sm:$0xff] %v6099_v14  ;;  %v6353_v17 = vmax.f32 %v6097_v48, %v6289_v37  ;;  %v5320_v8 = vadd.f32 %v5173_v55, %v4798_v24  ;;  %v5466_v48 = vld [vmem:[#allocation2 + $0xfa] sm:$0xff] }
 0x57d   :  { %v5690_v30 = vpop.f32.mrf.mxu2  ;;  %v6666_v51 = vld [vmem:[#allocation4 + $0x8] sm:$0x1]  ;;  %v6670_v2 = vld [vmem:[#allocation4 + $0xc] sm:$0x1]  ;;  %v6668_v12 = vld [vmem:[#allocation4 + $0xa] sm:$0x1] }
 0x57e   :  { %v5840_v32 = vadd.f32 %v5690_v30, %v5318_v41  ;;  %6667 = vst [vmem:[#allocation5 + $0x20] sm:$0x1] %v6666_v51  ;;  %v6419_v21 = vmax.f32 %v6353_v17, %v6099_v14  ;;  %v4945_v37 = vld [vmem:[#allocation2 + $0x101] sm:$0xff] }
 0x57f   :  { %v5176_v13 = vpop.f32.mrf.mxu1  ;;  %6671 = vst [vmem:[#allocation5 + $0x30] sm:$0x1] %v6670_v2  ;;  %v4995_v0 = vpack.c.bf16 %v4946_v26, %v4945_v37  ;;  %v4501_v51 = vld [vmem:[#allocation3 + $0x50] sm:$0xff]  ;;  %v5465_v2 = vld [vmem:[#allocation2 + $0xf2] sm:$0xff]  ;;  %v4502_v17 = vld [vmem:[#allocation3 + $0x58] sm:$0xff] }
 0x580   :  { %v6036_v36 = vadd.f32 %v14556_v22, %v5840_v32  ;;  %6669 = vst [vmem:[#allocation5 + $0x28] sm:$0x1] %v6668_v12  ;;  %v5516_v32 = vpack.c.bf16 %v5466_v48, %v5465_v2  ;;  %v4799_v6 = vadd.f32 %v14361_v10, %v4501_v51 }
 0x582   :  { %5215 = vmatmul.bf16.gmra.mxu1 %v4994_v42  ;;  %v6100_v53 = vmax.f32 %v6036_v36, 0.0  ;;  %5732 = vmatmul.bf16.gmra.mxu2 %v5515_v54  ;;  %v5321_v47 = vadd.f32 %v5176_v13, %v4799_v6 }
 0x583   :  { %v6290_v23 = vld [vmem:[#allocation3 + $0x29] sm:$0xff] }
 0x584   :  { %6164 = vst [vmem:[#allocation3 + $0x38] sm:$0xff] %v6100_v53  ;;  %v6354_v57 = vmax.f32 %v6098_v45, %v6290_v23 }
 0x585   :  { %v5693_v50 = vpop.f32.mrf.mxu2 }
 0x586   :  { %v5841_v15 = vadd.f32 %v5693_v50, %v5319_v40  ;;  %v6420_v42 = vmax.f32 %v6354_v57, %v6100_v53 }
 0x587   :  { %v5178_v1 = vpop.f32.mrf.mxu1 }
 0x588   :  { %v14593_v62 = vadd.f32 %v14556_v22, %v5841_v15  ;;  %v4800_v15 = vadd.f32 %v14368_v35, %v4502_v17  ;;  %v4950_v17 = vld [vmem:[#allocation2 + $0x129] sm:$0xff] }
 0x58a   :  { %v6101_v56 = vmax.f32 %v14593_v62, 0.0  ;;  %v5322_v24 = vadd.f32 %v5178_v1, %v4800_v15  ;;  %v4949_v15 = vld [vmem:[#allocation2 + $0x121] sm:$0xff] }
 0x58b   :  { %v6291_v60 = vld [vmem:[#allocation3 + $0x31] sm:$0xff] }
 0x58c   :  { %v6485_v41 = vmax.f32 %v6419_v21, %v6291_v60  ;;  %6165 = vst [vmem:[#allocation3 + $0x40] sm:$0xff] %v6101_v56  ;;  %v4948_v21 = vld [vmem:[#allocation2 + $0x119] sm:$0xff]  ;;  %v5468_v60 = vld [vmem:[#allocation2 + $0x10a] sm:$0xff] }
 0x58d   :  { %v5695_v33 = vpop.f32.mrf.mxu2  ;;  %v5517_v51 = vpack.c.bf16 %v5468_v60, %v5467_v3  ;;  %v5469_v60 = vld [vmem:[#allocation2 + $0x112] sm:$0xff] }
 0x58e   :  { %6549 = vst [vmem:[#allocation4 + $0x20] sm:$0xff] %v6485_v41  ;;  %v5842_v30 = vadd.f32 %v5695_v33, %v5320_v8  ;;  %v4947_v41 = vld [vmem:[#allocation2 + $0x111] sm:$0xff] }
 0x58f   :  { %v5181_v14 = vpop.f32.mrf.mxu1  ;;  %v4996_v57 = vpack.c.bf16 %v4948_v21, %v4947_v41 }
 0x590   :  { %v14605_v55 = vadd.f32 %v14556_v22, %v5842_v30 }
 0x592   :  { %5220 = vmatmul.bf16.gmra.mxu1 %v4995_v0  ;;  %v6102_v45 = vmax.f32 %v14605_v55, 0.0  ;;  %5737 = vmatmul.bf16.gmra.mxu2 %v5516_v32  ;;  %v4503_v0 = vld [vmem:[#allocation3 + $0x60] sm:$0xff] }
 0x593   :  { %v6292_v12 = vld [vmem:[#allocation3 + $0x39] sm:$0xff]  ;;  %v4801_v1 = vadd.f32 %v14375_v25, %v4503_v0 }
 0x594   :  { %v6486_v43 = vmax.f32 %v6420_v42, %v6292_v12  ;;  %6166 = vst [vmem:[#allocation3 + $0x48] sm:$0xff] %v6102_v45 }
 0x595   :  { %v5698_v36 = vpop.f32.mrf.mxu2  ;;  %v6674_v54 = vld [vmem:[#allocation4 + $0x22] sm:$0x1]  ;;  %v6672_v59 = vld [vmem:[#allocation4 + $0x20] sm:$0x1]  ;;  %v6678_v50 = vld [vmem:[#allocation4 + $0x26] sm:$0x1]  ;;  %v5323_v42 = vadd.f32 %v5181_v14, %v4801_v1 }
 0x596   :  { %6550 = vst [vmem:[#allocation4 + $0x28] sm:$0xff] %v6486_v43  ;;  %v5843_v23 = vadd.f32 %v5698_v36, %v5321_v47  ;;  %v6676_v53 = vld [vmem:[#allocation4 + $0x24] sm:$0x1]  ;;  %v13142_v36 = vld [vmem:[%s16296_s6 + $0xb0] sm:$0xff] }
 0x597   :  { %v5183_v40 = vpop.f32.mrf.mxu1  ;;  %6675 = vst [vmem:[#allocation5 + $0x40] sm:$0x1] %v6674_v54  ;;  %v4504_v54 = vld [vmem:[#allocation3 + $0x68] sm:$0xff]  ;;  %10119 = vmatpush.bf16.msra.mxu0 %v13142_v36  ;;  %v4506_v1 = vld [vmem:[#allocation3 + $0x78] sm:$0xff] }
 0x598   :  { %v6039_v10 = vadd.f32 %v14556_v22, %v5843_v23  ;;  %6673 = vst [vmem:[#allocation5 + $0x38] sm:$0x1] %v6672_v59  ;;  %v4802_v23 = vadd.f32 %v14379_v5, %v4504_v54  ;;  %v4505_v5 = vld [vmem:[#allocation3 + $0x70] sm:$0xff]  ;;  %v4951_v54 = vld [vmem:[#allocation2 + $0x131] sm:$0xff] }
 0x599   :  { %6679 = vst [vmem:[#allocation5 + $0x50] sm:$0x1] %v6678_v50 }
 0x59a   :  { %v6103_v13 = vmax.f32 %v6039_v10, 0.0  ;;  %6677 = vst [vmem:[#allocation5 + $0x48] sm:$0x1] %v6676_v53  ;;  %v5470_v10 = vld [vmem:[#allocation2 + $0x11a] sm:$0xff] }
 0x59b   :  { %v6293_v28 = vld [vmem:[#allocation3 + $0x41] sm:$0xff]  ;;  %v5518_v41 = vpack.c.bf16 %v5470_v10, %v5469_v60  ;;  %v5471_v10 = vld [vmem:[#allocation2 + $0x122] sm:$0xff] }
 0x59c   :  { %6167 = vst [vmem:[#allocation3 + $0x50] sm:$0xff] %v6103_v13  ;;  %v6357_v12 = vmax.f32 %v6101_v56, %v6293_v28  ;;  %v5324_v56 = vadd.f32 %v5183_v40, %v4802_v23 }
 0x59d   :  { %v5700_v26 = vpop.f32.mrf.mxu2  ;;  %v6682_v8 = vld [vmem:[#allocation4 + $0x2a] sm:$0x1]  ;;  %v6680_v33 = vld [vmem:[#allocation4 + $0x28] sm:$0x1]  ;;  %v6684_v30 = vld [vmem:[#allocation4 + $0x2c] sm:$0x1] }
 0x59e   :  { %v5844_v48 = vadd.f32 %v5700_v26, %v5322_v24  ;;  %6683 = vst [vmem:[#allocation5 + $0x60] sm:$0x1] %v6682_v8  ;;  %v6423_v25 = vmax.f32 %v6357_v12, %v6103_v13  ;;  %v4997_v24 = vpack.c.bf16 %v4950_v17, %v4949_v15  ;;  %v4803_v8 = vadd.f32 %v14385_v31, %v4505_v5 }
 0x59f   :  { %v5186_v37 = vpop.f32.mrf.mxu1  ;;  %6681 = vst [vmem:[#allocation5 + $0x58] sm:$0x1] %v6680_v33 }
 0x5a0   :  { %v6040_v35 = vadd.f32 %v14556_v22, %v5844_v48  ;;  %6685 = vst [vmem:[#allocation5 + $0x68] sm:$0x1] %v6684_v30 }
 0x5a2   :  { %5225 = vmatmul.bf16.gmra.mxu1 %v4996_v57  ;;  %v6104_v2 = vmax.f32 %v6040_v35, 0.0  ;;  %5742 = vmatmul.bf16.gmra.mxu2 %v5517_v51 }
 0x5a3   :  { %v6294_v32 = vld [vmem:[#allocation3 + $0x49] sm:$0xff] }
 0x5a4   :  { %6168 = vst [vmem:[#allocation3 + $0x58] sm:$0xff] %v6104_v2  ;;  %v6358_v28 = vmax.f32 %v6102_v45, %v6294_v32  ;;  %v5325_v45 = vadd.f32 %v5186_v37, %v4803_v8  ;;  %v4804_v32 = vadd.f32 %v14389_v58, %v4506_v1  ;;  %v4508_v8 = vld [vmem:[#allocation3 + $0x88] sm:$0xff] }
 0x5a5   :  { %v5703_v6 = vpop.f32.mrf.mxu2 }
 0x5a6   :  { %v5845_v43 = vadd.f32 %v5703_v6, %v5323_v42  ;;  %v6424_v40 = vmax.f32 %v6358_v28, %v6104_v2  ;;  %v4952_v6 = vld [vmem:[#allocation2 + $0x139] sm:$0xff] }
 0x5a7   :  { %v5188_v47 = vpop.f32.mrf.mxu1 }
 0x5a8   :  { %v14621_v59 = vadd.f32 %v14556_v22, %v5845_v43  ;;  %v5326_v12 = vadd.f32 %v5188_v47, %v4804_v32  ;;  %v5472_v43 = vld [vmem:[#allocation2 + $0x12a] sm:$0xff]  ;;  %v4509_v32 = vld [vmem:[#allocation3 + $0x90] sm:$0xff] }
 0x5a9   :  { %v5519_v15 = vpack.c.bf16 %v5472_v43, %v5471_v10 }
 0x5aa   :  { %v6105_v14 = vmax.f32 %v14621_v59, 0.0 }
 0x5ab   :  { %v6295_v50 = vld [vmem:[#allocation3 + $0x51] sm:$0xff] }
 0x5ac   :  { %v6489_v62 = vmax.f32 %v6423_v25, %v6295_v50  ;;  %6169 = vst [vmem:[#allocation3 + $0x60] sm:$0xff] %v6105_v14 }
 0x5ad   :  { %v5705_v53 = vpop.f32.mrf.mxu2 }
 0x5ae   :  { %6553 = vst [vmem:[#allocation4 + $0x40] sm:$0xff] %v6489_v62  ;;  %v5846_v21 = vadd.f32 %v5705_v53, %v5324_v56  ;;  %v4998_v62 = vpack.c.bf16 %v4952_v6, %v4951_v54  ;;  %v4507_v53 = vld [vmem:[#allocation3 + $0x80] sm:$0xff] }
 0x5af   :  { %v5191_v13 = vpop.f32.mrf.mxu1  ;;  %v4805_v47 = vadd.f32 %v14393_v7, %v4507_v53  ;;  %v4510_v53 = vld [vmem:[#allocation3 + $0x98] sm:$0xff] }
 0x5b0   :  { %v14630_v26 = vadd.f32 %v14556_v22, %v5846_v21 }
 0x5b2   :  { %5230 = vmatmul.bf16.gmra.mxu1 %v4997_v24  ;;  %v6106_v33 = vmax.f32 %v14630_v26, 0.0  ;;  %5747 = vmatmul.bf16.gmra.mxu2 %v5518_v41  ;;  %v5327_v24 = vadd.f32 %v5191_v13, %v4805_v47  ;;  %v4807_v26 = vadd.f32 %v14401_v61, %v4509_v32  ;;  %v4956_v47 = vld [vmem:[#allocation2 + $0x159] sm:$0xff]  ;;  %v13141_v32 = vld [vmem:[%s16296_s6 + $0xa8] sm:$0xff] }
 0x5b3   :  { %v6296_v48 = vld [vmem:[#allocation3 + $0x59] sm:$0xff]  ;;  %10120 = vmatpush.bf16.msra.mxu0 %v13141_v32 }
 0x5b4   :  { %v6490_v55 = vmax.f32 %v6424_v40, %v6296_v48  ;;  %6170 = vst [vmem:[#allocation3 + $0x68] sm:$0xff] %v6106_v33  ;;  %v4515_v32 = vld [vmem:[#allocation3 + $0xc0] sm:$0xff] }
 0x5b5   :  { %v5708_v57 = vpop.f32.mrf.mxu2  ;;  %v6686_v30 = vld [vmem:[#allocation4 + $0x40] sm:$0x1]  ;;  %v6690_v0 = vld [vmem:[#allocation4 + $0x44] sm:$0x1]  ;;  %v6688_v51 = vld [vmem:[#allocation4 + $0x42] sm:$0x1] }
 0x5b6   :  { %6554 = vst [vmem:[#allocation4 + $0x48] sm:$0xff] %v6490_v55  ;;  %v5847_v3 = vadd.f32 %v5708_v57, %v5325_v45  ;;  %v6692_v2 = vld [vmem:[#allocation4 + $0x46] sm:$0x1]  ;;  %v4806_v45 = vadd.f32 %v14399_v38, %v4508_v8 }
 0x5b7   :  { %v5193_v35 = vpop.f32.mrf.mxu1  ;;  %6687 = vst [vmem:[#allocation5 + $0x70] sm:$0x1] %v6686_v30  ;;  %v4954_v30 = vld [vmem:[#allocation2 + $0x149] sm:$0xff] }
 0x5b8   :  { %v6043_v31 = vadd.f32 %v14556_v22, %v5847_v3  ;;  %6691 = vst [vmem:[#allocation5 + $0x80] sm:$0x1] %v6690_v0  ;;  %v5328_v13 = vadd.f32 %v5193_v35, %v4806_v45  ;;  %v4953_v3 = vld [vmem:[#allocation2 + $0x141] sm:$0xff] }
 0x5b9   :  { %6689 = vst [vmem:[#allocation5 + $0x78] sm:$0x1] %v6688_v51  ;;  %v13125_v38 = vld [vmem:[%s16296_s6 + $0x28] sm:$0xff] }
 0x5ba   :  { %v6107_v37 = vmax.f32 %v6043_v31, 0.0  ;;  %6693 = vst [vmem:[#allocation5 + $0x88] sm:$0x1] %v6692_v2  ;;  %v4999_v31 = vpack.c.bf16 %v4954_v30, %v4953_v3  ;;  %10094 = vmatpush.bf16.msra.mxu3 %v13125_v38  ;;  %v4511_v30 = vld [vmem:[#allocation3 + $0xa0] sm:$0xff] }
 0x5bb   :  { %v6297_v42 = vld [vmem:[#allocation3 + $0x61] sm:$0xff] }
 0x5bc   :  { %6171 = vst [vmem:[#allocation3 + $0x70] sm:$0xff] %v6107_v37  ;;  %v6361_v60 = vmax.f32 %v6105_v14, %v6297_v42  ;;  %v5474_v14 = vld [vmem:[#allocation2 + $0x13a] sm:$0xff] }
 0x5bd   :  { %v5710_v36 = vpop.f32.mrf.mxu2  ;;  %v6694_v25 = vld [vmem:[#allocation4 + $0x48] sm:$0x1]  ;;  %v6698_v23 = vld [vmem:[#allocation4 + $0x4c] sm:$0x1]  ;;  %v6696_v56 = vld [vmem:[#allocation4 + $0x4a] sm:$0x1] }
 0x5be   :  { %v5848_v50 = vadd.f32 %v5710_v36, %v5326_v12  ;;  %6695 = vst [vmem:[#allocation5 + $0x90] sm:$0x1] %v6694_v25  ;;  %v6427_v55 = vmax.f32 %v6361_v60, %v6107_v37  ;;  %v5473_v37 = vld [vmem:[#allocation2 + $0x132] sm:$0xff] }
 0x5bf   :  { %v5196_v17 = vpop.f32.mrf.mxu1  ;;  %6699 = vst [vmem:[#allocation5 + $0xa0] sm:$0x1] %v6698_v23  ;;  %v5520_v42 = vpack.c.bf16 %v5474_v14, %v5473_v37  ;;  %v4512_v37 = vld [vmem:[#allocation3 + $0xa8] sm:$0xff] }
 0x5c0   :  { %v6044_v58 = vadd.f32 %v14556_v22, %v5848_v50  ;;  %6697 = vst [vmem:[#allocation5 + $0x98] sm:$0x1] %v6696_v56  ;;  %v5329_v36 = vadd.f32 %v5196_v17, %v4807_v26 }
 0x5c2   :  { %5235 = vmatmul.bf16.gmra.mxu1 %v4998_v62  ;;  %v6108_v28 = vmax.f32 %v6044_v58, 0.0  ;;  %5752 = vmatmul.bf16.gmra.mxu2 %v5519_v15  ;;  %v4808_v58 = vadd.f32 %v14407_v20, %v4510_v53  ;;  %v5477_v53 = vld [vmem:[#allocation2 + $0x152] sm:$0xff] }
 0x5c3   :  { %v6298_v21 = vld [vmem:[#allocation3 + $0x69] sm:$0xff] }
 0x5c4   :  { %6172 = vst [vmem:[#allocation3 + $0x78] sm:$0xff] %v6108_v28  ;;  %v6362_v51 = vmax.f32 %v6106_v33, %v6298_v21  ;;  %v5476_v21 = vld [vmem:[#allocation2 + $0x14a] sm:$0xff] }
 0x5c5   :  { %v5713_v5 = vpop.f32.mrf.mxu2 }
 0x5c6   :  { %v5849_v41 = vadd.f32 %v5713_v5, %v5327_v24  ;;  %v6428_v6 = vmax.f32 %v6362_v51, %v6108_v28  ;;  %v4955_v5 = vld [vmem:[#allocation2 + $0x151] sm:$0xff] }
 0x5c7   :  { %v5198_v40 = vpop.f32.mrf.mxu1  ;;  %v5000_v45 = vpack.c.bf16 %v4956_v47, %v4955_v5 }
 0x5c8   :  { %v14643_v48 = vadd.f32 %v14556_v22, %v5849_v41  ;;  %v5330_v28 = vadd.f32 %v5198_v40, %v4808_v58  ;;  %v4809_v40 = vadd.f32 %v14416_v16, %v4511_v30  ;;  %v4960_v30 = vld [vmem:[#allocation2 + $0x179] sm:$0xff] }
 0x5ca   :  { %v6109_v7 = vmax.f32 %v14643_v48, 0.0 }
 0x5cb   :  { %v6299_v57 = vld [vmem:[#allocation3 + $0x71] sm:$0xff] }
 0x5cc   :  { %v6493_v0 = vmax.f32 %v6427_v55, %v6299_v57  ;;  %6173 = vst [vmem:[#allocation3 + $0x80] sm:$0xff] %v6109_v7 }
 0x5cd   :  { %v5715_v59 = vpop.f32.mrf.mxu2 }
 0x5ce   :  { %6557 = vst [vmem:[#allocation4 + $0x60] sm:$0xff] %v6493_v0  ;;  %v5850_v1 = vadd.f32 %v5715_v59, %v5328_v13  ;;  %v5475_v0 = vld [vmem:[#allocation2 + $0x142] sm:$0xff] }
 0x5cf   :  { %v5201_v2 = vpop.f32.mrf.mxu1  ;;  %v5521_v13 = vpack.c.bf16 %v5476_v21, %v5475_v0 }
 0x5d0   :  { %v14655_v35 = vadd.f32 %v14556_v22, %v5850_v1  ;;  %v5331_v3 = vadd.f32 %v5201_v2, %v4809_v40  ;;  %v4959_v40 = vld [vmem:[#allocation2 + $0x171] sm:$0xff] }
 0x5d2   :  { %5240 = vmatmul.bf16.gmra.mxu1 %v4999_v31  ;;  %v6110_v33 = vmax.f32 %v14655_v35, 0.0  ;;  %5757 = vmatmul.bf16.gmra.mxu2 %v5520_v42 }
 0x5d3   :  { %v6300_v12 = vld [vmem:[#allocation3 + $0x79] sm:$0xff] }
 0x5d4   :  { %v6494_v43 = vmax.f32 %v6428_v6, %v6300_v12  ;;  %6174 = vst [vmem:[#allocation3 + $0x88] sm:$0xff] %v6110_v33  ;;  %v4810_v6 = vadd.f32 %v14421_v4, %v4512_v37  ;;  %v4958_v12 = vld [vmem:[#allocation2 + $0x169] sm:$0xff]  ;;  %v4513_v4 = vld [vmem:[#allocation3 + $0xb0] sm:$0xff] }
 0x5d5   :  { %v5718_v54 = vpop.f32.mrf.mxu2  ;;  %v6702_v25 = vld [vmem:[#allocation4 + $0x62] sm:$0x1]  ;;  %v6700_v23 = vld [vmem:[#allocation4 + $0x60] sm:$0x1]  ;;  %v6706_v56 = vld [vmem:[#allocation4 + $0x66] sm:$0x1]  ;;  %v4811_v58 = vadd.f32 %v14427_v34, %v4513_v4 }
 0x5d6   :  { %6558 = vst [vmem:[#allocation4 + $0x68] sm:$0xff] %v6494_v43  ;;  %v5851_v50 = vadd.f32 %v5718_v54, %v5329_v36  ;;  %v6704_v10 = vld [vmem:[#allocation4 + $0x64] sm:$0x1]  ;;  %v5478_v36 = vld [vmem:[#allocation2 + $0x15a] sm:$0xff]  ;;  %v5479_v37 = vld [vmem:[#allocation2 + $0x162] sm:$0xff] }
 0x5d7   :  { %v5203_v62 = vpop.f32.mrf.mxu1  ;;  %6703 = vst [vmem:[#allocation5 + $0xb0] sm:$0x1] %v6702_v25  ;;  %v4957_v54 = vld [vmem:[#allocation2 + $0x161] sm:$0xff] }
 0x5d8   :  { %v6047_v61 = vadd.f32 %v14556_v22, %v5851_v50  ;;  %6701 = vst [vmem:[#allocation5 + $0xa8] sm:$0x1] %v6700_v23 }
 0x5d9   :  { %6707 = vst [vmem:[#allocation5 + $0xc0] sm:$0x1] %v6706_v56  ;;  %v5001_v56 = vpack.c.bf16 %v4958_v12, %v4957_v54  ;;  %v4516_v54 = vld [vmem:[#allocation3 + $0xc8] sm:$0xff] }
 0x5da   :  { %v6111_v17 = vmax.f32 %v6047_v61, 0.0  ;;  %6705 = vst [vmem:[#allocation5 + $0xb8] sm:$0x1] %v6704_v10  ;;  %v5522_v61 = vpack.c.bf16 %v5478_v36, %v5477_v53  ;;  %v4962_v53 = vld [vmem:[#allocation2 + $0x189] sm:$0xff] }
 0x5db   :  { %v6301_v15 = vld [vmem:[#allocation3 + $0x81] sm:$0xff] }
 0x5dc   :  { %6175 = vst [vmem:[#allocation3 + $0x90] sm:$0xff] %v6111_v17  ;;  %v6365_v1 = vmax.f32 %v6109_v7, %v6301_v15  ;;  %v5332_v7 = vadd.f32 %v5203_v62, %v4810_v6 }
 0x5dd   :  { %v5720_v24 = vpop.f32.mrf.mxu2  ;;  %v6710_v60 = vld [vmem:[#allocation4 + $0x6a] sm:$0x1]  ;;  %v6708_v41 = vld [vmem:[#allocation4 + $0x68] sm:$0x1]  ;;  %v6712_v57 = vld [vmem:[#allocation4 + $0x6c] sm:$0x1] }
 0x5de   :  { %v5852_v8 = vadd.f32 %v5720_v24, %v5330_v28  ;;  %6711 = vst [vmem:[#allocation5 + $0xd0] sm:$0x1] %v6710_v60  ;;  %v6431_v16 = vmax.f32 %v6365_v1, %v6111_v17  ;;  %v5002_v1 = vpack.c.bf16 %v4960_v30, %v4959_v40 }
 0x5df   :  { %v5206_v55 = vpop.f32.mrf.mxu1  ;;  %6709 = vst [vmem:[#allocation5 + $0xc8] sm:$0x1] %v6708_v41  ;;  %v4514_v41 = vld [vmem:[#allocation3 + $0xb8] sm:$0xff] }
 0x5e0   :  { %v6048_v20 = vadd.f32 %v14556_v22, %v5852_v8  ;;  %6713 = vst [vmem:[#allocation5 + $0xd8] sm:$0x1] %v6712_v57 }
 0x5e2   :  { %5245 = vmatmul.bf16.gmra.mxu1 %v5000_v45  ;;  %v6112_v59 = vmax.f32 %v6048_v20, 0.0  ;;  %5762 = vmatmul.bf16.gmra.mxu2 %v5521_v13  ;;  %v4812_v45 = vadd.f32 %v14431_v9, %v4514_v41  ;;  %v5480_v20 = vld [vmem:[#allocation2 + $0x16a] sm:$0xff] }
 0x5e3   :  { %v6302_v14 = vld [vmem:[#allocation3 + $0x89] sm:$0xff] }
 0x5e4   :  { %6176 = vst [vmem:[#allocation3 + $0x98] sm:$0xff] %v6112_v59  ;;  %v6366_v25 = vmax.f32 %v6110_v33, %v6302_v14  ;;  %v5333_v33 = vadd.f32 %v5206_v55, %v4811_v58 }
 0x5e5   :  { %v5723_v51 = vpop.f32.mrf.mxu2 }
 0x5e6   :  { %v5853_v31 = vadd.f32 %v5723_v51, %v5331_v3  ;;  %v6432_v62 = vmax.f32 %v6366_v25, %v6112_v59 }
 0x5e7   :  { %v5208_v38 = vpop.f32.mrf.mxu1 }
 0x5e8   :  { %v14671_v42 = vadd.f32 %v14556_v22, %v5853_v31  ;;  %v5334_v0 = vadd.f32 %v5208_v38, %v4812_v45  ;;  %v4813_v38 = vadd.f32 %v14435_v29, %v4515_v32  ;;  %v5484_v32 = vld [vmem:[#allocation2 + $0x18a] sm:$0xff] }
 0x5ea   :  { %v6113_v2 = vmax.f32 %v14671_v42, 0.0 }
 0x5eb   :  { %v6303_v26 = vld [vmem:[#allocation3 + $0x91] sm:$0xff] }
 0x5ec   :  { %v6497_v48 = vmax.f32 %v6431_v16, %v6303_v26  ;;  %6177 = vst [vmem:[#allocation3 + $0xa0] sm:$0xff] %v6113_v2  ;;  %v5523_v16 = vpack.c.bf16 %v5480_v20, %v5479_v37 }
 0x5ed   :  { %v5725_v43 = vpop.f32.mrf.mxu2 }
 0x5ee   :  { %6561 = vst [vmem:[#allocation4 + $0x80] sm:$0xff] %v6497_v48  ;;  %v5854_v23 = vadd.f32 %v5725_v43, %v5332_v7 }
 0x5ef   :  { %v5211_v50 = vpop.f32.mrf.mxu1 }
 0x5f0   :  { %v14680_v10 = vadd.f32 %v14556_v22, %v5854_v23  ;;  %v5335_v12 = vadd.f32 %v5211_v50, %v4813_v38 }
 0x5f2   :  { %5250 = vmatmul.bf16.gmra.mxu1 %v5001_v56  ;;  %v6114_v17 = vmax.f32 %v14680_v10, 0.0  ;;  %5767 = vmatmul.bf16.gmra.mxu2 %v5522_v61  ;;  %v4814_v56 = vadd.f32 %v14441_v63, %v4516_v54  ;;  %v13124_v63 = vld [vmem:[%s16296_s6 + $0x20] sm:$0xff] }
 0x5f3   :  { %v6304_v15 = vld [vmem:[#allocation3 + $0x99] sm:$0xff]  ;;  %10095 = vmatpush.bf16.msra.mxu3 %v13124_v63 }
 0x5f4   :  { %v6498_v35 = vmax.f32 %v6432_v62, %v6304_v15  ;;  %6178 = vst [vmem:[#allocation3 + $0xa8] sm:$0xff] %v6114_v17  ;;  %v4961_v62 = vld [vmem:[#allocation2 + $0x181] sm:$0xff] }
 0x5f5   :  { %v5728_v47 = vpop.f32.mrf.mxu2  ;;  %v6720_v28 = vld [vmem:[#allocation4 + $0x86] sm:$0x1]  ;;  %v6714_v21 = vld [vmem:[#allocation4 + $0x80] sm:$0x1]  ;;  %v6718_v60 = vld [vmem:[#allocation4 + $0x84] sm:$0x1] }
 0x5f6   :  { %6562 = vst [vmem:[#allocation4 + $0x88] sm:$0xff] %v6498_v35  ;;  %v5855_v24 = vadd.f32 %v5728_v47, %v5333_v33  ;;  %v6716_v8 = vld [vmem:[#allocation4 + $0x82] sm:$0x1]  ;;  %v5003_v35 = vpack.c.bf16 %v4962_v53, %v4961_v62  ;;  %v4517_v33 = vld [vmem:[#allocation3 + $0xd0] sm:$0xff]  ;;  %v5481_v47 = vld [vmem:[#allocation2 + $0x172] sm:$0xff] }
 0x5f7   :  { %v5213_v5 = vpop.f32.mrf.mxu1  ;;  %6721 = vst [vmem:[#allocation5 + $0xf8] sm:$0x1] %v6720_v28  ;;  %v14707_v28 = vld [vmem:[%s16295_s5] ss:$0 sm:$0xff] }
 0x5f8   :  { %v6051_v34 = vadd.f32 %v14556_v22, %v5855_v24  ;;  %6715 = vst [vmem:[#allocation5 + $0xe0] sm:$0x1] %v6714_v21  ;;  %v5336_v50 = vadd.f32 %v5213_v5, %v4814_v56  ;;  %v4815_v5 = vadd.f32 %v14446_v19, %v4517_v33  ;;  %v13140_v62 = vld [vmem:[%s16296_s6 + $0xa0] sm:$0xff]  ;;  %v4966_v33 = vld [vmem:[#allocation2 + $0x1a9] sm:$0xff] }
 0x5f9   :  { %6719 = vst [vmem:[#allocation5 + $0xf0] sm:$0x1] %v6718_v60  ;;  %10121 = vmatpush.bf16.msra.mxu0 %v13140_v62 }
 0x5fa   :  { %v6115_v55 = vmax.f32 %v6051_v34, 0.0  ;;  %6717 = vst [vmem:[#allocation5 + $0xe8] sm:$0x1] %v6716_v8 }
 0x5fb   :  { %v6305_v57 = vld [vmem:[#allocation3 + $0xa1] sm:$0xff] }
 0x5fc   :  { %6179 = vst [vmem:[#allocation3 + $0xb0] sm:$0xff] %v6115_v55  ;;  %v6369_v7 = vmax.f32 %v6113_v2, %v6305_v57  ;;  %v5482_v2 = vld [vmem:[#allocation2 + $0x17a] sm:$0xff] }
 0x5fd   :  { %v5730_v13 = vpop.f32.mrf.mxu2  ;;  %v6722_v59 = vld [vmem:[#allocation4 + $0x88] sm:$0x1]  ;;  %v6726_v14 = vld [vmem:[#allocation4 + $0x8c] sm:$0x1]  ;;  %v6724_v31 = vld [vmem:[#allocation4 + $0x8a] sm:$0x1]  ;;  %v5524_v10 = vpack.c.bf16 %v5482_v2, %v5481_v47 }
 0x5fe   :  { %v5856_v3 = vadd.f32 %v5730_v13, %v5334_v0  ;;  %6723 = vst [vmem:[#allocation5 + $0x100] sm:$0x1] %v6722_v59  ;;  %v6435_v23 = vmax.f32 %v6369_v7, %v6115_v55  ;;  %v4518_v13 = vld [vmem:[#allocation3 + $0xd8] sm:$0xff]  ;;  %v4519_v7 = vld [vmem:[#allocation3 + $0xe0] sm:$0xff] }
 0x5ff   :  { %v5216_v51 = vpop.f32.mrf.mxu1  ;;  %6727 = vst [vmem:[#allocation5 + $0x110] sm:$0x1] %v6726_v14  ;;  %v4816_v59 = vadd.f32 %v14455_v44, %v4518_v13 }
 0x600   :  { %v6052_v9 = vadd.f32 %v14556_v22, %v5856_v3  ;;  %6725 = vst [vmem:[#allocation5 + $0x108] sm:$0x1] %v6724_v31  ;;  %v5337_v34 = vadd.f32 %v5216_v51, %v4815_v5 }
 0x602   :  { %5255 = vmatmul.bf16.gmra.mxu1 %v5002_v1  ;;  %v6116_v6 = vmax.f32 %v6052_v9, 0.0  ;;  %5772 = vmatmul.bf16.gmra.mxu2 %v5523_v16  ;;  %v4964_v1 = vld [vmem:[#allocation2 + $0x199] sm:$0xff]  ;;  %v4963_v9 = vld [vmem:[#allocation2 + $0x191] sm:$0xff] }
 0x603   :  { %v6306_v26 = vld [vmem:[#allocation3 + $0xa9] sm:$0xff] }
 0x604   :  { %6180 = vst [vmem:[#allocation3 + $0xb8] sm:$0xff] %v6116_v6  ;;  %v6370_v58 = vmax.f32 %v6114_v17, %v6306_v26  ;;  %v14712_v17 = vpop.f32.mrf.mxu0 }
 0x605   :  { %v5733_v48 = vpop.f32.mrf.mxu2 }
 0x606   :  { %v5857_v43 = vadd.f32 %v5733_v48, %v5335_v12  ;;  %v6436_v24 = vmax.f32 %v6370_v58, %v6116_v6  ;;  %v5004_v12 = vpack.c.bf16 %v4964_v1, %v4963_v9  ;;  %v4520_v58 = vld [vmem:[#allocation3 + $0xe8] sm:$0xff] }
 0x607   :  { %v5218_v36 = vpop.f32.mrf.mxu1 }
 0x608   :  { %v14693_v25 = vadd.f32 %v14556_v22, %v5857_v43  ;;  %v5338_v31 = vadd.f32 %v5218_v36, %v4816_v59  ;;  %v5483_v43 = vld [vmem:[#allocation2 + $0x182] sm:$0xff]  ;;  %v4817_v36 = vadd.f32 %v14461_v39, %v4519_v7  ;;  %v4967_v7 = vld [vmem:[#allocation2 + $0x1b1] sm:$0xff] }
 0x609   :  { %v5525_v54 = vpack.c.bf16 %v5484_v32, %v5483_v43  ;;  %v4522_v32 = vld [vmem:[#allocation3 + $0xf8] sm:$0xff] }
 0x60a   :  { %v6117_v29 = vmax.f32 %v14693_v25, 0.0 }
 0x60b   :  { %v6307_v4 = vld [vmem:[#allocation3 + $0xb1] sm:$0xff] }
 0x60c   :  { %v6501_v61 = vmax.f32 %v6435_v23, %v6307_v4  ;;  %6181 = vst [vmem:[#allocation3 + $0xc0] sm:$0xff] %v6117_v29  ;;  %v14720_v3 = vpop.f32.mrf.mxu0 }
 0x60d   :  { %v5735_v42 = vpop.f32.mrf.mxu2 }
 0x60e   :  { %6565 = vst [vmem:[#allocation4 + $0xa0] sm:$0xff] %v6501_v61  ;;  %v5858_v22 = vadd.f32 %v5735_v42, %v5336_v50 }
 0x60f   :  { %v5221_v15 = vpop.f32.mrf.mxu1 }
 0x610   :  { %v14710_v21 = vadd.f32 %v14707_v28, %v5858_v22  ;;  %v5339_v4 = vadd.f32 %v5221_v15, %v4817_v36  ;;  %v4818_v15 = vadd.f32 %v14463_v18, %v4520_v58  ;;  %v4521_v18 = vld [vmem:[#allocation3 + $0xf0] sm:$0xff] }
 0x611   :  { %v5487_v36 = vld [vmem:[#allocation2 + $0x1a2] sm:$0xff] }
 0x612   :  { %5260 = vmatmul.bf16.gmra.mxu1 %v5003_v35  ;;  %v6118_v60 = vmax.f32 %v14710_v21, 0.0  ;;  %5777 = vmatmul.bf16.gmra.mxu2 %v5524_v10 }
 0x613   :  { %v6308_v41 = vld [vmem:[#allocation3 + $0xb9] sm:$0xff] }
 0x614   :  { %v6502_v8 = vmax.f32 %v6436_v24, %v6308_v41  ;;  %6182 = vst [vmem:[#allocation3 + $0xc8] sm:$0xff] %v6118_v60  ;;  %v14724_v53 = vpop.f32.mrf.mxu0  ;;  %v4965_v24 = vld [vmem:[#allocation2 + $0x1a1] sm:$0xff] }
 0x615   :  { %v5738_v45 = vpop.f32.mrf.mxu2  ;;  %v6728_v55 = vld [vmem:[#allocation4 + $0xa0] sm:$0x1]  ;;  %v6730_v57 = vld [vmem:[#allocation4 + $0xa2] sm:$0x1]  ;;  %v6734_v20 = vld [vmem:[#allocation4 + $0xa6] sm:$0x1] }
 0x616   :  { %6566 = vst [vmem:[#allocation4 + $0xa8] sm:$0xff] %v6502_v8  ;;  %v5859_v30 = vadd.f32 %v5738_v45, %v5337_v34  ;;  %v6732_v40 = vld [vmem:[#allocation4 + $0xa4] sm:$0x1]  ;;  %v5005_v34 = vpack.c.bf16 %v4966_v33, %v4965_v24 }
 0x617   :  { %v5223_v0 = vpop.f32.mrf.mxu1  ;;  %6729 = vst [vmem:[#allocation5 + $0x118] sm:$0x1] %v6728_v55  ;;  %v5485_v55 = vld [vmem:[#allocation2 + $0x192] sm:$0xff] }
 0x618   :  { %v6055_v19 = vadd.f32 %v14707_v28, %v5859_v30  ;;  %6731 = vst [vmem:[#allocation5 + $0x120] sm:$0x1] %v6730_v57  ;;  %v5340_v10 = vadd.f32 %v5223_v0, %v4818_v15  ;;  %v13138_v15 = vld [vmem:[%s16296_s6 + $0x90] sm:$0xff] }
 0x619   :  { %6735 = vst [vmem:[#allocation5 + $0x130] sm:$0x1] %v6734_v20  ;;  %v4819_v20 = vadd.f32 %v14469_v46, %v4521_v18  ;;  %v13136_v18 = vld [vmem:[%s16296_s6 + $0x80] sm:$0xff] }
 0x61a   :  { %v6119_v14 = vmax.f32 %v6055_v19, 0.0  ;;  %6733 = vst [vmem:[#allocation5 + $0x128] sm:$0x1] %v6732_v40 }
 0x61b   :  { %v6309_v51 = vld [vmem:[#allocation3 + $0xc1] sm:$0xff] }
 0x61c   :  { %6183 = vst [vmem:[#allocation3 + $0xd0] sm:$0xff] %v6119_v14  ;;  %v6373_v50 = vmax.f32 %v6117_v29, %v6309_v51  ;;  %v5486_v29 = vld [vmem:[#allocation2 + $0x19a] sm:$0xff]  ;;  %v14737_v45 = vpop.f32.mrf.mxu0 }
 0x61d   :  { %v5740_v37 = vpop.f32.mrf.mxu2  ;;  %v6736_v16 = vld [vmem:[#allocation4 + $0xa8] sm:$0x1]  ;;  %v6738_v38 = vld [vmem:[#allocation4 + $0xaa] sm:$0x1]  ;;  %v6740_v48 = vld [vmem:[#allocation4 + $0xac] sm:$0x1]  ;;  %v5526_v30 = vpack.c.bf16 %v5486_v29, %v5485_v55 }
 0x61e   :  { %v5860_v6 = vadd.f32 %v5740_v37, %v5338_v31  ;;  %6737 = vst [vmem:[#allocation5 + $0x138] sm:$0x1] %v6736_v16  ;;  %v6439_v22 = vmax.f32 %v6373_v50, %v6119_v14  ;;  %v4820_v16 = vadd.f32 %v14473_v27, %v4522_v32  ;;  %v13123_v27 = vld [vmem:[%s16296_s6 + $0x18] sm:$0xff]  ;;  %v13137_v29 = vld [vmem:[%s16296_s6 + $0x88] sm:$0xff]  ;;  %v13158_v32 = vld [vmem:[%s16296_s6 + $0x130] sm:$0xff] }
 0x61f   :  { %v5226_v26 = vpop.f32.mrf.mxu1  ;;  %6739 = vst [vmem:[#allocation5 + $0x140] sm:$0x1] %v6738_v38  ;;  %v13139_v50 = vld [vmem:[%s16296_s6 + $0x98] sm:$0xff]  ;;  %10096 = vmatpush.bf16.msra.mxu3 %v13123_v27 }
 0x620   :  { %v6056_v44 = vadd.f32 %v14707_v28, %v5860_v6  ;;  %6741 = vst [vmem:[#allocation5 + $0x148] sm:$0x1] %v6740_v48  ;;  %v5341_v40 = vadd.f32 %v5226_v26, %v4819_v20  ;;  %v4968_v6 = vld [vmem:[#allocation2 + $0x1b9] sm:$0xff]  ;;  %10122 = vmatpush.bf16.msra.mxu0 %v13139_v50 }
 0x621   :  { %v5490_v20 = vld [vmem:[#allocation2 + $0x1ba] sm:$0xff] }
 0x622   :  { %5265 = vmatmul.bf16.gmra.mxu1 %v5004_v12  ;;  %v6120_v23 = vmax.f32 %v6056_v44, 0.0  ;;  %5782 = vmatmul.bf16.gmra.mxu2 %v5525_v54  ;;  %v5488_v12 = vld [vmem:[#allocation2 + $0x1aa] sm:$0xff]  ;;  %v4972_v27 = vld [vmem:[#allocation2 + $0x1d9] sm:$0xff] }
 0x623   :  { %v6310_v56 = vld [vmem:[#allocation3 + $0xc9] sm:$0xff] }
 0x624   :  { %6184 = vst [vmem:[#allocation3 + $0xd8] sm:$0xff] %v6120_v23  ;;  %v6374_v5 = vmax.f32 %v6118_v60, %v6310_v56  ;;  %v14742_v46 = vpop.f32.mrf.mxu0  ;;  %v5006_v56 = vpack.c.bf16 %v4968_v6, %v4967_v7  ;;  %10123 = vmatpush.bf16.msra.mxu0 %v13138_v15  ;;  %v13133_v6 = vld [vmem:[%s16296_s6 + $0x68] sm:$0xff] }
 0x625   :  { %v5743_v61 = vpop.f32.mrf.mxu2 }
 0x626   :  { %v5861_v42 = vadd.f32 %v5743_v61, %v5339_v4  ;;  %v6440_v0 = vmax.f32 %v6374_v5, %v6120_v23  ;;  %v4523_v61 = vld [vmem:[#allocation3 + $0x100] sm:$0xff] }
 0x627   :  { %v5228_v2 = vpop.f32.mrf.mxu1  ;;  %v4821_v62 = vadd.f32 %v14477_v49, %v4523_v61 }
 0x628   :  { %v6057_v39 = vadd.f32 %v14707_v28, %v5861_v42  ;;  %v5342_v26 = vadd.f32 %v5228_v2, %v4820_v16  ;;  %v5527_v2 = vpack.c.bf16 %v5488_v12, %v5487_v36  ;;  %10124 = vmatpush.bf16.msra.mxu0 %v13137_v29  ;;  %v13132_v36 = vld [vmem:[%s16296_s6 + $0x60] sm:$0xff] }
 0x62a   :  { %v6121_v35 = vmax.f32 %v6057_v39, 0.0 }
 0x62b   :  { %v6311_v63 = vld [vmem:[#allocation3 + $0xd1] sm:$0xff] }
 0x62c   :  { %v6505_v47 = vmax.f32 %v6439_v22, %v6311_v63  ;;  %6185 = vst [vmem:[#allocation3 + $0xe0] sm:$0xff] %v6121_v35  ;;  %v14755_v39 = vpop.f32.mrf.mxu0  ;;  %v13122_v22 = vld [vmem:[%s16296_s6 + $0x10] sm:$0xff]  ;;  %10125 = vmatpush.bf16.msra.mxu0 %v13136_v18 }
 0x62d   :  { %v5745_v25 = vpop.f32.mrf.mxu2  ;;  %10097 = vmatpush.bf16.msra.mxu3 %v13122_v22  ;;  %v4971_v22 = vld [vmem:[#allocation2 + $0x1d1] sm:$0xff] }
 0x62e   :  { %6569 = vst [vmem:[#allocation4 + $0xc0] sm:$0xff] %v6505_v47  ;;  %v5862_v41 = vadd.f32 %v5745_v25, %v5340_v10  ;;  %v13383_v47 = vld [vmem:[%s16296_s6 + $0x838] sm:$0xff]  ;;  %v13121_v25 = vld [vmem:[%s16296_s6 + $0x8] sm:$0xff] }
 0x62f   :  { %v14735_v8 = vpop.f32.mrf.mxu1  ;;  %v4524_v10 = vld [vmem:[#allocation3 + $0x108] sm:$0xff]  ;;  %10508 = vmatpush.bf16.msrb.mxu2 %v13383_v47 }
 0x630   :  { %v6058_v57 = vadd.f32 %v14707_v28, %v5862_v41  ;;  %v5343_v35 = vadd.f32 %v14735_v8, %v4821_v62  ;;  %v4822_v5 = vadd.f32 %v14489_v11, %v4524_v10  ;;  %v4970_v8 = vld [vmem:[#allocation2 + $0x1c9] sm:$0xff]  ;;  %v13159_v11 = vld [vmem:[%s16296_s6 + $0x138] sm:$0xff] }
 0x631   :  { %10098 = vmatpush.bf16.msra.mxu3 %v13121_v25  ;;  %10144 = vmatpush.bf16.msrb.mxu0 %v13159_v11  ;;  %v13130_v10 = vld [vmem:[%s16296_s6 + $0x50] sm:$0xff]  ;;  %v13153_v11 = vld [vmem:[%s16296_s6 + $0x108] sm:$0xff] }
 0x632   :  { %5270 = vmatmul.bf16.gmra.mxu1 %v5005_v34  ;;  %v6122_v13 = vmax.f32 %v6058_v57, 0.0  ;;  %5787 = vmatmul.bf16.gmra.mxu2 %v5526_v30  ;;  %v13120_v34 = vld [vmem:[%s16296_s6] sm:$0xff]  ;;  %v13135_v57 = vld [vmem:[%s16296_s6 + $0x78] sm:$0xff]  ;;  %v13154_v25 = vld [vmem:[%s16296_s6 + $0x110] sm:$0xff] }
 0x633   :  { %v6312_v21 = vld [vmem:[#allocation3 + $0xd9] sm:$0xff] }
 0x634   :  { %v6506_v60 = vmax.f32 %v6440_v0, %v6312_v21  ;;  %6186 = vst [vmem:[#allocation3 + $0xe8] sm:$0xff] %v6122_v13  ;;  %v14794_v30 = vpop.f32.mrf.mxu0  ;;  %v4969_v13 = vld [vmem:[#allocation2 + $0x1c1] sm:$0xff] }
 0x635   :  { %v5748_v19 = vpop.f32.mrf.mxu2  ;;  %v6744_v59 = vld [vmem:[#allocation4 + $0xc2] sm:$0x1]  ;;  %v6746_v14 = vld [vmem:[#allocation4 + $0xc4] sm:$0x1]  ;;  %v6742_v31 = vld [vmem:[#allocation4 + $0xc0] sm:$0x1]  ;;  %10099 = vmatpush.bf16.msra.mxu3 %v13120_v34  ;;  %10145 = vmatpush.bf16.msrb.mxu0 %v13158_v32 }
 0x636   :  { %6570 = vst [vmem:[#allocation4 + $0xc8] sm:$0xff] %v6506_v60  ;;  %v5863_v51 = vadd.f32 %v5748_v19, %v5341_v40  ;;  %v6748_v37 = vld [vmem:[#allocation4 + $0xc6] sm:$0x1]  ;;  %v5007_v40 = vpack.c.bf16 %v4970_v8, %v4969_v13  ;;  %v13375_v19 = vld [vmem:[%s16296_s6 + $0x7f8] sm:$0xff] }
 0x637   :  { %v5233_v1 = vpop.f32.mrf.mxu1  ;;  %6745 = vst [vmem:[#allocation5 + $0x158] sm:$0x1] %v6744_v59  ;;  %v4525_v59 = vld [vmem:[#allocation3 + $0x110] sm:$0xff]  ;;  %10495 = vmatpush.bf16.msrb.mxu1 %v13375_v19 }
 0x638   :  { %v6059_v9 = vadd.f32 %v14707_v28, %v5863_v51  ;;  %6747 = vst [vmem:[#allocation5 + $0x160] sm:$0x1] %v6746_v14  ;;  %v5344_v55 = vadd.f32 %v5233_v1, %v4822_v5  ;;  %v5489_v14 = vld [vmem:[#allocation2 + $0x1b2] sm:$0xff]  ;;  %v13128_v19 = vld [vmem:[%s16296_s6 + $0x40] sm:$0xff] }
 0x639   :  { %6743 = vst [vmem:[#allocation5 + $0x150] sm:$0x1] %v6742_v31  ;;  %10105 = vmatpush.bf16.msrb.mxu3 %v13135_v57  ;;  %v5528_v1 = vpack.c.bf16 %v5490_v20, %v5489_v14  ;;  %v13134_v31 = vld [vmem:[%s16296_s6 + $0x70] sm:$0xff]  ;;  %v16307_v5 = vld [vmem:[#allocation7_spill] sm:$0xff]  ;;  %v13129_v57 = vld [vmem:[%s16296_s6 + $0x48] sm:$0xff] }
 0x63a   :  { %v6123_v38 = vmax.f32 %v6059_v9, 0.0  ;;  %6749 = vst [vmem:[#allocation5 + $0x168] sm:$0x1] %v6748_v37  ;;  %v16306_v37 = vld [vmem:[#allocation6_spill] sm:$0xff] }
 0x63b   :  { %v4823_v9 = vadd.f32 %v16306_v37, %v4525_v59  ;;  %v13152_v59 = vld [vmem:[%s16296_s6 + $0x100] sm:$0xff]  ;;  %v4974_v37 = vld [vmem:[#allocation2 + $0x1e9] sm:$0xff] }
 0x63c   :  { %6187 = vst [vmem:[#allocation3 + $0xf0] sm:$0xff] %v6123_v38 }
 0x63d   :  { %v5750_v48 = vpop.f32.mrf.mxu2  ;;  %v6752_v43 = vld [vmem:[#allocation4 + $0xca] sm:$0x1]  ;;  %v6754_v44 = vld [vmem:[#allocation4 + $0xcc] sm:$0x1]  ;;  %v6750_v4 = vld [vmem:[#allocation4 + $0xc8] sm:$0x1]  ;;  %10106 = vmatpush.bf16.msrb.mxu3 %v13134_v31 }
 0x63e   :  { %v5864_v54 = vadd.f32 %v5750_v48, %v5342_v26  ;;  %6753 = vst [vmem:[#allocation5 + $0x178] sm:$0x1] %v6752_v43  ;;  %v13157_v26 = vld [vmem:[%s16296_s6 + $0x128] sm:$0xff]  ;;  %v14823_v43 = vpop.f32.mrf.mxu0 }
 0x63f   :  { %v14745_v23 = vpop.f32.mrf.mxu1  ;;  %6755 = vst [vmem:[#allocation5 + $0x180] sm:$0x1] %v6754_v44  ;;  %v4526_v44 = vld [vmem:[#allocation3 + $0x118] sm:$0xff]  ;;  %10146 = vmatpush.bf16.msrb.mxu0 %v13157_v26  ;;  %v5494_v26 = vld [vmem:[#allocation2 + $0x1da] sm:$0xff] }
 0x640   :  { %v6060_v42 = vadd.f32 %v14707_v28, %v5864_v54  ;;  %6751 = vst [vmem:[#allocation5 + $0x170] sm:$0x1] %v6750_v4  ;;  %v5345_v38 = vadd.f32 %v14745_v23, %v4823_v9  ;;  %v13156_v23 = vld [vmem:[%s16296_s6 + $0x120] sm:$0xff] }
 0x641   :  { %10107 = vmatpush.bf16.msrb.mxu3 %v13133_v6 }
 0x642   :  { %5275 = vmatmul.bf16.gmra.mxu1 %v5006_v56  ;;  %v6124_v58 = vmax.f32 %v6060_v42, 0.0  ;;  %5792 = vmatmul.bf16.gmra.mxu2 %v5527_v2  ;;  %v4824_v56 = vadd.f32 %v14497_v52, %v4526_v44  ;;  %v13131_v42 = vld [vmem:[%s16296_s6 + $0x58] sm:$0xff] }
 0x643   :  { %10147 = vmatpush.bf16.msrb.mxu0 %v13156_v23  ;;  %v13155_v2 = vld [vmem:[%s16296_s6 + $0x118] sm:$0xff]  ;;  %v4529_v23 = vld [vmem:[#allocation3 + $0x130] sm:$0xff] }
 0x644   :  { %6188 = vst [vmem:[#allocation3 + $0xf8] sm:$0xff] %v6124_v58  ;;  %v5492_v58 = vld [vmem:[#allocation2 + $0x1ca] sm:$0xff] }
 0x645   :  { %v5753_v63 = vpop.f32.mrf.mxu2  ;;  %10108 = vmatpush.bf16.msrb.mxu3 %v13132_v36 }
 0x646   :  { %v5865_v33 = vadd.f32 %v5753_v63, %v5343_v35  ;;  %v5008_v35 = vpack.c.bf16 %v4972_v27, %v4971_v22  ;;  %v4527_v63 = vld [vmem:[#allocation3 + $0x120] sm:$0xff]  ;;  %v14847_v29 = vpop.f32.mrf.mxu0  ;;  %v16309_v27 = vld [vmem:[#allocation9_spill] sm:$0xff] }
 0x647   :  { %v14764_v49 = vpop.f32.mrf.mxu1  ;;  %10148 = vmatpush.bf16.msrb.mxu0 %v13155_v2  ;;  %v4825_v8 = vadd.f32 %v16307_v5, %v4527_v63 }
 0x648   :  { %v14776_v24 = vadd.f32 %v14707_v28, %v5865_v33  ;;  %v5346_v50 = vadd.f32 %v14764_v49, %v4824_v56  ;;  %v5491_v33 = vld [vmem:[#allocation2 + $0x1c2] sm:$0xff]  ;;  %v5493_v56 = vld [vmem:[#allocation2 + $0x1d2] sm:$0xff] }
 0x649   :  { %10109 = vmatpush.bf16.msrb.mxu3 %v13131_v42  ;;  %v5529_v47 = vpack.c.bf16 %v5492_v58, %v5491_v33 }
 0x64a   :  { %v6125_v41 = vmax.f32 %v14776_v24, 0.0 }
 0x64b   :  { %10149 = vmatpush.bf16.msrb.mxu0 %v13154_v25 }
 0x64c   :  { %6189 = vst [vmem:[#allocation3 + $0x100] sm:$0xff] %v6125_v41 }
 0x64d   :  { %v5755_v0 = vpop.f32.mrf.mxu2  ;;  %10110 = vmatpush.bf16.msrb.mxu3 %v13130_v10 }
 0x64e   :  { %v5866_v21 = vadd.f32 %v5755_v0, %v5344_v55  ;;  %v14870_v31 = vpop.f32.mrf.mxu0 }
 0x64f   :  { %v14796_v60 = vpop.f32.mrf.mxu1  ;;  %10150 = vmatpush.bf16.msrb.mxu0 %v13153_v11 }
 0x650   :  { %v14802_v51 = vadd.f32 %v14707_v28, %v5866_v21  ;;  %v5347_v55 = vadd.f32 %v14796_v60, %v4825_v8 }
 0x651   :  { %10111 = vmatpush.bf16.msrb.mxu3 %v13129_v57  ;;  %v4531_v57 = vld [vmem:[#allocation3 + $0x140] sm:$0xff] }
 0x652   :  { %5280 = vmatmul.bf16.gmra.mxu1 %v5007_v40  ;;  %v6126_v16 = vmax.f32 %v14802_v51, 0.0  ;;  %5797 = vmatmul.bf16.gmra.mxu2 %v5528_v1  ;;  %v4528_v40 = vld [vmem:[#allocation3 + $0x128] sm:$0xff]  ;;  %v16308_v1 = vld [vmem:[#allocation8_spill] sm:$0xff] }
 0x653   :  { %v4826_v24 = vadd.f32 %v16308_v1, %v4528_v40  ;;  %10151 = vmatpush.bf16.msrb.mxu0 %v13152_v59 }
 0x654   :  { %6190 = vst [vmem:[#allocation3 + $0x108] sm:$0xff] %v6126_v16 }
 0x655   :  { %v5758_v12 = vpop.f32.mrf.mxu2  ;;  %10112 = vmatpush.bf16.msrb.mxu3 %v13128_v19 }
 0x656   :  { %v5867_v48 = vadd.f32 %v5758_v12, %v5345_v38  ;;  %v4973_v12 = vld [vmem:[#allocation2 + $0x1e1] sm:$0xff] }
 0x657   :  { %v14821_v7 = vpop.f32.mrf.mxu1  ;;  %v5009_v36 = vpack.c.bf16 %v4974_v37, %v4973_v12 }
 0x658   :  { %v6063_v54 = vadd.f32 %v14707_v28, %v5867_v48  ;;  %v5348_v38 = vadd.f32 %v14821_v7, %v4826_v24  ;;  %v5530_v7 = vpack.c.bf16 %v5494_v26, %v5493_v56  ;;  %v13174_v56 = vld [vmem:[%s16296_s6 + $0x1b0] sm:$0xff] }
 0x65a   :  { %v6127_v4 = vmax.f32 %v6063_v54, 0.0 }
 0x65b   :  { %v6317_v61 = vld [vmem:[#allocation3 + $0x101] sm:$0xff] }
 0x65c   :  { %6191 = vst [vmem:[#allocation3 + $0x110] sm:$0xff] %v6127_v4  ;;  %v6381_v20 = vmax.f32 %v6125_v41, %v6317_v61 }
 0x65d   :  { %v5760_v62 = vpop.f32.mrf.mxu2 }
 0x65e   :  { %v5868_v52 = vadd.f32 %v5760_v62, %v5346_v50  ;;  %v6447_v14 = vmax.f32 %v6381_v20, %v6127_v4  ;;  %v4827_v50 = vadd.f32 %v16309_v27, %v4529_v23  ;;  %v14886_v62 = vpop.f32.mrf.mxu0  ;;  %v4975_v20 = vld [vmem:[#allocation2 + $0x1f1] sm:$0xff] }
 0x65f   :  { %v5246_v15 = vpop.f32.mrf.mxu1  ;;  %v13150_v23 = vld [vmem:[%s16296_s6 + $0xf0] sm:$0xff] }
 0x660   :  { %v6064_v49 = vadd.f32 %v14707_v28, %v5868_v52  ;;  %v5349_v2 = vadd.f32 %v5246_v15, %v4827_v50  ;;  %v16310_v15 = vld [vmem:[#allocation10_spill] sm:$0xff] }
 0x662   :  { %5285 = vmatmul.bf16.gmra.mxu1 %v5008_v35  ;;  %v6128_v34 = vmax.f32 %v6064_v49, 0.0  ;;  %5802 = vmatmul.bf16.gmra.mxu2 %v5529_v47  ;;  %v4530_v49 = vld [vmem:[#allocation3 + $0x138] sm:$0xff] }
 0x663   :  { %v6318_v18 = vld [vmem:[#allocation3 + $0x109] sm:$0xff]  ;;  %v4828_v25 = vadd.f32 %v16310_v15, %v4530_v49 }
 0x664   :  { %6192 = vst [vmem:[#allocation3 + $0x118] sm:$0xff] %v6128_v34  ;;  %v6382_v48 = vmax.f32 %v6126_v16, %v6318_v18  ;;  %v13148_v49 = vld [vmem:[%s16296_s6 + $0xe0] sm:$0xff] }
 0x665   :  { %v5763_v0 = vpop.f32.mrf.mxu2 }
 0x666   :  { %v5869_v13 = vadd.f32 %v5763_v0, %v5347_v55  ;;  %v6448_v61 = vmax.f32 %v6382_v48, %v6128_v34  ;;  %v4976_v34 = vld [vmem:[#allocation2 + $0x1f9] sm:$0xff]  ;;  %v5496_v55 = vld [vmem:[#allocation2 + $0x1ea] sm:$0xff]  ;;  %v5495_v0 = vld [vmem:[#allocation2 + $0x1e2] sm:$0xff]  ;;  %v4829_v48 = vadd.f32 %v14712_v17, %v4531_v57 }
 0x667   :  { %v5248_v21 = vpop.f32.mrf.mxu1  ;;  %v5531_v26 = vpack.c.bf16 %v5496_v55, %v5495_v0  ;;  %v5497_v57 = vld [vmem:[#allocation2 + $0x1f2] sm:$0xff] }
 0x668   :  { %v14860_v60 = vadd.f32 %v14707_v28, %v5869_v13  ;;  %v5350_v18 = vadd.f32 %v5248_v21, %v4828_v25  ;;  %v13151_v21 = vld [vmem:[%s16296_s6 + $0xf8] sm:$0xff] }
 0x66a   :  { %v6129_v41 = vmax.f32 %v14860_v60, 0.0 }
 0x66b   :  { %v6319_v32 = vld [vmem:[#allocation3 + $0x111] sm:$0xff] }
 0x66c   :  { %v6513_v9 = vmax.f32 %v6447_v14, %v6319_v32  ;;  %6193 = vst [vmem:[#allocation3 + $0x120] sm:$0xff] %v6129_v41  ;;  %v5010_v14 = vpack.c.bf16 %v4976_v34, %v4975_v20  ;;  %v14894_v32 = vpop.f32.mrf.mxu0  ;;  %v4977_v34 = vld [vmem:[#allocation2 + $0x201] sm:$0xff] }
 0x66d   :  { %v5765_v6 = vpop.f32.mrf.mxu2  ;;  %v4533_v20 = vld [vmem:[#allocation3 + $0x150] sm:$0xff] }
 0x66e   :  { %6577 = vst [vmem:[#allocation4 + $0x100] sm:$0xff] %v6513_v9  ;;  %v5870_v44 = vadd.f32 %v5765_v6, %v5348_v38  ;;  %v13175_v38 = vld [vmem:[%s16296_s6 + $0x1b8] sm:$0xff] }
 0x66f   :  { %v14877_v54 = vpop.f32.mrf.mxu1 }
 0x670   :  { %v14880_v4 = vadd.f32 %v14707_v28, %v5870_v44 }
 0x672   :  { %5290 = vmatmul.bf16.gmra.mxu1 %v5009_v36  ;;  %v6130_v42 = vmax.f32 %v14880_v4, 0.0  ;;  %5807 = vmatmul.bf16.gmra.mxu2 %v5530_v7  ;;  %v5351_v7 = vadd.f32 %v14877_v54, %v4829_v48  ;;  %v13173_v54 = vld [vmem:[%s16296_s6 + $0x1a8] sm:$0xff]  ;;  %v13171_v4 = vld [vmem:[%s16296_s6 + $0x198] sm:$0xff] }
 0x673   :  { %v6320_v51 = vld [vmem:[#allocation3 + $0x119] sm:$0xff] }
 0x674   :  { %v6514_v16 = vmax.f32 %v6448_v61, %v6320_v51  ;;  %6194 = vst [vmem:[#allocation3 + $0x128] sm:$0xff] %v6130_v42  ;;  %v13382_v51 = vld [vmem:[%s16296_s6 + $0x830] sm:$0xff] }
 0x675   :  { %v5768_v58 = vpop.f32.mrf.mxu2  ;;  %v6756_v22 = vld [vmem:[#allocation4 + $0x100] sm:$0x1]  ;;  %v6760_v52 = vld [vmem:[#allocation4 + $0x104] sm:$0x1]  ;;  %v6758_v33 = vld [vmem:[#allocation4 + $0x102] sm:$0x1]  ;;  %10509 = vmatpush.bf16.msrb.mxu2 %v13382_v51 }
 0x676   :  { %6578 = vst [vmem:[#allocation4 + $0x108] sm:$0xff] %v6514_v16  ;;  %v5871_v35 = vadd.f32 %v5768_v58, %v5349_v2  ;;  %v6762_v47 = vld [vmem:[#allocation4 + $0x106] sm:$0x1]  ;;  %v4532_v16 = vld [vmem:[#allocation3 + $0x148] sm:$0xff] }
 0x677   :  { %v14888_v63 = vpop.f32.mrf.mxu1  ;;  %6757 = vst [vmem:[#allocation5 + $0x1] sm:$0x1] %v6756_v22  ;;  %v13149_v2 = vld [vmem:[%s16296_s6 + $0xe8] sm:$0xff]  ;;  %v4830_v22 = vadd.f32 %v14720_v3, %v4532_v16  ;;  %v5498_v3 = vld [vmem:[#allocation2 + $0x1fa] sm:$0xff] }
 0x678   :  { %v6067_v10 = vadd.f32 %v14707_v28, %v5871_v35  ;;  %6761 = vst [vmem:[#allocation5 + $0x11] sm:$0x1] %v6760_v52  ;;  %v4978_v35 = vld [vmem:[#allocation2 + $0x209] sm:$0xff] }
 0x679   :  { %6759 = vst [vmem:[#allocation5 + $0x9] sm:$0x1] %v6758_v33  ;;  %v5352_v15 = vadd.f32 %v14888_v63, %v4830_v22  ;;  %v5011_v0 = vpack.c.bf16 %v4978_v35, %v4977_v34  ;;  %v13374_v63 = vld [vmem:[%s16296_s6 + $0x7f0] sm:$0xff]  ;;  %v13168_v22 = vld [vmem:[%s16296_s6 + $0x180] sm:$0xff] }
 0x67a   :  { %v6131_v5 = vmax.f32 %v6067_v10, 0.0  ;;  %6763 = vst [vmem:[#allocation5 + $0x19] sm:$0x1] %v6762_v47  ;;  %v13172_v47 = vld [vmem:[%s16296_s6 + $0x1a0] sm:$0xff]  ;;  %10496 = vmatpush.bf16.msrb.mxu1 %v13374_v63  ;;  %v4979_v34 = vld [vmem:[#allocation2 + $0x211] sm:$0xff] }
 0x67b   :  { %v6321_v8 = vld [vmem:[#allocation3 + $0x121] sm:$0xff] }
 0x67c   :  { %6195 = vst [vmem:[#allocation3 + $0x130] sm:$0xff] %v6131_v5  ;;  %v6385_v17 = vmax.f32 %v6129_v41, %v6321_v8  ;;  %v14930_v41 = vpop.f32.mrf.mxu0 }
 0x67d   :  { %v5770_v11 = vpop.f32.mrf.mxu2  ;;  %v6764_v13 = vld [vmem:[#allocation4 + $0x108] sm:$0x1]  ;;  %v6768_v1 = vld [vmem:[#allocation4 + $0x10c] sm:$0x1]  ;;  %v6766_v24 = vld [vmem:[#allocation4 + $0x10a] sm:$0x1] }
 0x67e   :  { %v5872_v40 = vadd.f32 %v5770_v11, %v5350_v18  ;;  %v6854_v59 = vld [vmem:[#allocation5] sm:$0xff]  ;;  %6765 = vst [vmem:[#allocation5 + $0x21] sm:$0x1] %v6764_v13  ;;  %v6451_v58 = vmax.f32 %v6385_v17, %v6131_v5 }
 0x67f   :  { %v14892_v19 = vpop.f32.mrf.mxu1  ;;  %v6903_v37 = vpack.c.bf16 %v6854_v59, %v6854_v59  ;;  %v6856_v9 = vld [vmem:[#allocation5 + $0x10] sm:$0xff]  ;;  %6769 = vst [vmem:[#allocation5 + $0x31] sm:$0x1] %v6768_v1  ;;  %v5532_v59 = vpack.c.bf16 %v5498_v3, %v5497_v57  ;;  %v5499_v57 = vld [vmem:[#allocation2 + $0x202] sm:$0xff] }
 0x680   :  { %v14903_v6 = vadd.f32 %v14707_v28, %v5872_v40  ;;  %v6905_v12 = vpack.c.bf16 %v6856_v9, %v6856_v9  ;;  %6767 = vst [vmem:[#allocation5 + $0x29] sm:$0x1] %v6766_v24  ;;  %v6855_v25 = vld [vmem:[#allocation5 + $0x8] sm:$0xff]  ;;  %v13147_v40 = vld [vmem:[%s16296_s6 + $0xd8] sm:$0xff]  ;;  %v4831_v24 = vadd.f32 %v14724_v53, %v4533_v20 }
 0x681   :  { %10100 = vmatmul.bf16.vlgmr.msra.gmra.mxu3 %v6903_v37  ;;  %v6904_v13 = vpack.c.bf16 %v6855_v25, %v6855_v25  ;;  %v6857_v3 = vld [vmem:[#allocation5 + $0x18] sm:$0xff] }
 0x682   :  { %5295 = vmatmul.bf16.gmra.mxu1 %v5010_v14  ;;  %v6132_v44 = vmax.f32 %v14903_v6, 0.0  ;;  %5812 = vmatmul.bf16.gmra.mxu2 %v5531_v26  ;;  %v13170_v6 = vld [vmem:[%s16296_s6 + $0x190] sm:$0xff]  ;;  %v5353_v53 = vadd.f32 %v14892_v19, %v4831_v24  ;;  %v13169_v19 = vld [vmem:[%s16296_s6 + $0x188] sm:$0xff] }
 0x683   :  { %10126 = vmatmul.bf16.vlgmr.msra.gmra.mxu0 %v6905_v12  ;;  %v6322_v36 = vld [vmem:[#allocation3 + $0x129] sm:$0xff]  ;;  %10131 = vmatpush.bf16.msra.mxu3 %v13151_v21 }
 0x684   :  { %10170 = vmatpush.bf16.msra.mxu0 %v13175_v38  ;;  %6196 = vst [vmem:[#allocation3 + $0x138] sm:$0xff] %v6132_v44  ;;  %v6386_v18 = vmax.f32 %v6130_v42, %v6322_v36  ;;  %v14961_v9 = vpop.f32.mrf.mxu0  ;;  %v13146_v38 = vld [vmem:[%s16296_s6 + $0xd0] sm:$0xff]  ;;  %v4534_v36 = vld [vmem:[#allocation3 + $0x158] sm:$0xff] }
 0x685   :  { %v5773_v61 = vpop.f32.mrf.mxu2  ;;  %v6858_v8 = vld [vmem:[#allocation5 + $0x20] sm:$0xff]  ;;  %v4832_v51 = vadd.f32 %v14737_v45, %v4534_v36  ;;  %v13167_v45 = vld [vmem:[%s16296_s6 + $0x178] sm:$0xff]  ;;  %v13188_v36 = vld [vmem:[%s16296_s6 + $0x220] sm:$0xff] }
 0x686   :  { %v5873_v27 = vadd.f32 %v5773_v61, %v5351_v7  ;;  %v6907_v14 = vpack.c.bf16 %v6858_v8, %v6858_v8  ;;  %v6452_v1 = vmax.f32 %v6386_v18, %v6132_v44  ;;  %v13145_v61 = vld [vmem:[%s16296_s6 + $0xc8] sm:$0xff] }
 0x687   :  { %v14916_v50 = vpop.f32.mrf.mxu1  ;;  %10132 = vmatpush.bf16.msra.mxu3 %v13150_v23 }
 0x688   :  { %10171 = vmatpush.bf16.msra.mxu0 %v13174_v56  ;;  %v14928_v60 = vadd.f32 %v14707_v28, %v5873_v27 }
 0x68a   :  { %v6133_v52 = vmax.f32 %v14928_v60, 0.0 }
 0x68b   :  { %v6323_v33 = vld [vmem:[#allocation3 + $0x131] sm:$0xff]  ;;  %10133 = vmatpush.bf16.msra.mxu3 %v13149_v2 }
 0x68c   :  { %10172 = vmatpush.bf16.msra.mxu0 %v13173_v54  ;;  %v6517_v10 = vmax.f32 %v6451_v58, %v6323_v33  ;;  %6197 = vst [vmem:[#allocation3 + $0x140] sm:$0xff] %v6133_v52  ;;  %v5500_v54 = vld [vmem:[#allocation2 + $0x20a] sm:$0xff]  ;;  %v13144_v58 = vld [vmem:[%s16296_s6 + $0xc0] sm:$0xff]  ;;  %v5354_v33 = vadd.f32 %v14916_v50, %v4832_v51  ;;  %v6860_v50 = vld [vmem:[#allocation5 + $0x30] sm:$0xff] }
 0x68d   :  { %v5775_v5 = vpop.f32.mrf.mxu2  ;;  %v5533_v20 = vpack.c.bf16 %v5500_v54, %v5499_v57  ;;  %v13187_v51 = vld [vmem:[%s16296_s6 + $0x218] sm:$0xff]  ;;  %v4538_v57 = vld [vmem:[#allocation3 + $0x178] sm:$0xff] }
 0x68e   :  { %6581 = vst [vmem:[#allocation4 + $0x120] sm:$0xff] %v6517_v10  ;;  %v5874_v55 = vadd.f32 %v5775_v5, %v5352_v15  ;;  %v14997_v10 = vpop.f32.mrf.mxu0 }
 0x68f   :  { %v14945_v11 = vpop.f32.mrf.mxu1  ;;  %10134 = vmatpush.bf16.msra.mxu3 %v13148_v49  ;;  %v13191_v49 = vld [vmem:[%s16296_s6 + $0x238] sm:$0xff] }
 0x690   :  { %10173 = vmatpush.bf16.msra.mxu0 %v13172_v47  ;;  %v14957_v42 = vadd.f32 %v14707_v28, %v5874_v55  ;;  %v4980_v47 = vld [vmem:[#allocation2 + $0x219] sm:$0xff]  ;;  %v4535_v55 = vld [vmem:[#allocation3 + $0x160] sm:$0xff] }
 0x691   :  { %10113 = vmatmul.bf16.vlgmr.msrb.gmra.mxu3 %v6904_v13  ;;  %v6906_v13 = vpack.c.bf16 %v6857_v3, %v6857_v3 }
 0x692   :  { %5300 = vmatmul.bf16.gmra.mxu1 %v5011_v0  ;;  %v6134_v37 = vmax.f32 %v14957_v42, 0.0  ;;  %5817 = vmatmul.bf16.gmra.mxu2 %v5532_v59  ;;  %v5012_v0 = vpack.c.bf16 %v4980_v47, %v4979_v34  ;;  %v6909_v59 = vpack.c.bf16 %v6860_v50, %v6860_v50 }
 0x693   :  { %10152 = vmatmul.bf16.vlgmr.msrb.gmra.mxu0 %v6907_v14  ;;  %v6324_v21 = vld [vmem:[#allocation3 + $0x139] sm:$0xff]  ;;  %10135 = vmatpush.bf16.msra.mxu3 %v13147_v40  ;;  %v4833_v14 = vadd.f32 %v14742_v46, %v4535_v55 }
 0x694   :  { %10174 = vmatpush.bf16.msra.mxu0 %v13171_v4  ;;  %v6518_v26 = vmax.f32 %v6452_v1, %v6324_v21  ;;  %6198 = vst [vmem:[#allocation3 + $0x148] sm:$0xff] %v6134_v37  ;;  %v13166_v40 = vld [vmem:[%s16296_s6 + $0x170] sm:$0xff]  ;;  %v13189_v46 = vld [vmem:[%s16296_s6 + $0x228] sm:$0xff] }
 0x695   :  { %v5778_v12 = vpop.f32.mrf.mxu2  ;;  %v6772_v48 = vld [vmem:[#allocation4 + $0x122] sm:$0x1]  ;;  %v6770_v44 = vld [vmem:[#allocation4 + $0x120] sm:$0x1]  ;;  %v6776_v7 = vld [vmem:[#allocation4 + $0x126] sm:$0x1]  ;;  %v5355_v21 = vadd.f32 %v14945_v11, %v4833_v14 }
 0x696   :  { %6582 = vst [vmem:[#allocation4 + $0x128] sm:$0xff] %v6518_v26  ;;  %v5875_v23 = vadd.f32 %v5778_v12, %v5353_v53  ;;  %v6774_v17 = vld [vmem:[#allocation4 + $0x124] sm:$0x1]  ;;  %v13190_v4 = vld [vmem:[%s16296_s6 + $0x230] sm:$0xff]  ;;  %v15020_v42 = vpop.f32.mrf.mxu0  ;;  %v15025_v11 = vld [vmem:[%s16295_s5] ss:$0 sm:$0xff] }
 0x697   :  { %v14972_v56 = vpop.f32.mrf.mxu1  ;;  %10136 = vmatpush.bf16.msra.mxu3 %v13146_v38  ;;  %6773 = vst [vmem:[#allocation5 + $0x41] sm:$0x1] %v6772_v48  ;;  %v13165_v38 = vld [vmem:[%s16296_s6 + $0x168] sm:$0xff] }
 0x698   :  { %10175 = vmatpush.bf16.msra.mxu0 %v13170_v6  ;;  %v6071_v27 = vadd.f32 %v14707_v28, %v5875_v23  ;;  %6771 = vst [vmem:[#allocation5 + $0x39] sm:$0x1] %v6770_v44  ;;  %v13164_v44 = vld [vmem:[%s16296_s6 + $0x160] sm:$0xff] }
 0x699   :  { %6777 = vst [vmem:[#allocation5 + $0x51] sm:$0x1] %v6776_v7 }
 0x69a   :  { %v6135_v16 = vmax.f32 %v6071_v27, 0.0  ;;  %6775 = vst [vmem:[#allocation5 + $0x49] sm:$0x1] %v6774_v17  ;;  %v13163_v27 = vld [vmem:[%s16296_s6 + $0x158] sm:$0xff] }
 0x69b   :  { %v6325_v2 = vld [vmem:[#allocation3 + $0x141] sm:$0xff]  ;;  %10137 = vmatpush.bf16.msra.mxu3 %v13145_v61 }
 0x69c   :  { %10176 = vmatpush.bf16.msra.mxu0 %v13169_v19  ;;  %v6389_v35 = vmax.f32 %v6133_v52, %v6325_v2  ;;  %6199 = vst [vmem:[#allocation3 + $0x150] sm:$0xff] %v6135_v16  ;;  %v5502_v2 = vld [vmem:[#allocation2 + $0x21a] sm:$0xff] }
 0x69d   :  { %v5780_v15 = vpop.f32.mrf.mxu2  ;;  %v6780_v25 = vld [vmem:[#allocation4 + $0x12a] sm:$0x1]  ;;  %v6778_v5 = vld [vmem:[#allocation4 + $0x128] sm:$0x1]  ;;  %v6782_v18 = vld [vmem:[#allocation4 + $0x12c] sm:$0x1] }
 0x69e   :  { %v6455_v60 = vmax.f32 %v6389_v35, %v6135_v16  ;;  %v5876_v52 = vadd.f32 %v5780_v15, %v5354_v33  ;;  %6781 = vst [vmem:[#allocation5 + $0x61] sm:$0x1] %v6780_v25  ;;  %v13162_v33 = vld [vmem:[%s16296_s6 + $0x150] sm:$0xff] }
 0x69f   :  { %v14999_v8 = vpop.f32.mrf.mxu1  ;;  %10138 = vmatpush.bf16.msra.mxu3 %v13144_v58  ;;  %6779 = vst [vmem:[#allocation5 + $0x59] sm:$0x1] %v6778_v5  ;;  %v4537_v58 = vld [vmem:[#allocation3 + $0x170] sm:$0xff] }
 0x6a0   :  { %10177 = vmatpush.bf16.msra.mxu0 %v13168_v22  ;;  %v6072_v63 = vadd.f32 %v14707_v28, %v5876_v52  ;;  %6783 = vst [vmem:[#allocation5 + $0x69] sm:$0x1] %v6782_v18  ;;  %v5501_v22 = vld [vmem:[#allocation2 + $0x212] sm:$0xff]  ;;  %v4835_v47 = vadd.f32 %v14794_v30, %v4537_v58  ;;  %v13185_v30 = vld [vmem:[%s16296_s6 + $0x208] sm:$0xff] }
 0x6a1   :  { %v5534_v35 = vpack.c.bf16 %v5502_v2, %v5501_v22  ;;  %v13205_v2 = vld [vmem:[%s16296_s6 + $0x2a8] sm:$0xff]  ;;  %v13371_v22 = vld [vmem:[%s16296_s6 + $0x7d8] sm:$0xff] }
 0x6a2   :  { %5305 = vmatmul.bf16.gmra.mxu1 %v5012_v0  ;;  %v6136_v1 = vmax.f32 %v6072_v63, 0.0  ;;  %5822 = vmatmul.bf16.gmra.mxu2 %v5533_v20  ;;  %v5357_v5 = vadd.f32 %v14999_v8, %v4835_v47  ;;  %v13160_v20 = vld [vmem:[%s16296_s6 + $0x140] sm:$0xff] }
 0x6a3   :  { %10157 = vmatpush.bf16.msrb.mxu3 %v13167_v45  ;;  %v6326_v28 = vld [vmem:[#allocation3 + $0x149] sm:$0xff]  ;;  %10178 = vmatmul.bf16.vlgmr.msra.gmra.mxu0 %v6909_v59  ;;  %v13186_v45 = vld [vmem:[%s16296_s6 + $0x210] sm:$0xff]  ;;  %v4836_v59 = vadd.f32 %v14823_v43, %v4538_v57 }
 0x6a4   :  { %10196 = vmatpush.bf16.msrb.mxu0 %v13191_v49  ;;  %10139 = vmatmul.bf16.vlgmr.msra.gmra.mxu3 %v6906_v13  ;;  %v6390_v24 = vmax.f32 %v6134_v37, %v6326_v28  ;;  %6200 = vst [vmem:[#allocation3 + $0x158] sm:$0xff] %v6136_v1  ;;  %v4536_v37 = vld [vmem:[#allocation3 + $0x168] sm:$0xff]  ;;  %v15056_v49 = vpop.f32.mrf.mxu0  ;;  %v13184_v13 = vld [vmem:[%s16296_s6 + $0x200] sm:$0xff]  ;;  %v6862_v28 = vld [vmem:[#allocation5 + $0x40] sm:$0xff] }
 0x6a5   :  { %v5783_v6 = vpop.f32.mrf.mxu2  ;;  %v4834_v23 = vadd.f32 %v14755_v39, %v4536_v37  ;;  %v13182_v43 = vld [vmem:[%s16296_s6 + $0x1f0] sm:$0xff]  ;;  %v6911_v37 = vpack.c.bf16 %v6862_v28, %v6862_v28 }
 0x6a6   :  { %v6456_v26 = vmax.f32 %v6390_v24, %v6136_v1  ;;  %v5877_v53 = vadd.f32 %v5783_v6, %v5355_v21  ;;  %v6859_v1 = vld [vmem:[#allocation5 + $0x28] sm:$0xff]  ;;  %v13373_v24 = vld [vmem:[%s16296_s6 + $0x7e8] sm:$0xff] }
 0x6a7   :  { %10158 = vmatpush.bf16.msrb.mxu3 %v13166_v40  ;;  %v15018_v12 = vpop.f32.mrf.mxu1  ;;  %v5356_v17 = vadd.f32 %v14972_v56, %v4834_v23  ;;  %v13183_v40 = vld [vmem:[%s16296_s6 + $0x1f8] sm:$0xff]  ;;  %10497 = vmatpush.bf16.msrb.mxu1 %v13373_v24  ;;  %v4541_v24 = vld [vmem:[#allocation3 + $0x190] sm:$0xff] }
 0x6a8   :  { %10197 = vmatpush.bf16.msrb.mxu0 %v13190_v4  ;;  %v15028_v48 = vadd.f32 %v15025_v11, %v5877_v53  ;;  %v13207_v4 = vld [vmem:[%s16296_s6 + $0x2b8] sm:$0xff]  ;;  %v5358_v6 = vadd.f32 %v15018_v12, %v4836_v59  ;;  %v6908_v53 = vpack.c.bf16 %v6859_v1, %v6859_v1  ;;  %v13202_v59 = vld [vmem:[%s16296_s6 + $0x290] sm:$0xff] }
 0x6aa   :  { %v6137_v7 = vmax.f32 %v15028_v48, 0.0  ;;  %v13206_v48 = vld [vmem:[%s16296_s6 + $0x2b0] sm:$0xff] }
 0x6ab   :  { %10159 = vmatpush.bf16.msrb.mxu3 %v13165_v38  ;;  %v6327_v61 = vld [vmem:[#allocation3 + $0x151] sm:$0xff] }
 0x6ac   :  { %10198 = vmatpush.bf16.msrb.mxu0 %v13189_v46  ;;  %v6521_v19 = vmax.f32 %v6455_v60, %v6327_v61  ;;  %6201 = vst [vmem:[#allocation3 + $0x160] sm:$0xff] %v6137_v7  ;;  %v13161_v60 = vld [vmem:[%s16296_s6 + $0x148] sm:$0xff]  ;;  %v15088_v21 = vpop.f32.mrf.mxu0  ;;  %v13372_v61 = vld [vmem:[%s16296_s6 + $0x7e0] sm:$0xff] }
 0x6ad   :  { %v5785_v16 = vpop.f32.mrf.mxu2  ;;  %10498 = vmatpush.bf16.msrb.mxu1 %v13372_v61  ;;  %v13176_v61 = vld [vmem:[%s16296_s6 + $0x1c0] sm:$0xff] }
 0x6ae   :  { %6585 = vst [vmem:[#allocation4 + $0x140] sm:$0xff] %v6521_v19  ;;  %v5878_v39 = vadd.f32 %v5785_v16, %v5356_v17  ;;  %v4539_v17 = vld [vmem:[#allocation3 + $0x180] sm:$0xff]  ;;  %v13181_v16 = vld [vmem:[%s16296_s6 + $0x1e8] sm:$0xff] }
 0x6af   :  { %10160 = vmatpush.bf16.msrb.mxu3 %v13164_v44  ;;  %v15045_v54 = vpop.f32.mrf.mxu1 }
 0x6b0   :  { %10199 = vmatpush.bf16.msrb.mxu0 %v13188_v36  ;;  %v15048_v56 = vadd.f32 %v15025_v11, %v5878_v39  ;;  %v4837_v39 = vadd.f32 %v14847_v29, %v4539_v17 }
 0x6b1   :  { %10499 = vmatpush.bf16.msrb.mxu1 %v13371_v22  ;;  %v13223_v22 = vld [vmem:[%s16296_s6 + $0x338] sm:$0xff] }
 0x6b2   :  { %v6138_v15 = vmax.f32 %v15048_v56, 0.0  ;;  %5827 = vmatmul.bf16.gmra.mxu2 %v5534_v35  ;;  %v5359_v47 = vadd.f32 %v15045_v54, %v4837_v39  ;;  %v13370_v54 = vld [vmem:[%s16296_s6 + $0x7d0] sm:$0xff] }
 0x6b3   :  { %10161 = vmatpush.bf16.msrb.mxu3 %v13163_v27  ;;  %v6328_v3 = vld [vmem:[#allocation3 + $0x159] sm:$0xff] }
 0x6b4   :  { %10200 = vmatpush.bf16.msrb.mxu0 %v13187_v51  ;;  %v6522_v25 = vmax.f32 %v6456_v26, %v6328_v3  ;;  %6202 = vst [vmem:[#allocation3 + $0x168] sm:$0xff] %v6138_v15  ;;  %v13381_v27 = vld [vmem:[%s16296_s6 + $0x828] sm:$0xff]  ;;  %v15122_v3 = vpop.f32.mrf.mxu0 }
 0x6b5   :  { %v5788_v52 = vpop.f32.mrf.mxu2  ;;  %v6784_v50 = vld [vmem:[#allocation4 + $0x140] sm:$0x1]  ;;  %v6788_v34 = vld [vmem:[#allocation4 + $0x144] sm:$0x1]  ;;  %v6786_v8 = vld [vmem:[#allocation4 + $0x142] sm:$0x1]  ;;  %10510 = vmatpush.bf16.msrb.mxu2 %v13381_v27  ;;  %10500 = vmatpush.bf16.msrb.mxu1 %v13370_v54 }
 0x6b6   :  { %6586 = vst [vmem:[#allocation4 + $0x148] sm:$0xff] %v6522_v25  ;;  %v5879_v18 = vadd.f32 %v5788_v52, %v5357_v5  ;;  %v6790_v0 = vld [vmem:[#allocation4 + $0x146] sm:$0x1]  ;;  %v13180_v25 = vld [vmem:[%s16296_s6 + $0x1e0] sm:$0xff]  ;;  %v13379_v52 = vld [vmem:[%s16296_s6 + $0x818] sm:$0xff] }
 0x6b7   :  { %10162 = vmatpush.bf16.msrb.mxu3 %v13162_v33  ;;  %v15069_v55 = vpop.f32.mrf.mxu1  ;;  %6785 = vst [vmem:[#allocation5 + $0x71] sm:$0x1] %v6784_v50  ;;  %v13380_v33 = vld [vmem:[%s16296_s6 + $0x820] sm:$0xff] }
 0x6b8   :  { %10201 = vmatpush.bf16.msrb.mxu0 %v13186_v45  ;;  %v6075_v63 = vadd.f32 %v15025_v11, %v5879_v18  ;;  %6789 = vst [vmem:[#allocation5 + $0x81] sm:$0x1] %v6788_v34  ;;  %v13204_v5 = vld [vmem:[%s16296_s6 + $0x2a0] sm:$0xff]  ;;  %v13179_v34 = vld [vmem:[%s16296_s6 + $0x1d8] sm:$0xff] }
 0x6b9   :  { %6787 = vst [vmem:[#allocation5 + $0x79] sm:$0x1] %v6786_v8  ;;  %10511 = vmatpush.bf16.msrb.mxu2 %v13380_v33  ;;  %v13203_v18 = vld [vmem:[%s16296_s6 + $0x298] sm:$0xff]  ;;  %v13200_v27 = vld [vmem:[%s16296_s6 + $0x280] sm:$0xff] }
 0x6ba   :  { %v6139_v14 = vmax.f32 %v6075_v63, 0.0  ;;  %6791 = vst [vmem:[#allocation5 + $0x89] sm:$0x1] %v6790_v0  ;;  %v13369_v0 = vld [vmem:[%s16296_s6 + $0x7c8] sm:$0xff]  ;;  %v6864_v33 = vld [vmem:[#allocation5 + $0x50] sm:$0xff] }
 0x6bb   :  { %10163 = vmatpush.bf16.msrb.mxu3 %v13161_v60  ;;  %v6329_v38 = vld [vmem:[#allocation3 + $0x161] sm:$0xff]  ;;  %10501 = vmatpush.bf16.msrb.mxu1 %v13369_v0 }
 0x6bc   :  { %10202 = vmatpush.bf16.msrb.mxu0 %v13185_v30  ;;  %v6393_v46 = vmax.f32 %v6137_v7, %v6329_v38  ;;  %6203 = vst [vmem:[#allocation3 + $0x170] sm:$0xff] %v6139_v14  ;;  %v4540_v30 = vld [vmem:[#allocation3 + $0x188] sm:$0xff]  ;;  %v15171_v28 = vpop.f32.mrf.mxu0  ;;  %v13377_v38 = vld [vmem:[%s16296_s6 + $0x808] sm:$0xff] }
 0x6bd   :  { %v5790_v26 = vpop.f32.mrf.mxu2  ;;  %v6792_v44 = vld [vmem:[#allocation4 + $0x148] sm:$0x1]  ;;  %v6796_v36 = vld [vmem:[#allocation4 + $0x14c] sm:$0x1]  ;;  %v6794_v19 = vld [vmem:[#allocation4 + $0x14a] sm:$0x1]  ;;  %v4838_v8 = vadd.f32 %v14870_v31, %v4540_v30  ;;  %10512 = vmatpush.bf16.msrb.mxu2 %v13379_v52  ;;  %v6913_v30 = vpack.c.bf16 %v6864_v33, %v6864_v33 }
 0x6be   :  { %v6459_v23 = vmax.f32 %v6393_v46, %v6139_v14  ;;  %v5880_v12 = vadd.f32 %v5790_v26, %v5358_v6  ;;  %6793 = vst [vmem:[#allocation5 + $0x91] sm:$0x1] %v6792_v44  ;;  %v13407_v46 = vld [vmem:[%s16296_s6 + $0x8f8] sm:$0xff]  ;;  %v13201_v26 = vld [vmem:[%s16296_s6 + $0x288] sm:$0xff]  ;;  %v13376_v44 = vld [vmem:[%s16296_s6 + $0x800] sm:$0xff] }
 0x6bf   :  { %10164 = vmatpush.bf16.msrb.mxu3 %v13160_v20  ;;  %v15097_v7 = vpop.f32.mrf.mxu1  ;;  %6797 = vst [vmem:[#allocation5 + $0xa1] sm:$0x1] %v6796_v36  ;;  %v13378_v20 = vld [vmem:[%s16296_s6 + $0x810] sm:$0xff]  ;;  %v13400_v33 = vld [vmem:[%s16296_s6 + $0x8c0] sm:$0xff] }
 0x6c0   :  { %10203 = vmatpush.bf16.msrb.mxu0 %v13184_v13  ;;  %v6076_v51 = vadd.f32 %v15025_v11, %v5880_v12  ;;  %6795 = vst [vmem:[#allocation5 + $0x99] sm:$0x1] %v6794_v19  ;;  %v13406_v36 = vld [vmem:[%s16296_s6 + $0x8f0] sm:$0xff]  ;;  %v13415_v19 = vld [vmem:[%s16296_s6 + $0x938] sm:$0xff] }
 0x6c1   :  { %10513 = vmatpush.bf16.msrb.mxu2 %v13378_v20  ;;  %v13198_v52 = vld [vmem:[%s16296_s6 + $0x270] sm:$0xff] }
 0x6c2   :  { %10165 = vmatmul.bf16.vlgmr.msrb.gmra.mxu3 %v6908_v53  ;;  %v6140_v58 = vmax.f32 %v6076_v51, 0.0  ;;  %v4839_v53 = vadd.f32 %v14886_v62, %v4541_v24  ;;  %v4542_v62 = vld [vmem:[#allocation3 + $0x198] sm:$0xff] }
 0x6c3   :  { %10183 = vmatpush.bf16.msra.mxu3 %v13183_v40  ;;  %10204 = vmatmul.bf16.vlgmr.msrb.gmra.mxu0 %v6911_v37  ;;  %v6330_v35 = vld [vmem:[#allocation3 + $0x169] sm:$0xff]  ;;  %v5360_v40 = vadd.f32 %v15069_v55, %v4838_v8 }
 0x6c4   :  { %10222 = vmatpush.bf16.msra.mxu0 %v13207_v4  ;;  %v6394_v45 = vmax.f32 %v6138_v15, %v6330_v35  ;;  %6204 = vst [vmem:[#allocation3 + $0x178] sm:$0xff] %v6140_v58  ;;  %v13178_v4 = vld [vmem:[%s16296_s6 + $0x1d0] sm:$0xff]  ;;  %v13368_v55 = vld [vmem:[%s16296_s6 + $0x7c0] sm:$0xff]  ;;  %v5361_v12 = vadd.f32 %v15097_v7, %v4839_v53 }
 0x6c5   :  { %v5793_v29 = vpop.f32.mrf.mxu2  ;;  %10502 = vmatpush.bf16.msrb.mxu1 %v13368_v55  ;;  %10514 = vmatpush.bf16.msrb.mxu2 %v13377_v38  ;;  %v6861_v7 = vld [vmem:[#allocation5 + $0x38] sm:$0xff]  ;;  %v13403_v55 = vld [vmem:[%s16296_s6 + $0x8d8] sm:$0xff] }
 0x6c6   :  { %v15130_v60 = vmax.f32 %v6394_v45, %v6140_v58  ;;  %v5881_v56 = vadd.f32 %v5793_v29, %v5359_v47  ;;  %v13199_v58 = vld [vmem:[%s16296_s6 + $0x278] sm:$0xff]  ;;  %v13405_v45 = vld [vmem:[%s16296_s6 + $0x8e8] sm:$0xff]  ;;  %v6910_v54 = vpack.c.bf16 %v6861_v7, %v6861_v7  ;;  %v13412_v38 = vld [vmem:[%s16296_s6 + $0x920] sm:$0xff] }
 0x6c7   :  { %10184 = vmatpush.bf16.msra.mxu3 %v13182_v43  ;;  %v15132_v15 = vpop.f32.mrf.mxu1  ;;  %v13177_v43 = vld [vmem:[%s16296_s6 + $0x1c8] sm:$0xff]  ;;  %v13220_v53 = vld [vmem:[%s16296_s6 + $0x320] sm:$0xff] }
 0x6c8   :  { %10223 = vmatpush.bf16.msra.mxu0 %v13206_v48  ;;  %v15141_v50 = vadd.f32 %v15025_v11, %v5881_v56 }
 0x6c9   :  { %10547 = vmatpush.bf16.msra.mxu1 %v13407_v46  ;;  %10515 = vmatpush.bf16.msrb.mxu2 %v13376_v44 }
 0x6ca   :  { %v6141_v57 = vmax.f32 %v15141_v50, 0.0 }
 0x6cb   :  { %10185 = vmatpush.bf16.msra.mxu3 %v13181_v16  ;;  %v6331_v63 = vld [vmem:[#allocation3 + $0x171] sm:$0xff] }
 0x6cc   :  { %10224 = vmatpush.bf16.msra.mxu0 %v13205_v2  ;;  %v6525_v13 = vmax.f32 %v6459_v23, %v6331_v63  ;;  %6205 = vst [vmem:[#allocation3 + $0x180] sm:$0xff] %v6141_v57  ;;  %v13413_v63 = vld [vmem:[%s16296_s6 + $0x928] sm:$0xff] }
 0x6cd   :  { %v5795_v31 = vpop.f32.mrf.mxu2  ;;  %10548 = vmatpush.bf16.msra.mxu1 %v13406_v36  ;;  %10560 = vmatpush.bf16.msra.mxu2 %v13415_v19  ;;  %v13219_v19 = vld [vmem:[%s16296_s6 + $0x318] sm:$0xff] }
 0x6ce   :  { %6589 = vst [vmem:[#allocation4 + $0x160] sm:$0xff] %v6525_v13  ;;  %v5882_v14 = vadd.f32 %v5795_v31, %v5360_v40  ;;  %v13197_v13 = vld [vmem:[%s16296_s6 + $0x268] sm:$0xff] }
 0x6cf   :  { %10186 = vmatpush.bf16.msra.mxu3 %v13180_v25  ;;  %v15166_v1 = vpop.f32.mrf.mxu1  ;;  %v13414_v25 = vld [vmem:[%s16296_s6 + $0x930] sm:$0xff] }
 0x6d0   :  { %10225 = vmatpush.bf16.msra.mxu0 %v13204_v5  ;;  %v15180_v6 = vadd.f32 %v15025_v11, %v5882_v14  ;;  %v15224_v5 = vpop.f32.mrf.mxu0  ;;  %v4543_v14 = vld [vmem:[#allocation3 + $0x1a0] sm:$0xff] }
 0x6d1   :  { %10549 = vmatpush.bf16.msra.mxu1 %v13405_v45  ;;  %10561 = vmatpush.bf16.msra.mxu2 %v13414_v25  ;;  %v4841_v46 = vadd.f32 %v14930_v41, %v4543_v14  ;;  %v13402_v41 = vld [vmem:[%s16296_s6 + $0x8d0] sm:$0xff] }
 0x6d2   :  { %v6142_v37 = vmax.f32 %v15180_v6, 0.0  ;;  %v13408_v6 = vld [vmem:[%s16296_s6 + $0x900] sm:$0xff] }
 0x6d3   :  { %10187 = vmatpush.bf16.msra.mxu3 %v13179_v34  ;;  %v6332_v48 = vld [vmem:[#allocation3 + $0x179] sm:$0xff]  ;;  %v5363_v36 = vadd.f32 %v15166_v1, %v4841_v46 }
 0x6d4   :  { %10226 = vmatpush.bf16.msra.mxu0 %v13203_v18  ;;  %v6526_v23 = vmax.f32 %v15130_v60, %v6332_v48  ;;  %6206 = vst [vmem:[#allocation3 + $0x188] sm:$0xff] %v6142_v37  ;;  %v4840_v60 = vadd.f32 %v14894_v32, %v4542_v62  ;;  %v13222_v34 = vld [vmem:[%s16296_s6 + $0x330] sm:$0xff]  ;;  %v13404_v32 = vld [vmem:[%s16296_s6 + $0x8e0] sm:$0xff]  ;;  %v13401_v1 = vld [vmem:[%s16296_s6 + $0x8c8] sm:$0xff] }
 0x6d5   :  { %v5798_v17 = vpop.f32.mrf.mxu2  ;;  %v6800_v51 = vld [vmem:[#allocation4 + $0x162] sm:$0x1]  ;;  %v6798_v16 = vld [vmem:[#allocation4 + $0x160] sm:$0x1]  ;;  %v6804_v35 = vld [vmem:[#allocation4 + $0x166] sm:$0x1]  ;;  %10550 = vmatpush.bf16.msra.mxu1 %v13404_v32  ;;  %10562 = vmatpush.bf16.msra.mxu2 %v13413_v63 }
 0x6d6   :  { %6590 = vst [vmem:[#allocation4 + $0x168] sm:$0xff] %v6526_v23  ;;  %v5883_v2 = vadd.f32 %v5798_v17, %v5361_v12  ;;  %v6802_v47 = vld [vmem:[#allocation4 + $0x164] sm:$0x1]  ;;  %v5362_v0 = vadd.f32 %v15132_v15, %v4840_v60  ;;  %v13411_v23 = vld [vmem:[%s16296_s6 + $0x918] sm:$0xff] }
 0x6d7   :  { %10188 = vmatpush.bf16.msra.mxu3 %v13178_v4  ;;  %v15209_v39 = vpop.f32.mrf.mxu1  ;;  %6801 = vst [vmem:[#allocation5 + $0xb1] sm:$0x1] %v6800_v51  ;;  %v13221_v15 = vld [vmem:[%s16296_s6 + $0x328] sm:$0xff]  ;;  %v4544_v17 = vld [vmem:[#allocation3 + $0x1a8] sm:$0xff]  ;;  %v13410_v51 = vld [vmem:[%s16296_s6 + $0x910] sm:$0xff] }
 0x6d8   :  { %10227 = vmatpush.bf16.msra.mxu0 %v13202_v59  ;;  %v6079_v29 = vadd.f32 %v15025_v11, %v5883_v2  ;;  %6799 = vst [vmem:[#allocation5 + $0xa9] sm:$0x1] %v6798_v16  ;;  %v15264_v48 = vpop.f32.mrf.mxu0  ;;  %v4842_v16 = vadd.f32 %v14961_v9, %v4544_v17 }
 0x6d9   :  { %6805 = vst [vmem:[#allocation5 + $0xc1] sm:$0x1] %v6804_v35  ;;  %10551 = vmatpush.bf16.msra.mxu1 %v13403_v55  ;;  %10563 = vmatpush.bf16.msra.mxu2 %v13412_v38 }
 0x6da   :  { %v6143_v56 = vmax.f32 %v6079_v29, 0.0  ;;  %6803 = vst [vmem:[#allocation5 + $0xb9] sm:$0x1] %v6802_v47  ;;  %v5364_v45 = vadd.f32 %v15209_v39, %v4842_v16  ;;  %v13409_v47 = vld [vmem:[%s16296_s6 + $0x908] sm:$0xff] }
 0x6db   :  { %10189 = vmatpush.bf16.msra.mxu3 %v13177_v43  ;;  %v6333_v18 = vld [vmem:[#allocation3 + $0x181] sm:$0xff]  ;;  %v13193_v39 = vld [vmem:[%s16296_s6 + $0x248] sm:$0xff] }
 0x6dc   :  { %10228 = vmatpush.bf16.msra.mxu0 %v13201_v26  ;;  %v6397_v8 = vmax.f32 %v6141_v57, %v6333_v18  ;;  %6207 = vst [vmem:[#allocation3 + $0x190] sm:$0xff] %v6143_v56  ;;  %v13196_v26 = vld [vmem:[%s16296_s6 + $0x260] sm:$0xff] }
 0x6dd   :  { %v5800_v20 = vpop.f32.mrf.mxu2  ;;  %v6808_v40 = vld [vmem:[#allocation4 + $0x16a] sm:$0x1]  ;;  %v6806_v57 = vld [vmem:[#allocation4 + $0x168] sm:$0x1]  ;;  %v6810_v59 = vld [vmem:[#allocation4 + $0x16c] sm:$0x1]  ;;  %10552 = vmatpush.bf16.msra.mxu1 %v13402_v41  ;;  %10564 = vmatpush.bf16.msra.mxu2 %v13411_v23 }
 0x6de   :  { %v6463_v31 = vmax.f32 %v6397_v8, %v6143_v56  ;;  %v5884_v4 = vadd.f32 %v5800_v20, %v5362_v0  ;;  %6809 = vst [vmem:[#allocation5 + $0xd1] sm:$0x1] %v6808_v40  ;;  %v13192_v8 = vld [vmem:[%s16296_s6 + $0x240] sm:$0xff]  ;;  %v13215_v20 = vld [vmem:[%s16296_s6 + $0x2f8] sm:$0xff] }
 0x6df   :  { %10190 = vmatpush.bf16.msra.mxu3 %v13176_v61  ;;  %v15245_v50 = vpop.f32.mrf.mxu1  ;;  %6807 = vst [vmem:[#allocation5 + $0xc9] sm:$0x1] %v6806_v57  ;;  %v13195_v61 = vld [vmem:[%s16296_s6 + $0x258] sm:$0xff]  ;;  %v13216_v0 = vld [vmem:[%s16296_s6 + $0x300] sm:$0xff] }
 0x6e0   :  { %10229 = vmatpush.bf16.msra.mxu0 %v13200_v27  ;;  %v6080_v24 = vadd.f32 %v15025_v11, %v5884_v4  ;;  %6811 = vst [vmem:[#allocation5 + $0xd9] sm:$0x1] %v6810_v59  ;;  %v15307_v29 = vpop.f32.mrf.mxu0  ;;  %v6866_v4 = vld [vmem:[#allocation5 + $0x60] sm:$0xff] }
 0x6e1   :  { %10553 = vmatpush.bf16.msra.mxu1 %v13401_v1  ;;  %10565 = vmatpush.bf16.msra.mxu2 %v13410_v51  ;;  %v4546_v59 = vld [vmem:[#allocation3 + $0x1b8] sm:$0xff] }
 0x6e2   :  { %10191 = vmatmul.bf16.vlgmr.msra.gmra.mxu3 %v6910_v54  ;;  %v6144_v43 = vmax.f32 %v6080_v24, 0.0  ;;  %v13217_v54 = vld [vmem:[%s16296_s6 + $0x308] sm:$0xff]  ;;  %v4844_v41 = vadd.f32 %v15020_v42, %v4546_v59  ;;  %v13446_v59 = vld [vmem:[%s16296_s6 + $0xa30] sm:$0xff] }
 0x6e3   :  { %10209 = vmatpush.bf16.msrb.mxu3 %v13199_v58  ;;  %10230 = vmatmul.bf16.vlgmr.msra.gmra.mxu0 %v6913_v30  ;;  %v6334_v44 = vld [vmem:[#allocation3 + $0x189] sm:$0xff]  ;;  %v13194_v58 = vld [vmem:[%s16296_s6 + $0x250] sm:$0xff] }
 0x6e4   :  { %10248 = vmatpush.bf16.msrb.mxu0 %v13223_v22  ;;  %6208 = vst [vmem:[#allocation3 + $0x198] sm:$0xff] %v6144_v43  ;;  %v13218_v22 = vld [vmem:[%s16296_s6 + $0x310] sm:$0xff]  ;;  %v6398_v60 = vmax.f32 %v6142_v37, %v6334_v44  ;;  %v4545_v30 = vld [vmem:[#allocation3 + $0x1b0] sm:$0xff] }
 0x6e5   :  { %v5803_v12 = vpop.f32.mrf.mxu2  ;;  %10554 = vmatpush.bf16.msra.mxu1 %v13400_v33  ;;  %10566 = vmatpush.bf16.msra.mxu2 %v13409_v47  ;;  %v13439_v33 = vld [vmem:[%s16296_s6 + $0x9f8] sm:$0xff] }
 0x6e6   :  { %v5885_v62 = vadd.f32 %v5803_v12, %v5363_v36  ;;  %v6464_v37 = vmax.f32 %v6398_v60, %v6144_v43  ;;  %v13214_v43 = vld [vmem:[%s16296_s6 + $0x2f0] sm:$0xff]  ;;  %v13213_v12 = vld [vmem:[%s16296_s6 + $0x2e8] sm:$0xff] }
 0x6e7   :  { %10210 = vmatpush.bf16.msrb.mxu3 %v13198_v52  ;;  %v15285_v7 = vpop.f32.mrf.mxu1 }
 0x6e8   :  { %10249 = vmatpush.bf16.msrb.mxu0 %v13222_v34  ;;  %v15283_v27 = vadd.f32 %v15025_v11, %v5885_v62  ;;  %v4843_v34 = vadd.f32 %v14997_v10, %v4545_v30  ;;  %v13239_v10 = vld [vmem:[%s16296_s6 + $0x3b8] sm:$0xff]  ;;  %v15342_v38 = vpop.f32.mrf.mxu0  ;;  %v13237_v62 = vld [vmem:[%s16296_s6 + $0x3a8] sm:$0xff] }
 0x6e9   :  { %10567 = vmatpush.bf16.msra.mxu2 %v13408_v6  ;;  %v13235_v30 = vld [vmem:[%s16296_s6 + $0x398] sm:$0xff] }
 0x6ea   :  { %v6145_v2 = vmax.f32 %v15283_v27, 0.0  ;;  %v5365_v40 = vadd.f32 %v15245_v50, %v4843_v34  ;;  %v6915_v50 = vpack.c.bf16 %v6866_v4, %v6866_v4  ;;  %v13212_v27 = vld [vmem:[%s16296_s6 + $0x2e0] sm:$0xff] }
 0x6eb   :  { %10211 = vmatpush.bf16.msrb.mxu3 %v13197_v13  ;;  %v6335_v35 = vld [vmem:[#allocation3 + $0x191] sm:$0xff] }
 0x6ec   :  { %10250 = vmatpush.bf16.msrb.mxu0 %v13221_v15  ;;  %v6529_v9 = vmax.f32 %v6463_v31, %v6335_v35  ;;  %6209 = vst [vmem:[#allocation3 + $0x1a0] sm:$0xff] %v6145_v2  ;;  %v6863_v31 = vld [vmem:[#allocation5 + $0x48] sm:$0xff] }
 0x6ed   :  { %v5805_v25 = vpop.f32.mrf.mxu2  ;;  %v6912_v46 = vpack.c.bf16 %v6863_v31, %v6863_v31 }
 0x6ee   :  { %6593 = vst [vmem:[#allocation4 + $0x180] sm:$0xff] %v6529_v9  ;;  %v5886_v56 = vadd.f32 %v5805_v25, %v5364_v45 }
 0x6ef   :  { %10212 = vmatpush.bf16.msrb.mxu3 %v13196_v26  ;;  %v15325_v32 = vpop.f32.mrf.mxu1  ;;  %v13238_v26 = vld [vmem:[%s16296_s6 + $0x3b0] sm:$0xff] }
 0x6f0   :  { %10251 = vmatpush.bf16.msrb.mxu0 %v13220_v53  ;;  %v15318_v52 = vadd.f32 %v15025_v11, %v5886_v56  ;;  %v13438_v56 = vld [vmem:[%s16296_s6 + $0x9f0] sm:$0xff] }
 0x6f2   :  { %v6146_v18 = vmax.f32 %v15318_v52, 0.0 }
 0x6f3   :  { %10213 = vmatpush.bf16.msrb.mxu3 %v13195_v61  ;;  %v6336_v63 = vld [vmem:[#allocation3 + $0x199] sm:$0xff] }
 0x6f4   :  { %10252 = vmatpush.bf16.msrb.mxu0 %v13219_v19  ;;  %v6530_v13 = vmax.f32 %v6464_v37, %v6336_v63  ;;  %6210 = vst [vmem:[#allocation3 + $0x1a8] sm:$0xff] %v6146_v18  ;;  %v5366_v19 = vadd.f32 %v15285_v7, %v4844_v41  ;;  %v13236_v7 = vld [vmem:[%s16296_s6 + $0x3a0] sm:$0xff]  ;;  %v13447_v63 = vld [vmem:[%s16296_s6 + $0xa38] sm:$0xff] }
 0x6f5   :  { %v5808_v15 = vpop.f32.mrf.mxu2  ;;  %v6818_v57 = vld [vmem:[#allocation4 + $0x186] sm:$0x1]  ;;  %v6812_v55 = vld [vmem:[#allocation4 + $0x180] sm:$0x1]  ;;  %v6816_v24 = vld [vmem:[#allocation4 + $0x184] sm:$0x1] }
 0x6f6   :  { %6594 = vst [vmem:[#allocation4 + $0x188] sm:$0xff] %v6530_v13  ;;  %v5887_v14 = vadd.f32 %v5808_v15, %v5365_v40  ;;  %v6814_v53 = vld [vmem:[#allocation4 + $0x182] sm:$0x1]  ;;  %v13210_v13 = vld [vmem:[%s16296_s6 + $0x2d0] sm:$0xff] }
 0x6f7   :  { %10214 = vmatpush.bf16.msrb.mxu3 %v13194_v58  ;;  %6819 = vst [vmem:[#allocation5 + $0xf9] sm:$0x1] %v6818_v57  ;;  %v5293_v42 = vpop.f32.mrf.mxu1  ;;  %v4547_v58 = vld [vmem:[#allocation3 + $0x1c0] sm:$0xff] }
 0x6f8   :  { %10253 = vmatpush.bf16.msrb.mxu0 %v13218_v22  ;;  %v6083_v44 = vadd.f32 %v15025_v11, %v5887_v14  ;;  %6813 = vst [vmem:[#allocation5 + $0xe1] sm:$0x1] %v6812_v55  ;;  %v4845_v25 = vadd.f32 %v15056_v49, %v4547_v58  ;;  %v13234_v40 = vld [vmem:[%s16296_s6 + $0x390] sm:$0xff]  ;;  %v13436_v14 = vld [vmem:[%s16296_s6 + $0x9e0] sm:$0xff] }
 0x6f9   :  { %6817 = vst [vmem:[#allocation5 + $0xf1] sm:$0x1] %v6816_v24  ;;  %v13209_v24 = vld [vmem:[%s16296_s6 + $0x2c8] sm:$0xff] }
 0x6fa   :  { %v6147_v36 = vmax.f32 %v6083_v44, 0.0  ;;  %6815 = vst [vmem:[#allocation5 + $0xe9] sm:$0x1] %v6814_v53  ;;  %v5367_v49 = vadd.f32 %v15325_v32, %v4845_v25  ;;  %v4549_v44 = vld [vmem:[#allocation3 + $0x1d0] sm:$0xff] }
 0x6fb   :  { %10215 = vmatpush.bf16.msrb.mxu3 %v13193_v39  ;;  %v6337_v23 = vld [vmem:[#allocation3 + $0x1a1] sm:$0xff]  ;;  %v4847_v58 = vadd.f32 %v15122_v3, %v4549_v44 }
 0x6fc   :  { %10254 = vmatpush.bf16.msrb.mxu0 %v13217_v54  ;;  %v6401_v61 = vmax.f32 %v6145_v2, %v6337_v23  ;;  %6211 = vst [vmem:[#allocation3 + $0x1b0] sm:$0xff] %v6147_v36  ;;  %v13211_v54 = vld [vmem:[%s16296_s6 + $0x2d8] sm:$0xff] }
 0x6fd   :  { %v5810_v17 = vpop.f32.mrf.mxu2  ;;  %v6820_v1 = vld [vmem:[#allocation4 + $0x188] sm:$0x1]  ;;  %v6824_v51 = vld [vmem:[#allocation4 + $0x18c] sm:$0x1]  ;;  %v6822_v45 = vld [vmem:[#allocation4 + $0x18a] sm:$0x1] }
 0x6fe   :  { %v6467_v16 = vmax.f32 %v6401_v61, %v6147_v36  ;;  %v5888_v22 = vadd.f32 %v5810_v17, %v5366_v19  ;;  %v6885_v35 = vld [vmem:[#allocation5 + $0xf8] sm:$0xff]  ;;  %6821 = vst [vmem:[#allocation5 + $0x101] sm:$0x1] %v6820_v1  ;;  %v13445_v36 = vld [vmem:[%s16296_s6 + $0xa28] sm:$0xff]  ;;  %v13435_v23 = vld [vmem:[%s16296_s6 + $0x9d8] sm:$0xff] }
 0x6ff   :  { %10216 = vmatpush.bf16.msrb.mxu3 %v13192_v8  ;;  %v6934_v2 = vpack.c.bf16 %v6885_v35, %v6885_v35  ;;  %6825 = vst [vmem:[#allocation5 + $0x111] sm:$0x1] %v6824_v51  ;;  %v15389_v8 = vpop.f32.mrf.mxu1  ;;  %v13255_v17 = vld [vmem:[%s16296_s6 + $0x438] sm:$0xff]  ;;  %v6865_v1 = vld [vmem:[#allocation5 + $0x58] sm:$0xff] }
 0x700   :  { %10255 = vmatpush.bf16.msrb.mxu0 %v13216_v0  ;;  %v15364_v9 = vpop.f32.mrf.mxu0  ;;  %v15373_v47 = vadd.f32 %v15025_v11, %v5888_v22  ;;  %6823 = vst [vmem:[#allocation5 + $0x109] sm:$0x1] %v6822_v45  ;;  %v6868_v51 = vld [vmem:[#allocation5 + $0x70] sm:$0xff]  ;;  %v5369_v3 = vadd.f32 %v15389_v8, %v4847_v58 }
 0x701   :  { %10503 = vmatmul.bf16.vlgmr.msrb.gmra.mxu1 %v6934_v2  ;;  %v13434_v2 = vld [vmem:[%s16296_s6 + $0x9d0] sm:$0xff]  ;;  %v6917_v25 = vpack.c.bf16 %v6868_v51, %v6868_v51  ;;  %v13443_v8 = vld [vmem:[%s16296_s6 + $0xa18] sm:$0xff] }
 0x702   :  { %10217 = vmatmul.bf16.vlgmr.msrb.gmra.mxu3 %v6912_v46  ;;  %v6148_v60 = vmax.f32 %v15373_v47, 0.0  ;;  %10599 = vmatpush.bf16.msrb.mxu1 %v13439_v33  ;;  %v13471_v44 = vld [vmem:[%s16296_s6 + $0xaf8] sm:$0xff] }
 0x703   :  { %10235 = vmatpush.bf16.msra.mxu3 %v13215_v20  ;;  %10256 = vmatmul.bf16.vlgmr.msrb.gmra.mxu0 %v6915_v50  ;;  %v6338_v39 = vld [vmem:[#allocation3 + $0x1a9] sm:$0xff]  ;;  %v13437_v20 = vld [vmem:[%s16296_s6 + $0x9e8] sm:$0xff] }
 0x704   :  { %10274 = vmatpush.bf16.msra.mxu0 %v13239_v10  ;;  %6212 = vst [vmem:[#allocation3 + $0x1b8] sm:$0xff] %v6148_v60  ;;  %v10101_v6 = vpop.f32.mrf.mxu3  ;;  %v4548_v10 = vld [vmem:[#allocation3 + $0x1c8] sm:$0xff]  ;;  %v6402_v53 = vmax.f32 %v6146_v18, %v6338_v39  ;;  %v13208_v18 = vld [vmem:[%s16296_s6 + $0x2c0] sm:$0xff] }
 0x705   :  { %v5813_v37 = vpop.f32.mrf.mxu2  ;;  %v6886_v0 = vld [vmem:[#allocation5 + $0x100] sm:$0xff]  ;;  %v4846_v15 = vadd.f32 %v15088_v21, %v4548_v10  ;;  %v13251_v51 = vld [vmem:[%s16296_s6 + $0x418] sm:$0xff] }
 0x706   :  { %v5889_v34 = vadd.f32 %v5813_v37, %v5367_v49  ;;  %10600 = vmatpush.bf16.msrb.mxu1 %v13438_v56  ;;  %v6935_v31 = vpack.c.bf16 %v6886_v0, %v6886_v0  ;;  %v13233_v21 = vld [vmem:[%s16296_s6 + $0x388] sm:$0xff]  ;;  %v13254_v56 = vld [vmem:[%s16296_s6 + $0x430] sm:$0xff] }
 0x707   :  { %10236 = vmatpush.bf16.msra.mxu3 %v13214_v43  ;;  %v5368_v50 = vadd.f32 %v5293_v42, %v4846_v15  ;;  %v5298_v19 = vpop.f32.mrf.mxu1  ;;  %v13231_v42 = vld [vmem:[%s16296_s6 + $0x378] sm:$0xff]  ;;  %v13433_v0 = vld [vmem:[%s16296_s6 + $0x9c8] sm:$0xff] }
 0x708   :  { %10275 = vmatpush.bf16.msra.mxu0 %v13238_v26  ;;  %v10129_v32 = vpop.f32.mrf.mxu0  ;;  %v15404_v4 = vadd.f32 %v15025_v11, %v5889_v34  ;;  %10516 = vmatmul.bf16.vlgmr.msrb.gmra.mxu2 %v6935_v31 }
 0x709   :  { %10612 = vmatpush.bf16.msrb.mxu2 %v13447_v63  ;;  %v13229_v32 = vld [vmem:[%s16296_s6 + $0x368] sm:$0xff] }
 0x70a   :  { %v6149_v57 = vmax.f32 %v15404_v4, 0.0  ;;  %10601 = vmatpush.bf16.msrb.mxu1 %v13437_v20 }
 0x70b   :  { %10237 = vmatpush.bf16.msra.mxu3 %v13213_v12  ;;  %v6339_v55 = vld [vmem:[#allocation3 + $0x1b1] sm:$0xff]  ;;  %v13527_v12 = vld [vmem:[%s16297_s7] ss:$0 sm:$0xff] }
 0x70c   :  { %10276 = vmatpush.bf16.msra.mxu0 %v13237_v62  ;;  %v6533_v46 = vmax.f32 %v6467_v16, %v6339_v55  ;;  %6213 = vst [vmem:[#allocation3 + $0x1c0] sm:$0xff] %v6149_v57  ;;  %v10103_v43 = vpop.f32.mrf.mxu3  ;;  %v13232_v62 = vld [vmem:[%s16296_s6 + $0x380] sm:$0xff]  ;;  %v6468_v16 = vmax.f32 %v6402_v53, %v6148_v60  ;;  %v10102_v33 = vadd.f32 %v13527_v12, %v10101_v6  ;;  %v13230_v60 = vld [vmem:[%s16296_s6 + $0x370] sm:$0xff]  ;;  %v4550_v6 = vld [vmem:[#allocation3 + $0x1d8] sm:$0xff] }
 0x70d   :  { %v5815_v26 = vpop.f32.mrf.mxu2  ;;  %10613 = vmatpush.bf16.msrb.mxu2 %v13446_v59  ;;  %v4848_v31 = vadd.f32 %v15171_v28, %v4550_v6  ;;  %v13225_v6 = vld [vmem:[%s16296_s6 + $0x348] sm:$0xff] }
 0x70e   :  { %6597 = vst [vmem:[#allocation4 + $0x1a0] sm:$0xff] %v6533_v46  ;;  %v5890_v41 = vadd.f32 %v5815_v26, %v5368_v50  ;;  %10602 = vmatpush.bf16.msrb.mxu1 %v13436_v14  ;;  %v13432_v14 = vld [vmem:[%s16296_s6 + $0x9c0] sm:$0xff] }
 0x70f   :  { %10238 = vmatpush.bf16.msra.mxu3 %v13212_v27  ;;  %v6914_v27 = vpack.c.bf16 %v6865_v1, %v6865_v1  ;;  %v5301_v15 = vpop.f32.mrf.mxu1  ;;  %v13252_v46 = vld [vmem:[%s16296_s6 + $0x420] sm:$0xff]  ;;  %v13227_v1 = vld [vmem:[%s16296_s6 + $0x358] sm:$0xff] }
 0x710   :  { %10277 = vmatpush.bf16.msra.mxu0 %v13236_v7  ;;  %v15433_v52 = vpop.f32.mrf.mxu0  ;;  %v15442_v61 = vadd.f32 %v15025_v11, %v5890_v41  ;;  %v13444_v7 = vld [vmem:[%s16296_s6 + $0xa20] sm:$0xff] }
 0x711   :  { %10614 = vmatpush.bf16.msrb.mxu2 %v13445_v36  ;;  %v4551_v36 = vld [vmem:[#allocation3 + $0x1e0] sm:$0xff] }
 0x712   :  { %v6150_v22 = vmax.f32 %v15442_v61, 0.0  ;;  %10603 = vmatpush.bf16.msrb.mxu1 %v13435_v23  ;;  %v13467_v61 = vld [vmem:[%s16296_s6 + $0xad8] sm:$0xff] }
 0x713   :  { %10239 = vmatpush.bf16.msra.mxu3 %v13211_v54  ;;  %v6340_v35 = vld [vmem:[#allocation3 + $0x1b9] sm:$0xff] }
 0x714   :  { %10278 = vmatpush.bf16.msra.mxu0 %v13235_v30  ;;  %v6534_v45 = vmax.f32 %v6468_v16, %v6340_v35  ;;  %6214 = vst [vmem:[#allocation3 + $0x1c8] sm:$0xff] %v6150_v22  ;;  %v10114_v47 = vpop.f32.mrf.mxu3  ;;  %v4849_v16 = vadd.f32 %v15224_v5, %v4551_v36  ;;  %v13470_v35 = vld [vmem:[%s16296_s6 + $0xaf0] sm:$0xff] }
 0x715   :  { %v5818_v39 = vpop.f32.mrf.mxu2  ;;  %v10115_v54 = vadd.f32 %v10114_v47, %v10102_v33  ;;  %v6826_v30 = vld [vmem:[#allocation4 + $0x1a0] sm:$0x1]  ;;  %v6828_v49 = vld [vmem:[#allocation4 + $0x1a2] sm:$0x1]  ;;  %10615 = vmatpush.bf16.msrb.mxu2 %v13444_v7  ;;  %v6832_v20 = vld [vmem:[#allocation4 + $0x1a6] sm:$0x1] }
 0x716   :  { %6598 = vst [vmem:[#allocation4 + $0x1a8] sm:$0xff] %v6534_v45  ;;  %v5891_v37 = vadd.f32 %v5818_v39, %v5369_v3  ;;  %10604 = vmatpush.bf16.msrb.mxu1 %v13434_v2  ;;  %v5371_v7 = vadd.f32 %v5301_v15, %v4849_v16  ;;  %v13226_v5 = vld [vmem:[%s16296_s6 + $0x350] sm:$0xff]  ;;  %v13469_v39 = vld [vmem:[%s16296_s6 + $0xae8] sm:$0xff]  ;;  %v13247_v15 = vld [vmem:[%s16296_s6 + $0x3f8] sm:$0xff] }
 0x717   :  { %10240 = vmatpush.bf16.msra.mxu3 %v13210_v13  ;;  %6827 = vst [vmem:[#allocation5 + $0x119] sm:$0x1] %v6826_v30  ;;  %v15476_v63 = vadd.f32 %v15364_v9, %v10115_v54  ;;  %v13253_v13 = vld [vmem:[%s16296_s6 + $0x428] sm:$0xff]  ;;  %v5303_v2 = vpop.f32.mrf.mxu1  ;;  %v13250_v45 = vld [vmem:[%s16296_s6 + $0x410] sm:$0xff]  ;;  %v4552_v54 = vld [vmem:[#allocation3 + $0x1e8] sm:$0xff] }
 0x718   :  { %10279 = vmatpush.bf16.msra.mxu0 %v13234_v40  ;;  %v10155_v34 = vpop.f32.mrf.mxu0  ;;  %v6087_v10 = vadd.f32 %v15025_v11, %v5891_v37  ;;  %6829 = vst [vmem:[#allocation5 + $0x121] sm:$0x1] %v6828_v49  ;;  %v6830_v40 = vld [vmem:[#allocation4 + $0x1a4] sm:$0x1]  ;;  %v13442_v11 = vld [vmem:[%s16296_s6 + $0xa10] sm:$0xff] }
 0x719   :  { %6833 = vst [vmem:[#allocation5 + $0x131] sm:$0x1] %v6832_v20  ;;  %10616 = vmatpush.bf16.msrb.mxu2 %v13443_v8  ;;  %v13249_v37 = vld [vmem:[%s16296_s6 + $0x408] sm:$0xff]  ;;  %v13478_v8 = vld [vmem:[%s16296_s6 + $0xb30] sm:$0xff]  ;;  %v13468_v20 = vld [vmem:[%s16296_s6 + $0xae0] sm:$0xff] }
 0x71a   :  { %v6151_v9 = vmax.f32 %v6087_v10, 0.0  ;;  %6831 = vst [vmem:[#allocation5 + $0x129] sm:$0x1] %v6830_v40  ;;  %10605 = vmatpush.bf16.msrb.mxu1 %v13433_v0  ;;  %v4850_v0 = vadd.f32 %v15264_v48, %v4552_v54  ;;  %v13248_v48 = vld [vmem:[%s16296_s6 + $0x400] sm:$0xff]  ;;  %v13245_v16 = vld [vmem:[%s16296_s6 + $0x3e8] sm:$0xff] }
 0x71b   :  { %10241 = vmatpush.bf16.msra.mxu3 %v13209_v24  ;;  %v6341_v59 = vld [vmem:[#allocation3 + $0x1c1] sm:$0xff]  ;;  %v5370_v24 = vadd.f32 %v5298_v19, %v4848_v31  ;;  %v13268_v54 = vld [vmem:[%s16296_s6 + $0x4a0] sm:$0xff] }
 0x71c   :  { %10280 = vmatpush.bf16.msra.mxu0 %v13233_v21  ;;  %v6405_v55 = vmax.f32 %v6149_v57, %v6341_v59  ;;  %6215 = vst [vmem:[#allocation3 + $0x1d0] sm:$0xff] %v6151_v9  ;;  %v10116_v28 = vpop.f32.mrf.mxu3  ;;  %v13228_v21 = vld [vmem:[%s16296_s6 + $0x360] sm:$0xff] }
 0x71d   :  { %v5820_v50 = vpop.f32.mrf.mxu2  ;;  %v6834_v43 = vld [vmem:[#allocation4 + $0x1a8] sm:$0x1]  ;;  %v6836_v26 = vld [vmem:[#allocation4 + $0x1aa] sm:$0x1]  ;;  %v6838_v41 = vld [vmem:[#allocation4 + $0x1ac] sm:$0x1]  ;;  %10617 = vmatpush.bf16.msrb.mxu2 %v13442_v11 }
 0x71e   :  { %v15500_v53 = vmax.f32 %v6405_v55, %v6151_v9  ;;  %v5892_v4 = vadd.f32 %v5820_v50, %v5370_v24  ;;  %v6889_v57 = vld [vmem:[#allocation5 + $0x118] sm:$0xff]  ;;  %10606 = vmatpush.bf16.msrb.mxu1 %v13432_v14  ;;  %6835 = vst [vmem:[#allocation5 + $0x139] sm:$0x1] %v6834_v43  ;;  %v13477_v9 = vld [vmem:[%s16296_s6 + $0xb28] sm:$0xff]  ;;  %v13271_v55 = vld [vmem:[%s16296_s6 + $0x4b8] sm:$0xff] }
 0x71f   :  { %10242 = vmatpush.bf16.msra.mxu3 %v13208_v18  ;;  %v6938_v23 = vpack.c.bf16 %v6889_v57, %v6889_v57  ;;  %v6890_v12 = vld [vmem:[#allocation5 + $0x120] sm:$0xff]  ;;  %6837 = vst [vmem:[#allocation5 + $0x141] sm:$0x1] %v6836_v26  ;;  %v6867_v24 = vld [vmem:[#allocation5 + $0x68] sm:$0xff] }
 0x720   :  { %10281 = vmatpush.bf16.msra.mxu0 %v13232_v62  ;;  %v13441_v18 = vld [vmem:[%s16296_s6 + $0xa08] sm:$0xff]  ;;  %v15511_v62 = vld [vmem:[%s16295_s5] ss:$0 sm:$0xff]  ;;  %6839 = vst [vmem:[#allocation5 + $0x149] sm:$0x1] %v6838_v41  ;;  %v13246_v57 = vld [vmem:[%s16296_s6 + $0x3f0] sm:$0xff] }
 0x721   :  { %v15514_v19 = vadd.f32 %v15511_v62, %v5892_v4  ;;  %10555 = vmatmul.bf16.vlgmr.msra.gmra.mxu1 %v6938_v23  ;;  %10618 = vmatpush.bf16.msrb.mxu2 %v13441_v18  ;;  %v6870_v28 = vld [vmem:[#allocation5 + $0x80] sm:$0xff]  ;;  %v13476_v4 = vld [vmem:[%s16296_s6 + $0xb20] sm:$0xff] }
 0x722   :  { %10243 = vmatmul.bf16.vlgmr.msra.gmra.mxu3 %v6914_v27  ;;  %10651 = vmatpush.bf16.msra.mxu1 %v13471_v44  ;;  %v13440_v27 = vld [vmem:[%s16296_s6 + $0xa00] sm:$0xff] }
 0x723   :  { %10261 = vmatpush.bf16.msrb.mxu3 %v13231_v42  ;;  %10282 = vmatmul.bf16.vlgmr.msra.gmra.mxu0 %v6917_v25  ;;  %v15516_v42 = vpop.f32.mrf.mxu0  ;;  %v6152_v58 = vmax.f32 %v15514_v19, 0.0  ;;  %v6342_v33 = vld [vmem:[#allocation3 + $0x1c9] sm:$0xff] }
 0x724   :  { %10300 = vmatpush.bf16.msrb.mxu0 %v13255_v17  ;;  %v6939_v17 = vpack.c.bf16 %v6890_v12, %v6890_v12  ;;  %v13479_v25 = vld [vmem:[%s16296_s6 + $0xb38] sm:$0xff]  ;;  %v6406_v11 = vmax.f32 %v6150_v22, %v6342_v33  ;;  %v6916_v22 = vpack.c.bf16 %v6867_v24, %v6867_v24  ;;  %v13270_v12 = vld [vmem:[%s16296_s6 + $0x4b0] sm:$0xff] }
 0x725   :  { %6216 = vst [vmem:[#allocation3 + $0x1d8] sm:$0xff] %v6152_v58  ;;  %v5823_v3 = vpop.f32.mrf.mxu2  ;;  %10619 = vmatpush.bf16.msrb.mxu2 %v13440_v27  ;;  %v6893_v59 = vld [vmem:[#allocation5 + $0x138] sm:$0xff]  ;;  %v13475_v19 = vld [vmem:[%s16296_s6 + $0xb18] sm:$0xff]  ;;  %v13269_v27 = vld [vmem:[%s16296_s6 + $0x4a8] sm:$0xff] }
 0x726   :  { %10568 = vmatmul.bf16.vlgmr.msra.gmra.mxu2 %v6939_v17  ;;  %10652 = vmatpush.bf16.msra.mxu1 %v13470_v35  ;;  %v6894_v50 = vld [vmem:[#allocation5 + $0x140] sm:$0xff]  ;;  %v6942_v26 = vpack.c.bf16 %v6893_v59, %v6893_v59  ;;  %v6472_v44 = vmax.f32 %v6406_v11, %v6152_v58  ;;  %v13266_v11 = vld [vmem:[%s16296_s6 + $0x490] sm:$0xff] }
 0x727   :  { %10262 = vmatpush.bf16.msrb.mxu3 %v13230_v60  ;;  %v10140_v47 = vpop.f32.mrf.mxu3  ;;  %v5893_v60 = vadd.f32 %v5823_v3, %v5371_v7  ;;  %v6943_v23 = vpack.c.bf16 %v6894_v50, %v6894_v50  ;;  %v4554_v7 = vld [vmem:[#allocation3 + $0x1f8] sm:$0xff] }
 0x728   :  { %10301 = vmatpush.bf16.msrb.mxu0 %v13254_v56  ;;  %v10141_v56 = vadd.f32 %v10140_v47, %v15476_v63  ;;  %v13474_v47 = vld [vmem:[%s16296_s6 + $0xb10] sm:$0xff]  ;;  %v13241_v50 = vld [vmem:[%s16296_s6 + $0x3c8] sm:$0xff] }
 0x729   :  { %v6089_v30 = vadd.f32 %v15511_v62, %v5893_v60  ;;  %10664 = vmatpush.bf16.msra.mxu2 %v13479_v25  ;;  %v13244_v25 = vld [vmem:[%s16296_s6 + $0x3e0] sm:$0xff] }
 0x72a   :  { %v15555_v34 = vadd.f32 %v15433_v52, %v10141_v56  ;;  %10653 = vmatpush.bf16.msra.mxu1 %v13469_v39  ;;  %v13224_v52 = vld [vmem:[%s16296_s6 + $0x340] sm:$0xff]  ;;  %v4852_v56 = vadd.f32 %v15342_v38, %v4554_v7  ;;  %v13473_v38 = vld [vmem:[%s16296_s6 + $0xb08] sm:$0xff] }
 0x72b   :  { %10263 = vmatpush.bf16.msrb.mxu3 %v13229_v32  ;;  %v10181_v49 = vpop.f32.mrf.mxu0  ;;  %v6153_v63 = vmax.f32 %v6089_v30, 0.0  ;;  %v13284_v7 = vld [vmem:[%s16296_s6 + $0x520] sm:$0xff] }
 0x72c   :  { %10302 = vmatpush.bf16.msrb.mxu0 %v13253_v13  ;;  %v6343_v10 = vld [vmem:[#allocation3 + $0x1d1] sm:$0xff]  ;;  %v5372_v13 = vadd.f32 %v5303_v2, %v4850_v0  ;;  %v13243_v0 = vld [vmem:[%s16296_s6 + $0x3d8] sm:$0xff] }
 0x72d   :  { %v6537_v32 = vmax.f32 %v15500_v53, %v6343_v10  ;;  %6217 = vst [vmem:[#allocation3 + $0x1e0] sm:$0xff] %v6153_v63  ;;  %v5825_v40 = vpop.f32.mrf.mxu2  ;;  %10665 = vmatpush.bf16.msra.mxu2 %v13478_v8  ;;  %v6919_v53 = vpack.c.bf16 %v6870_v28, %v6870_v28 }
 0x72e   :  { %v5894_v14 = vadd.f32 %v5825_v40, %v5372_v13  ;;  %10654 = vmatpush.bf16.msra.mxu1 %v13468_v20 }
 0x72f   :  { %10264 = vmatpush.bf16.msrb.mxu3 %v13228_v21  ;;  %v10142_v31 = vpop.f32.mrf.mxu3  ;;  %6601 = vst [vmem:[#allocation4 + $0x1c0] sm:$0xff] %v6537_v32  ;;  %v4553_v21 = vld [vmem:[#allocation3 + $0x1f0] sm:$0xff]  ;;  %v13267_v32 = vld [vmem:[%s16296_s6 + $0x498] sm:$0xff] }
 0x730   :  { %10303 = vmatpush.bf16.msrb.mxu0 %v13252_v46  ;;  %v5306_v46 = vpop.f32.mrf.mxu1  ;;  %v6090_v43 = vadd.f32 %v15511_v62, %v5894_v14  ;;  %v4851_v41 = vadd.f32 %v15307_v29, %v4553_v21  ;;  %v13466_v29 = vld [vmem:[%s16296_s6 + $0xad0] sm:$0xff]  ;;  %v13472_v31 = vld [vmem:[%s16296_s6 + $0xb00] sm:$0xff]  ;;  %v13501_v21 = vld [vmem:[%s16296_s6 + $0xbe8] sm:$0xff] }
 0x731   :  { %10666 = vmatpush.bf16.msra.mxu2 %v13477_v9  ;;  %10607 = vmatmul.bf16.vlgmr.msrb.gmra.mxu1 %v6942_v26  ;;  %v13502_v9 = vld [vmem:[%s16296_s6 + $0xbf0] sm:$0xff] }
 0x732   :  { %v6154_v36 = vmax.f32 %v6090_v43, 0.0  ;;  %10655 = vmatpush.bf16.msra.mxu1 %v13467_v61  ;;  %v13265_v43 = vld [vmem:[%s16296_s6 + $0x488] sm:$0xff]  ;;  %v13510_v26 = vld [vmem:[%s16296_s6 + $0xc30] sm:$0xff] }
 0x733   :  { %10265 = vmatpush.bf16.msrb.mxu3 %v13227_v1  ;;  %v5373_v1 = vadd.f32 %v5306_v46, %v4851_v41  ;;  %v6869_v41 = vld [vmem:[#allocation5 + $0x78] sm:$0xff] }
 0x734   :  { %10304 = vmatpush.bf16.msrb.mxu0 %v13251_v51  ;;  %v6344_v18 = vld [vmem:[#allocation3 + $0x1d9] sm:$0xff]  ;;  %6218 = vst [vmem:[#allocation3 + $0x1e8] sm:$0xff] %v6154_v36  ;;  %v6872_v36 = vld [vmem:[#allocation5 + $0x90] sm:$0xff] }
 0x735   :  { %v6538_v17 = vmax.f32 %v6472_v44, %v6344_v18  ;;  %v5828_v51 = vpop.f32.mrf.mxu2  ;;  %10667 = vmatpush.bf16.msra.mxu2 %v13476_v4  ;;  %v13509_v4 = vld [vmem:[%s16296_s6 + $0xc28] sm:$0xff]  ;;  %v13287_v44 = vld [vmem:[%s16296_s6 + $0x538] sm:$0xff]  ;;  %v6921_v18 = vpack.c.bf16 %v6872_v36, %v6872_v36 }
 0x736   :  { %10620 = vmatmul.bf16.vlgmr.msrb.gmra.mxu2 %v6943_v23  ;;  %v6842_v58 = vld [vmem:[#allocation4 + $0x1c2] sm:$0x1]  ;;  %v6844_v35 = vld [vmem:[#allocation4 + $0x1c4] sm:$0x1]  ;;  %v5895_v33 = vadd.f32 %v5828_v51, %v5373_v1  ;;  %10656 = vmatpush.bf16.msra.mxu1 %v13466_v29  ;;  %v6846_v60 = vld [vmem:[#allocation4 + $0x1c6] sm:$0x1] }
 0x737   :  { %10266 = vmatpush.bf16.msrb.mxu3 %v13226_v5  ;;  %6602 = vst [vmem:[#allocation4 + $0x1c8] sm:$0xff] %v6538_v17  ;;  %v13465_v5 = vld [vmem:[%s16296_s6 + $0xac8] sm:$0xff]  ;;  %v13499_v23 = vld [vmem:[%s16296_s6 + $0xbd8] sm:$0xff]  ;;  %v13508_v17 = vld [vmem:[%s16296_s6 + $0xc20] sm:$0xff] }
 0x738   :  { %10305 = vmatpush.bf16.msrb.mxu0 %v13250_v45  ;;  %6843 = vst [vmem:[#allocation5 + $0x159] sm:$0x1] %v6842_v58  ;;  %v6091_v2 = vadd.f32 %v15511_v62, %v5895_v33  ;;  %v6840_v45 = vld [vmem:[#allocation4 + $0x1c0] sm:$0x1]  ;;  %v5308_v3 = vpop.f32.mrf.mxu1  ;;  %v13262_v1 = vld [vmem:[%s16296_s6 + $0x470] sm:$0xff]  ;;  %v13507_v51 = vld [vmem:[%s16296_s6 + $0xc18] sm:$0xff] }
 0x739   :  { %6845 = vst [vmem:[#allocation5 + $0x161] sm:$0x1] %v6844_v35  ;;  %10668 = vmatpush.bf16.msra.mxu2 %v13475_v19  ;;  %v5374_v30 = vadd.f32 %v5308_v3, %v4852_v56  ;;  %v13286_v29 = vld [vmem:[%s16296_s6 + $0x530] sm:$0xff]  ;;  %v13285_v58 = vld [vmem:[%s16296_s6 + $0x528] sm:$0xff]  ;;  %v13259_v3 = vld [vmem:[%s16296_s6 + $0x458] sm:$0xff] }
 0x73a   :  { %6841 = vst [vmem:[#allocation5 + $0x151] sm:$0x1] %v6840_v45  ;;  %v6155_v39 = vmax.f32 %v6091_v2, 0.0  ;;  %10657 = vmatpush.bf16.msra.mxu1 %v13465_v5  ;;  %v13498_v19 = vld [vmem:[%s16296_s6 + $0xbd0] sm:$0xff]  ;;  %v13497_v35 = vld [vmem:[%s16296_s6 + $0xbc8] sm:$0xff]  ;;  %v13496_v5 = vld [vmem:[%s16296_s6 + $0xbc0] sm:$0xff] }
 0x73b   :  { %10267 = vmatpush.bf16.msrb.mxu3 %v13225_v6  ;;  %6847 = vst [vmem:[#allocation5 + $0x169] sm:$0x1] %v6846_v60  ;;  %v13464_v6 = vld [vmem:[%s16296_s6 + $0xac0] sm:$0xff]  ;;  %v13506_v33 = vld [vmem:[%s16296_s6 + $0xc10] sm:$0xff]  ;;  %v13505_v45 = vld [vmem:[%s16296_s6 + $0xc08] sm:$0xff] }
 0x73c   :  { %10306 = vmatpush.bf16.msrb.mxu0 %v13249_v37  ;;  %6219 = vst [vmem:[#allocation3 + $0x1f0] sm:$0xff] %v6155_v39  ;;  %v13503_v37 = vld [vmem:[%s16296_s6 + $0xbf8] sm:$0xff]  ;;  %v13504_v39 = vld [vmem:[%s16296_s6 + $0xc00] sm:$0xff] }
 0x73d   :  { %v5830_v8 = vpop.f32.mrf.mxu2  ;;  %10669 = vmatpush.bf16.msra.mxu2 %v13474_v47  ;;  %v13283_v47 = vld [vmem:[%s16296_s6 + $0x518] sm:$0xff] }
 0x73e   :  { %v6850_v63 = vld [vmem:[#allocation4 + $0x1ca] sm:$0x1]  ;;  %v6852_v20 = vld [vmem:[#allocation4 + $0x1cc] sm:$0x1]  ;;  %v5896_v10 = vadd.f32 %v5830_v8, %v5374_v30  ;;  %10658 = vmatpush.bf16.msra.mxu1 %v13464_v6  ;;  %v13319_v36 = vld [vmem:[%s16296_s6 + $0x638] sm:$0xff] }
 0x73f   :  { %10268 = vmatpush.bf16.msrb.mxu3 %v13224_v52  ;;  %v6897_v13 = vld [vmem:[#allocation5 + $0x158] sm:$0xff]  ;;  %v6848_v52 = vld [vmem:[#allocation4 + $0x1c8] sm:$0x1]  ;;  %6851 = vst [vmem:[#allocation5 + $0x179] sm:$0x1] %v6850_v63 }
 0x740   :  { %10307 = vmatpush.bf16.msrb.mxu0 %v13248_v48  ;;  %v15624_v49 = vpop.f32.mrf.mxu0  ;;  %v6946_v48 = vpack.c.bf16 %v6897_v13, %v6897_v13  ;;  %v6092_v40 = vadd.f32 %v15511_v62, %v5896_v10  ;;  %6853 = vst [vmem:[#allocation5 + $0x181] sm:$0x1] %v6852_v20  ;;  %v13242_v62 = vld [vmem:[%s16296_s6 + $0x3d0] sm:$0xff]  ;;  %v6898_v24 = vld [vmem:[#allocation5 + $0x160] sm:$0xff]  ;;  %v13279_v13 = vld [vmem:[%s16296_s6 + $0x4f8] sm:$0xff] }
 0x741   :  { %10670 = vmatpush.bf16.msra.mxu2 %v13473_v38  ;;  %6849 = vst [vmem:[#allocation5 + $0x171] sm:$0x1] %v6848_v52  ;;  %v13282_v6 = vld [vmem:[%s16296_s6 + $0x510] sm:$0xff]  ;;  %v13281_v20 = vld [vmem:[%s16296_s6 + $0x508] sm:$0xff]  ;;  %v13303_v52 = vld [vmem:[%s16296_s6 + $0x5b8] sm:$0xff] }
 0x742   :  { %10269 = vmatmul.bf16.vlgmr.msrb.gmra.mxu3 %v6916_v22  ;;  %10703 = vmatpush.bf16.msrb.mxu1 %v13503_v37  ;;  %v13240_v22 = vld [vmem:[%s16296_s6 + $0x3c0] sm:$0xff] }
 0x743   :  { %10287 = vmatpush.bf16.msra.mxu3 %v13247_v15  ;;  %10308 = vmatmul.bf16.vlgmr.msrb.gmra.mxu0 %v6919_v53  ;;  %v6156_v15 = vmax.f32 %v6092_v40, 0.0  ;;  %v13264_v53 = vld [vmem:[%s16296_s6 + $0x480] sm:$0xff]  ;;  %v6874_v40 = vld [vmem:[#allocation5 + $0xa0] sm:$0xff] }
 0x744   :  { %10326 = vmatpush.bf16.msra.mxu0 %v13271_v55  ;;  %10659 = vmatmul.bf16.vlgmr.msra.gmra.mxu1 %v6946_v48  ;;  %v13511_v55 = vld [vmem:[%s16296_s6 + $0xc38] sm:$0xff]  ;;  %v6871_v48 = vld [vmem:[#allocation5 + $0x88] sm:$0xff] }
 0x745   :  { %v10166_v59 = vpop.f32.mrf.mxu3  ;;  %6220 = vst [vmem:[#allocation3 + $0x1f8] sm:$0xff] %v6156_v15  ;;  %10671 = vmatpush.bf16.msra.mxu2 %v13472_v31  ;;  %v6920_v31 = vpack.c.bf16 %v6871_v48, %v6871_v48  ;;  %v6923_v15 = vpack.c.bf16 %v6874_v40, %v6874_v40  ;;  %v13334_v48 = vld [vmem:[%s16296_s6 + $0x6b0] sm:$0xff]  ;;  %v13309_v40 = vld [vmem:[%s16296_s6 + $0x5e8] sm:$0xff] }
 0x746   :  { %v10167_v14 = vadd.f32 %v10166_v59, %v15555_v34  ;;  %10704 = vmatpush.bf16.msrb.mxu1 %v13502_v9  ;;  %v6947_v34 = vpack.c.bf16 %v6898_v24, %v6898_v24  ;;  %v13278_v9 = vld [vmem:[%s16296_s6 + $0x4f0] sm:$0xff] }
 0x747   :  { %10288 = vmatpush.bf16.msra.mxu3 %v13246_v57  ;;  %v13263_v57 = vld [vmem:[%s16296_s6 + $0x478] sm:$0xff]  ;;  %v6902_v37 = vld [vmem:[#allocation5 + $0x180] sm:$0xff]  ;;  %v13302_v59 = vld [vmem:[%s16296_s6 + $0x5b0] sm:$0xff] }
 0x748   :  { %10327 = vmatpush.bf16.msra.mxu0 %v13270_v12  ;;  %v10207_v28 = vpop.f32.mrf.mxu0  ;;  %v15662_v46 = vadd.f32 %v15516_v42, %v10167_v14  ;;  %10672 = vmatmul.bf16.vlgmr.msra.gmra.mxu2 %v6947_v34  ;;  %v13500_v42 = vld [vmem:[%s16296_s6 + $0xbe0] sm:$0xff]  ;;  %v6918_v12 = vpack.c.bf16 %v6869_v41, %v6869_v41  ;;  %v6951_v63 = vpack.c.bf16 %v6902_v37, %v6902_v37  ;;  %v13274_v34 = vld [vmem:[%s16296_s6 + $0x4d0] sm:$0xff]  ;;  %v13295_v41 = vld [vmem:[%s16296_s6 + $0x578] sm:$0xff] }
 0x749   :  { %10716 = vmatpush.bf16.msrb.mxu2 %v13511_v55  ;;  %v13276_v14 = vld [vmem:[%s16296_s6 + $0x4e0] sm:$0xff]  ;;  %v13275_v28 = vld [vmem:[%s16296_s6 + $0x4d8] sm:$0xff] }
 0x74a   :  { %10705 = vmatpush.bf16.msrb.mxu1 %v13501_v21  ;;  %v13300_v55 = vld [vmem:[%s16296_s6 + $0x5a0] sm:$0xff]  ;;  %v13299_v21 = vld [vmem:[%s16296_s6 + $0x598] sm:$0xff] }
 0x74b   :  { %10289 = vmatpush.bf16.msra.mxu3 %v13245_v16  ;;  %v13261_v16 = vld [vmem:[%s16296_s6 + $0x468] sm:$0xff]  ;;  %v13312_v37 = vld [vmem:[%s16296_s6 + $0x600] sm:$0xff] }
 0x74c   :  { %10328 = vmatpush.bf16.msra.mxu0 %v13269_v27  ;;  %v13260_v27 = vld [vmem:[%s16296_s6 + $0x460] sm:$0xff] }
 0x74d   :  { %v10168_v61 = vpop.f32.mrf.mxu3  ;;  %10717 = vmatpush.bf16.msrb.mxu2 %v13510_v26 }
 0x74e   :  { %10706 = vmatpush.bf16.msrb.mxu1 %v13500_v42 }
 0x74f   :  { %10290 = vmatpush.bf16.msra.mxu3 %v13244_v25  ;;  %v6901_v25 = vld [vmem:[#allocation5 + $0x178] sm:$0xff] }
 0x750   :  { %10329 = vmatpush.bf16.msra.mxu0 %v13268_v54  ;;  %v6950_v56 = vpack.c.bf16 %v6901_v25, %v6901_v25  ;;  %v13258_v54 = vld [vmem:[%s16296_s6 + $0x450] sm:$0xff] }
 0x751   :  { %10718 = vmatpush.bf16.msrb.mxu2 %v13509_v4  ;;  %v13314_v25 = vld [vmem:[%s16296_s6 + $0x610] sm:$0xff] }
 0x752   :  { %10707 = vmatpush.bf16.msrb.mxu1 %v13499_v23 }
 0x753   :  { %10291 = vmatpush.bf16.msra.mxu3 %v13243_v0  ;;  %v13257_v0 = vld [vmem:[%s16296_s6 + $0x448] sm:$0xff] }
 0x754   :  { %10330 = vmatpush.bf16.msra.mxu0 %v13267_v32  ;;  %v13256_v32 = vld [vmem:[%s16296_s6 + $0x440] sm:$0xff] }
 0x755   :  { %10719 = vmatpush.bf16.msrb.mxu2 %v13508_v17 }
 0x756   :  { %10708 = vmatpush.bf16.msrb.mxu1 %v13498_v19  ;;  %v13318_v19 = vld [vmem:[%s16296_s6 + $0x630] sm:$0xff] }
 0x757   :  { %10292 = vmatpush.bf16.msra.mxu3 %v13242_v62  ;;  %v13277_v62 = vld [vmem:[%s16296_s6 + $0x4e8] sm:$0xff] }
 0x758   :  { %10331 = vmatpush.bf16.msra.mxu0 %v13266_v11  ;;  %v13301_v11 = vld [vmem:[%s16296_s6 + $0x5a8] sm:$0xff] }
 0x759   :  { %10720 = vmatpush.bf16.msrb.mxu2 %v13507_v51 }
 0x75a   :  { %10709 = vmatpush.bf16.msrb.mxu1 %v13497_v35  ;;  %v13292_v35 = vld [vmem:[%s16296_s6 + $0x560] sm:$0xff] }
 0x75b   :  { %10293 = vmatpush.bf16.msra.mxu3 %v13241_v50 }
 0x75c   :  { %10332 = vmatpush.bf16.msra.mxu0 %v13265_v43  ;;  %v13298_v43 = vld [vmem:[%s16296_s6 + $0x590] sm:$0xff] }
 0x75d   :  { %10721 = vmatpush.bf16.msrb.mxu2 %v13506_v33  ;;  %v13316_v33 = vld [vmem:[%s16296_s6 + $0x620] sm:$0xff] }
 0x75e   :  { %10710 = vmatpush.bf16.msrb.mxu1 %v13496_v5  ;;  %v13315_v5 = vld [vmem:[%s16296_s6 + $0x618] sm:$0xff] }
 0x75f   :  { %10294 = vmatpush.bf16.msra.mxu3 %v13240_v22  ;;  %v13273_v22 = vld [vmem:[%s16296_s6 + $0x4c8] sm:$0xff] }
 0x760   :  { %10333 = vmatpush.bf16.msra.mxu0 %v13264_v53  ;;  %v15727_v2 = vpop.f32.mrf.mxu0  ;;  %v13297_v53 = vld [vmem:[%s16296_s6 + $0x588] sm:$0xff] }
 0x761   :  { %10722 = vmatpush.bf16.msrb.mxu2 %v13505_v45  ;;  %10711 = vmatmul.bf16.vlgmr.msrb.gmra.mxu1 %v6950_v56 }
 0x762   :  { %10295 = vmatmul.bf16.vlgmr.msra.gmra.mxu3 %v6918_v12  ;;  %v6873_v12 = vld [vmem:[#allocation5 + $0x98] sm:$0xff] }
 0x763   :  { %10313 = vmatpush.bf16.msrb.mxu3 %v13263_v57  ;;  %10334 = vmatmul.bf16.vlgmr.msra.gmra.mxu0 %v6921_v18  ;;  %v13272_v57 = vld [vmem:[%s16296_s6 + $0x4c0] sm:$0xff]  ;;  %v6876_v18 = vld [vmem:[#allocation5 + $0xb0] sm:$0xff]  ;;  %v6922_v17 = vpack.c.bf16 %v6873_v12, %v6873_v12 }
 0x764   :  { %10352 = vmatpush.bf16.msrb.mxu0 %v13287_v44  ;;  %v13296_v44 = vld [vmem:[%s16296_s6 + $0x580] sm:$0xff] }
 0x765   :  { %v10192_v60 = vpop.f32.mrf.mxu3  ;;  %10723 = vmatpush.bf16.msrb.mxu2 %v13504_v39  ;;  %v13289_v39 = vld [vmem:[%s16296_s6 + $0x548] sm:$0xff]  ;;  %v6877_v12 = vld [vmem:[#allocation5 + $0xb8] sm:$0xff] }
 0x766   :  { %v10193_v30 = vadd.f32 %v10192_v60, %v15662_v46 }
 0x767   :  { %10314 = vmatpush.bf16.msrb.mxu3 %v13262_v1  ;;  %v13294_v1 = vld [vmem:[%s16296_s6 + $0x570] sm:$0xff] }
 0x768   :  { %10353 = vmatpush.bf16.msrb.mxu0 %v13286_v29  ;;  %v10233_v38 = vpop.f32.mrf.mxu0  ;;  %v10206_v8 = vadd.f32 %v15624_v49, %v10193_v30  ;;  %10724 = vmatmul.bf16.vlgmr.msrb.gmra.mxu2 %v6951_v63  ;;  %v13280_v49 = vld [vmem:[%s16296_s6 + $0x500] sm:$0xff]  ;;  %v6925_v29 = vpack.c.bf16 %v6876_v18, %v6876_v18  ;;  %v6875_v63 = vld [vmem:[#allocation5 + $0xa8] sm:$0xff]  ;;  %v6880_v18 = vld [vmem:[#allocation5 + $0xd0] sm:$0xff] }
 0x769   :  { %v13288_v38 = vld [vmem:[%s16296_s6 + $0x540] sm:$0xff] }
 0x76b   :  { %10315 = vmatpush.bf16.msrb.mxu3 %v13261_v16  ;;  %v13293_v16 = vld [vmem:[%s16296_s6 + $0x568] sm:$0xff] }
 0x76c   :  { %10354 = vmatpush.bf16.msrb.mxu0 %v13285_v58  ;;  %v13317_v58 = vld [vmem:[%s16296_s6 + $0x628] sm:$0xff] }
 0x76d   :  { %v10194_v10 = vpop.f32.mrf.mxu3 }
 0x76f   :  { %10316 = vmatpush.bf16.msrb.mxu3 %v13260_v27 }
 0x770   :  { %10355 = vmatpush.bf16.msrb.mxu0 %v13284_v7 }
 0x773   :  { %10317 = vmatpush.bf16.msrb.mxu3 %v13259_v3  ;;  %v13290_v3 = vld [vmem:[%s16296_s6 + $0x550] sm:$0xff] }
 0x774   :  { %10356 = vmatpush.bf16.msrb.mxu0 %v13283_v47 }
 0x777   :  { %10318 = vmatpush.bf16.msrb.mxu3 %v13258_v54  ;;  %v13313_v54 = vld [vmem:[%s16296_s6 + $0x608] sm:$0xff] }
 0x778   :  { %10357 = vmatpush.bf16.msrb.mxu0 %v13282_v6 }
 0x77b   :  { %10319 = vmatpush.bf16.msrb.mxu3 %v13257_v0  ;;  %v13335_v0 = vld [vmem:[%s16296_s6 + $0x6b8] sm:$0xff] }
 0x77c   :  { %10358 = vmatpush.bf16.msrb.mxu0 %v13281_v20  ;;  %v6878_v20 = vld [vmem:[#allocation5 + $0xc0] sm:$0xff] }
 0x77e   :  { %v15800_v42 = vpop.f32.mrf.mxu1 }
 0x77f   :  { %10320 = vmatpush.bf16.msrb.mxu3 %v13256_v32  ;;  %v6924_v32 = vpack.c.bf16 %v6875_v63, %v6875_v63  ;;  %v13343_v63 = vld [vmem:[%s16296_s6 + $0x6f8] sm:$0xff] }
 0x780   :  { %10359 = vmatpush.bf16.msrb.mxu0 %v13280_v49  ;;  %v10257_v24 = vpop.f32.mrf.mxu0 }
 0x782   :  { %10321 = vmatmul.bf16.vlgmr.msrb.gmra.mxu3 %v6920_v31  ;;  %v13333_v31 = vld [vmem:[%s16296_s6 + $0x6a8] sm:$0xff] }
 0x783   :  { %10339 = vmatpush.bf16.msra.mxu3 %v13279_v13  ;;  %10360 = vmatmul.bf16.vlgmr.msrb.gmra.mxu0 %v6923_v15  ;;  %v13310_v13 = vld [vmem:[%s16296_s6 + $0x5f0] sm:$0xff]  ;;  %v13308_v15 = vld [vmem:[%s16296_s6 + $0x5e0] sm:$0xff] }
 0x784   :  { %10378 = vmatpush.bf16.msra.mxu0 %v13303_v52  ;;  %v6927_v52 = vpack.c.bf16 %v6878_v20, %v6878_v20  ;;  %v13367_v20 = vld [vmem:[%s16296_s6 + $0x7b8] sm:$0xff] }
 0x785   :  { %v10218_v46 = vpop.f32.mrf.mxu3 }
 0x786   :  { %v10219_v50 = vadd.f32 %v10218_v46, %v10206_v8  ;;  %v10506_v23 = vpop.f32.mrf.mxu1  ;;  %v13311_v8 = vld [vmem:[%s16296_s6 + $0x5f8] sm:$0xff] }
 0x787   :  { %10340 = vmatpush.bf16.msra.mxu3 %v13278_v9  ;;  %v13351_v23 = vld [vmem:[%s16296_s6 + $0x738] sm:$0xff] }
 0x788   :  { %10379 = vmatpush.bf16.msra.mxu0 %v13302_v59  ;;  %v10259_v26 = vpop.f32.mrf.mxu0  ;;  %v10232_v61 = vadd.f32 %v15727_v2, %v10219_v50  ;;  %v13291_v2 = vld [vmem:[%s16296_s6 + $0x558] sm:$0xff]  ;;  %v13330_v50 = vld [vmem:[%s16296_s6 + $0x690] sm:$0xff] }
 0x78b   :  { %10341 = vmatpush.bf16.msra.mxu3 %v13277_v62  ;;  %v15827_v51 = vpop.f32.mrf.mxu2  ;;  %v13332_v62 = vld [vmem:[%s16296_s6 + $0x6a0] sm:$0xff] }
 0x78c   :  { %10380 = vmatpush.bf16.msra.mxu0 %v13301_v11 }
 0x78d   :  { %v10220_v4 = vpop.f32.mrf.mxu3 }
 0x78e   :  { %v13304_v4 = vld [vmem:[%s16296_s6 + $0x5c0] sm:$0xff] }
 0x78f   :  { %10342 = vmatpush.bf16.msra.mxu3 %v13276_v14  ;;  %v13307_v14 = vld [vmem:[%s16296_s6 + $0x5d8] sm:$0xff] }
 0x790   :  { %10381 = vmatpush.bf16.msra.mxu0 %v13300_v55  ;;  %v13331_v55 = vld [vmem:[%s16296_s6 + $0x698] sm:$0xff] }
 0x793   :  { %10343 = vmatpush.bf16.msra.mxu3 %v13275_v28  ;;  %v10519_v7 = vpop.f32.mrf.mxu2  ;;  %v13306_v28 = vld [vmem:[%s16296_s6 + $0x5d0] sm:$0xff] }
 0x794   :  { %10382 = vmatpush.bf16.msra.mxu0 %v13299_v21  ;;  %v13348_v7 = vld [vmem:[%s16296_s6 + $0x720] sm:$0xff] }
 0x797   :  { %10344 = vmatpush.bf16.msra.mxu3 %v13274_v34 }
 0x798   :  { %10383 = vmatpush.bf16.msra.mxu0 %v13298_v43 }
 0x79b   :  { %10345 = vmatpush.bf16.msra.mxu3 %v13273_v22  ;;  %v13329_v22 = vld [vmem:[%s16296_s6 + $0x688] sm:$0xff] }
 0x79c   :  { %10384 = vmatpush.bf16.msra.mxu0 %v13297_v53 }
 0x79e   :  { %v15861_v30 = vpop.f32.mrf.mxu1 }
 0x79f   :  { %10346 = vmatpush.bf16.msra.mxu3 %v13272_v57 }
 0x7a0   :  { %10385 = vmatpush.bf16.msra.mxu0 %v13296_v44  ;;  %v15841_v27 = vpop.f32.mrf.mxu0  ;;  %v13328_v44 = vld [vmem:[%s16296_s6 + $0x680] sm:$0xff] }
 0x7a2   :  { %10347 = vmatmul.bf16.vlgmr.msra.gmra.mxu3 %v6922_v17  ;;  %v6926_v17 = vpack.c.bf16 %v6877_v12, %v6877_v12  ;;  %v13359_v12 = vld [vmem:[%s16296_s6 + $0x778] sm:$0xff] }
 0x7a3   :  { %10365 = vmatpush.bf16.msrb.mxu3 %v13295_v41  ;;  %10386 = vmatmul.bf16.vlgmr.msra.gmra.mxu0 %v6925_v29  ;;  %v13327_v41 = vld [vmem:[%s16296_s6 + $0x678] sm:$0xff]  ;;  %v6929_v29 = vpack.c.bf16 %v6880_v18, %v6880_v18 }
 0x7a4   :  { %10404 = vmatpush.bf16.msrb.mxu0 %v13319_v36  ;;  %v13399_v18 = vld [vmem:[%s16296_s6 + $0x8b8] sm:$0xff] }
 0x7a5   :  { %v10244_v45 = vpop.f32.mrf.mxu3 }
 0x7a6   :  { %v10245_v47 = vadd.f32 %v10244_v45, %v10232_v61  ;;  %v10558_v49 = vpop.f32.mrf.mxu1  ;;  %v13305_v61 = vld [vmem:[%s16296_s6 + $0x5c8] sm:$0xff]  ;;  %v13347_v45 = vld [vmem:[%s16296_s6 + $0x718] sm:$0xff] }
 0x7a7   :  { %10366 = vmatpush.bf16.msrb.mxu3 %v13294_v1  ;;  %v13326_v1 = vld [vmem:[%s16296_s6 + $0x670] sm:$0xff] }
 0x7a8   :  { %10405 = vmatpush.bf16.msrb.mxu0 %v13318_v19  ;;  %v10285_v60 = vpop.f32.mrf.mxu0  ;;  %v10258_v56 = vadd.f32 %v10257_v24, %v10245_v47  ;;  %v13350_v19 = vld [vmem:[%s16296_s6 + $0x730] sm:$0xff] }
 0x7a9   :  { %v15875_v10 = vpop.f32.mrf.mxu2  ;;  %v13322_v47 = vld [vmem:[%s16296_s6 + $0x650] sm:$0xff] }
 0x7aa   :  { %v13346_v60 = vld [vmem:[%s16296_s6 + $0x710] sm:$0xff] }
 0x7ab   :  { %10367 = vmatpush.bf16.msrb.mxu3 %v13293_v16  ;;  %v13325_v16 = vld [vmem:[%s16296_s6 + $0x668] sm:$0xff] }
 0x7ac   :  { %10406 = vmatpush.bf16.msrb.mxu0 %v13317_v58 }
 0x7ad   :  { %v10246_v6 = vpop.f32.mrf.mxu3 }
 0x7ae   :  { %v15892_v59 = vpop.f32.mrf.mxu1 }
 0x7af   :  { %10368 = vmatpush.bf16.msrb.mxu3 %v13292_v35  ;;  %v13349_v35 = vld [vmem:[%s16296_s6 + $0x728] sm:$0xff] }
 0x7b0   :  { %10407 = vmatpush.bf16.msrb.mxu0 %v13316_v33 }
 0x7b1   :  { %v10571_v9 = vpop.f32.mrf.mxu2 }
 0x7b2   :  { %v13341_v9 = vld [vmem:[%s16296_s6 + $0x6e8] sm:$0xff] }
 0x7b3   :  { %10369 = vmatpush.bf16.msrb.mxu3 %v13291_v2 }
 0x7b4   :  { %10408 = vmatpush.bf16.msrb.mxu0 %v13315_v5  ;;  %v13323_v5 = vld [vmem:[%s16296_s6 + $0x658] sm:$0xff] }
 0x7b6   :  { %v10610_v34 = vpop.f32.mrf.mxu1 }
 0x7b7   :  { %10370 = vmatpush.bf16.msrb.mxu3 %v13290_v3  ;;  %v13338_v34 = vld [vmem:[%s16296_s6 + $0x6d0] sm:$0xff] }
 0x7b8   :  { %10409 = vmatpush.bf16.msrb.mxu0 %v13314_v25 }
 0x7b9   :  { %v15908_v46 = vpop.f32.mrf.mxu2 }
 0x7bb   :  { %10371 = vmatpush.bf16.msrb.mxu3 %v13289_v39 }
 0x7bc   :  { %10410 = vmatpush.bf16.msrb.mxu0 %v13313_v54  ;;  %v13321_v54 = vld [vmem:[%s16296_s6 + $0x648] sm:$0xff] }
 0x7bf   :  { %10372 = vmatpush.bf16.msrb.mxu3 %v13288_v38  ;;  %v13345_v38 = vld [vmem:[%s16296_s6 + $0x708] sm:$0xff] }
 0x7c0   :  { %10411 = vmatpush.bf16.msrb.mxu0 %v13312_v37  ;;  %v15897_v11 = vpop.f32.mrf.mxu0  ;;  %v13320_v37 = vld [vmem:[%s16296_s6 + $0x640] sm:$0xff] }
 0x7c1   :  { %v10623_v57 = vpop.f32.mrf.mxu2  ;;  %v15929_v36 = vpop.f32.mrf.mxu1 }
 0x7c2   :  { %10373 = vmatmul.bf16.vlgmr.msrb.gmra.mxu3 %v6924_v32  ;;  %v6879_v32 = vld [vmem:[#allocation5 + $0xc8] sm:$0xff]  ;;  %v13361_v57 = vld [vmem:[%s16296_s6 + $0x788] sm:$0xff] }
 0x7c3   :  { %10391 = vmatpush.bf16.msra.mxu3 %v13311_v8  ;;  %10412 = vmatmul.bf16.vlgmr.msrb.gmra.mxu0 %v6927_v52  ;;  %v6928_v52 = vpack.c.bf16 %v6879_v32, %v6879_v32  ;;  %v6883_v32 = vld [vmem:[#allocation5 + $0xe8] sm:$0xff] }
 0x7c4   :  { %10430 = vmatpush.bf16.msra.mxu0 %v13335_v0  ;;  %v13344_v0 = vld [vmem:[%s16296_s6 + $0x700] sm:$0xff] }
 0x7c5   :  { %v10270_v24 = vpop.f32.mrf.mxu3 }
 0x7c6   :  { %v10271_v21 = vadd.f32 %v10270_v24, %v10258_v56 }
 0x7c7   :  { %10392 = vmatpush.bf16.msra.mxu3 %v13310_v13  ;;  %v6882_v13 = vld [vmem:[#allocation5 + $0xe0] sm:$0xff] }
 0x7c8   :  { %10431 = vmatpush.bf16.msra.mxu0 %v13334_v48  ;;  %v10311_v43 = vpop.f32.mrf.mxu0  ;;  %v10284_v26 = vadd.f32 %v15841_v27, %v10271_v21  ;;  %v13324_v27 = vld [vmem:[%s16296_s6 + $0x660] sm:$0xff]  ;;  %v13342_v48 = vld [vmem:[%s16296_s6 + $0x6f0] sm:$0xff]  ;;  %v13363_v21 = vld [vmem:[%s16296_s6 + $0x798] sm:$0xff] }
 0x7c9   :  { %v10662_v58 = vpop.f32.mrf.mxu1 }
 0x7ca   :  { %v13398_v58 = vld [vmem:[%s16296_s6 + $0x8b0] sm:$0xff] }
 0x7cb   :  { %10393 = vmatpush.bf16.msra.mxu3 %v13309_v40  ;;  %v15946_v33 = vpop.f32.mrf.mxu2  ;;  %v6931_v40 = vpack.c.bf16 %v6882_v13, %v6882_v13  ;;  %v6888_v13 = vld [vmem:[#allocation5 + $0x110] sm:$0xff] }
 0x7cc   :  { %10432 = vmatpush.bf16.msra.mxu0 %v13333_v31  ;;  %v13366_v31 = vld [vmem:[%s16296_s6 + $0x7b0] sm:$0xff] }
 0x7cd   :  { %v10272_v53 = vpop.f32.mrf.mxu3 }
 0x7ce   :  { %v13337_v53 = vld [vmem:[%s16296_s6 + $0x6c8] sm:$0xff] }
 0x7cf   :  { %10394 = vmatpush.bf16.msra.mxu3 %v13308_v15  ;;  %v13365_v15 = vld [vmem:[%s16296_s6 + $0x7a8] sm:$0xff] }
 0x7d0   :  { %10433 = vmatpush.bf16.msra.mxu0 %v13332_v62 }
 0x7d3   :  { %10395 = vmatpush.bf16.msra.mxu3 %v13307_v14  ;;  %v10675_v3 = vpop.f32.mrf.mxu2 }
 0x7d4   :  { %10434 = vmatpush.bf16.msra.mxu0 %v13331_v55  ;;  %v13364_v55 = vld [vmem:[%s16296_s6 + $0x7a0] sm:$0xff]  ;;  %v13395_v3 = vld [vmem:[%s16296_s6 + $0x898] sm:$0xff] }
 0x7d7   :  { %10396 = vmatpush.bf16.msra.mxu3 %v13306_v28  ;;  %v13339_v28 = vld [vmem:[%s16296_s6 + $0x6d8] sm:$0xff] }
 0x7d8   :  { %10435 = vmatpush.bf16.msra.mxu0 %v13330_v50 }
 0x7db   :  { %10397 = vmatpush.bf16.msra.mxu3 %v13305_v61 }
 0x7dc   :  { %10436 = vmatpush.bf16.msra.mxu0 %v13329_v22 }
 0x7de   :  { %v15987_v49 = vpop.f32.mrf.mxu1 }
 0x7df   :  { %10398 = vmatpush.bf16.msra.mxu3 %v13304_v4 }
 0x7e0   :  { %10437 = vmatpush.bf16.msra.mxu0 %v13328_v44  ;;  %v15954_v2 = vpop.f32.mrf.mxu0  ;;  %v13336_v44 = vld [vmem:[%s16296_s6 + $0x6c0] sm:$0xff] }
 0x7e2   :  { %10399 = vmatmul.bf16.vlgmr.msra.gmra.mxu3 %v6926_v17  ;;  %v6881_v17 = vld [vmem:[#allocation5 + $0xd8] sm:$0xff] }
 0x7e3   :  { %10417 = vmatpush.bf16.msrb.mxu3 %v13327_v41  ;;  %10438 = vmatmul.bf16.vlgmr.msra.gmra.mxu0 %v6929_v29  ;;  %v6930_v29 = vpack.c.bf16 %v6881_v17, %v6881_v17 }
 0x7e4   :  { %10456 = vmatpush.bf16.msrb.mxu0 %v13351_v23  ;;  %v13360_v23 = vld [vmem:[%s16296_s6 + $0x780] sm:$0xff] }
 0x7e5   :  { %v10296_v25 = vpop.f32.mrf.mxu3 }
 0x7e6   :  { %v10297_v56 = vadd.f32 %v10296_v25, %v10284_v26  ;;  %v10714_v62 = vpop.f32.mrf.mxu1  ;;  %v13362_v26 = vld [vmem:[%s16296_s6 + $0x790] sm:$0xff] }
 0x7e7   :  { %10418 = vmatpush.bf16.msrb.mxu3 %v13326_v1  ;;  %v6884_v1 = vld [vmem:[#allocation5 + $0xf0] sm:$0xff]  ;;  %v13388_v62 = vld [vmem:[%s16296_s6 + $0x860] sm:$0xff] }
 0x7e8   :  { %10457 = vmatpush.bf16.msrb.mxu0 %v13350_v19  ;;  %v10337_v39 = vpop.f32.mrf.mxu0  ;;  %v10310_v6 = vadd.f32 %v15897_v11, %v10297_v56  ;;  %v13340_v11 = vld [vmem:[%s16296_s6 + $0x6e0] sm:$0xff]  ;;  %v13358_v19 = vld [vmem:[%s16296_s6 + $0x770] sm:$0xff] }
 0x7eb   :  { %10419 = vmatpush.bf16.msrb.mxu3 %v13325_v16  ;;  %v16004_v14 = vpop.f32.mrf.mxu2  ;;  %v6933_v16 = vpack.c.bf16 %v6884_v1, %v6884_v1  ;;  %v13422_v1 = vld [vmem:[%s16296_s6 + $0x970] sm:$0xff] }
 0x7ec   :  { %10458 = vmatpush.bf16.msrb.mxu0 %v13349_v35  ;;  %v13357_v35 = vld [vmem:[%s16296_s6 + $0x768] sm:$0xff] }
 0x7ed   :  { %v10298_v8 = vpop.f32.mrf.mxu3 }
 0x7ef   :  { %10420 = vmatpush.bf16.msrb.mxu3 %v13324_v27  ;;  %v13397_v27 = vld [vmem:[%s16296_s6 + $0x8a8] sm:$0xff] }
 0x7f0   :  { %10459 = vmatpush.bf16.msrb.mxu0 %v13348_v7  ;;  %v13356_v7 = vld [vmem:[%s16296_s6 + $0x760] sm:$0xff] }
 0x7f3   :  { %10421 = vmatpush.bf16.msrb.mxu3 %v13323_v5  ;;  %v10727_v50 = vpop.f32.mrf.mxu2 }
 0x7f4   :  { %10460 = vmatpush.bf16.msrb.mxu0 %v13347_v45  ;;  %v13355_v45 = vld [vmem:[%s16296_s6 + $0x758] sm:$0xff]  ;;  %v13426_v50 = vld [vmem:[%s16296_s6 + $0x990] sm:$0xff] }
 0x7f7   :  { %10422 = vmatpush.bf16.msrb.mxu3 %v13322_v47  ;;  %v13354_v47 = vld [vmem:[%s16296_s6 + $0x750] sm:$0xff] }
 0x7f8   :  { %10461 = vmatpush.bf16.msrb.mxu0 %v13346_v60  ;;  %v13394_v60 = vld [vmem:[%s16296_s6 + $0x890] sm:$0xff] }
 0x7fb   :  { %10423 = vmatpush.bf16.msrb.mxu3 %v13321_v54  ;;  %v13353_v54 = vld [vmem:[%s16296_s6 + $0x748] sm:$0xff] }
 0x7fc   :  { %10462 = vmatpush.bf16.msrb.mxu0 %v13345_v38  ;;  %v13393_v38 = vld [vmem:[%s16296_s6 + $0x888] sm:$0xff] }
 0x7ff   :  { %10424 = vmatpush.bf16.msrb.mxu3 %v13320_v37  ;;  %v13352_v37 = vld [vmem:[%s16296_s6 + $0x740] sm:$0xff] }
 0x800   :  { %10463 = vmatpush.bf16.msrb.mxu0 %v13344_v0  ;;  %v10361_v24 = vpop.f32.mrf.mxu0  ;;  %v13392_v0 = vld [vmem:[%s16296_s6 + $0x880] sm:$0xff] }
 0x802   :  { %10425 = vmatmul.bf16.vlgmr.msrb.gmra.mxu3 %v6928_v52  ;;  %v6932_v52 = vpack.c.bf16 %v6883_v32, %v6883_v32 }
 0x803   :  { %10443 = vmatpush.bf16.msra.mxu3 %v13343_v63  ;;  %10464 = vmatmul.bf16.vlgmr.msrb.gmra.mxu0 %v6931_v40  ;;  %v13391_v63 = vld [vmem:[%s16296_s6 + $0x878] sm:$0xff]  ;;  %v6937_v40 = vpack.c.bf16 %v6888_v13, %v6888_v13  ;;  %v13454_v13 = vld [vmem:[%s16296_s6 + $0xa70] sm:$0xff] }
 0x804   :  { %10482 = vmatpush.bf16.msra.mxu0 %v13367_v20  ;;  %v13431_v20 = vld [vmem:[%s16296_s6 + $0x9b8] sm:$0xff] }
 0x805   :  { %v10322_v43 = vpop.f32.mrf.mxu3 }
 0x806   :  { %v10323_v61 = vadd.f32 %v10322_v43, %v10310_v6 }
 0x807   :  { %10444 = vmatpush.bf16.msra.mxu3 %v13342_v48  ;;  %v13390_v48 = vld [vmem:[%s16296_s6 + $0x870] sm:$0xff] }
 0x808   :  { %10483 = vmatpush.bf16.msra.mxu0 %v13366_v31  ;;  %v10363_v22 = vpop.f32.mrf.mxu0  ;;  %v10336_v4 = vadd.f32 %v15954_v2, %v10323_v61  ;;  %v13396_v2 = vld [vmem:[%s16296_s6 + $0x8a0] sm:$0xff]  ;;  %v13430_v31 = vld [vmem:[%s16296_s6 + $0x9b0] sm:$0xff]  ;;  %v13385_v61 = vld [vmem:[%s16296_s6 + $0x848] sm:$0xff] }
 0x80b   :  { %10445 = vmatpush.bf16.msra.mxu3 %v13341_v9  ;;  %v13389_v9 = vld [vmem:[%s16296_s6 + $0x868] sm:$0xff] }
 0x80c   :  { %10484 = vmatpush.bf16.msra.mxu0 %v13365_v15  ;;  %v13429_v15 = vld [vmem:[%s16296_s6 + $0x9a8] sm:$0xff] }
 0x80d   :  { %v10324_v41 = vpop.f32.mrf.mxu3 }
 0x80e   :  { %v13423_v41 = vld [vmem:[%s16296_s6 + $0x978] sm:$0xff] }
 0x80f   :  { %10446 = vmatpush.bf16.msra.mxu3 %v13340_v11  ;;  %v13428_v11 = vld [vmem:[%s16296_s6 + $0x9a0] sm:$0xff] }
 0x810   :  { %10485 = vmatpush.bf16.msra.mxu0 %v13364_v55 }
 0x813   :  { %10447 = vmatpush.bf16.msra.mxu3 %v13339_v28  ;;  %v13427_v28 = vld [vmem:[%s16296_s6 + $0x998] sm:$0xff] }
 0x814   :  { %10486 = vmatpush.bf16.msra.mxu0 %v13363_v21  ;;  %v13386_v21 = vld [vmem:[%s16296_s6 + $0x850] sm:$0xff] }
 0x817   :  { %10448 = vmatpush.bf16.msra.mxu3 %v13338_v34 }
 0x818   :  { %10487 = vmatpush.bf16.msra.mxu0 %v13362_v26 }
 0x81b   :  { %10449 = vmatpush.bf16.msra.mxu3 %v13337_v53  ;;  %v13425_v53 = vld [vmem:[%s16296_s6 + $0x988] sm:$0xff] }
 0x81c   :  { %10488 = vmatpush.bf16.msra.mxu0 %v13361_v57 }
 0x81f   :  { %10450 = vmatpush.bf16.msra.mxu3 %v13336_v44  ;;  %v13424_v44 = vld [vmem:[%s16296_s6 + $0x980] sm:$0xff] }
 0x820   :  { %10489 = vmatpush.bf16.msra.mxu0 %v13360_v23  ;;  %v10387_v5 = vpop.f32.mrf.mxu0  ;;  %v13463_v23 = vld [vmem:[%s16296_s6 + $0xab8] sm:$0xff] }
 0x822   :  { %10451 = vmatmul.bf16.vlgmr.msra.gmra.mxu3 %v6930_v29 }
 0x823   :  { %10469 = vmatpush.bf16.msrb.mxu3 %v13359_v12  ;;  %10490 = vmatmul.bf16.vlgmr.msra.gmra.mxu0 %v6933_v16  ;;  %v6887_v12 = vld [vmem:[#allocation5 + $0x108] sm:$0xff]  ;;  %v13421_v16 = vld [vmem:[%s16296_s6 + $0x968] sm:$0xff] }
 0x824   :  { %10534 = vmatpush.bf16.msrb.mxu0 %v13399_v18  ;;  %v6892_v18 = vld [vmem:[#allocation5 + $0x130] sm:$0xff]  ;;  %v6936_v17 = vpack.c.bf16 %v6887_v12, %v6887_v12  ;;  %v13486_v12 = vld [vmem:[%s16296_s6 + $0xb70] sm:$0xff] }
 0x825   :  { %v10348_v25 = vpop.f32.mrf.mxu3  ;;  %v6941_v29 = vpack.c.bf16 %v6892_v18, %v6892_v18 }
 0x826   :  { %v10349_v56 = vadd.f32 %v10348_v25, %v10336_v4  ;;  %v13384_v4 = vld [vmem:[%s16296_s6 + $0x840] sm:$0xff] }
 0x827   :  { %10470 = vmatpush.bf16.msrb.mxu3 %v13358_v19  ;;  %v13462_v19 = vld [vmem:[%s16296_s6 + $0xab0] sm:$0xff] }
 0x828   :  { %10535 = vmatpush.bf16.msrb.mxu0 %v13398_v58  ;;  %v10389_v39 = vpop.f32.mrf.mxu0  ;;  %v10362_v6 = vadd.f32 %v10361_v24, %v10349_v56  ;;  %v13387_v24 = vld [vmem:[%s16296_s6 + $0x858] sm:$0xff]  ;;  %v13461_v58 = vld [vmem:[%s16296_s6 + $0xaa8] sm:$0xff] }
 0x829   :  { %v13417_v56 = vld [vmem:[%s16296_s6 + $0x948] sm:$0xff] }
 0x82b   :  { %10471 = vmatpush.bf16.msrb.mxu3 %v13357_v35  ;;  %v13420_v35 = vld [vmem:[%s16296_s6 + $0x960] sm:$0xff] }
 0x82c   :  { %10536 = vmatpush.bf16.msrb.mxu0 %v13397_v27  ;;  %v13460_v27 = vld [vmem:[%s16296_s6 + $0xaa0] sm:$0xff] }
 0x82d   :  { %v10350_v8 = vpop.f32.mrf.mxu3 }
 0x82e   :  { %v13455_v8 = vld [vmem:[%s16296_s6 + $0xa78] sm:$0xff] }
 0x82f   :  { %10472 = vmatpush.bf16.msrb.mxu3 %v13356_v7 }
 0x830   :  { %10537 = vmatpush.bf16.msrb.mxu0 %v13396_v2  ;;  %v13419_v2 = vld [vmem:[%s16296_s6 + $0x958] sm:$0xff] }
 0x833   :  { %10473 = vmatpush.bf16.msrb.mxu3 %v13355_v45  ;;  %v13418_v45 = vld [vmem:[%s16296_s6 + $0x950] sm:$0xff] }
 0x834   :  { %10538 = vmatpush.bf16.msrb.mxu0 %v13395_v3 }
 0x837   :  { %10474 = vmatpush.bf16.msrb.mxu3 %v13354_v47  ;;  %v13458_v47 = vld [vmem:[%s16296_s6 + $0xa90] sm:$0xff] }
 0x838   :  { %10539 = vmatpush.bf16.msrb.mxu0 %v13394_v60 }
 0x83b   :  { %10475 = vmatpush.bf16.msrb.mxu3 %v13353_v54  ;;  %v13457_v54 = vld [vmem:[%s16296_s6 + $0xa88] sm:$0xff] }
 0x83c   :  { %10540 = vmatpush.bf16.msrb.mxu0 %v13393_v38 }
 0x83f   :  { %10476 = vmatpush.bf16.msrb.mxu3 %v13352_v37  ;;  %v13456_v37 = vld [vmem:[%s16296_s6 + $0xa80] sm:$0xff] }
 0x840   :  { %10541 = vmatpush.bf16.msrb.mxu0 %v13392_v0  ;;  %v10413_v55 = vpop.f32.mrf.mxu0  ;;  %v13495_v0 = vld [vmem:[%s16296_s6 + $0xbb8] sm:$0xff] }
 0x842   :  { %10477 = vmatmul.bf16.vlgmr.msrb.gmra.mxu3 %v6932_v52 }
 0x843   :  { %10521 = vmatpush.bf16.msra.mxu3 %v13391_v63  ;;  %10542 = vmatmul.bf16.vlgmr.msrb.gmra.mxu0 %v6937_v40  ;;  %v6891_v63 = vld [vmem:[#allocation5 + $0x128] sm:$0xff]  ;;  %v13453_v40 = vld [vmem:[%s16296_s6 + $0xa68] sm:$0xff] }
 0x844   :  { %10586 = vmatpush.bf16.msra.mxu0 %v13431_v20  ;;  %v6896_v20 = vld [vmem:[#allocation5 + $0x150] sm:$0xff]  ;;  %v6940_v32 = vpack.c.bf16 %v6891_v63, %v6891_v63 }
 0x845   :  { %v10374_v34 = vpop.f32.mrf.mxu3  ;;  %v6945_v52 = vpack.c.bf16 %v6896_v20, %v6896_v20 }
 0x846   :  { %v10375_v43 = vadd.f32 %v10374_v34, %v10362_v6  ;;  %v13416_v6 = vld [vmem:[%s16296_s6 + $0x940] sm:$0xff] }
 0x847   :  { %10522 = vmatpush.bf16.msra.mxu3 %v13390_v48  ;;  %v13494_v48 = vld [vmem:[%s16296_s6 + $0xbb0] sm:$0xff] }
 0x848   :  { %10587 = vmatpush.bf16.msra.mxu0 %v13430_v31  ;;  %v10415_v26 = vpop.f32.mrf.mxu0  ;;  %v10388_v22 = vadd.f32 %v10387_v5, %v10375_v43  ;;  %v13459_v5 = vld [vmem:[%s16296_s6 + $0xa98] sm:$0xff]  ;;  %v13493_v31 = vld [vmem:[%s16296_s6 + $0xba8] sm:$0xff] }
 0x849   :  { %v13449_v43 = vld [vmem:[%s16296_s6 + $0xa48] sm:$0xff] }
 0x84b   :  { %10523 = vmatpush.bf16.msra.mxu3 %v13389_v9  ;;  %v13452_v9 = vld [vmem:[%s16296_s6 + $0xa60] sm:$0xff] }
 0x84c   :  { %10588 = vmatpush.bf16.msra.mxu0 %v13429_v15  ;;  %v13492_v15 = vld [vmem:[%s16296_s6 + $0xba0] sm:$0xff] }
 0x84d   :  { %v10376_v57 = vpop.f32.mrf.mxu3 }
 0x84e   :  { %v13487_v57 = vld [vmem:[%s16296_s6 + $0xb78] sm:$0xff] }
 0x84f   :  { %10524 = vmatpush.bf16.msra.mxu3 %v13388_v62 }
 0x850   :  { %10589 = vmatpush.bf16.msra.mxu0 %v13428_v11  ;;  %v13451_v11 = vld [vmem:[%s16296_s6 + $0xa58] sm:$0xff] }
 0x853   :  { %10525 = vmatpush.bf16.msra.mxu3 %v13387_v24  ;;  %v13450_v24 = vld [vmem:[%s16296_s6 + $0xa50] sm:$0xff] }
 0x854   :  { %10590 = vmatpush.bf16.msra.mxu0 %v13427_v28 }
 0x857   :  { %10526 = vmatpush.bf16.msra.mxu3 %v13386_v21  ;;  %v13490_v21 = vld [vmem:[%s16296_s6 + $0xb90] sm:$0xff] }
 0x858   :  { %10591 = vmatpush.bf16.msra.mxu0 %v13426_v50 }
 0x85b   :  { %10527 = vmatpush.bf16.msra.mxu3 %v13385_v61  ;;  %v13489_v61 = vld [vmem:[%s16296_s6 + $0xb88] sm:$0xff] }
 0x85c   :  { %10592 = vmatpush.bf16.msra.mxu0 %v13425_v53 }
 0x85f   :  { %10528 = vmatpush.bf16.msra.mxu3 %v13384_v4  ;;  %v13488_v4 = vld [vmem:[%s16296_s6 + $0xb80] sm:$0xff] }
 0x860   :  { %10593 = vmatpush.bf16.msra.mxu0 %v13424_v44  ;;  %v10439_v7 = vpop.f32.mrf.mxu0  ;;  %v6895_v44 = vld [vmem:[#allocation5 + $0x148] sm:$0xff] }
 0x862   :  { %10529 = vmatmul.bf16.vlgmr.msra.gmra.mxu3 %v6936_v17  ;;  %v13485_v17 = vld [vmem:[%s16296_s6 + $0xb68] sm:$0xff] }
 0x863   :  { %10573 = vmatpush.bf16.msrb.mxu3 %v13423_v41  ;;  %10594 = vmatmul.bf16.vlgmr.msra.gmra.mxu0 %v6941_v29  ;;  %v6900_v41 = vld [vmem:[#allocation5 + $0x170] sm:$0xff] }
 0x864   :  { %10638 = vmatpush.bf16.msrb.mxu0 %v13463_v23  ;;  %v6944_v23 = vpack.c.bf16 %v6895_v44, %v6895_v44  ;;  %v6949_v18 = vpack.c.bf16 %v6900_v41, %v6900_v41 }
 0x865   :  { %v10400_v3 = vpop.f32.mrf.mxu3 }
 0x866   :  { %v10401_v25 = vadd.f32 %v10400_v3, %v10388_v22  ;;  %v13448_v22 = vld [vmem:[%s16296_s6 + $0xa40] sm:$0xff]  ;;  %v6899_v3 = vld [vmem:[#allocation5 + $0x168] sm:$0xff] }
 0x867   :  { %10574 = vmatpush.bf16.msrb.mxu3 %v13422_v1  ;;  %v13484_v1 = vld [vmem:[%s16296_s6 + $0xb60] sm:$0xff] }
 0x868   :  { %10639 = vmatpush.bf16.msrb.mxu0 %v13462_v19  ;;  %v10441_v60 = vpop.f32.mrf.mxu0  ;;  %v10414_v39 = vadd.f32 %v10413_v55, %v10401_v25  ;;  %v13491_v55 = vld [vmem:[%s16296_s6 + $0xb98] sm:$0xff] }
 0x869   :  { %v13483_v19 = vld [vmem:[%s16296_s6 + $0xb58] sm:$0xff] }
 0x86b   :  { %10575 = vmatpush.bf16.msrb.mxu3 %v13421_v16  ;;  %v13482_v16 = vld [vmem:[%s16296_s6 + $0xb50] sm:$0xff] }
 0x86c   :  { %10640 = vmatpush.bf16.msrb.mxu0 %v13461_v58 }
 0x86d   :  { %v10402_v38 = vpop.f32.mrf.mxu3 }
 0x86f   :  { %10576 = vmatpush.bf16.msrb.mxu3 %v13420_v35 }
 0x870   :  { %10641 = vmatpush.bf16.msrb.mxu0 %v13460_v27 }
 0x873   :  { %10577 = vmatpush.bf16.msrb.mxu3 %v13419_v2 }
 0x874   :  { %10642 = vmatpush.bf16.msrb.mxu0 %v13459_v5  ;;  %v13480_v5 = vld [vmem:[%s16296_s6 + $0xb40] sm:$0xff] }
 0x877   :  { %10578 = vmatpush.bf16.msrb.mxu3 %v13418_v45 }
 0x878   :  { %10643 = vmatpush.bf16.msrb.mxu0 %v13458_v47  ;;  %v6948_v47 = vpack.c.bf16 %v6899_v3, %v6899_v3 }
 0x87b   :  { %10579 = vmatpush.bf16.msrb.mxu3 %v13417_v56 }
 0x87c   :  { %10644 = vmatpush.bf16.msrb.mxu0 %v13457_v54 }
 0x87f   :  { %10580 = vmatpush.bf16.msrb.mxu3 %v13416_v6 }
 0x880   :  { %10645 = vmatpush.bf16.msrb.mxu0 %v13456_v37  ;;  %v10465_v62 = vpop.f32.mrf.mxu0 }
 0x882   :  { %10581 = vmatmul.bf16.vlgmr.msrb.gmra.mxu3 %v6940_v32 }
 0x883   :  { %10625 = vmatpush.bf16.msra.mxu3 %v13455_v8  ;;  %10646 = vmatmul.bf16.vlgmr.msrb.gmra.mxu0 %v6945_v52 }
 0x884   :  { %10690 = vmatpush.bf16.msra.mxu0 %v13495_v0 }
 0x885   :  { %v10426_v28 = vpop.f32.mrf.mxu3 }
 0x886   :  { %v10427_v34 = vadd.f32 %v10426_v28, %v10414_v39 }
 0x887   :  { %10626 = vmatpush.bf16.msra.mxu3 %v13454_v13 }
 0x888   :  { %10691 = vmatpush.bf16.msra.mxu0 %v13494_v48  ;;  %v10467_v50 = vpop.f32.mrf.mxu0  ;;  %v10440_v26 = vadd.f32 %v10439_v7, %v10427_v34  ;;  %v13481_v7 = vld [vmem:[%s16296_s6 + $0xb48] sm:$0xff]  ;;  %v13514_v34 = vld [vmem:[%s16299_s8 + $0x10] sm:$0xff] }
 0x88b   :  { %10627 = vmatpush.bf16.msra.mxu3 %v13453_v40 }
 0x88c   :  { %10692 = vmatpush.bf16.msra.mxu0 %v13493_v31 }
 0x88d   :  { %v10428_v53 = vpop.f32.mrf.mxu3 }
 0x88f   :  { %10628 = vmatpush.bf16.msra.mxu3 %v13452_v9 }
 0x890   :  { %10693 = vmatpush.bf16.msra.mxu0 %v13492_v15 }
 0x893   :  { %10629 = vmatpush.bf16.msra.mxu3 %v13451_v11 }
 0x894   :  { %10694 = vmatpush.bf16.msra.mxu0 %v13491_v55  ;;  %v13515_v55 = vld [vmem:[%s16299_s8 + $0x18] sm:$0xff] }
 0x897   :  { %10630 = vmatpush.bf16.msra.mxu3 %v13450_v24 }
 0x898   :  { %10695 = vmatpush.bf16.msra.mxu0 %v13490_v21 }
 0x89b   :  { %10631 = vmatpush.bf16.msra.mxu3 %v13449_v43  ;;  %v13513_v43 = vld [vmem:[%s16299_s8 + $0x8] sm:$0xff] }
 0x89c   :  { %10696 = vmatpush.bf16.msra.mxu0 %v13489_v61  ;;  %v13512_v61 = vld [vmem:[%s16299_s8] sm:$0xff] }
 0x89f   :  { %10632 = vmatpush.bf16.msra.mxu3 %v13448_v22 }
 0x8a0   :  { %10697 = vmatpush.bf16.msra.mxu0 %v13488_v4  ;;  %v10491_v29 = vpop.f32.mrf.mxu0 }
 0x8a2   :  { %10633 = vmatmul.bf16.vlgmr.msra.gmra.mxu3 %v6944_v23 }
 0x8a3   :  { %10677 = vmatpush.bf16.msrb.mxu3 %v13487_v57  ;;  %10698 = vmatmul.bf16.vlgmr.msra.gmra.mxu0 %v6949_v18 }
 0x8a5   :  { %v10452_v58 = vpop.f32.mrf.mxu3 }
 0x8a6   :  { %v10453_v35 = vadd.f32 %v10452_v58, %v10440_v26 }
 0x8a7   :  { %10678 = vmatpush.bf16.msrb.mxu3 %v13486_v12 }
 0x8a8   :  { %v10493_v27 = vpop.f32.mrf.mxu0  ;;  %v10466_v2 = vadd.f32 %v10465_v62, %v10453_v35 }
 0x8ab   :  { %10679 = vmatpush.bf16.msrb.mxu3 %v13485_v17 }
 0x8ad   :  { %v10454_v45 = vpop.f32.mrf.mxu3 }
 0x8af   :  { %10680 = vmatpush.bf16.msrb.mxu3 %v13484_v1 }
 0x8b3   :  { %10681 = vmatpush.bf16.msrb.mxu3 %v13483_v19 }
 0x8b7   :  { %10682 = vmatpush.bf16.msrb.mxu3 %v13482_v16 }
 0x8bb   :  { %10683 = vmatpush.bf16.msrb.mxu3 %v13481_v7 }
 0x8bf   :  { %10684 = vmatpush.bf16.msrb.mxu3 %v13480_v5 }
 0x8c0   :  { %v10543_v25 = vpop.f32.mrf.mxu0 }
 0x8c2   :  { %10685 = vmatmul.bf16.vlgmr.msrb.gmra.mxu3 %v6948_v47 }
 0x8c5   :  { %v10478_v60 = vpop.f32.mrf.mxu3 }
 0x8c6   :  { %v10479_v56 = vadd.f32 %v10478_v60, %v10466_v2 }
 0x8c8   :  { %v10492_v39 = vadd.f32 %v10491_v29, %v10479_v56  ;;  %v10545_v54 = vpop.f32.mrf.mxu0 }
 0x8ca   :  { %v10505_v37 = vadd.f32 %v15800_v42, %v10492_v39  ;;  %v13519_v42 = vld [vmem:[%s16299_s8 + $0x38] sm:$0xff] }
 0x8cb   :  { %10799 = vmatpush.bf16.msra.mxu3 %v13519_v42 }
 0x8cc   :  { %v10518_v8 = vadd.f32 %v15827_v51, %v10505_v37  ;;  %v13518_v51 = vld [vmem:[%s16299_s8 + $0x30] sm:$0xff] }
 0x8cd   :  { %v10480_v6 = vpop.f32.mrf.mxu3 }
 0x8cf   :  { %10800 = vmatpush.bf16.msra.mxu3 %v13518_v51 }
 0x8e0   :  { %v10595_v38 = vpop.f32.mrf.mxu0 }
 0x8e5   :  { %v10530_v0 = vpop.f32.mrf.mxu3 }
 0x8e6   :  { %v10531_v63 = vadd.f32 %v10530_v0, %v10518_v8 }
 0x8e8   :  { %v10544_v20 = vadd.f32 %v10543_v25, %v10531_v63  ;;  %v10597_v32 = vpop.f32.mrf.mxu0 }
 0x8ea   :  { %v10557_v48 = vadd.f32 %v15861_v30, %v10544_v20  ;;  %v13517_v30 = vld [vmem:[%s16299_s8 + $0x28] sm:$0xff] }
 0x8eb   :  { %10801 = vmatpush.bf16.msra.mxu3 %v13517_v30 }
 0x8ec   :  { %v10570_v40 = vadd.f32 %v15875_v10, %v10557_v48  ;;  %v13516_v10 = vld [vmem:[%s16299_s8 + $0x20] sm:$0xff] }
 0x8ed   :  { %v10532_v13 = vpop.f32.mrf.mxu3 }
 0x8ef   :  { %10802 = vmatpush.bf16.msra.mxu3 %v13516_v10 }
 0x8f3   :  { %10803 = vmatpush.bf16.msra.mxu3 %v13515_v55 }
 0x8f7   :  { %10804 = vmatpush.bf16.msra.mxu3 %v13514_v34 }
 0x8fb   :  { %10805 = vmatpush.bf16.msra.mxu3 %v13513_v43 }
 0x8ff   :  { %10806 = vmatpush.bf16.msra.mxu3 %v13512_v61 }
 0x900   :  { %v10647_v52 = vpop.f32.mrf.mxu0 }
 0x905   :  { %v10582_v31 = vpop.f32.mrf.mxu3 }
 0x906   :  { %v10583_v9 = vadd.f32 %v10582_v31, %v10570_v40 }
 0x908   :  { %v10596_v15 = vadd.f32 %v10595_v38, %v10583_v9  ;;  %v10649_v62 = vpop.f32.mrf.mxu0 }
 0x90a   :  { %v10609_v26 = vadd.f32 %v15892_v59, %v10596_v15 }
 0x90c   :  { %v10622_v22 = vadd.f32 %v15908_v46, %v10609_v26  ;;  %v13528_v46 = vld [vmem:[%s16298_s9] ss:$0 sm:$0xff] }
 0x90d   :  { %v10584_v11 = vpop.f32.mrf.mxu3 }
 0x920   :  { %v10699_v24 = vpop.f32.mrf.mxu0 }
 0x925   :  { %v10634_v28 = vpop.f32.mrf.mxu3 }
 0x926   :  { %v10635_v53 = vadd.f32 %v10634_v28, %v10622_v22 }
 0x928   :  { %v10701_v21 = vpop.f32.mrf.mxu0  ;;  %v10648_v4 = vadd.f32 %v10647_v52, %v10635_v53 }
 0x92a   :  { %v10661_v57 = vadd.f32 %v15929_v36, %v10648_v4 }
 0x92c   :  { %v10674_v44 = vadd.f32 %v15946_v33, %v10661_v57 }
 0x92d   :  { %v10636_v50 = vpop.f32.mrf.mxu3 }
 0x945   :  { %v10686_v41 = vpop.f32.mrf.mxu3 }
 0x946   :  { %v10687_v23 = vadd.f32 %v10686_v41, %v10674_v44 }
 0x948   :  { %v10700_v12 = vadd.f32 %v10699_v24, %v10687_v23 }
 0x94a   :  { %v10713_v18 = vadd.f32 %v15987_v49, %v10700_v12 }
 0x94c   :  { %v10726_v59 = vadd.f32 %v16004_v14, %v10713_v18 }
 0x94d   :  { %v10688_v17 = vpop.f32.mrf.mxu3 }
 0x94e   :  { %v10729_v1 = vmax.f32 %v10726_v59, 0.0 }
 0x950   :  { %v10730_v29 = vpack.c.bf16 %v10729_v1, %v10729_v1 }
 0x952   :  { %10807 = vmatmul.bf16.vlgmr.msra.gmra.mxu3 %v10730_v29 }
 0x9d5   :  { %v10808_v19 = vpop.f32.mrf.mxu3 }
 0x9d6   :  { %v10809_v16 = vadd.f32 %v13528_v46, %v10808_v19 }
 0x9d8   :  { %10812 = vst [vmem:[%s16300_s10] sm:$0xff] %v10809_v16 }
 0x9dd   :  { %v10810_v36 = vpop.f32.mrf.mxu3 }

</bundles_post_ra>
